<compile_context>
chip_gen: v6e
topology: v6e:2x2x1
jax: 0.10.0
libtpu: 0.0.40
codegen_flags: <defaults>
</compile_context>

<pallas_src>
import math

import numpy as np
import jax
import jax.numpy as jnp
from jax import lax
from jax.experimental import pallas as pl
from jax.experimental.pallas import tpu as pltpu

Q_DIM = 128          # DSMIL query/key dimension (nn.Linear(nf, 128))
_NEG = -1e30         # large negative for masking (avoids inf-inf hazards)


# ----------------------------------------------------------------------------
# Fused DSMIL kernel: instance classifier + critical instance + attention
# ----------------------------------------------------------------------------
def _fused_dsmil_kernel(
    # SMEM scalar prefetch (per flattened tile)
    bag_id_ref, rows_ref, first_ref, last_ref,
    # VMEM inputs
    h_ref, wins_ref, bins_ref, wq_ref, bq_ref, wv_ref, bv_ref,
    wfcc_ref, bfcc_ref,
    # VMEM outputs
    ins_out_ref, bag_out_ref,
    # VMEM scratch (persists across grid steps)
    crit_score, crit_feats, kcomb_all, bcomb_all, m_ref, l_ref, acc_ref,
):
    p = pl.program_id(0)        # pass: 0 = critical instance, 1 = attention
    t = pl.program_id(1)        # flattened tile index (ragged bags, no padding steps)

    bag = bag_id_ref[t]         # bag id of this tile
    n_valid = rows_ref[t]       # number of real rows in this tile
    is_first = first_ref[t] == 1
    is_last = last_ref[t] == 1

    tile_n = h_ref.shape[0]
    num_cls = wins_ref.shape[0]

    h = h_ref[...]                                              # (tile_n, nf) bf16
    lane = lax.broadcasted_iota(jnp.int32, (num_cls, tile_n), 1)
    valid = lane < n_valid                                      # mask padded rows

    # ------------------------- pass 0: instance preds + critical instance ----
    @pl.when(p == 0)
    def _pass0():
        # instance classifier, lane-dense (C, tile_n); written exactly once
        c_t = (lax.dot_general(wins_ref[...], h, (((1,), (1,)), ((), ())),
                               preferred_element_type=jnp.float32)
               + bins_ref[...])                                 # (C, tile_n) f32
        ins_out_ref[...] = c_t

        @pl.when(is_first)
        def _():
            crit_score[...] = jnp.full_like(crit_score, _NEG)
            crit_feats[...] = jnp.zeros_like(crit_feats)

        scores = jnp.where(valid, c_t, _NEG)
        tile_max = jnp.max(scores, axis=1, keepdims=True)       # (C, 1)
        first_pos = jnp.min(jnp.where(scores == tile_max, lane, tile_n),
                            axis=1, keepdims=True)              # first argmax in tile
        onehot = (lane == first_pos).astype(h.dtype)            # (C, tile_n) bf16
        tile_crit = jnp.dot(onehot, h,
                            preferred_element_type=jnp.float32)  # (C, nf) gather
        better = tile_max > crit_score[...]                     # strict > keeps earliest
        crit_score[...] = jnp.where(better, tile_max, crit_score[...])
        crit_feats[...] = jnp.where(better, tile_crit, crit_feats[...])

        # At the bag's last tile fold the Q projection into a per-bag key
        # matrix so pass 1 only needs one (tile_n, nf) x (nf, nf) matmul.
        @pl.when(is_last)
        def _():
            scale = 1.0 / math.sqrt(float(Q_DIM))
            mf = crit_feats[...].astype(h.dtype)                 # (C, nf) bf16
            q_max = (jnp.dot(mf, wq_ref[...],
                             preferred_element_type=jnp.float32)
                     + bq_ref[...])                              # (C, 128) f32
            # k_comb = q_max @ Wq  (Wq = wq_ref^T), pre-scaled by 1/sqrt(128)
            kc = lax.dot_general(q_max.astype(h.dtype), wq_ref[...],
                                 (((1,), (1,)), ((), ())),
                                 preferred_element_type=jnp.float32) * scale
            bc = jnp.sum(q_max * bq_ref[...], axis=1, keepdims=True) * scale
            kcomb_all[bag] = kc                                  # (C, nf)
            bcomb_all[bag] = bc                                  # (C, 1)

    # ------------------------- pass 1: attention + aggregation ---------------
    @pl.when(p == 1)
    def _pass1():
        @pl.when(is_first)
        def _():
            m_ref[...] = jnp.full_like(m_ref, _NEG)
            l_ref[...] = jnp.zeros_like(l_ref)
            acc_ref[...] = jnp.zeros_like(acc_ref)

        kc = kcomb_all[bag].astype(h.dtype)                      # (C, nf) bf16
        bc = bcomb_all[bag]                                      # (C, 1) f32

        # attention logits, lane-dense: (C, tile_n); Q projection already folded
        logits = (lax.dot_general(kc, h, (((1,), (1,)), ((), ())),
                                  preferred_element_type=jnp.float32) + bc)
        logits = jnp.where(valid, logits, _NEG)

        # V projection only (fused [Q|V] no longer needed)
        v_tile = (jnp.dot(h, wv_ref[...], preferred_element_type=jnp.float32)
                  + bv_ref[...])                                 # (tile_n, nf) f32

        # online softmax over the instance axis
        m_old = m_ref[...]
        m_new = jnp.maximum(m_old, jnp.max(logits, axis=1, keepdims=True))
        alpha = jnp.exp(m_old - m_new)                           # (C, 1)
        p_w = jnp.exp(logits - m_new)                            # (C, tile_n)
        l_ref[...] = alpha * l_ref[...] + jnp.sum(p_w, axis=1, keepdims=True)
        acc_ref[...] = alpha * acc_ref[...] + jnp.dot(
            p_w, v_tile, preferred_element_type=jnp.float32)     # (C, nf)
        m_ref[...] = m_new

        @pl.when(is_last)
        def _():
            # B = softmax-normalized aggregate (exact division, once per bag)
            bag_b = acc_ref[...] / l_ref[...]                    # (C, nf)
            # fcc Conv1d(C, C, kernel_size=nf): out[j] = b[j] + sum_{i,k} W[j,i,k]*B[i,k]
            # VPU broadcast-mul + row-sum (no M=1 MXU matmuls).
            out = bfcc_ref[...]                                  # (C, 1)
            for i in range(num_cls):                             # static, tiny
                out = out + jnp.sum(wfcc_ref[i] * bag_b[i:i + 1, :],
                                    axis=1, keepdims=True)
            bag_out_ref[0] = out                                 # (C, 1)


# ----------------------------------------------------------------------------
# VMEM budget: actual footprint with headroom, clamped to 3/4 of chip VMEM
# ----------------------------------------------------------------------------
def _vmem_limit_bytes(tile_n, nf, num_cls, num_bags):
    f32b, bf16b = 4, 2
    est = 0
    est += 3 * tile_n * nf * bf16b                       # feats tile (pipelined)
    est += 2 * num_cls * tile_n * f32b                   # instance-pred block
    est += 2 * num_cls * f32b                            # bag-pred block
    est += 2 * (num_cls * nf * bf16b + nf * Q_DIM * bf16b + nf * nf * bf16b
                + num_cls * num_cls * nf * f32b
                + (2 * num_cls + Q_DIM + nf) * f32b)     # resident weights / biases
    est += (4 * num_cls + 2 * num_cls * nf
            + num_bags * num_cls * (nf + 1)) * f32b      # scratch
    est += 4 << 20                                       # tiling padding + compiler slack
    limit = max(2 * est, 32 << 20)
    try:
        cap = pltpu.get_tpu_info().vmem_capacity_bytes   # 64 MiB on v7x, 128 on v5e/v6e
        limit = min(limit, max((cap * 3) // 4, 24 << 20))
    except Exception:
        limit = min(limit, 48 << 20)
    return int(limit)


# ----------------------------------------------------------------------------
# Wrapper: layout plumbing (pad / cast / per-tile metadata) + single pallas_call
# ----------------------------------------------------------------------------
def unified_attention_aggregator(feats, split_sizes, params, pred_on=True,
                                 tile_n=2048):
    """feats: [N_total, nf] f32; split_sizes: python list of bag sizes."""
    assert tile_n % 128 == 0, "tile_n must be a multiple of 128"
    split_sizes = [int(s) for s in split_sizes]
    assert all(s > 0 for s in split_sizes)

    nf = feats.shape[1]
    num_cls = params["w_ins"].shape[0]
    num_bags = len(split_sizes)
    cdt = jnp.bfloat16
    f32 = jnp.float32

    # ---- weights: bf16 for MXU inputs, f32 biases / fcc --------------------
    w_ins = params["w_ins"].astype(cdt)                                  # (C, nf)
    b_ins = params["b_ins"].reshape(num_cls, 1).astype(f32)              # (C, 1)
    wq_t = params["wq"].T.astype(cdt)                                    # (nf, 128)
    bq = params["bq"].reshape(1, Q_DIM).astype(f32)                      # (1, 128)
    wv_t = params["wv"].T.astype(cdt)                                    # (nf, nf)
    bv = params["bv"].reshape(1, nf).astype(f32)                         # (1, nf)
    wfcc_t = jnp.transpose(params["wfcc"], (1, 0, 2)).astype(f32)        # (Cin, Cout, nf)
    b_fcc = params["bfcc"].reshape(num_cls, 1).astype(f32)               # (Cout, 1)

    # ---- pad each bag to a multiple of tile_n (static shapes) --------------
    feats_c = feats.astype(cdt)
    ntiles = [-(-s // tile_n) for s in split_sizes]
    total_tiles = sum(ntiles)
    pieces, pad_row_off = [], []
    row_off, acc_tiles = 0, 0
    for s, nt_b in zip(split_sizes, ntiles):
        pad_row_off.append(acc_tiles * tile_n)
        h_b = feats_c[row_off:row_off + s]
        pad = nt_b * tile_n - s
        if pad:
            h_b = jnp.pad(h_b, ((0, pad), (0, 0)))
        pieces.append(h_b)
        row_off += s
        acc_tiles += nt_b
    feats_pad = pieces[0] if len(pieces) == 1 else jnp.concatenate(pieces, axis=0)
    n_pad = total_tiles * tile_n

    # ---- flattened per-tile metadata (scalar prefetch) ---------------------
    bag_id_np, first_np, last_np, rows_np = [], [], [], []
    for b, (s, nt_b) in enumerate(zip(split_sizes, ntiles)):
        for ti in range(nt_b):
            bag_id_np.append(b)
            first_np.append(1 if ti == 0 else 0)
            last_np.append(1 if ti == nt_b - 1 else 0)
            rows_np.append(min(tile_n, s - ti * tile_n))
    bag_id = jnp.asarray(np.asarray(bag_id_np, dtype=np.int32))
    tile_first = jnp.asarray(np.asarray(first_np, dtype=np.int32))
    tile_last = jnp.asarray(np.asarray(last_np, dtype=np.int32))
    rows_valid = jnp.asarray(np.asarray(rows_np, dtype=np.int32))

    num_passes = 2 if pred_on else 1     # pred_on=False skips the attention pass

    # ---- index maps (scalar-prefetch refs arrive as trailing args) ---------
    def feats_idx(p, t, *_):
        return (t, 0)

    def ins_idx(p, t, *_):
        # pass 0 writes each block exactly once; pass 1 parks on a dummy
        # trailing block so pass-0 results are never overwritten.
        return (0, jnp.where(p == 0, t, total_tiles))

    def bag_idx(p, t, bid, *_):
        return (jnp.where(p == 0, 0, bid[t]), 0, 0)

    def const2(p, t, *_):
        return (0, 0)

    def const3(p, t, *_):
        return (0, 0, 0)

    grid_spec = pltpu.PrefetchScalarGridSpec(
        num_scalar_prefetch=4,
        grid=(num_passes, total_tiles),
        in_specs=[
            pl.BlockSpec((tile_n, nf), feats_idx),             # h tiles
            pl.BlockSpec((num_cls, nf), const2),               # w_ins (resident)
            pl.BlockSpec((num_cls, 1), const2),                # b_ins
            pl.BlockSpec((nf, Q_DIM), const2),                 # Wq^T
            pl.BlockSpec((1, Q_DIM), const2),                  # bq
            pl.BlockSpec((nf, nf), const2),                    # Wv^T
            pl.BlockSpec((1, nf), const2),                     # bv
            pl.BlockSpec((num_cls, num_cls, nf), const3),      # fcc weight (Cin,Cout,nf)
            pl.BlockSpec((num_cls, 1), const2),                # fcc bias
        ],
        out_specs=(
            pl.BlockSpec((num_cls, tile_n), ins_idx),          # instance preds (C, N_pad+dummy)
            pl.BlockSpec((1, num_cls, 1), bag_idx),            # bag preds
        ),
        scratch_shapes=[
            pltpu.VMEM((num_cls, 1), f32),                     # running critical score
            pltpu.VMEM((num_cls, nf), f32),                    # running critical features
            pltpu.VMEM((num_bags, num_cls, nf), f32),          # per-bag folded key matrix
            pltpu.VMEM((num_bags, num_cls, 1), f32),           # per-bag folded key bias
            pltpu.VMEM((num_cls, 1), f32),                     # online softmax max
            pltpu.VMEM((num_cls, 1), f32),                     # online softmax denom
            pltpu.VMEM((num_cls, nf), f32),                    # B accumulator
        ],
    )

    # NOTE: both grid axes carry sequential state (pass-1 depends on pass-0
    # scratch; tiles of a bag reduce into scratch), so both are "arbitrary".
    # TODO(synk): v7x megacore bag balancing (pl.core_map / bag interleaving).
    ins_pad_t, bag_pred3 = pl.pallas_call(
        _fused_dsmil_kernel,
        grid_spec=grid_spec,
        out_shape=(
            jax.ShapeDtypeStruct((num_cls, n_pad + tile_n), f32),
            jax.ShapeDtypeStruct((num_bags, num_cls, 1), f32),
        ),
        compiler_params=pltpu.CompilerParams(
            dimension_semantics=("arbitrary", "arbitrary"),
            vmem_limit_bytes=_vmem_limit_bytes(tile_n, nf, num_cls, num_bags),
        ),
    )(bag_id, rows_valid, tile_first, tile_last,
      feats_pad, w_ins, b_ins, wq_t, bq, wv_t, bv, wfcc_t, b_fcc)

    # ---- un-pad instance predictions back to [N, C] ------------------------
    # (padded columns of ins_pad_t hold garbage and must never be consumed)
    parts = [lax.slice_in_dim(ins_pad_t, po, po + s, axis=1)
             for po, s in zip(pad_row_off, split_sizes)]
    ins_pred = jnp.transpose(parts[0] if len(parts) == 1
                             else jnp.concatenate(parts, axis=1))        # (N, C)

    if pred_on:
        bag_pred = bag_pred3.reshape(num_bags, num_cls)
    else:
        # TODO(synk): PyTorch reference returns torch.empty (uninitialized); zeros here.
        bag_pred = jnp.zeros((num_bags, num_cls), f32)

    return bag_pred, jnp.squeeze(ins_pred)


# ----------------------------------------------------------------------------
# Pure-JAX reference (same bf16 matmul precision) for self-check
# ----------------------------------------------------------------------------
def _reference_forward(feats, split_sizes, params):
    f32, bf16 = jnp.float32, jnp.bfloat16
    h_all = feats.astype(bf16)
    c_all = (jnp.dot(h_all, params["w_ins"].T.astype(bf16),
                     preferred_element_type=f32) + params["b_ins"][None, :])
    wq_t = params["wq"].T.astype(bf16)
    wv_t = params["wv"].T.astype(bf16)
    bag_preds, off = [], 0
    for s in split_sizes:
        h = h_all[off:off + int(s)]
        c = c_all[off:off + int(s)]
        off += int(s)
        Q = jnp.dot(h, wq_t, preferred_element_type=f32) + params["bq"][None, :]
        V = jnp.dot(h, wv_t, preferred_element_type=f32) + params["bv"][None, :]
        idx = jnp.argmax(c, axis=0)                              # first max per class
        m_feats = h[idx]                                         # (C, nf)
        q_max = (jnp.dot(m_feats, wq_t, preferred_element_type=f32)
                 + params["bq"][None, :])
        logits = jnp.dot(Q, q_max.T) / jnp.sqrt(jnp.float32(Q_DIM))   # (n, C)
        A = jax.nn.softmax(logits, axis=0)
        B = A.T @ V                                              # (C, nf)
        out = jnp.einsum("jik,ik->j", params["wfcc"], B) + params["bfcc"]
        bag_preds.append(out)
    return jnp.stack(bag_preds, axis=0), jnp.squeeze(c_all)


# ----------------------------------------------------------------------------
# Deterministic parameter construction (PyTorch-like shapes)
# ----------------------------------------------------------------------------
def init_params(nf, num_classes, key):
    ks = jax.random.split(key, 8)

    def u(k, shape, fan_in):
        bound = 1.0 / math.sqrt(float(fan_in))
        return jax.random.uniform(k, shape, jnp.float32, -bound, bound)

    return {
        "w_ins": u(ks[0], (num_classes, nf), nf),                # Linear(nf, C)
        "b_ins": u(ks[1], (num_classes,), nf),
        "wq": u(ks[2], (Q_DIM, nf), nf),                         # Linear(nf, 128)
        "bq": u(ks[3], (Q_DIM,), nf),
        "wv": u(ks[4], (nf, nf), nf),                            # Linear(nf, nf)
        "bv": u(ks[5], (nf,), nf),
        "wfcc": u(ks[6], (num_classes, num_classes, nf), num_classes * nf),
        "bfcc": u(ks[7], (num_classes,), num_classes * nf),
    }


if __name__ == "__main__":
    nf = 32
    num_classes = 2
    split_sizes = [3, 5]            # 2 bags, 8 instances total
    n_total = sum(split_sizes)

    key = jax.random.PRNGKey(0)
    k_feats, k_params = jax.random.split(key)
    feats = jax.random.normal(k_feats, (n_total, nf), jnp.float32)
    params = init_params(nf, num_classes, k_params)

    bag_pred, instance_pred = unified_attention_aggregator(
        feats, split_sizes, params, pred_on=True)        # default tile_n (2048)
    jax.block_until_ready(bag_pred)
    jax.block_until_ready(instance_pred)

    assert bag_pred.shape == (len(split_sizes), num_classes)
    assert instance_pred.shape == (n_total, num_classes)

    ref_bag, ref_ins = _reference_forward(feats, split_sizes, params)
    np.testing.assert_allclose(np.asarray(instance_pred), np.asarray(ref_ins),
                               rtol=2e-2, atol=2e-2)
    np.testing.assert_allclose(np.asarray(bag_pred), np.asarray(ref_bag),
                               rtol=2e-2, atol=2e-2)

    print("KERNEL_OK")
</pallas_src>

<mosaic_0001>
module attributes {stable_mosaic.version = 11 : i64} {
  func.func @_fused_dsmil_kernel(%arg0: i32, %arg1: i32, %arg2: memref<2xi32, #tpu.memory_space<smem>>, %arg3: memref<2xi32, #tpu.memory_space<smem>>, %arg4: memref<2xi32, #tpu.memory_space<smem>>, %arg5: memref<2xi32, #tpu.memory_space<smem>>, %arg6: memref<2048x32xbf16, #tpu.memory_space<vmem>>, %arg7: memref<2x32xbf16, #tpu.memory_space<vmem>>, %arg8: memref<2x1xf32, #tpu.memory_space<vmem>>, %arg9: memref<32x128xbf16, #tpu.memory_space<vmem>>, %arg10: memref<1x128xf32, #tpu.memory_space<vmem>>, %arg11: memref<32x32xbf16, #tpu.memory_space<vmem>>, %arg12: memref<1x32xf32, #tpu.memory_space<vmem>>, %arg13: memref<2x2x32xf32, #tpu.memory_space<vmem>>, %arg14: memref<2x1xf32, #tpu.memory_space<vmem>>, %arg15: memref<2x2048xf32, #tpu.memory_space<vmem>>, %arg16: memref<1x2x1xf32, #tpu.memory_space<vmem>>, %arg17: memref<2x1xf32, #tpu.memory_space<vmem>>, %arg18: memref<2x32xf32, #tpu.memory_space<vmem>>, %arg19: memref<2x2x32xf32, #tpu.memory_space<vmem>>, %arg20: memref<2x2x1xf32, #tpu.memory_space<vmem>>, %arg21: memref<2x1xf32, #tpu.memory_space<vmem>>, %arg22: memref<2x1xf32, #tpu.memory_space<vmem>>, %arg23: memref<2x32xf32, #tpu.memory_space<vmem>>) attributes {dimension_semantics = [#tpu.dimension_semantics<arbitrary>, #tpu.dimension_semantics<arbitrary>], iteration_bounds = array<i64: 2, 2>, scalar_prefetch = 4 : i64, scratch_operands = 7 : i64, tpu.core_type = #tpu.core_type<tc>, window_params = [{transform_indices = @transform_0, window_bounds = array<i64: 2048, 32>}, {pipeline_mode = #tpu.pipeline_mode<synchronous>, transform_indices = @transform_1, window_bounds = array<i64: 2, 32>}, {pipeline_mode = #tpu.pipeline_mode<synchronous>, transform_indices = @transform_2, window_bounds = array<i64: 2, 1>}, {pipeline_mode = #tpu.pipeline_mode<synchronous>, transform_indices = @transform_3, window_bounds = array<i64: 32, 128>}, {pipeline_mode = #tpu.pipeline_mode<synchronous>, transform_indices = @transform_4, window_bounds = array<i64: 1, 128>}, {pipeline_mode = #tpu.pipeline_mode<synchronous>, transform_indices = @transform_5, window_bounds = array<i64: 32, 32>}, {pipeline_mode = #tpu.pipeline_mode<synchronous>, transform_indices = @transform_6, window_bounds = array<i64: 1, 32>}, {pipeline_mode = #tpu.pipeline_mode<synchronous>, transform_indices = @transform_7, window_bounds = array<i64: 2, 2, 32>}, {pipeline_mode = #tpu.pipeline_mode<synchronous>, transform_indices = @transform_8, window_bounds = array<i64: 2, 1>}, {transform_indices = @transform_9, window_bounds = array<i64: 2, 2048>}, {transform_indices = @transform_10, window_bounds = array<i64: 1, 2, 1>}]} {
    %0 = arith.index_cast %arg1 : i32 to index
    %1 = memref.load %arg2[%0] : memref<2xi32, #tpu.memory_space<smem>>
    %2 = arith.index_cast %arg1 : i32 to index
    %3 = memref.load %arg3[%2] : memref<2xi32, #tpu.memory_space<smem>>
    %4 = arith.index_cast %arg1 : i32 to index
    %5 = memref.load %arg4[%4] : memref<2xi32, #tpu.memory_space<smem>>
    %c1_i32 = arith.constant 1 : i32
    %6 = arith.cmpi eq, %5, %c1_i32 : i32
    %7 = arith.index_cast %arg1 : i32 to index
    %8 = memref.load %arg5[%7] : memref<2xi32, #tpu.memory_space<smem>>
    %c1_i32_0 = arith.constant 1 : i32
    %9 = arith.cmpi eq, %8, %c1_i32_0 : i32
    %c0 = arith.constant 0 : index
    %c0_1 = arith.constant 0 : index
    %10 = vector.load %arg6[%c0, %c0_1] : memref<2048x32xbf16, #tpu.memory_space<vmem>>, vector<2048x32xbf16>
    %11 = tpu.iota {dimensions = array<i32: 1>} : vector<2x2048xi32>
    %12 = vector.broadcast %3 : i32 to vector<2x2048xi32>
    %13 = arith.cmpi slt, %11, %12 : vector<2x2048xi32>
    %c0_i32 = arith.constant 0 : i32
    %14 = arith.cmpi eq, %arg0, %c0_i32 : i32
    %15 = arith.extui %14 : i1 to i32
    %c0_i32_2 = arith.constant 0 : i32
    %16 = arith.cmpi ne, %15, %c0_i32_2 : i32
    scf.if %16 {
      %c0_5 = arith.constant 0 : index
      %c0_6 = arith.constant 0 : index
      %20 = vector.load %arg7[%c0_5, %c0_6] : memref<2x32xbf16, #tpu.memory_space<vmem>>, vector<2x32xbf16>
      %cst = arith.constant dense<0.000000e+00> : vector<2x2048xf32>
      %21 = tpu.matmul %20, %10, %cst {dimension_numbers = #tpu.dot_dimension_numbers<[1], [1], [0], [0], [0, 0, 1, 0], [], []>} : vector<2x32xbf16>, vector<2048x32xbf16>, vector<2x2048xf32> -> vector<2x2048xf32>
      %c0_7 = arith.constant 0 : index
      %c0_8 = arith.constant 0 : index
      %22 = vector.load %arg8[%c0_7, %c0_8] : memref<2x1xf32, #tpu.memory_space<vmem>>, vector<2x1xf32>
      %23 = vector.broadcast %22 : vector<2x1xf32> to vector<2x2048xf32>
      %24 = arith.addf %21, %23 : vector<2x2048xf32>
      %c0_9 = arith.constant 0 : index
      %c0_10 = arith.constant 0 : index
      %25 = vector.load %arg15[%c0_9, %c0_10] : memref<2x2048xf32, #tpu.memory_space<vmem>>, vector<2x2048xf32>
      tpu.vector_store %arg15[%c0_9, %c0_10], %24 {strides = array<i32>} : memref<2x2048xf32, #tpu.memory_space<vmem>>, vector<2x2048xf32>,
      %26 = arith.extui %6 : i1 to i32
      %c0_i32_11 = arith.constant 0 : i32
      %27 = arith.cmpi ne, %26, %c0_i32_11 : i32
      scf.if %27 {
        %cst_27 = arith.constant -1.000000e+30 : f32
        %56 = vector.broadcast %cst_27 : f32 to vector<2x1xf32>
        %c0_28 = arith.constant 0 : index
        %c0_29 = arith.constant 0 : index
        %57 = vector.load %arg17[%c0_28, %c0_29] : memref<2x1xf32, #tpu.memory_space<vmem>>, vector<2x1xf32>
        tpu.vector_store %arg17[%c0_28, %c0_29], %56 {strides = array<i32>} : memref<2x1xf32, #tpu.memory_space<vmem>>, vector<2x1xf32>,
        %cst_30 = arith.constant 0.000000e+00 : f32
        %58 = vector.broadcast %cst_30 : f32 to vector<2x32xf32>
        %c0_31 = arith.constant 0 : index
        %c0_32 = arith.constant 0 : index
        %59 = vector.load %arg18[%c0_31, %c0_32] : memref<2x32xf32, #tpu.memory_space<vmem>>, vector<2x32xf32>
        tpu.vector_store %arg18[%c0_31, %c0_32], %58 {strides = array<i32>} : memref<2x32xf32, #tpu.memory_space<vmem>>, vector<2x32xf32>,
      } else {
      }
      %cst_12 = arith.constant -1.000000e+30 : f32
      %28 = vector.broadcast %cst_12 : f32 to vector<2x2048xf32>
      %29 = arith.select %13, %24, %28 : vector<2x2048xi1>, vector<2x2048xf32>
      %cst_13 = arith.constant dense<0xFF800000> : vector<2xf32>
      %30 = vector.multi_reduction <maximumf>, %29, %cst_13 [1] : vector<2x2048xf32> to vector<2xf32>
      %31 = vector.shape_cast %30 : vector<2xf32> to vector<2x1xf32>
      %32 = vector.broadcast %31 : vector<2x1xf32> to vector<2x2048xf32>
      %33 = arith.cmpf oeq, %29, %32 : vector<2x2048xf32>
      %c2048_i32 = arith.constant 2048 : i32
      %34 = vector.broadcast %c2048_i32 : i32 to vector<2x2048xi32>
      %35 = arith.select %33, %11, %34 : vector<2x2048xi1>, vector<2x2048xi32>
      %cst_14 = arith.constant dense<2147483647> : vector<2xi32>
      %36 = vector.multi_reduction <minsi>, %35, %cst_14 [1] : vector<2x2048xi32> to vector<2xi32>
      %37 = vector.shape_cast %36 : vector<2xi32> to vector<2x1xi32>
      %38 = vector.broadcast %37 : vector<2x1xi32> to vector<2x2048xi32>
      %39 = arith.cmpi eq, %11, %38 : vector<2x2048xi32>
      %40 = arith.extui %39 : vector<2x2048xi1> to vector<2x2048xi32>
      %41 = arith.sitofp %40 : vector<2x2048xi32> to vector<2x2048xf32>
      %42 = arith.truncf %41 : vector<2x2048xf32> to vector<2x2048xbf16>
      %cst_15 = arith.constant dense<0.000000e+00> : vector<2x32xf32>
      %43 = tpu.matmul %42, %10, %cst_15 {dimension_numbers = #tpu.dot_dimension_numbers<[1], [0], [0], [1], [0, 0, 1, 1], [], []>} : vector<2x2048xbf16>, vector<2048x32xbf16>, vector<2x32xf32> -> vector<2x32xf32>
      %c0_16 = arith.constant 0 : index
      %c0_17 = arith.constant 0 : index
      %44 = vector.load %arg17[%c0_16, %c0_17] : memref<2x1xf32, #tpu.memory_space<vmem>>, vector<2x1xf32>
      %45 = arith.cmpf ogt, %31, %44 : vector<2x1xf32>
      %c0_18 = arith.constant 0 : index
      %c0_19 = arith.constant 0 : index
      %46 = vector.load %arg17[%c0_18, %c0_19] : memref<2x1xf32, #tpu.memory_space<vmem>>, vector<2x1xf32>
      %47 = arith.select %45, %31, %46 : vector<2x1xi1>, vector<2x1xf32>
      %c0_20 = arith.constant 0 : index
      %c0_21 = arith.constant 0 : index
      %48 = vector.load %arg17[%c0_20, %c0_21] : memref<2x1xf32, #tpu.memory_space<vmem>>, vector<2x1xf32>
      tpu.vector_store %arg17[%c0_20, %c0_21], %47 {strides = array<i32>} : memref<2x1xf32, #tpu.memory_space<vmem>>, vector<2x1xf32>,
      %c0_22 = arith.constant 0 : index
      %c0_23 = arith.constant 0 : index
      %49 = vector.load %arg18[%c0_22, %c0_23] : memref<2x32xf32, #tpu.memory_space<vmem>>, vector<2x32xf32>
      %50 = vector.shape_cast %45 : vector<2x1xi1> to vector<2x1xi1>
      %51 = vector.broadcast %50 : vector<2x1xi1> to vector<2x32xi1>
      %52 = arith.select %51, %43, %49 : vector<2x32xi1>, vector<2x32xf32>
      %c0_24 = arith.constant 0 : index
      %c0_25 = arith.constant 0 : index
      %53 = vector.load %arg18[%c0_24, %c0_25] : memref<2x32xf32, #tpu.memory_space<vmem>>, vector<2x32xf32>
      tpu.vector_store %arg18[%c0_24, %c0_25], %52 {strides = array<i32>} : memref<2x32xf32, #tpu.memory_space<vmem>>, vector<2x32xf32>,
      %54 = arith.extui %9 : i1 to i32
      %c0_i32_26 = arith.constant 0 : i32
      %55 = arith.cmpi ne, %54, %c0_i32_26 : i32
      scf.if %55 {
        %c0_27 = arith.constant 0 : index
        %c0_28 = arith.constant 0 : index
        %56 = vector.load %arg18[%c0_27, %c0_28] : memref<2x32xf32, #tpu.memory_space<vmem>>, vector<2x32xf32>
        %57 = arith.truncf %56 : vector<2x32xf32> to vector<2x32xbf16>
        %c0_29 = arith.constant 0 : index
        %c0_30 = arith.constant 0 : index
        %58 = vector.load %arg9[%c0_29, %c0_30] : memref<32x128xbf16, #tpu.memory_space<vmem>>, vector<32x128xbf16>
        %cst_31 = arith.constant dense<0.000000e+00> : vector<2x128xf32>
        %59 = tpu.matmul %57, %58, %cst_31 {dimension_numbers = #tpu.dot_dimension_numbers<[1], [0], [0], [1], [0, 0, 1, 1], [], []>} : vector<2x32xbf16>, vector<32x128xbf16>, vector<2x128xf32> -> vector<2x128xf32>
        %c0_32 = arith.constant 0 : index
        %c0_33 = arith.constant 0 : index
        %60 = vector.load %arg10[%c0_32, %c0_33] : memref<1x128xf32, #tpu.memory_space<vmem>>, vector<1x128xf32>
        %61 = vector.broadcast %60 : vector<1x128xf32> to vector<2x128xf32>
        %62 = arith.addf %59, %61 : vector<2x128xf32>
        %63 = arith.truncf %62 : vector<2x128xf32> to vector<2x128xbf16>
        %c0_34 = arith.constant 0 : index
        %c0_35 = arith.constant 0 : index
        %64 = vector.load %arg9[%c0_34, %c0_35] : memref<32x128xbf16, #tpu.memory_space<vmem>>, vector<32x128xbf16>
        %cst_36 = arith.constant dense<0.000000e+00> : vector<2x32xf32>
        %65 = tpu.matmul %63, %64, %cst_36 {dimension_numbers = #tpu.dot_dimension_numbers<[1], [1], [0], [0], [0, 0, 1, 0], [], []>} : vector<2x128xbf16>, vector<32x128xbf16>, vector<2x32xf32> -> vector<2x32xf32>
        %cst_37 = arith.constant 0.0883883461 : f32
        %66 = vector.broadcast %cst_37 : f32 to vector<2x32xf32>
        %67 = arith.mulf %65, %66 : vector<2x32xf32>
        %c0_38 = arith.constant 0 : index
        %c0_39 = arith.constant 0 : index
        %68 = vector.load %arg10[%c0_38, %c0_39] : memref<1x128xf32, #tpu.memory_space<vmem>>, vector<1x128xf32>
        %69 = vector.broadcast %68 : vector<1x128xf32> to vector<2x128xf32>
        %70 = arith.mulf %62, %69 : vector<2x128xf32>
        %cst_40 = arith.constant dense<0.000000e+00> : vector<2xf32>
        %71 = vector.multi_reduction <add>, %70, %cst_40 [1] : vector<2x128xf32> to vector<2xf32>
        %72 = vector.shape_cast %71 : vector<2xf32> to vector<2x1xf32>
        %cst_41 = arith.constant 0.0883883461 : f32
        %73 = vector.broadcast %cst_41 : f32 to vector<2x1xf32>
        %74 = arith.mulf %72, %73 : vector<2x1xf32>
        %75 = arith.index_cast %1 : i32 to index
        %c0_42 = arith.constant 0 : index
        %c0_43 = arith.constant 0 : index
        %76 = vector.load %arg19[%75, %c0_42, %c0_43] : memref<2x2x32xf32, #tpu.memory_space<vmem>>, vector<1x2x32xf32>
        %77 = vector.shape_cast %76 : vector<1x2x32xf32> to vector<2x32xf32>
        %78 = vector.shape_cast %67 : vector<2x32xf32> to vector<1x2x32xf32>
        tpu.vector_store %arg19[%75, %c0_42, %c0_43], %78 {strides = array<i32>} : memref<2x2x32xf32, #tpu.memory_space<vmem>>, vector<1x2x32xf32>,
        %79 = arith.index_cast %1 : i32 to index
        %c0_44 = arith.constant 0 : index
        %c0_45 = arith.constant 0 : index
        %80 = vector.load %arg20[%79, %c0_44, %c0_45] : memref<2x2x1xf32, #tpu.memory_space<vmem>>, vector<1x2x1xf32>
        %81 = vector.shape_cast %80 : vector<1x2x1xf32> to vector<2x1xf32>
        %82 = vector.shape_cast %74 : vector<2x1xf32> to vector<1x2x1xf32>
        tpu.vector_store %arg20[%79, %c0_44, %c0_45], %82 {strides = array<i32>} : memref<2x2x1xf32, #tpu.memory_space<vmem>>, vector<1x2x1xf32>,
      } else {
      }
    } else {
    }
    %c1_i32_3 = arith.constant 1 : i32
    %17 = arith.cmpi eq, %arg0, %c1_i32_3 : i32
    %18 = arith.extui %17 : i1 to i32
    %c0_i32_4 = arith.constant 0 : i32
    %19 = arith.cmpi ne, %18, %c0_i32_4 : i32
    scf.if %19 {
      %20 = arith.extui %6 : i1 to i32
      %c0_i32_5 = arith.constant 0 : i32
      %21 = arith.cmpi ne, %20, %c0_i32_5 : i32
      scf.if %21 {
        %cst_32 = arith.constant -1.000000e+30 : f32
        %63 = vector.broadcast %cst_32 : f32 to vector<2x1xf32>
        %c0_33 = arith.constant 0 : index
        %c0_34 = arith.constant 0 : index
        %64 = vector.load %arg21[%c0_33, %c0_34] : memref<2x1xf32, #tpu.memory_space<vmem>>, vector<2x1xf32>
        tpu.vector_store %arg21[%c0_33, %c0_34], %63 {strides = array<i32>} : memref<2x1xf32, #tpu.memory_space<vmem>>, vector<2x1xf32>,
        %cst_35 = arith.constant 0.000000e+00 : f32
        %65 = vector.broadcast %cst_35 : f32 to vector<2x1xf32>
        %c0_36 = arith.constant 0 : index
        %c0_37 = arith.constant 0 : index
        %66 = vector.load %arg22[%c0_36, %c0_37] : memref<2x1xf32, #tpu.memory_space<vmem>>, vector<2x1xf32>
        tpu.vector_store %arg22[%c0_36, %c0_37], %65 {strides = array<i32>} : memref<2x1xf32, #tpu.memory_space<vmem>>, vector<2x1xf32>,
        %cst_38 = arith.constant 0.000000e+00 : f32
        %67 = vector.broadcast %cst_38 : f32 to vector<2x32xf32>
        %c0_39 = arith.constant 0 : index
        %c0_40 = arith.constant 0 : index
        %68 = vector.load %arg23[%c0_39, %c0_40] : memref<2x32xf32, #tpu.memory_space<vmem>>, vector<2x32xf32>
        tpu.vector_store %arg23[%c0_39, %c0_40], %67 {strides = array<i32>} : memref<2x32xf32, #tpu.memory_space<vmem>>, vector<2x32xf32>,
      } else {
      }
      %22 = arith.index_cast %1 : i32 to index
      %c0_6 = arith.constant 0 : index
      %c0_7 = arith.constant 0 : index
      %23 = vector.load %arg19[%22, %c0_6, %c0_7] : memref<2x2x32xf32, #tpu.memory_space<vmem>>, vector<1x2x32xf32>
      %24 = vector.shape_cast %23 : vector<1x2x32xf32> to vector<2x32xf32>
      %25 = arith.truncf %24 : vector<2x32xf32> to vector<2x32xbf16>
      %26 = arith.index_cast %1 : i32 to index
      %c0_8 = arith.constant 0 : index
      %c0_9 = arith.constant 0 : index
      %27 = vector.load %arg20[%26, %c0_8, %c0_9] : memref<2x2x1xf32, #tpu.memory_space<vmem>>, vector<1x2x1xf32>
      %28 = vector.shape_cast %27 : vector<1x2x1xf32> to vector<2x1xf32>
      %cst = arith.constant dense<0.000000e+00> : vector<2x2048xf32>
      %29 = tpu.matmul %25, %10, %cst {dimension_numbers = #tpu.dot_dimension_numbers<[1], [1], [0], [0], [0, 0, 1, 0], [], []>} : vector<2x32xbf16>, vector<2048x32xbf16>, vector<2x2048xf32> -> vector<2x2048xf32>
      %30 = vector.broadcast %28 : vector<2x1xf32> to vector<2x2048xf32>
      %31 = arith.addf %29, %30 : vector<2x2048xf32>
      %cst_10 = arith.constant -1.000000e+30 : f32
      %32 = vector.broadcast %cst_10 : f32 to vector<2x2048xf32>
      %33 = arith.select %13, %31, %32 : vector<2x2048xi1>, vector<2x2048xf32>
      %c0_11 = arith.constant 0 : index
      %c0_12 = arith.constant 0 : index
      %34 = vector.load %arg11[%c0_11, %c0_12] : memref<32x32xbf16, #tpu.memory_space<vmem>>, vector<32x32xbf16>
      %cst_13 = arith.constant dense<0.000000e+00> : vector<2048x32xf32>
      %35 = tpu.matmul %10, %34, %cst_13 {dimension_numbers = #tpu.dot_dimension_numbers<[1], [0], [0], [1], [0, 0, 1, 1], [], []>} : vector<2048x32xbf16>, vector<32x32xbf16>, vector<2048x32xf32> -> vector<2048x32xf32>
      %c0_14 = arith.constant 0 : index
      %c0_15 = arith.constant 0 : index
      %36 = vector.load %arg12[%c0_14, %c0_15] : memref<1x32xf32, #tpu.memory_space<vmem>>, vector<1x32xf32>
      %37 = vector.broadcast %36 : vector<1x32xf32> to vector<2048x32xf32>
      %38 = arith.addf %35, %37 : vector<2048x32xf32>
      %c0_16 = arith.constant 0 : index
      %c0_17 = arith.constant 0 : index
      %39 = vector.load %arg21[%c0_16, %c0_17] : memref<2x1xf32, #tpu.memory_space<vmem>>, vector<2x1xf32>
      %cst_18 = arith.constant dense<0xFF800000> : vector<2xf32>
      %40 = vector.multi_reduction <maximumf>, %33, %cst_18 [1] : vector<2x2048xf32> to vector<2xf32>
      %41 = vector.shape_cast %40 : vector<2xf32> to vector<2x1xf32>
      %42 = arith.maximumf %39, %41 : vector<2x1xf32>
      %43 = arith.subf %39, %42 : vector<2x1xf32>
      %44 = math.exp %43 : vector<2x1xf32>
      %45 = vector.broadcast %42 : vector<2x1xf32> to vector<2x2048xf32>
      %46 = arith.subf %33, %45 : vector<2x2048xf32>
      %47 = math.exp %46 : vector<2x2048xf32>
      %c0_19 = arith.constant 0 : index
      %c0_20 = arith.constant 0 : index
      %48 = vector.load %arg22[%c0_19, %c0_20] : memref<2x1xf32, #tpu.memory_space<vmem>>, vector<2x1xf32>
      %49 = arith.mulf %44, %48 : vector<2x1xf32>
      %cst_21 = arith.constant dense<0.000000e+00> : vector<2xf32>
      %50 = vector.multi_reduction <add>, %47, %cst_21 [1] : vector<2x2048xf32> to vector<2xf32>
      %51 = vector.shape_cast %50 : vector<2xf32> to vector<2x1xf32>
      %52 = arith.addf %49, %51 : vector<2x1xf32>
      %c0_22 = arith.constant 0 : index
      %c0_23 = arith.constant 0 : index
      %53 = vector.load %arg22[%c0_22, %c0_23] : memref<2x1xf32, #tpu.memory_space<vmem>>, vector<2x1xf32>
      tpu.vector_store %arg22[%c0_22, %c0_23], %52 {strides = array<i32>} : memref<2x1xf32, #tpu.memory_space<vmem>>, vector<2x1xf32>,
      %c0_24 = arith.constant 0 : index
      %c0_25 = arith.constant 0 : index
      %54 = vector.load %arg23[%c0_24, %c0_25] : memref<2x32xf32, #tpu.memory_space<vmem>>, vector<2x32xf32>
      %55 = vector.broadcast %44 : vector<2x1xf32> to vector<2x32xf32>
      %56 = arith.mulf %55, %54 : vector<2x32xf32>
      %cst_26 = arith.constant dense<0.000000e+00> : vector<2x32xf32>
      %57 = tpu.matmul %47, %38, %cst_26 {dimension_numbers = #tpu.dot_dimension_numbers<[1], [0], [0], [1], [0, 0, 1, 1], [], []>} : vector<2x2048xf32>, vector<2048x32xf32>, vector<2x32xf32> -> vector<2x32xf32>
      %58 = arith.addf %56, %57 : vector<2x32xf32>
      %c0_27 = arith.constant 0 : index
      %c0_28 = arith.constant 0 : index
      %59 = vector.load %arg23[%c0_27, %c0_28] : memref<2x32xf32, #tpu.memory_space<vmem>>, vector<2x32xf32>
      tpu.vector_store %arg23[%c0_27, %c0_28], %58 {strides = array<i32>} : memref<2x32xf32, #tpu.memory_space<vmem>>, vector<2x32xf32>,
      %c0_29 = arith.constant 0 : index
      %c0_30 = arith.constant 0 : index
      %60 = vector.load %arg21[%c0_29, %c0_30] : memref<2x1xf32, #tpu.memory_space<vmem>>, vector<2x1xf32>
      tpu.vector_store %arg21[%c0_29, %c0_30], %42 {strides = array<i32>} : memref<2x1xf32, #tpu.memory_space<vmem>>, vector<2x1xf32>,
      %61 = arith.extui %9 : i1 to i32
      %c0_i32_31 = arith.constant 0 : i32
      %62 = arith.cmpi ne, %61, %c0_i32_31 : i32
      scf.if %62 {
        %c0_32 = arith.constant 0 : index
        %c0_33 = arith.constant 0 : index
        %63 = vector.load %arg23[%c0_32, %c0_33] : memref<2x32xf32, #tpu.memory_space<vmem>>, vector<2x32xf32>
        %c0_34 = arith.constant 0 : index
        %c0_35 = arith.constant 0 : index
        %64 = vector.load %arg22[%c0_34, %c0_35] : memref<2x1xf32, #tpu.memory_space<vmem>>, vector<2x1xf32>
        %65 = vector.broadcast %64 : vector<2x1xf32> to vector<2x32xf32>
        %66 = arith.divf %63, %65 : vector<2x32xf32>
        %c0_36 = arith.constant 0 : index
        %c0_37 = arith.constant 0 : index
        %67 = vector.load %arg14[%c0_36, %c0_37] : memref<2x1xf32, #tpu.memory_space<vmem>>, vector<2x1xf32>
        %c0_38 = arith.constant 0 : index
        %c0_39 = arith.constant 0 : index
        %c0_40 = arith.constant 0 : index
        %68 = vector.load %arg13[%c0_38, %c0_39, %c0_40] : memref<2x2x32xf32, #tpu.memory_space<vmem>>, vector<1x2x32xf32>
        %69 = vector.shape_cast %68 : vector<1x2x32xf32> to vector<2x32xf32>
        %70 = vector.extract_strided_slice %66 {offsets = [0, 0], sizes = [1, 32], strides = [1, 1]} : vector<2x32xf32> to vector<1x32xf32>
        %71 = vector.broadcast %70 : vector<1x32xf32> to vector<2x32xf32>
        %72 = arith.mulf %69, %71 : vector<2x32xf32>
        %cst_41 = arith.constant dense<0.000000e+00> : vector<2xf32>
        %73 = vector.multi_reduction <add>, %72, %cst_41 [1] : vector<2x32xf32> to vector<2xf32>
        %74 = vector.shape_cast %73 : vector<2xf32> to vector<2x1xf32>
        %75 = arith.addf %67, %74 : vector<2x1xf32>
        %c1 = arith.constant 1 : index
        %c0_42 = arith.constant 0 : index
        %c0_43 = arith.constant 0 : index
        %76 = vector.load %arg13[%c1, %c0_42, %c0_43] : memref<2x2x32xf32, #tpu.memory_space<vmem>>, vector<1x2x32xf32>
        %77 = vector.shape_cast %76 : vector<1x2x32xf32> to vector<2x32xf32>
        %78 = vector.extract_strided_slice %66 {offsets = [1, 0], sizes = [1, 32], strides = [1, 1]} : vector<2x32xf32> to vector<1x32xf32>
        %79 = vector.broadcast %78 : vector<1x32xf32> to vector<2x32xf32>
        %80 = arith.mulf %77, %79 : vector<2x32xf32>
        %cst_44 = arith.constant dense<0.000000e+00> : vector<2xf32>
        %81 = vector.multi_reduction <add>, %80, %cst_44 [1] : vector<2x32xf32> to vector<2xf32>
        %82 = vector.shape_cast %81 : vector<2xf32> to vector<2x1xf32>
        %83 = arith.addf %75, %82 : vector<2x1xf32>
        %c0_45 = arith.constant 0 : index
        %c0_46 = arith.constant 0 : index
        %c0_47 = arith.constant 0 : index
        %84 = vector.load %arg16[%c0_45, %c0_46, %c0_47] : memref<1x2x1xf32, #tpu.memory_space<vmem>>, vector<1x2x1xf32>
        %85 = vector.shape_cast %84 : vector<1x2x1xf32> to vector<2x1xf32>
        %86 = vector.shape_cast %83 : vector<2x1xf32> to vector<1x2x1xf32>
        tpu.vector_store %arg16[%c0_45, %c0_46, %c0_47], %86 {strides = array<i32>} : memref<1x2x1xf32, #tpu.memory_space<vmem>>, vector<1x2x1xf32>,
      } else {
      }
    } else {
    }
    return
  }
  func.func @transform_0(%arg0: i32, %arg1: i32, %arg2: memref<2xi32, #tpu.memory_space<smem>>, %arg3: memref<2xi32, #tpu.memory_space<smem>>, %arg4: memref<2xi32, #tpu.memory_space<smem>>, %arg5: memref<2xi32, #tpu.memory_space<smem>>) -> (i32, i32) {
    %c0_i32 = arith.constant 0 : i32
    %c0_i32_0 = arith.constant 0 : i32
    return %arg1, %c0_i32 : i32, i32
  }
  func.func @transform_1(%arg0: i32, %arg1: i32, %arg2: memref<2xi32, #tpu.memory_space<smem>>, %arg3: memref<2xi32, #tpu.memory_space<smem>>, %arg4: memref<2xi32, #tpu.memory_space<smem>>, %arg5: memref<2xi32, #tpu.memory_space<smem>>) -> (i32, i32) {
    %c0_i32 = arith.constant 0 : i32
    %c0_i32_0 = arith.constant 0 : i32
    %c0_i32_1 = arith.constant 0 : i32
    return %c0_i32, %c0_i32_0 : i32, i32
  }
  func.func @transform_2(%arg0: i32, %arg1: i32, %arg2: memref<2xi32, #tpu.memory_space<smem>>, %arg3: memref<2xi32, #tpu.memory_space<smem>>, %arg4: memref<2xi32, #tpu.memory_space<smem>>, %arg5: memref<2xi32, #tpu.memory_space<smem>>) -> (i32, i32) {
    %c0_i32 = arith.constant 0 : i32
    %c0_i32_0 = arith.constant 0 : i32
    %c0_i32_1 = arith.constant 0 : i32
    return %c0_i32, %c0_i32_0 : i32, i32
  }
  func.func @transform_3(%arg0: i32, %arg1: i32, %arg2: memref<2xi32, #tpu.memory_space<smem>>, %arg3: memref<2xi32, #tpu.memory_space<smem>>, %arg4: memref<2xi32, #tpu.memory_space<smem>>, %arg5: memref<2xi32, #tpu.memory_space<smem>>) -> (i32, i32) {
    %c0_i32 = arith.constant 0 : i32
    %c0_i32_0 = arith.constant 0 : i32
    %c0_i32_1 = arith.constant 0 : i32
    return %c0_i32, %c0_i32_0 : i32, i32
  }
  func.func @transform_4(%arg0: i32, %arg1: i32, %arg2: memref<2xi32, #tpu.memory_space<smem>>, %arg3: memref<2xi32, #tpu.memory_space<smem>>, %arg4: memref<2xi32, #tpu.memory_space<smem>>, %arg5: memref<2xi32, #tpu.memory_space<smem>>) -> (i32, i32) {
    %c0_i32 = arith.constant 0 : i32
    %c0_i32_0 = arith.constant 0 : i32
    %c0_i32_1 = arith.constant 0 : i32
    return %c0_i32, %c0_i32_0 : i32, i32
  }
  func.func @transform_5(%arg0: i32, %arg1: i32, %arg2: memref<2xi32, #tpu.memory_space<smem>>, %arg3: memref<2xi32, #tpu.memory_space<smem>>, %arg4: memref<2xi32, #tpu.memory_space<smem>>, %arg5: memref<2xi32, #tpu.memory_space<smem>>) -> (i32, i32) {
    %c0_i32 = arith.constant 0 : i32
    %c0_i32_0 = arith.constant 0 : i32
    %c0_i32_1 = arith.constant 0 : i32
    return %c0_i32, %c0_i32_0 : i32, i32
  }
  func.func @transform_6(%arg0: i32, %arg1: i32, %arg2: memref<2xi32, #tpu.memory_space<smem>>, %arg3: memref<2xi32, #tpu.memory_space<smem>>, %arg4: memref<2xi32, #tpu.memory_space<smem>>, %arg5: memref<2xi32, #tpu.memory_space<smem>>) -> (i32, i32) {
    %c0_i32 = arith.constant 0 : i32
    %c0_i32_0 = arith.constant 0 : i32
    %c0_i32_1 = arith.constant 0 : i32
    return %c0_i32, %c0_i32_0 : i32, i32
  }
  func.func @transform_7(%arg0: i32, %arg1: i32, %arg2: memref<2xi32, #tpu.memory_space<smem>>, %arg3: memref<2xi32, #tpu.memory_space<smem>>, %arg4: memref<2xi32, #tpu.memory_space<smem>>, %arg5: memref<2xi32, #tpu.memory_space<smem>>) -> (i32, i32, i32) {
    %c0_i32 = arith.constant 0 : i32
    %c0_i32_0 = arith.constant 0 : i32
    %c0_i32_1 = arith.constant 0 : i32
    %c0_i32_2 = arith.constant 0 : i32
    return %c0_i32, %c0_i32_0, %c0_i32_1 : i32, i32, i32
  }
  func.func @transform_8(%arg0: i32, %arg1: i32, %arg2: memref<2xi32, #tpu.memory_space<smem>>, %arg3: memref<2xi32, #tpu.memory_space<smem>>, %arg4: memref<2xi32, #tpu.memory_space<smem>>, %arg5: memref<2xi32, #tpu.memory_space<smem>>) -> (i32, i32) {
    %c0_i32 = arith.constant 0 : i32
    %c0_i32_0 = arith.constant 0 : i32
    %c0_i32_1 = arith.constant 0 : i32
    return %c0_i32, %c0_i32_0 : i32, i32
  }
  func.func @transform_9(%arg0: i32, %arg1: i32, %arg2: memref<2xi32, #tpu.memory_space<smem>>, %arg3: memref<2xi32, #tpu.memory_space<smem>>, %arg4: memref<2xi32, #tpu.memory_space<smem>>, %arg5: memref<2xi32, #tpu.memory_space<smem>>) -> (i32, i32) {
    %c0_i32 = arith.constant 0 : i32
    %0 = arith.cmpi eq, %arg0, %c0_i32 : i32
    %c2_i32 = arith.constant 2 : i32
    %1 = arith.select %0, %arg1, %c2_i32 : i32
    %c0_i32_0 = arith.constant 0 : i32
    %c0_i32_1 = arith.constant 0 : i32
    return %c0_i32_0, %1 : i32, i32
  }
  func.func @transform_10(%arg0: i32, %arg1: i32, %arg2: memref<2xi32, #tpu.memory_space<smem>>, %arg3: memref<2xi32, #tpu.memory_space<smem>>, %arg4: memref<2xi32, #tpu.memory_space<smem>>, %arg5: memref<2xi32, #tpu.memory_space<smem>>) -> (i32, i32, i32) {
    %c0_i32 = arith.constant 0 : i32
    %0 = arith.cmpi eq, %arg0, %c0_i32 : i32
    %1 = arith.index_cast %arg1 : i32 to index
    %2 = memref.load %arg2[%1] : memref<2xi32, #tpu.memory_space<smem>>
    %c0_i32_0 = arith.constant 0 : i32
    %3 = arith.select %0, %c0_i32_0, %2 : i32
    %c0_i32_1 = arith.constant 0 : i32
    %c0_i32_2 = arith.constant 0 : i32
    %c0_i32_3 = arith.constant 0 : i32
    return %3, %c0_i32_1, %c0_i32_2 : i32, i32, i32
  }
}

</mosaic_0001>

<bundles_post_ra>
// kernel: tpu_custom_call.1
= control target key start
LH: loop header
LB: loop body
LE: loop exit
PB: predicated region body
PF: predicated region fallthrough
CT: control target
= control target key end

     0   :  { %s13057_s0 = inlined_call_operand.vmem [shape: s32[2], index: 0, kind: input, shape index: {}]   ;;  %s13058_s4 = inlined_call_operand.vmem [shape: bf16[4096,32], index: 4, kind: input, shape index: {}]   ;;  %s13059_s5 = inlined_call_operand.vmem [shape: bf16[2,32], index: 5, kind: input, shape index: {}]   ;;  %s13060_s6 = inlined_call_operand.vmem [shape: f32[2,1], index: 6, kind: input, shape index: {}]   ;;  %s13061_s7 = inlined_call_operand.vmem [shape: bf16[32,128], index: 7, kind: input, shape index: {}]   ;;  %s13062_s8 = inlined_call_operand.vmem [shape: f32[1,128], index: 8, kind: input, shape index: {}]   ;;  %s13063_s9 = inlined_call_operand.vmem [shape: bf16[32,32], index: 9, kind: input, shape index: {}]   ;;  %s13064_s10 = inlined_call_operand.vmem [shape: f32[1,32], index: 10, kind: input, shape index: {}]   ;;  %s13065_s11 = inlined_call_operand.vmem [shape: f32[2,2,32], index: 11, kind: input, shape index: {}]   ;;  %s13066_s12 = inlined_call_operand.vmem [shape: f32[2,1], index: 12, kind: input, shape index: {}]   ;;  %s13067_s13 = inlined_call_operand.hbm [shape: f32[2,6144], index: 13, kind: output, shape index: {0}]   ;;  %s13068_s14 = inlined_call_operand.vmem [shape: f32[2,2,1], index: 14, kind: output, shape index: {1}]   ;;  %s13069_s1 = inlined_call_operand.vmem [shape: s32[2], index: 1, kind: input, shape index: {}]   ;;  %s13070_s2 = inlined_call_operand.vmem [shape: s32[2], index: 2, kind: input, shape index: {}]   ;;  %s13071_s3 = inlined_call_operand.vmem [shape: s32[2], index: 3, kind: input, shape index: {}]  }
   0x1   :  { %13361 = sst [smem:[#allocation488_spill]] %s13058_s4  ;;  %s20_s15 = sshll.u32 %s13057_s0, 4  ;;  %s21_s15 = int_to_ptr.vmem [resolvable:$true] %s20_s15 }
   0x2   :  { %13362 = sst [smem:[#allocation489_spill]] %s13059_s5  ;;  %s24_s18 = sshll.u32 %s13069_s1, 4  ;;  %s25_s18 = int_to_ptr.vmem [resolvable:$true] %s24_s18 }
   0x3   :  { %13363 = sst [smem:[#allocation490_spill]] %s13060_s6  ;;  %s8227_s19 = scalar_lea.vmem %s21_s15, 16 }
   0x4   :  { %13364 = sst [smem:[#allocation491_spill]] %s13061_s7  ;;  %p8228_p0 = scmp.ne.s32.totalorder %s21_s15, %s8227_s19 }
   0x5   :  { %p8232_p1 = scmp.lt.s32.totalorder %s21_s15, %s21_s15  ;;  %p8233_p2 = scmp.lt.s32.totalorder %s8227_s19, %s8227_s19 }
   0x7   :  { %p8234_p3 = por %p8233_p2, %p8232_p1 }
   0x9   :  { %p8235_p4 = pnand %p8234_p3, %p8228_p0 }
   0xb   :  { %8238 = shalt.err (!%p8235_p4)  }
   0xc   :  { %s8371_s20 = smov [#allocation10]   ;;  %s8239_s21 = scalar_lea.vmem %s25_s18, 16 }
   0xd   :  { %23 = dma.vmem_to_smem %s21_s15, 16, %s8371_s20, [#allocation9] }
   0xe   :  { %p8240_p5 = scmp.ne.s32.totalorder %s25_s18, %s8239_s21  ;;  %p8244_p6 = scmp.lt.s32.totalorder %s25_s18, %s25_s18 }
   0xf   :  { %p8245_p7 = scmp.lt.s32.totalorder %s8239_s21, %s8239_s21 }
  0x11   :  { %p8246_p8 = por %p8245_p7, %p8244_p6 }
  0x13   :  { %p8247_p9 = pnand %p8246_p8, %p8240_p5 }
  0x15   :  { %8250 = shalt.err (!%p8247_p9)  }
  0x16   :  { %s8372_s0 = smov [#allocation11]   ;;  %s28_s23 = sshll.u32 %s13070_s2, 4  ;;  %s29_s23 = int_to_ptr.vmem [resolvable:$true] %s28_s23 }
  0x17   :  { %27 = dma.vmem_to_smem %s25_s18, 16, %s8372_s0, [#allocation9] }
  0x18   :  { %s32_s26 = sshll.u32 %s13071_s3, 4  ;;  %s8251_s27 = scalar_lea.vmem %s29_s23, 16  ;;  %s33_s26 = int_to_ptr.vmem [resolvable:$true] %s32_s26 }
  0x19   :  { %p8252_p10 = scmp.ne.s32.totalorder %s29_s23, %s8251_s27  ;;  %p8256_p11 = scmp.lt.s32.totalorder %s29_s23, %s29_s23 }
  0x1a   :  { %p8257_p12 = scmp.lt.s32.totalorder %s8251_s27, %s8251_s27 }
  0x1c   :  { %p8258_p13 = por %p8257_p12, %p8256_p11 }
  0x1e   :  { %p8259_p0 = pnand %p8258_p13, %p8252_p10 }
  0x20   :  { %8262 = shalt.err (!%p8259_p0)  }
  0x21   :  { %s8373_s28 = smov [#allocation12]   ;;  %s8263_s29 = scalar_lea.vmem %s33_s26, 16 }
  0x22   :  { %31 = dma.vmem_to_smem %s29_s23, 16, %s8373_s28, [#allocation9] }
  0x23   :  { %p8264_p1 = scmp.ne.s32.totalorder %s33_s26, %s8263_s29  ;;  %p8268_p2 = scmp.lt.s32.totalorder %s33_s26, %s33_s26 }
  0x24   :  { %p8269_p3 = scmp.lt.s32.totalorder %s8263_s29, %s8263_s29 }
  0x26   :  { %p8270_p4 = por %p8269_p3, %p8268_p2 }
  0x28   :  { %p8271_p5 = pnand %p8270_p4, %p8264_p1 }
  0x2a   :  { %8274 = shalt.err (!%p8271_p5)  }
  0x2b   :  { %s8374_s2 = smov [#allocation13]  }
  0x2c   :  { %35 = dma.vmem_to_smem %s33_s26, 16, %s8374_s2, [#allocation9] }
  0x2d   :  { %8333 = dma.done.wait [#allocation9], 64 }
  0x2e   :  { %8334 = vsyncadd [#allocation9], 4294967232 }
  0x2f   :  { %37 = sfence }
  0x30   :  { %38 = vsyncpa [#allocation15], 0 }
  0x31   :  { %40 = vsyncpa [#allocation15 + $0x1], 0  ;;  %s8474_s3 = smov 0   ;;  %s8476_s30 = smov 0  }
  0x32   :  { %s8478_s15 = smov 0   ;;  %s8480_s16 = smov 0  }
  0x33   :  { %s8482_s17 = smov 0   ;;  %s8484_s18 = smov 0  }
  0x34   :  { %s8486_s19 = smov 0   ;;  %s8488_s20 = smov 0  }
  0x35 LB: > { %s6327_s21 = sadd.s32 4294967295, %s8369_s20   ;;  %s55_s0 = sadd.s32 1, %s8361_s18  ;;  %s8369_s20 = sphi %s8488_s20, %s46_s20   ;;  %s8365_s19 = sphi %s8486_s19, %s14748_s19   ;;  %s8361_s18 = sphi %s8484_s18, %s14747_s18   ;;  %s8357_s17 = sphi %s8482_s17, %s14746_s17   ;;  %s8353_s16 = sphi %s8480_s16, %s14745_s16   ;;  %s8349_s15 = sphi %s8478_s15, %s14744_s15   ;;  %s8345_s30 = sphi %s8476_s30, %s14743_s30   ;;  %s8341_s3 = sphi %s8474_s3, %s14742_s3  }
  0x36   : > { %s58_s1 = sadd.s32 1, %s8365_s19  ;;  %p56_p6 = scmp.ge.s32.totalorder %s55_s0, 2 }
  0x37   : > { %p256_p7 = scmp.eq.s32.totalorder %s8365_s19, 0  ;;  %s6328_s22 = sadd.s32 4294967294, %s8369_s20  }
  0x38   : > { %p273_p8 = scmp.ne.s32.totalorder %s8349_s15, %s8345_s30  ;;  %s14750_s0 = smov (%p56_p6, %s55_s0), 0 }
  0x39   : > { %s14752_s1 = smov (!%p56_p6, %s58_s1), %s8365_s19  ;;  %p274_p10 = scmp.eq.s32.totalorder %s6327_s21, 3 }
  0x3a   : > { %s257_s23 = scalar_select %p256_p7, %s8361_s18, 2 }
  0x3b   : > { %p60_p9 = scmp.ge.s32.totalorder %s14752_s1, 2  ;;  %p279_p11 = scmp.ne.s32.totalorder %s8345_s30, %s8341_s3 }
  0x3c   : > { %p280_p12 = scmp.eq.s32.totalorder %s6328_s22, 3  ;;  %p8529_p13 = por %p274_p10, %p273_p8 }
  0x3d   : > { %s14754_s1 = smov (%p60_p9, %s14752_s1), 0  ;;  %p6331_p2 = scmp.ge.s32.totalorder %s8369_s20, 1 }
  0x3e   : > { %13365 = sst [smem:[#allocation18_spill]] %s14754_s1  ;;  %p8533_p0 = por %p280_p12, %p279_p11 }
  0x3f   : > { %p258_p1 = scmp.eq.s32.totalorder %s14754_s1, 0  ;;  %p363_p3 = scmp.lt.s32.totalorder %s8369_s20, 5 }
  0x40   : > { %s263_s28 = sadd.s32 1, %s8349_s15 }
  0x41   : > { %s259_s26 = scalar_select %p258_p1, %s14750_s0, 2 }
  0x42   : > { %p364_p4 = pnand %p6331_p2, %p363_p3 }
  0x43   : > { %s260_s27 = ssub.s32 %s257_s23, %s259_s26 }
  0x44   : > { %p261_p5 = scmp.eq.s32.totalorder %s260_s27, 0  ;;  %367 = sbr.rel (%p364_p4) target bundleno = 3374 (0xd2e), region = 56 }
  0x46   : > { %s8543_s29 = scalar_select %p261_p5, %s8349_s15, %s263_s28  }
  0x49   : > { %s13072_s2 = sand.u32 1, %s8345_s30   ;;  %s6333_s21 = sshll.u32 %s8353_s16, 8  ;;  %v13074_v0 = vlaneseq }
  0x4a   : > { %s8549_s22 = sshll.u32 %s13072_s2, 5  ;;  %p409_p6 = scmp.lt.s32.totalorder %s6333_s21, 511 }
  0x4b   : > { %v8552_v1 = vand.u32 127, %v13074_v0  ;;  %p417_p7 = scmp.eq.s32.totalorder %s8357_s17, 0  ;;  %s418_s23 = sld [smem:[#allocation10 + %s8353_s16]] }
  0x4c   : > { %s14756_s21 = smov (!%p409_p6, %s6333_s21), 511  ;;  %s8566_s27 = sld [smem:[#allocation10 + %s8353_s16]] }
  0x4d   : > { %13368 = vst [vmem:[#allocation19_spill] sm:$0xff] %v8552_v1  ;;  %v8557_v2 = vadd.s32 128, %v8552_v1  ;;  %v8560_v3 = vadd.s32 256, %v8552_v1  ;;  %v8563_v4 = vadd.s32 384, %v8552_v1  ;;  %s6334_s26 = sshll.u32 %s14756_s21, 2  ;;  %v8569_v5 = vadd.s32 512, %v8552_v1 }
  0x4e   : > { %v8572_v6 = vadd.s32 640, %v8552_v1  ;;  %v8575_v7 = vadd.s32 768, %v8552_v1  ;;  %v8578_v8 = vadd.s32 896, %v8552_v1  ;;  %s13376_s4 = sld [smem:[#allocation488_spill]]  ;;  %v8587_v9 = vadd.s32 1024, %v8552_v1  ;;  %p6336_p9 = scmp.ne.s32.totalorder %s8357_s17, 0 }
  0x4f   : > { %13369 = vst [vmem:[#allocation20_spill] sm:$0xff] %v8557_v2  ;;  %13370 = vst [vmem:[#allocation21_spill] sm:$0xff] %v8560_v3  ;;  %s429_s21 = sld [smem:[#allocation11 + %s8353_s16]]  ;;  %v8590_v10 = vadd.s32 1152, %v8552_v1  ;;  %v8593_v11 = vadd.s32 1280, %v8552_v1  ;;  %v8596_v12 = vadd.s32 1408, %v8552_v1 }
  0x50   : > { %13371 = vst [vmem:[#allocation22_spill] sm:$0xff] %v8563_v4  ;;  %13372 = vst [vmem:[#allocation23_spill] sm:$0xff] %v8569_v5  ;;  %s8599_s2 = sld [smem:[#allocation12 + %s8353_s16]]  ;;  %v8608_v15 = vadd.s32 1536, %v8552_v1  ;;  %v8620_v18 = vadd.s32 1664, %v8552_v1  ;;  %v8640_v24 = vadd.s32 1792, %v8552_v1 }
  0x51   : > { %13373 = vst [vmem:[#allocation24_spill] sm:$0xff] %v8572_v6  ;;  %13374 = vst [vmem:[#allocation25_spill] sm:$0xff] %v8575_v7  ;;  %s14758_s23 = smov (%p417_p7, %s418_s23), 0  ;;  %v8658_v30 = vadd.s32 1920, %v8552_v1 }
  0x52   : > { %13375 = vst [vmem:[#allocation26_spill] sm:$0xff] %v8578_v8  ;;  %13377 = vst [vmem:[#allocation27_spill] sm:$0xff] %v8587_v9  ;;  %p420_p8 = scmp.lt.s32.totalorder %s14758_s23, 1 }
  0x53   : > { %13378 = vst [vmem:[#allocation28_spill] sm:$0xff] %v8590_v10  ;;  %13379 = vst [vmem:[#allocation29_spill] sm:$0xff] %v8593_v11 }
  0x54   : > { %s8583_s1 = scalar_lea.vmem %s13376_s4, %s6334_s26  ;;  %13380 = vst [vmem:[#allocation30_spill] sm:$0xff] %v8596_v12  ;;  %13383 = vst [vmem:[#allocation33_spill] sm:$0xff] %v8608_v15  ;;  %s8611_s26 = sld [smem:[#allocation13 + %s8353_s16]] }
  0x55   : > { %v8602_v13 = vld [vmem:[%s8583_s1] sm:$0xf]  ;;  %v8605_v14 = vld [vmem:[%s8583_s1 + $0x4] sm:$0xf]  ;;  %v8614_v16 = vld [vmem:[%s8583_s1 + $0x8] sm:$0xf]  ;;  %v8660_v31 = vstv %s429_s21 }
  0x56   : > { %13381 = vst [vmem:[#allocation31_spill] sm:$0xff] %v8602_v13  ;;  %13382 = vst [vmem:[#allocation32_spill] sm:$0xff] %v8605_v14  ;;  %v8617_v17 = vld [vmem:[%s8583_s1 + $0xc] sm:$0xf]  ;;  %v8623_v19 = vld [vmem:[%s8583_s1 + $0x10] sm:$0xf]  ;;  %vm13281_vm0 = vcmp.lt.s32.totalorder %v8552_v1, %v8660_v31  ;;  %vm13276_vm1 = vcmp.lt.s32.totalorder %v8557_v2, %v8660_v31  ;;  %vm13278_vm2 = vcmp.lt.s32.totalorder %v8560_v3, %v8660_v31 }
  0x57   : > { %13384 = vst [vmem:[#allocation34_spill] sm:$0xff] %v8614_v16  ;;  %13385 = vst [vmem:[#allocation35_spill] sm:$0xff] %v8617_v17  ;;  %v8626_v20 = vld [vmem:[%s8583_s1 + $0x14] sm:$0xf]  ;;  %v8629_v21 = vld [vmem:[%s8583_s1 + $0x18] sm:$0xf]  ;;  %vm13275_vm3 = vcmp.lt.s32.totalorder %v8563_v4, %v8660_v31  ;;  %vm13280_vm4 = vcmp.lt.s32.totalorder %v8569_v5, %v8660_v31  ;;  %vm13277_vm5 = vcmp.lt.s32.totalorder %v8572_v6, %v8660_v31 }
  0x58   : > { %13386 = vst [vmem:[#allocation36_spill] sm:$0xff] %v8620_v18  ;;  %13387 = vst [vmem:[#allocation37_spill] sm:$0xff] %v8623_v19  ;;  %v8634_v22 = vld [vmem:[%s8583_s1 + $0x1c] sm:$0xf]  ;;  %v8637_v23 = vld [vmem:[%s8583_s1 + $0x20] sm:$0xf]  ;;  %vm13279_vm6 = vcmp.lt.s32.totalorder %v8575_v7, %v8660_v31  ;;  %vm13274_vm7 = vcmp.lt.s32.totalorder %v8578_v8, %v8660_v31  ;;  %vm13273_vm8 = vcmp.lt.s32.totalorder %v8587_v9, %v8660_v31 }
  0x59   : > { %13388 = vst [vmem:[#allocation38_spill] sm:$0xff] %v8626_v20  ;;  %13389 = vst [vmem:[#allocation39_spill] sm:$0xff] %v8629_v21  ;;  %v8643_v25 = vld [vmem:[%s8583_s1 + $0x24] sm:$0xf]  ;;  %v8646_v26 = vld [vmem:[%s8583_s1 + $0x28] sm:$0xf]  ;;  %vm13272_vm9 = vcmp.lt.s32.totalorder %v8590_v10, %v8660_v31  ;;  %vm13271_vm10 = vcmp.lt.s32.totalorder %v8593_v11, %v8660_v31  ;;  %vm13268_vm11 = vcmp.lt.s32.totalorder %v8596_v12, %v8660_v31 }
  0x5a   : > { %13390 = vst [vmem:[#allocation40_spill] sm:$0xff] %v8634_v22  ;;  %13391 = vst [vmem:[#allocation41_spill] sm:$0xff] %v8637_v23  ;;  %v8649_v27 = vld [vmem:[%s8583_s1 + $0x2c] sm:$0xf]  ;;  %v8652_v28 = vld [vmem:[%s8583_s1 + $0x30] sm:$0xf]  ;;  %vm13270_vm12 = vcmp.lt.s32.totalorder %v8608_v15, %v8660_v31  ;;  %vm13269_vm13 = vcmp.lt.s32.totalorder %v8620_v18, %v8660_v31 }
  0x5b   : > { %13392 = vst [vmem:[#allocation42_spill] sm:$0xff] %v8640_v24  ;;  %13393 = vst [vmem:[#allocation43_spill] sm:$0xff] %v8643_v25  ;;  %v8655_v29 = vld [vmem:[%s8583_s1 + $0x34] sm:$0xf]  ;;  %v8663_v32 = vld [vmem:[%s8583_s1 + $0x38] sm:$0xf] }
  0x5c   : > { %13394 = vst [vmem:[#allocation44_spill] sm:$0xff] %v8646_v26  ;;  %13395 = vst [vmem:[#allocation45_spill] sm:$0xff] %v8649_v27  ;;  %v8666_v33 = vld [vmem:[%s8583_s1 + $0x3c] sm:$0xf]  ;;  %v8669_v34 = vld [vmem:[%s8583_s1 + $0x40] sm:$0xf] }
  0x5d   : > { %13396 = vst [vmem:[#allocation46_spill] sm:$0xff] %v8652_v28  ;;  %13397 = vst [vmem:[#allocation47_spill] sm:$0xff] %v8655_v29  ;;  %s14760_s23 = smov (!%p420_p8, %s14758_s23), 1  ;;  %v8680_v35 = vld [vmem:[%s8583_s1 + $0x44] sm:$0xf] }
  0x5e   : > { %13398 = vst [vmem:[#allocation48_spill] sm:$0xff] %v8658_v30  ;;  %13399 = vst [vmem:[#allocation49_spill] sm:$0xff] %v8660_v31  ;;  %v8683_v36 = vld [vmem:[%s8583_s1 + $0x48] sm:$0xf]  ;;  %v8694_v37 = vld [vmem:[%s8583_s1 + $0x4c] sm:$0xf] }
  0x5f   : > { %13400 = vst [vmem:[#allocation50_spill] sm:$0xff] %v8663_v32  ;;  %13401 = vst [vmem:[#allocation51_spill] sm:$0xff] %v8666_v33  ;;  %v8697_v38 = vld [vmem:[%s8583_s1 + $0x50] sm:$0xf]  ;;  %v8700_v39 = vld [vmem:[%s8583_s1 + $0x54] sm:$0xf] }
  0x60   : > { %13402 = vst [vmem:[#allocation52_spill] sm:$0xff] %v8669_v34  ;;  %13403 = vst [vmem:[#allocation53_spill] sm:$0xff] %v8680_v35  ;;  %s6335_s28 = sshll.u32 %s14760_s23, 1  ;;  %v8711_v40 = vld [vmem:[%s8583_s1 + $0x58] sm:$0xf] }
  0x61   : > { %13404 = vst [vmem:[#allocation54_spill] sm:$0xff] %v8683_v36  ;;  %13405 = vst [vmem:[#allocation55_spill] sm:$0xff] %v8694_v37  ;;  %v8714_v41 = vld [vmem:[%s8583_s1 + $0x5c] sm:$0xf]  ;;  %s8727_s4 = scalar_lea.vmem %s13068_s14, %s6335_s28  ;;  %v8730_v42 = vld [vmem:[%s8583_s1 + $0x60] sm:$0xf] }
  0x62   : > { %13406 = vst [vmem:[#allocation56_spill] sm:$0xff] %v8697_v38  ;;  %13407 = vst [vmem:[#allocation57_spill] sm:$0xff] %v8700_v39  ;;  %v8733_v43 = vld [vmem:[%s8583_s1 + $0x64] sm:$0xf]  ;;  %v8736_v44 = vld [vmem:[%s8583_s1 + $0x68] sm:$0xf] }
  0x63   : > { %13408 = vst [vmem:[#allocation58_spill] sm:$0xff] %v8711_v40  ;;  %13409 = vst [vmem:[#allocation59_spill] sm:$0xff] %v8714_v41  ;;  %v8739_v45 = vld [vmem:[%s8583_s1 + $0x6c] sm:$0xf]  ;;  %v8742_v46 = vld [vmem:[%s8583_s1 + $0x70] sm:$0xf] }
  0x64   : > { %13410 = vst [vmem:[#allocation60_spill] sm:$0xff] %v8730_v42  ;;  %13411 = vst [vmem:[#allocation61_spill] sm:$0xff] %v8733_v43  ;;  %v8745_v47 = vld [vmem:[%s8583_s1 + $0x74] sm:$0xf]  ;;  %v8748_v48 = vld [vmem:[%s8583_s1 + $0x78] sm:$0xf] }
  0x65   : > { %13412 = vst [vmem:[#allocation62_spill] sm:$0xff] %v8736_v44  ;;  %13413 = vst [vmem:[#allocation63_spill] sm:$0xff] %v8739_v45  ;;  %v8751_v49 = vld [vmem:[%s8583_s1 + $0x7c] sm:$0xf]  ;;  %v8754_v50 = vld [vmem:[%s8583_s1 + $0x80] sm:$0xf] }
  0x66   : > { %13414 = vst [vmem:[#allocation64_spill] sm:$0xff] %v8742_v46  ;;  %13415 = vst [vmem:[#allocation65_spill] sm:$0xff] %v8745_v47  ;;  %v8757_v51 = vld [vmem:[%s8583_s1 + $0x84] sm:$0xf]  ;;  %v8760_v52 = vld [vmem:[%s8583_s1 + $0x88] sm:$0xf] }
  0x67   : > { %13416 = vst [vmem:[#allocation66_spill] sm:$0xff] %v8748_v48  ;;  %13417 = vst [vmem:[#allocation67_spill] sm:$0xff] %v8751_v49  ;;  %v8763_v53 = vld [vmem:[%s8583_s1 + $0x8c] sm:$0xf]  ;;  %v8766_v54 = vld [vmem:[%s8583_s1 + $0x90] sm:$0xf] }
  0x68   : > { %13418 = vst [vmem:[#allocation68_spill] sm:$0xff] %v8754_v50  ;;  %13419 = vst [vmem:[#allocation69_spill] sm:$0xff] %v8757_v51  ;;  %v8769_v55 = vld [vmem:[%s8583_s1 + $0x94] sm:$0xf]  ;;  %v8772_v56 = vld [vmem:[%s8583_s1 + $0x98] sm:$0xf] }
  0x69   : > { %13420 = vst [vmem:[#allocation70_spill] sm:$0xff] %v8760_v52  ;;  %13421 = vst [vmem:[#allocation71_spill] sm:$0xff] %v8763_v53  ;;  %v8775_v57 = vld [vmem:[%s8583_s1 + $0x9c] sm:$0xf]  ;;  %v8778_v58 = vld [vmem:[%s8583_s1 + $0xa0] sm:$0xf] }
  0x6a   : > { %13422 = vst [vmem:[#allocation72_spill] sm:$0xff] %v8766_v54  ;;  %13423 = vst [vmem:[#allocation73_spill] sm:$0xff] %v8769_v55  ;;  %v8781_v59 = vld [vmem:[%s8583_s1 + $0xa4] sm:$0xf]  ;;  %v8784_v60 = vld [vmem:[%s8583_s1 + $0xa8] sm:$0xf] }
  0x6b   : > { %13424 = vst [vmem:[#allocation74_spill] sm:$0xff] %v8772_v56  ;;  %13425 = vst [vmem:[#allocation75_spill] sm:$0xff] %v8775_v57  ;;  %v8787_v61 = vld [vmem:[%s8583_s1 + $0xac] sm:$0xf]  ;;  %v8790_v62 = vld [vmem:[%s8583_s1 + $0xb0] sm:$0xf] }
  0x6c   : > { %13426 = vst [vmem:[#allocation76_spill] sm:$0xff] %v8778_v58  ;;  %13427 = vst [vmem:[#allocation77_spill] sm:$0xff] %v8781_v59  ;;  %v8793_v63 = vld [vmem:[%s8583_s1 + $0xb4] sm:$0xf]  ;;  %v8796_v0 = vld [vmem:[%s8583_s1 + $0xb8] sm:$0xf] }
  0x6d   : > { %13428 = vst [vmem:[#allocation78_spill] sm:$0xff] %v8784_v60  ;;  %13429 = vst [vmem:[#allocation79_spill] sm:$0xff] %v8787_v61  ;;  %v8799_v30 = vld [vmem:[%s8583_s1 + $0xbc] sm:$0xf]  ;;  %v8802_v24 = vld [vmem:[%s8583_s1 + $0xc0] sm:$0xf] }
  0x6e   : > { %13430 = vst [vmem:[#allocation80_spill] sm:$0xff] %v8790_v62  ;;  %13431 = vst [vmem:[#allocation81_spill] sm:$0xff] %v8793_v63  ;;  %v8805_v18 = vld [vmem:[%s8583_s1 + $0xc4] sm:$0xf]  ;;  %v8808_v15 = vld [vmem:[%s8583_s1 + $0xc8] sm:$0xf] }
  0x6f   : > { %13432 = vst [vmem:[#allocation82_spill] sm:$0xff] %v8796_v0  ;;  %13433 = vst [vmem:[#allocation83_spill] sm:$0xff] %v8799_v30  ;;  %v8811_v12 = vld [vmem:[%s8583_s1 + $0xcc] sm:$0xf]  ;;  %v8814_v11 = vld [vmem:[%s8583_s1 + $0xd0] sm:$0xf] }
  0x70   : > { %13434 = vst [vmem:[#allocation84_spill] sm:$0xff] %v8802_v24  ;;  %13435 = vst [vmem:[#allocation85_spill] sm:$0xff] %v8805_v18  ;;  %v8817_v10 = vld [vmem:[%s8583_s1 + $0xd4] sm:$0xf]  ;;  %v8820_v9 = vld [vmem:[%s8583_s1 + $0xd8] sm:$0xf] }
  0x71   : > { %13436 = vst [vmem:[#allocation86_spill] sm:$0xff] %v8808_v15  ;;  %13437 = vst [vmem:[#allocation87_spill] sm:$0xff] %v8811_v12  ;;  %v8823_v8 = vld [vmem:[%s8583_s1 + $0xdc] sm:$0xf]  ;;  %v8826_v7 = vld [vmem:[%s8583_s1 + $0xe0] sm:$0xf] }
  0x72   : > { %13438 = vst [vmem:[#allocation88_spill] sm:$0xff] %v8814_v11  ;;  %13439 = vst [vmem:[#allocation89_spill] sm:$0xff] %v8817_v10  ;;  %v8829_v6 = vld [vmem:[%s8583_s1 + $0xe4] sm:$0xf]  ;;  %v8832_v5 = vld [vmem:[%s8583_s1 + $0xe8] sm:$0xf] }
  0x73   : > { %13440 = vst [vmem:[#allocation90_spill] sm:$0xff] %v8820_v9  ;;  %13441 = vst [vmem:[#allocation91_spill] sm:$0xff] %v8823_v8  ;;  %v8835_v4 = vld [vmem:[%s8583_s1 + $0xec] sm:$0xf]  ;;  %v8838_v3 = vld [vmem:[%s8583_s1 + $0xf0] sm:$0xf] }
  0x74   : > { %13442 = vst [vmem:[#allocation92_spill] sm:$0xff] %v8826_v7  ;;  %13443 = vst [vmem:[#allocation93_spill] sm:$0xff] %v8829_v6  ;;  %v8841_v2 = vld [vmem:[%s8583_s1 + $0xf4] sm:$0xf]  ;;  %v8844_v31 = vld [vmem:[%s8583_s1 + $0xf8] sm:$0xf] }
  0x75   : > { %13444 = vst [vmem:[#allocation94_spill] sm:$0xff] %v8832_v5  ;;  %13445 = vst [vmem:[#allocation95_spill] sm:$0xff] %v8835_v4  ;;  %v8847_v1 = vld [vmem:[%s8583_s1 + $0xfc] sm:$0xf]  ;;  %v8850_v50 = vld [vmem:[%s8583_s1 + $0x100] sm:$0xf] }
  0x76   : > { %13446 = vst [vmem:[#allocation96_spill] sm:$0xff] %v8838_v3  ;;  %13447 = vst [vmem:[#allocation97_spill] sm:$0xff] %v8841_v2  ;;  %v8853_v51 = vld [vmem:[%s8583_s1 + $0x104] sm:$0xf]  ;;  %v8856_v13 = vld [vmem:[%s8583_s1 + $0x108] sm:$0xf] }
  0x77   : > { %13448 = vst [vmem:[#allocation98_spill] sm:$0xff] %v8844_v31  ;;  %13449 = vst [vmem:[#allocation99_spill] sm:$0xff] %v8847_v1  ;;  %v8859_v14 = vld [vmem:[%s8583_s1 + $0x10c] sm:$0xf]  ;;  %v8862_v24 = vld [vmem:[%s8583_s1 + $0x110] sm:$0xf] }
  0x78   : > { %13450 = vst [vmem:[#allocation100_spill] sm:$0xff] %v8850_v50  ;;  %13451 = vst [vmem:[#allocation101_spill] sm:$0xff] %v8853_v51  ;;  %v8865_v18 = vld [vmem:[%s8583_s1 + $0x114] sm:$0xf]  ;;  %v8868_v34 = vld [vmem:[%s8583_s1 + $0x118] sm:$0xf] }
  0x79   : > { %13452 = vst [vmem:[#allocation102_spill] sm:$0xff] %v8856_v13  ;;  %13453 = vst [vmem:[#allocation103_spill] sm:$0xff] %v8859_v14  ;;  %v8871_v50 = vld [vmem:[%s8583_s1 + $0x11c] sm:$0xf]  ;;  %v8874_v51 = vld [vmem:[%s8583_s1 + $0x120] sm:$0xf] }
  0x7a   : > { %13454 = vst [vmem:[#allocation104_spill] sm:$0xff] %v8862_v24  ;;  %13455 = vst [vmem:[#allocation105_spill] sm:$0xff] %v8865_v18  ;;  %v8877_v13 = vld [vmem:[%s8583_s1 + $0x124] sm:$0xf]  ;;  %v8880_v14 = vld [vmem:[%s8583_s1 + $0x128] sm:$0xf] }
  0x7b   : > { %13456 = vst [vmem:[#allocation106_spill] sm:$0xff] %v8868_v34  ;;  %13457 = vst [vmem:[#allocation107_spill] sm:$0xff] %v8871_v50  ;;  %v8883_v24 = vld [vmem:[%s8583_s1 + $0x12c] sm:$0xf]  ;;  %v8886_v18 = vld [vmem:[%s8583_s1 + $0x130] sm:$0xf] }
  0x7c   : > { %13458 = vst [vmem:[#allocation108_spill] sm:$0xff] %v8874_v51  ;;  %13459 = vst [vmem:[#allocation109_spill] sm:$0xff] %v8877_v13  ;;  %v8889_v34 = vld [vmem:[%s8583_s1 + $0x134] sm:$0xf]  ;;  %v8892_v50 = vld [vmem:[%s8583_s1 + $0x138] sm:$0xf] }
  0x7d   : > { %13460 = vst [vmem:[#allocation110_spill] sm:$0xff] %v8880_v14  ;;  %13461 = vst [vmem:[#allocation111_spill] sm:$0xff] %v8883_v24  ;;  %v8895_v51 = vld [vmem:[%s8583_s1 + $0x13c] sm:$0xf]  ;;  %v8898_v13 = vld [vmem:[%s8583_s1 + $0x140] sm:$0xf] }
  0x7e   : > { %13462 = vst [vmem:[#allocation112_spill] sm:$0xff] %v8886_v18  ;;  %13463 = vst [vmem:[#allocation113_spill] sm:$0xff] %v8889_v34  ;;  %v8901_v14 = vld [vmem:[%s8583_s1 + $0x144] sm:$0xf]  ;;  %v8904_v24 = vld [vmem:[%s8583_s1 + $0x148] sm:$0xf] }
  0x7f   : > { %13464 = vst [vmem:[#allocation114_spill] sm:$0xff] %v8892_v50  ;;  %13465 = vst [vmem:[#allocation115_spill] sm:$0xff] %v8895_v51  ;;  %v8907_v18 = vld [vmem:[%s8583_s1 + $0x14c] sm:$0xf]  ;;  %v8910_v34 = vld [vmem:[%s8583_s1 + $0x150] sm:$0xf] }
  0x80   : > { %13466 = vst [vmem:[#allocation116_spill] sm:$0xff] %v8898_v13  ;;  %13467 = vst [vmem:[#allocation117_spill] sm:$0xff] %v8901_v14  ;;  %v8913_v50 = vld [vmem:[%s8583_s1 + $0x154] sm:$0xf]  ;;  %v8916_v51 = vld [vmem:[%s8583_s1 + $0x158] sm:$0xf] }
  0x81   : > { %13468 = vst [vmem:[#allocation118_spill] sm:$0xff] %v8904_v24  ;;  %13469 = vst [vmem:[#allocation119_spill] sm:$0xff] %v8907_v18  ;;  %v8919_v13 = vld [vmem:[%s8583_s1 + $0x15c] sm:$0xf]  ;;  %v8922_v14 = vld [vmem:[%s8583_s1 + $0x160] sm:$0xf] }
  0x82   : > { %13470 = vst [vmem:[#allocation120_spill] sm:$0xff] %v8910_v34  ;;  %13471 = vst [vmem:[#allocation121_spill] sm:$0xff] %v8913_v50  ;;  %v8925_v24 = vld [vmem:[%s8583_s1 + $0x164] sm:$0xf]  ;;  %v8928_v18 = vld [vmem:[%s8583_s1 + $0x168] sm:$0xf] }
  0x83   : > { %13472 = vst [vmem:[#allocation122_spill] sm:$0xff] %v8916_v51  ;;  %13473 = vst [vmem:[#allocation123_spill] sm:$0xff] %v8919_v13  ;;  %v8931_v34 = vld [vmem:[%s8583_s1 + $0x16c] sm:$0xf]  ;;  %v8934_v50 = vld [vmem:[%s8583_s1 + $0x170] sm:$0xf] }
  0x84   : > { %13474 = vst [vmem:[#allocation124_spill] sm:$0xff] %v8922_v14  ;;  %13475 = vst [vmem:[#allocation125_spill] sm:$0xff] %v8925_v24  ;;  %v8937_v51 = vld [vmem:[%s8583_s1 + $0x174] sm:$0xf]  ;;  %v8940_v13 = vld [vmem:[%s8583_s1 + $0x178] sm:$0xf] }
  0x85   : > { %13476 = vst [vmem:[#allocation126_spill] sm:$0xff] %v8928_v18  ;;  %13477 = vst [vmem:[#allocation127_spill] sm:$0xff] %v8931_v34  ;;  %v8943_v14 = vld [vmem:[%s8583_s1 + $0x17c] sm:$0xf]  ;;  %v8946_v24 = vld [vmem:[%s8583_s1 + $0x180] sm:$0xf] }
  0x86   : > { %13478 = vst [vmem:[#allocation128_spill] sm:$0xff] %v8934_v50  ;;  %13479 = vst [vmem:[#allocation129_spill] sm:$0xff] %v8937_v51  ;;  %v8949_v18 = vld [vmem:[%s8583_s1 + $0x184] sm:$0xf]  ;;  %v8952_v34 = vld [vmem:[%s8583_s1 + $0x188] sm:$0xf] }
  0x87   : > { %13480 = vst [vmem:[#allocation130_spill] sm:$0xff] %v8940_v13  ;;  %13481 = vst [vmem:[#allocation131_spill] sm:$0xff] %v8943_v14  ;;  %v8955_v50 = vld [vmem:[%s8583_s1 + $0x18c] sm:$0xf]  ;;  %v8958_v51 = vld [vmem:[%s8583_s1 + $0x190] sm:$0xf] }
  0x88   : > { %13482 = vst [vmem:[#allocation132_spill] sm:$0xff] %v8946_v24  ;;  %13483 = vst [vmem:[#allocation133_spill] sm:$0xff] %v8949_v18  ;;  %v8961_v13 = vld [vmem:[%s8583_s1 + $0x194] sm:$0xf]  ;;  %v8964_v14 = vld [vmem:[%s8583_s1 + $0x198] sm:$0xf] }
  0x89   : > { %13484 = vst [vmem:[#allocation134_spill] sm:$0xff] %v8952_v34  ;;  %13485 = vst [vmem:[#allocation135_spill] sm:$0xff] %v8955_v50  ;;  %v8967_v24 = vld [vmem:[%s8583_s1 + $0x19c] sm:$0xf]  ;;  %v8970_v18 = vld [vmem:[%s8583_s1 + $0x1a0] sm:$0xf] }
  0x8a   : > { %13486 = vst [vmem:[#allocation136_spill] sm:$0xff] %v8958_v51  ;;  %13487 = vst [vmem:[#allocation137_spill] sm:$0xff] %v8961_v13  ;;  %v8973_v34 = vld [vmem:[%s8583_s1 + $0x1a4] sm:$0xf]  ;;  %v8976_v50 = vld [vmem:[%s8583_s1 + $0x1a8] sm:$0xf] }
  0x8b   : > { %13488 = vst [vmem:[#allocation138_spill] sm:$0xff] %v8964_v14  ;;  %13489 = vst [vmem:[#allocation139_spill] sm:$0xff] %v8967_v24  ;;  %v8979_v51 = vld [vmem:[%s8583_s1 + $0x1ac] sm:$0xf]  ;;  %v8982_v13 = vld [vmem:[%s8583_s1 + $0x1b0] sm:$0xf] }
  0x8c   : > { %13490 = vst [vmem:[#allocation140_spill] sm:$0xff] %v8970_v18  ;;  %13491 = vst [vmem:[#allocation141_spill] sm:$0xff] %v8973_v34  ;;  %v8985_v14 = vld [vmem:[%s8583_s1 + $0x1b4] sm:$0xf]  ;;  %v8988_v24 = vld [vmem:[%s8583_s1 + $0x1b8] sm:$0xf] }
  0x8d   : > { %13492 = vst [vmem:[#allocation142_spill] sm:$0xff] %v8976_v50  ;;  %13493 = vst [vmem:[#allocation143_spill] sm:$0xff] %v8979_v51  ;;  %v8991_v18 = vld [vmem:[%s8583_s1 + $0x1bc] sm:$0xf]  ;;  %v8994_v34 = vld [vmem:[%s8583_s1 + $0x1c0] sm:$0xf] }
  0x8e   : > { %13494 = vst [vmem:[#allocation144_spill] sm:$0xff] %v8982_v13  ;;  %13495 = vst [vmem:[#allocation145_spill] sm:$0xff] %v8985_v14  ;;  %v8997_v50 = vld [vmem:[%s8583_s1 + $0x1c4] sm:$0xf]  ;;  %v9000_v51 = vld [vmem:[%s8583_s1 + $0x1c8] sm:$0xf] }
  0x8f   : > { %13496 = vst [vmem:[#allocation146_spill] sm:$0xff] %v8988_v24  ;;  %13497 = vst [vmem:[#allocation147_spill] sm:$0xff] %v8991_v18  ;;  %v9003_v13 = vld [vmem:[%s8583_s1 + $0x1cc] sm:$0xf]  ;;  %v9006_v14 = vld [vmem:[%s8583_s1 + $0x1d0] sm:$0xf] }
  0x90   : > { %13498 = vst [vmem:[#allocation148_spill] sm:$0xff] %v8994_v34  ;;  %13499 = vst [vmem:[#allocation149_spill] sm:$0xff] %v8997_v50  ;;  %v9009_v24 = vld [vmem:[%s8583_s1 + $0x1d4] sm:$0xf]  ;;  %v9012_v18 = vld [vmem:[%s8583_s1 + $0x1d8] sm:$0xf] }
  0x91   : > { %13500 = vst [vmem:[#allocation150_spill] sm:$0xff] %v9000_v51  ;;  %13501 = vst [vmem:[#allocation151_spill] sm:$0xff] %v9003_v13  ;;  %v9015_v34 = vld [vmem:[%s8583_s1 + $0x1dc] sm:$0xf]  ;;  %v9018_v50 = vld [vmem:[%s8583_s1 + $0x1e0] sm:$0xf] }
  0x92   : > { %13502 = vst [vmem:[#allocation152_spill] sm:$0xff] %v9006_v14  ;;  %13503 = vst [vmem:[#allocation153_spill] sm:$0xff] %v9009_v24  ;;  %v9021_v51 = vld [vmem:[%s8583_s1 + $0x1e4] sm:$0xf]  ;;  %v9024_v13 = vld [vmem:[%s8583_s1 + $0x1e8] sm:$0xf] }
  0x93   : > { %13504 = vst [vmem:[#allocation154_spill] sm:$0xff] %v9012_v18  ;;  %13505 = vst [vmem:[#allocation155_spill] sm:$0xff] %v9015_v34  ;;  %v9027_v14 = vld [vmem:[%s8583_s1 + $0x1ec] sm:$0xf]  ;;  %v9030_v24 = vld [vmem:[%s8583_s1 + $0x1f0] sm:$0xf] }
  0x94   : > { %13506 = vst [vmem:[#allocation156_spill] sm:$0xff] %v9018_v50  ;;  %13507 = vst [vmem:[#allocation157_spill] sm:$0xff] %v9021_v51  ;;  %v9033_v18 = vld [vmem:[%s8583_s1 + $0x1f4] sm:$0xf]  ;;  %v9036_v34 = vld [vmem:[%s8583_s1 + $0x1f8] sm:$0xf] }
  0x95   : > { %13508 = vst [vmem:[#allocation158_spill] sm:$0xff] %v9024_v13  ;;  %13509 = vst [vmem:[#allocation159_spill] sm:$0xff] %v9027_v14  ;;  %v9039_v50 = vld [vmem:[%s8583_s1 + $0x1fc] sm:$0xf]  ;;  %v9042_v51 = vld [vmem:[%s8583_s1 + $0x200] sm:$0xf] }
  0x96   : > { %13510 = vst [vmem:[#allocation160_spill] sm:$0xff] %v9030_v24  ;;  %13511 = vst [vmem:[#allocation161_spill] sm:$0xff] %v9033_v18  ;;  %v9045_v13 = vld [vmem:[%s8583_s1 + $0x204] sm:$0xf]  ;;  %v9048_v14 = vld [vmem:[%s8583_s1 + $0x208] sm:$0xf] }
  0x97   : > { %13512 = vst [vmem:[#allocation162_spill] sm:$0xff] %v9036_v34  ;;  %13513 = vst [vmem:[#allocation163_spill] sm:$0xff] %v9039_v50  ;;  %v9051_v24 = vld [vmem:[%s8583_s1 + $0x20c] sm:$0xf]  ;;  %v9054_v18 = vld [vmem:[%s8583_s1 + $0x210] sm:$0xf] }
  0x98   : > { %13514 = vst [vmem:[#allocation164_spill] sm:$0xff] %v9042_v51  ;;  %13515 = vst [vmem:[#allocation165_spill] sm:$0xff] %v9045_v13  ;;  %v9057_v34 = vld [vmem:[%s8583_s1 + $0x214] sm:$0xf]  ;;  %v9060_v50 = vld [vmem:[%s8583_s1 + $0x218] sm:$0xf] }
  0x99   : > { %13516 = vst [vmem:[#allocation166_spill] sm:$0xff] %v9048_v14  ;;  %13517 = vst [vmem:[#allocation167_spill] sm:$0xff] %v9051_v24  ;;  %v9063_v51 = vld [vmem:[%s8583_s1 + $0x21c] sm:$0xf]  ;;  %v9066_v13 = vld [vmem:[%s8583_s1 + $0x220] sm:$0xf] }
  0x9a   : > { %13518 = vst [vmem:[#allocation168_spill] sm:$0xff] %v9054_v18  ;;  %13519 = vst [vmem:[#allocation169_spill] sm:$0xff] %v9057_v34  ;;  %v9069_v14 = vld [vmem:[%s8583_s1 + $0x224] sm:$0xf]  ;;  %v9072_v24 = vld [vmem:[%s8583_s1 + $0x228] sm:$0xf] }
  0x9b   : > { %13520 = vst [vmem:[#allocation170_spill] sm:$0xff] %v9060_v50  ;;  %13521 = vst [vmem:[#allocation171_spill] sm:$0xff] %v9063_v51  ;;  %v9075_v18 = vld [vmem:[%s8583_s1 + $0x22c] sm:$0xf]  ;;  %v9078_v34 = vld [vmem:[%s8583_s1 + $0x230] sm:$0xf] }
  0x9c   : > { %13522 = vst [vmem:[#allocation172_spill] sm:$0xff] %v9066_v13  ;;  %13523 = vst [vmem:[#allocation173_spill] sm:$0xff] %v9069_v14  ;;  %v9081_v50 = vld [vmem:[%s8583_s1 + $0x234] sm:$0xf]  ;;  %v9084_v51 = vld [vmem:[%s8583_s1 + $0x238] sm:$0xf] }
  0x9d   : > { %13524 = vst [vmem:[#allocation174_spill] sm:$0xff] %v9072_v24  ;;  %13525 = vst [vmem:[#allocation175_spill] sm:$0xff] %v9075_v18  ;;  %v9087_v13 = vld [vmem:[%s8583_s1 + $0x23c] sm:$0xf]  ;;  %v9090_v14 = vld [vmem:[%s8583_s1 + $0x240] sm:$0xf] }
  0x9e   : > { %13526 = vst [vmem:[#allocation176_spill] sm:$0xff] %v9078_v34  ;;  %13527 = vst [vmem:[#allocation177_spill] sm:$0xff] %v9081_v50  ;;  %v9093_v24 = vld [vmem:[%s8583_s1 + $0x244] sm:$0xf]  ;;  %v9096_v18 = vld [vmem:[%s8583_s1 + $0x248] sm:$0xf] }
  0x9f   : > { %13528 = vst [vmem:[#allocation178_spill] sm:$0xff] %v9084_v51  ;;  %13529 = vst [vmem:[#allocation179_spill] sm:$0xff] %v9087_v13  ;;  %v9099_v34 = vld [vmem:[%s8583_s1 + $0x24c] sm:$0xf]  ;;  %v9102_v50 = vld [vmem:[%s8583_s1 + $0x250] sm:$0xf] }
  0xa0   : > { %13530 = vst [vmem:[#allocation180_spill] sm:$0xff] %v9090_v14  ;;  %13531 = vst [vmem:[#allocation181_spill] sm:$0xff] %v9093_v24  ;;  %v9105_v51 = vld [vmem:[%s8583_s1 + $0x254] sm:$0xf]  ;;  %v9108_v13 = vld [vmem:[%s8583_s1 + $0x258] sm:$0xf] }
  0xa1   : > { %13532 = vst [vmem:[#allocation182_spill] sm:$0xff] %v9096_v18  ;;  %13533 = vst [vmem:[#allocation183_spill] sm:$0xff] %v9099_v34  ;;  %v9111_v14 = vld [vmem:[%s8583_s1 + $0x25c] sm:$0xf]  ;;  %v9114_v24 = vld [vmem:[%s8583_s1 + $0x260] sm:$0xf] }
  0xa2   : > { %13534 = vst [vmem:[#allocation184_spill] sm:$0xff] %v9102_v50  ;;  %13535 = vst [vmem:[#allocation185_spill] sm:$0xff] %v9105_v51  ;;  %v9117_v18 = vld [vmem:[%s8583_s1 + $0x264] sm:$0xf]  ;;  %v9120_v34 = vld [vmem:[%s8583_s1 + $0x268] sm:$0xf] }
  0xa3   : > { %13536 = vst [vmem:[#allocation186_spill] sm:$0xff] %v9108_v13  ;;  %13537 = vst [vmem:[#allocation187_spill] sm:$0xff] %v9111_v14  ;;  %v9123_v50 = vld [vmem:[%s8583_s1 + $0x26c] sm:$0xf]  ;;  %v9126_v51 = vld [vmem:[%s8583_s1 + $0x270] sm:$0xf] }
  0xa4   : > { %13538 = vst [vmem:[#allocation188_spill] sm:$0xff] %v9114_v24  ;;  %13539 = vst [vmem:[#allocation189_spill] sm:$0xff] %v9117_v18  ;;  %v9129_v13 = vld [vmem:[%s8583_s1 + $0x274] sm:$0xf]  ;;  %v9132_v14 = vld [vmem:[%s8583_s1 + $0x278] sm:$0xf] }
  0xa5   : > { %13540 = vst [vmem:[#allocation190_spill] sm:$0xff] %v9120_v34  ;;  %13541 = vst [vmem:[#allocation191_spill] sm:$0xff] %v9123_v50  ;;  %v9135_v24 = vld [vmem:[%s8583_s1 + $0x27c] sm:$0xf]  ;;  %v9138_v18 = vld [vmem:[%s8583_s1 + $0x280] sm:$0xf] }
  0xa6   : > { %13542 = vst [vmem:[#allocation192_spill] sm:$0xff] %v9126_v51  ;;  %13543 = vst [vmem:[#allocation193_spill] sm:$0xff] %v9129_v13  ;;  %v9141_v34 = vld [vmem:[%s8583_s1 + $0x284] sm:$0xf]  ;;  %v9144_v50 = vld [vmem:[%s8583_s1 + $0x288] sm:$0xf] }
  0xa7   : > { %13544 = vst [vmem:[#allocation194_spill] sm:$0xff] %v9132_v14  ;;  %13545 = vst [vmem:[#allocation195_spill] sm:$0xff] %v9135_v24  ;;  %v9147_v51 = vld [vmem:[%s8583_s1 + $0x28c] sm:$0xf]  ;;  %v9150_v13 = vld [vmem:[%s8583_s1 + $0x290] sm:$0xf] }
  0xa8   : > { %13546 = vst [vmem:[#allocation196_spill] sm:$0xff] %v9138_v18  ;;  %13547 = vst [vmem:[#allocation197_spill] sm:$0xff] %v9141_v34  ;;  %v9153_v14 = vld [vmem:[%s8583_s1 + $0x294] sm:$0xf]  ;;  %v9156_v24 = vld [vmem:[%s8583_s1 + $0x298] sm:$0xf] }
  0xa9   : > { %13548 = vst [vmem:[#allocation198_spill] sm:$0xff] %v9144_v50  ;;  %13549 = vst [vmem:[#allocation199_spill] sm:$0xff] %v9147_v51  ;;  %v9159_v18 = vld [vmem:[%s8583_s1 + $0x29c] sm:$0xf]  ;;  %v9162_v34 = vld [vmem:[%s8583_s1 + $0x2a0] sm:$0xf] }
  0xaa   : > { %13550 = vst [vmem:[#allocation200_spill] sm:$0xff] %v9150_v13  ;;  %13551 = vst [vmem:[#allocation201_spill] sm:$0xff] %v9153_v14  ;;  %v9165_v50 = vld [vmem:[%s8583_s1 + $0x2a4] sm:$0xf]  ;;  %v9168_v51 = vld [vmem:[%s8583_s1 + $0x2a8] sm:$0xf] }
  0xab   : > { %13552 = vst [vmem:[#allocation202_spill] sm:$0xff] %v9156_v24  ;;  %13553 = vst [vmem:[#allocation203_spill] sm:$0xff] %v9159_v18  ;;  %v9171_v13 = vld [vmem:[%s8583_s1 + $0x2ac] sm:$0xf]  ;;  %v9174_v14 = vld [vmem:[%s8583_s1 + $0x2b0] sm:$0xf] }
  0xac   : > { %13554 = vst [vmem:[#allocation204_spill] sm:$0xff] %v9162_v34  ;;  %13555 = vst [vmem:[#allocation205_spill] sm:$0xff] %v9165_v50  ;;  %v9177_v24 = vld [vmem:[%s8583_s1 + $0x2b4] sm:$0xf]  ;;  %v9180_v18 = vld [vmem:[%s8583_s1 + $0x2b8] sm:$0xf] }
  0xad   : > { %13556 = vst [vmem:[#allocation206_spill] sm:$0xff] %v9168_v51  ;;  %13557 = vst [vmem:[#allocation207_spill] sm:$0xff] %v9171_v13  ;;  %v9183_v34 = vld [vmem:[%s8583_s1 + $0x2bc] sm:$0xf]  ;;  %v9186_v50 = vld [vmem:[%s8583_s1 + $0x2c0] sm:$0xf] }
  0xae   : > { %13558 = vst [vmem:[#allocation208_spill] sm:$0xff] %v9174_v14  ;;  %13559 = vst [vmem:[#allocation209_spill] sm:$0xff] %v9177_v24  ;;  %v9189_v51 = vld [vmem:[%s8583_s1 + $0x2c4] sm:$0xf]  ;;  %v9192_v13 = vld [vmem:[%s8583_s1 + $0x2c8] sm:$0xf] }
  0xaf   : > { %13560 = vst [vmem:[#allocation210_spill] sm:$0xff] %v9180_v18  ;;  %13561 = vst [vmem:[#allocation211_spill] sm:$0xff] %v9183_v34  ;;  %v9195_v14 = vld [vmem:[%s8583_s1 + $0x2cc] sm:$0xf]  ;;  %v9198_v24 = vld [vmem:[%s8583_s1 + $0x2d0] sm:$0xf] }
  0xb0   : > { %13562 = vst [vmem:[#allocation212_spill] sm:$0xff] %v9186_v50  ;;  %13563 = vst [vmem:[#allocation213_spill] sm:$0xff] %v9189_v51  ;;  %v9201_v18 = vld [vmem:[%s8583_s1 + $0x2d4] sm:$0xf]  ;;  %v9204_v34 = vld [vmem:[%s8583_s1 + $0x2d8] sm:$0xf] }
  0xb1   : > { %13564 = vst [vmem:[#allocation214_spill] sm:$0xff] %v9192_v13  ;;  %13565 = vst [vmem:[#allocation215_spill] sm:$0xff] %v9195_v14  ;;  %v9207_v50 = vld [vmem:[%s8583_s1 + $0x2dc] sm:$0xf]  ;;  %v9210_v51 = vld [vmem:[%s8583_s1 + $0x2e0] sm:$0xf] }
  0xb2   : > { %13566 = vst [vmem:[#allocation216_spill] sm:$0xff] %v9198_v24  ;;  %13567 = vst [vmem:[#allocation217_spill] sm:$0xff] %v9201_v18  ;;  %v9213_v13 = vld [vmem:[%s8583_s1 + $0x2e4] sm:$0xf]  ;;  %v9216_v14 = vld [vmem:[%s8583_s1 + $0x2e8] sm:$0xf] }
  0xb3   : > { %13568 = vst [vmem:[#allocation218_spill] sm:$0xff] %v9204_v34  ;;  %13569 = vst [vmem:[#allocation219_spill] sm:$0xff] %v9207_v50  ;;  %v9219_v24 = vld [vmem:[%s8583_s1 + $0x2ec] sm:$0xf]  ;;  %v9222_v18 = vld [vmem:[%s8583_s1 + $0x2f0] sm:$0xf] }
  0xb4   : > { %13570 = vst [vmem:[#allocation220_spill] sm:$0xff] %v9210_v51  ;;  %13571 = vst [vmem:[#allocation221_spill] sm:$0xff] %v9213_v13  ;;  %v9225_v34 = vld [vmem:[%s8583_s1 + $0x2f4] sm:$0xf]  ;;  %v9228_v50 = vld [vmem:[%s8583_s1 + $0x2f8] sm:$0xf] }
  0xb5   : > { %13572 = vst [vmem:[#allocation222_spill] sm:$0xff] %v9216_v14  ;;  %13573 = vst [vmem:[#allocation223_spill] sm:$0xff] %v9219_v24  ;;  %v9231_v51 = vld [vmem:[%s8583_s1 + $0x2fc] sm:$0xf]  ;;  %v9234_v13 = vld [vmem:[%s8583_s1 + $0x300] sm:$0xf] }
  0xb6   : > { %13574 = vst [vmem:[#allocation224_spill] sm:$0xff] %v9222_v18  ;;  %13575 = vst [vmem:[#allocation225_spill] sm:$0xff] %v9225_v34  ;;  %v9237_v14 = vld [vmem:[%s8583_s1 + $0x304] sm:$0xf]  ;;  %v9240_v24 = vld [vmem:[%s8583_s1 + $0x308] sm:$0xf] }
  0xb7   : > { %13576 = vst [vmem:[#allocation226_spill] sm:$0xff] %v9228_v50  ;;  %13577 = vst [vmem:[#allocation227_spill] sm:$0xff] %v9231_v51  ;;  %v9243_v18 = vld [vmem:[%s8583_s1 + $0x30c] sm:$0xf]  ;;  %v9246_v34 = vld [vmem:[%s8583_s1 + $0x310] sm:$0xf] }
  0xb8   : > { %13578 = vst [vmem:[#allocation228_spill] sm:$0xff] %v9234_v13  ;;  %13579 = vst [vmem:[#allocation229_spill] sm:$0xff] %v9237_v14  ;;  %v9249_v50 = vld [vmem:[%s8583_s1 + $0x314] sm:$0xf]  ;;  %v9252_v51 = vld [vmem:[%s8583_s1 + $0x318] sm:$0xf] }
  0xb9   : > { %13580 = vst [vmem:[#allocation230_spill] sm:$0xff] %v9240_v24  ;;  %13581 = vst [vmem:[#allocation231_spill] sm:$0xff] %v9243_v18  ;;  %v9255_v13 = vld [vmem:[%s8583_s1 + $0x31c] sm:$0xf]  ;;  %v9258_v14 = vld [vmem:[%s8583_s1 + $0x320] sm:$0xf] }
  0xba   : > { %13582 = vst [vmem:[#allocation232_spill] sm:$0xff] %v9246_v34  ;;  %13583 = vst [vmem:[#allocation233_spill] sm:$0xff] %v9249_v50  ;;  %v9261_v24 = vld [vmem:[%s8583_s1 + $0x324] sm:$0xf]  ;;  %v9264_v18 = vld [vmem:[%s8583_s1 + $0x328] sm:$0xf] }
  0xbb   : > { %13584 = vst [vmem:[#allocation234_spill] sm:$0xff] %v9252_v51  ;;  %13585 = vst [vmem:[#allocation235_spill] sm:$0xff] %v9255_v13  ;;  %v9267_v34 = vld [vmem:[%s8583_s1 + $0x32c] sm:$0xf]  ;;  %v9270_v50 = vld [vmem:[%s8583_s1 + $0x330] sm:$0xf] }
  0xbc   : > { %13586 = vst [vmem:[#allocation236_spill] sm:$0xff] %v9258_v14  ;;  %13587 = vst [vmem:[#allocation237_spill] sm:$0xff] %v9261_v24  ;;  %v9273_v51 = vld [vmem:[%s8583_s1 + $0x334] sm:$0xf]  ;;  %v9276_v13 = vld [vmem:[%s8583_s1 + $0x338] sm:$0xf] }
  0xbd   : > { %13588 = vst [vmem:[#allocation238_spill] sm:$0xff] %v9264_v18  ;;  %13589 = vst [vmem:[#allocation239_spill] sm:$0xff] %v9267_v34  ;;  %v9279_v14 = vld [vmem:[%s8583_s1 + $0x33c] sm:$0xf]  ;;  %v9282_v24 = vld [vmem:[%s8583_s1 + $0x340] sm:$0xf] }
  0xbe   : > { %13590 = vst [vmem:[#allocation240_spill] sm:$0xff] %v9270_v50  ;;  %13591 = vst [vmem:[#allocation241_spill] sm:$0xff] %v9273_v51  ;;  %v9285_v18 = vld [vmem:[%s8583_s1 + $0x344] sm:$0xf]  ;;  %v9288_v34 = vld [vmem:[%s8583_s1 + $0x348] sm:$0xf] }
  0xbf   : > { %13592 = vst [vmem:[#allocation242_spill] sm:$0xff] %v9276_v13  ;;  %13593 = vst [vmem:[#allocation243_spill] sm:$0xff] %v9279_v14  ;;  %v9291_v50 = vld [vmem:[%s8583_s1 + $0x34c] sm:$0xf]  ;;  %v9294_v51 = vld [vmem:[%s8583_s1 + $0x350] sm:$0xf] }
  0xc0   : > { %13594 = vst [vmem:[#allocation244_spill] sm:$0xff] %v9282_v24  ;;  %13595 = vst [vmem:[#allocation245_spill] sm:$0xff] %v9285_v18  ;;  %v9297_v13 = vld [vmem:[%s8583_s1 + $0x354] sm:$0xf]  ;;  %v9300_v14 = vld [vmem:[%s8583_s1 + $0x358] sm:$0xf] }
  0xc1   : > { %13596 = vst [vmem:[#allocation246_spill] sm:$0xff] %v9288_v34  ;;  %13597 = vst [vmem:[#allocation247_spill] sm:$0xff] %v9291_v50  ;;  %v9303_v24 = vld [vmem:[%s8583_s1 + $0x35c] sm:$0xf]  ;;  %v9306_v18 = vld [vmem:[%s8583_s1 + $0x360] sm:$0xf] }
  0xc2   : > { %13598 = vst [vmem:[#allocation248_spill] sm:$0xff] %v9294_v51  ;;  %13599 = vst [vmem:[#allocation249_spill] sm:$0xff] %v9297_v13  ;;  %v9309_v34 = vld [vmem:[%s8583_s1 + $0x364] sm:$0xf]  ;;  %v9312_v50 = vld [vmem:[%s8583_s1 + $0x368] sm:$0xf] }
  0xc3   : > { %13600 = vst [vmem:[#allocation250_spill] sm:$0xff] %v9300_v14  ;;  %13601 = vst [vmem:[#allocation251_spill] sm:$0xff] %v9303_v24  ;;  %v9315_v51 = vld [vmem:[%s8583_s1 + $0x36c] sm:$0xf]  ;;  %v9318_v13 = vld [vmem:[%s8583_s1 + $0x370] sm:$0xf] }
  0xc4   : > { %13602 = vst [vmem:[#allocation252_spill] sm:$0xff] %v9306_v18  ;;  %13603 = vst [vmem:[#allocation253_spill] sm:$0xff] %v9309_v34  ;;  %v9321_v14 = vld [vmem:[%s8583_s1 + $0x374] sm:$0xf]  ;;  %v9324_v24 = vld [vmem:[%s8583_s1 + $0x378] sm:$0xf] }
  0xc5   : > { %13604 = vst [vmem:[#allocation254_spill] sm:$0xff] %v9312_v50  ;;  %13605 = vst [vmem:[#allocation255_spill] sm:$0xff] %v9315_v51  ;;  %v9327_v18 = vld [vmem:[%s8583_s1 + $0x37c] sm:$0xf]  ;;  %v9330_v34 = vld [vmem:[%s8583_s1 + $0x380] sm:$0xf] }
  0xc6   : > { %13606 = vst [vmem:[#allocation256_spill] sm:$0xff] %v9318_v13  ;;  %13607 = vst [vmem:[#allocation257_spill] sm:$0xff] %v9321_v14  ;;  %v9333_v50 = vld [vmem:[%s8583_s1 + $0x384] sm:$0xf]  ;;  %v9336_v51 = vld [vmem:[%s8583_s1 + $0x388] sm:$0xf] }
  0xc7   : > { %13608 = vst [vmem:[#allocation258_spill] sm:$0xff] %v9324_v24  ;;  %13609 = vst [vmem:[#allocation259_spill] sm:$0xff] %v9327_v18  ;;  %v9339_v13 = vld [vmem:[%s8583_s1 + $0x38c] sm:$0xf]  ;;  %v9342_v14 = vld [vmem:[%s8583_s1 + $0x390] sm:$0xf] }
  0xc8   : > { %13610 = vst [vmem:[#allocation260_spill] sm:$0xff] %v9330_v34  ;;  %13611 = vst [vmem:[#allocation261_spill] sm:$0xff] %v9333_v50  ;;  %v9345_v24 = vld [vmem:[%s8583_s1 + $0x394] sm:$0xf]  ;;  %v9348_v18 = vld [vmem:[%s8583_s1 + $0x398] sm:$0xf] }
  0xc9   : > { %13612 = vst [vmem:[#allocation262_spill] sm:$0xff] %v9336_v51  ;;  %13613 = vst [vmem:[#allocation263_spill] sm:$0xff] %v9339_v13  ;;  %v9351_v34 = vld [vmem:[%s8583_s1 + $0x39c] sm:$0xf]  ;;  %v9354_v50 = vld [vmem:[%s8583_s1 + $0x3a0] sm:$0xf] }
  0xca   : > { %13614 = vst [vmem:[#allocation264_spill] sm:$0xff] %v9342_v14  ;;  %13615 = vst [vmem:[#allocation265_spill] sm:$0xff] %v9345_v24  ;;  %v9357_v51 = vld [vmem:[%s8583_s1 + $0x3a4] sm:$0xf]  ;;  %v9360_v13 = vld [vmem:[%s8583_s1 + $0x3a8] sm:$0xf] }
  0xcb   : > { %13616 = vst [vmem:[#allocation266_spill] sm:$0xff] %v9348_v18  ;;  %13617 = vst [vmem:[#allocation267_spill] sm:$0xff] %v9351_v34  ;;  %v9363_v14 = vld [vmem:[%s8583_s1 + $0x3ac] sm:$0xf]  ;;  %v9366_v24 = vld [vmem:[%s8583_s1 + $0x3b0] sm:$0xf] }
  0xcc   : > { %13618 = vst [vmem:[#allocation268_spill] sm:$0xff] %v9354_v50  ;;  %13619 = vst [vmem:[#allocation269_spill] sm:$0xff] %v9357_v51  ;;  %v9369_v18 = vld [vmem:[%s8583_s1 + $0x3b4] sm:$0xf]  ;;  %v9372_v34 = vld [vmem:[%s8583_s1 + $0x3b8] sm:$0xf] }
  0xcd   : > { %13620 = vst [vmem:[#allocation270_spill] sm:$0xff] %v9360_v13  ;;  %13621 = vst [vmem:[#allocation271_spill] sm:$0xff] %v9363_v14  ;;  %v9375_v50 = vld [vmem:[%s8583_s1 + $0x3bc] sm:$0xf]  ;;  %v9378_v51 = vld [vmem:[%s8583_s1 + $0x3c0] sm:$0xf] }
  0xce   : > { %13622 = vst [vmem:[#allocation272_spill] sm:$0xff] %v9366_v24  ;;  %13623 = vst [vmem:[#allocation273_spill] sm:$0xff] %v9369_v18  ;;  %v9381_v13 = vld [vmem:[%s8583_s1 + $0x3c4] sm:$0xf]  ;;  %v9384_v35 = vld [vmem:[%s8583_s1 + $0x3c8] sm:$0xf] }
  0xcf   : > { %13624 = vst [vmem:[#allocation274_spill] sm:$0xff] %v9372_v34  ;;  %13625 = vst [vmem:[#allocation275_spill] sm:$0xff] %v9375_v50  ;;  %v9387_v14 = vld [vmem:[%s8583_s1 + $0x3cc] sm:$0xf]  ;;  %v9390_v24 = vld [vmem:[%s8583_s1 + $0x3d0] sm:$0xf] }
  0xd0   : > { %13626 = vst [vmem:[#allocation276_spill] sm:$0xff] %v9378_v51  ;;  %13627 = vst [vmem:[#allocation277_spill] sm:$0xff] %v9381_v13  ;;  %v9393_v52 = vld [vmem:[%s8583_s1 + $0x3d4] sm:$0xf]  ;;  %v9396_v18 = vld [vmem:[%s8583_s1 + $0x3d8] sm:$0xf] }
  0xd1   : > { %13628 = vst [vmem:[#allocation278_spill] sm:$0xff] %v9384_v35  ;;  %13629 = vst [vmem:[#allocation279_spill] sm:$0xff] %v9387_v14  ;;  %v9399_v34 = vld [vmem:[%s8583_s1 + $0x3dc] sm:$0xf]  ;;  %v9402_v53 = vld [vmem:[%s8583_s1 + $0x3e0] sm:$0xf] }
  0xd2   : > { %13630 = vst [vmem:[#allocation280_spill] sm:$0xff] %v9390_v24  ;;  %13631 = vst [vmem:[#allocation281_spill] sm:$0xff] %v9393_v52  ;;  %v9405_v50 = vld [vmem:[%s8583_s1 + $0x3e4] sm:$0xf]  ;;  %v9408_v51 = vld [vmem:[%s8583_s1 + $0x3e8] sm:$0xf] }
  0xd3   : > { %13632 = vst [vmem:[#allocation282_spill] sm:$0xff] %v9396_v18  ;;  %13633 = vst [vmem:[#allocation283_spill] sm:$0xff] %v9399_v34  ;;  %v9411_v16 = vld [vmem:[%s8583_s1 + $0x3ec] sm:$0xf]  ;;  %v9414_v13 = vld [vmem:[%s8583_s1 + $0x3f0] sm:$0xf] }
  0xd4   : > { %13634 = vst [vmem:[#allocation284_spill] sm:$0xff] %v9402_v53  ;;  %13635 = vst [vmem:[#allocation285_spill] sm:$0xff] %v9405_v50  ;;  %v9417_v35 = vld [vmem:[%s8583_s1 + $0x3f4] sm:$0xf]  ;;  %v9420_v14 = vld [vmem:[%s8583_s1 + $0x3f8] sm:$0xf] }
  0xd5   : > { %13636 = vst [vmem:[#allocation286_spill] sm:$0xff] %v9408_v51  ;;  %13637 = vst [vmem:[#allocation287_spill] sm:$0xff] %v9411_v16  ;;  %v9423_v24 = vld [vmem:[%s8583_s1 + $0x3fc] sm:$0xf]  ;;  %s9426_s28 = scalar_lea.vmem [#allocation14], %s8549_s22  ;;  %727 = sbr.rel (%p6336_p9) target bundleno = 1866 (0x74a), region = 60 }
  0xd6   : > { %13638 = vst [vmem:[#allocation288_spill] sm:$0xff] %v9414_v13  ;;  %13639 = vst [vmem:[#allocation289_spill] sm:$0xff] %v9417_v35 }
  0xd7   : > { %13640 = vst [vmem:[#allocation290_spill] sm:$0xff] %v9420_v14  ;;  %13641 = vst [vmem:[#allocation291_spill] sm:$0xff] %v9423_v24 }
  0xda   : > { %v9431_v52 = vcombine.low %v8748_v48, %v8751_v49  ;;  %vm13266_vm15 = vcmask 261120   ;;  %v9435_v18 = vcombine.low %v8844_v31, %v8847_v1  ;;  %v9439_v34 = vcombine.low %v8663_v32, %v8666_v33  ;;  %s13642_s5 = sld [smem:[#allocation489_spill]]  ;;  %v13693_v32 = vld [vmem:[#allocation157_spill] sm:$0xff]  ;;  %p6473_p10 = scmp.ne.s32.totalorder %s8599_s2, 1 }
  0xdb   : > { %v9448_v50 = vcombine.low %v8796_v0, %v8799_v30  ;;  %v9452_v48 = vcombine.low %v8742_v46, %v8745_v47  ;;  %v9456_v31 = vcombine.low %v8838_v3, %v8841_v2  ;;  %v9474_v3 = vcombine.low %v8652_v28, %v8655_v29  ;;  %s13643_s6 = sld [smem:[#allocation490_spill]] }
  0xdc   : > { %7966 = vmatprep.subr.msk.bf16.mxu0 %vm13266_vm15, %v9431_v52  ;;  %7974 = vmatprep.subr.msk.bf16.mxu1 %vm13266_vm15, %v9435_v18  ;;  %v1401_v0 = vsel %vm13266_vm15, %v9439_v34, 0  ;;  %v9492_v28 = vcombine.low %v8832_v5, %v8835_v4  ;;  %v13682_v4 = vld [vmem:[#allocation158_spill] sm:$0xff] }
  0xdd   : > { %6807 = vmatpush3.bf16.xpose.msra.mxu0 %v1401_v0  ;;  %v1449_v46 = vsel %vm13266_vm15, %v9448_v50, 0  ;;  %v9480_v0 = vcombine.low %v8790_v62, %v8793_v63  ;;  %v1398_v2 = vsel %vm13266_vm15, %v9474_v3, 0  ;;  %v9498_v62 = vcombine.low %v8646_v26, %v8649_v27  ;;  %v13681_v27 = vld [vmem:[#allocation159_spill] sm:$0xff] }
  0xde   : > { %6825 = vmatpush3.bf16.xpose.msra.mxu1 %v1449_v46  ;;  %7967 = vmatprep.subr.msk.bf16.mxu0 %vm13266_vm15, %v9452_v48  ;;  %v9486_v46 = vcombine.low %v8736_v44, %v8739_v45  ;;  %v9504_v44 = vcombine.low %v8784_v60, %v8787_v61  ;;  %v9516_v26 = vcombine.low %v8826_v7, %v8829_v6  ;;  %v13679_v61 = vld [vmem:[#allocation126_spill] sm:$0xff] }
  0xdf   : > { %7975 = vmatprep.subr.msk.bf16.mxu1 %vm13266_vm15, %v9456_v31  ;;  %v1446_v47 = vsel %vm13266_vm15, %v9480_v0, 0  ;;  %v1395_v5 = vsel %vm13266_vm15, %v9498_v62, 0  ;;  %v9522_v60 = vcombine.low %v8637_v23, %v8643_v25  ;;  %v9543_v25 = vcombine.low %v8820_v9, %v8823_v8  ;;  %v13657_v8 = vld [vmem:[#allocation163_spill] sm:$0xff]  ;;  %v13685_v45 = vld [vmem:[#allocation110_spill] sm:$0xff] }
  0xe0   : > { %v9444_v53 = vld [vmem:[%s13642_s5] sm:$0x1]  ;;  %v9556_v9 = vcombine.low %v8772_v56, %v8775_v57  ;;  %v9574_v56 = vcombine.low %v8623_v19, %v8626_v20  ;;  %v9592_v19 = vcombine.low %v8808_v15, %v8811_v12  ;;  %v13647_v12 = vld [vmem:[#allocation53_spill] sm:$0xff] }
  0xe1   : > { %6822 = vmatprep.mubr.msk.bf16.mxu0 %vm13266_vm15, %v9444_v53  ;;  %6840 = vmatprep.mubr.msk.bf16.mxu1 %vm13266_vm15, %v9444_v53  ;;  %v1392_v7 = vsel %vm13266_vm15, %v9522_v60, 0 }
  0xe5   : > { %6809 = vmatpush3.bf16.xpose.msra.mxu0 %v1398_v2  ;;  %v9510_v2 = vcombine.low %v8730_v42, %v8733_v43  ;;  %v9528_v42 = vcombine.low %v8778_v58, %v8781_v59  ;;  %v13130_v58 = vmov 0   ;;  %v13669_v43 = vld [vmem:[#allocation161_spill] sm:$0xff] }
  0xe6   : > { %6827 = vmatpush3.bf16.xpose.msra.mxu1 %v1446_v47  ;;  %7968 = vmatprep.subr.msk.bf16.mxu0 %vm13266_vm15, %v9486_v46  ;;  %v1443_v47 = vsel %vm13266_vm15, %v9504_v44, 0 }
  0xe7   : > { %7976 = vmatprep.subr.msk.bf16.mxu1 %vm13266_vm15, %v9492_v28  ;;  %v1440_v23 = vsel %vm13266_vm15, %v9528_v42, 0  ;;  %8180 = vset.pattern.permute.xlu0 %v13130_v58 }
  0xed   : > { %6811 = vmatpush3.bf16.xpose.msra.mxu0 %v1395_v5  ;;  %v9534_v5 = vcombine.low %v8711_v40, %v8714_v41  ;;  %v9550_v40 = vcombine.low %v8629_v21, %v8634_v22 }
  0xee   : > { %6829 = vmatpush3.bf16.xpose.msra.mxu1 %v1443_v47  ;;  %7969 = vmatprep.subr.msk.bf16.mxu0 %vm13266_vm15, %v9510_v2  ;;  %v729_v47 = vld [vmem:[%s13643_s6] sm:$0x3] }
  0xef   : > { %7977 = vmatprep.subr.msk.bf16.mxu1 %vm13266_vm15, %v9516_v26  ;;  %732 = vperm.xlu0 %8180, %v729_v47   ;;  %v1389_v58 = vsel %vm13266_vm15, %v9550_v40, 0  ;;  %v9568_v47 = vcombine.low %v8814_v11, %v8817_v10  ;;  %v1386_v11 = vsel %vm13266_vm15, %v9574_v56, 0 }
  0xf5   : > { %6813 = vmatpush3.bf16.xpose.msra.mxu0 %v1392_v7  ;;  %v9562_v7 = vcombine.low %v8697_v38, %v8700_v39  ;;  %v9580_v38 = vcombine.low %v8766_v54, %v8769_v55  ;;  %v13644_v54 = vld [vmem:[#allocation34_spill] sm:$0xff]  ;;  %v13649_v39 = vld [vmem:[#allocation85_spill] sm:$0xff] }
  0xf6   : > { %6831 = vmatpush3.bf16.xpose.msra.mxu1 %v1440_v23  ;;  %7970 = vmatprep.subr.msk.bf16.mxu0 %vm13266_vm15, %v9534_v5  ;;  %v1437_v23 = vsel %vm13266_vm15, %v9556_v9, 0  ;;  %v9598_v55 = vcombine.low %v13644_v54, %v8617_v17  ;;  %v13650_v54 = vld [vmem:[#allocation84_spill] sm:$0xff] }
  0xf7   : > { %7978 = vmatprep.subr.msk.bf16.mxu1 %vm13266_vm15, %v9543_v25  ;;  %v9616_v17 = vcombine.low %v13650_v54, %v13649_v39  ;;  %v13655_v54 = vld [vmem:[#allocation131_spill] sm:$0xff] }
  0xf8   : > { %v1383_v15 = vsel %vm13266_vm15, %v9598_v55, 0 }
  0xfd   : > { %6815 = vmatpush3.bf16.xpose.msra.mxu0 %v1389_v58  ;;  %v9586_v58 = vcombine.low %v8683_v36, %v8694_v37  ;;  %v13645_v36 = vld [vmem:[#allocation71_spill] sm:$0xff]  ;;  %v13646_v37 = vld [vmem:[#allocation70_spill] sm:$0xff] }
  0xfe   : > { %6833 = vmatpush3.bf16.xpose.msra.mxu1 %v1437_v23  ;;  %7971 = vmatprep.subr.msk.bf16.mxu0 %vm13266_vm15, %v9562_v7  ;;  %v1434_v23 = vsel %vm13266_vm15, %v9580_v38, 0  ;;  %v9604_v20 = vcombine.low %v13646_v37, %v13645_v36  ;;  %v13651_v36 = vld [vmem:[#allocation32_spill] sm:$0xff]  ;;  %v13652_v37 = vld [vmem:[#allocation31_spill] sm:$0xff] }
  0xff   : > { %7979 = vmatprep.subr.msk.bf16.mxu1 %vm13266_vm15, %v9568_v47  ;;  %v9622_v57 = vcombine.low %v13652_v37, %v13651_v36  ;;  %v13658_v36 = vld [vmem:[#allocation162_spill] sm:$0xff] }
 0x100   : > { %v1431_v10 = vsel %vm13266_vm15, %v9604_v20, 0  ;;  %v9640_v37 = vcombine.low %v13658_v36, %v13657_v8  ;;  %v13666_v36 = vld [vmem:[#allocation129_spill] sm:$0xff] }
 0x101   : > { %v1380_v39 = vsel %vm13266_vm15, %v9622_v57, 0 }
 0x102   : > { %13659 = vst [vmem:[#allocation292_spill] sm:$0xff] %v9640_v37 }
 0x105   : > { %6817 = vmatpush3.bf16.xpose.msra.mxu0 %v1386_v11  ;;  %v13648_v11 = vld [vmem:[#allocation52_spill] sm:$0xff] }
 0x106   : > { %6835 = vmatpush3.bf16.xpose.msra.mxu1 %v1434_v23  ;;  %7972 = vmatprep.subr.msk.bf16.mxu0 %vm13266_vm15, %v9586_v58  ;;  %v9610_v23 = vcombine.low %v13648_v11, %v13647_v12  ;;  %v13653_v12 = vld [vmem:[#allocation69_spill] sm:$0xff]  ;;  %v13654_v11 = vld [vmem:[#allocation68_spill] sm:$0xff] }
 0x107   : > { %7980 = vmatprep.subr.msk.bf16.mxu1 %vm13266_vm15, %v9592_v19  ;;  %v9628_v21 = vcombine.low %v13654_v11, %v13653_v12  ;;  %v13660_v12 = vld [vmem:[#allocation115_spill] sm:$0xff]  ;;  %v13661_v11 = vld [vmem:[#allocation114_spill] sm:$0xff] }
 0x108   : > { %v9646_v41 = vcombine.low %v13661_v11, %v13660_v12  ;;  %v13670_v12 = vld [vmem:[#allocation160_spill] sm:$0xff] }
 0x109   : > { %v1428_v22 = vsel %vm13266_vm15, %v9628_v21, 0  ;;  %v9664_v11 = vcombine.low %v13670_v12, %v13669_v43  ;;  %v13675_v43 = vld [vmem:[#allocation145_spill] sm:$0xff] }
 0x10a   : > { %13662 = vst [vmem:[#allocation293_spill] sm:$0xff] %v9646_v41  ;;  %v1497_v8 = vsel %vm13266_vm15, %v9646_v41, 0 }
 0x10b   : > { %13671 = vst [vmem:[#allocation296_spill] sm:$0xff] %v9664_v11 }
 0x10d   : > { %6819 = vmatpush3.bf16.xpose.msra.mxu0 %v1383_v15  ;;  %v13656_v15 = vld [vmem:[#allocation130_spill] sm:$0xff] }
 0x10e   : > { %6837 = vmatpush3.bf16.xpose.msra.mxu1 %v1431_v10  ;;  %7973 = vmatprep.subr.msk.bf16.mxu0 %vm13266_vm15, %v9610_v23  ;;  %v9634_v10 = vcombine.low %v13656_v15, %v13655_v54  ;;  %v13663_v54 = vld [vmem:[#allocation147_spill] sm:$0xff]  ;;  %v13664_v15 = vld [vmem:[#allocation146_spill] sm:$0xff] }
 0x10f   : > { %7981 = vmatprep.subr.msk.bf16.mxu1 %vm13266_vm15, %v9616_v17  ;;  %v9652_v59 = vcombine.low %v13664_v15, %v13663_v54  ;;  %v13672_v54 = vld [vmem:[#allocation113_spill] sm:$0xff]  ;;  %v13673_v15 = vld [vmem:[#allocation112_spill] sm:$0xff] }
 0x111   : > { %13665 = vst [vmem:[#allocation294_spill] sm:$0xff] %v9652_v59  ;;  %v1545_v6 = vsel %vm13266_vm15, %v9652_v59, 0 }
 0x115   : > { %6821 = vmatpush3.bf16.xpose.msra.mxu0 %v1380_v39  ;;  %v13667_v39 = vld [vmem:[#allocation128_spill] sm:$0xff] }
 0x116   : > { %6839 = vmatpush3.bf16.xpose.msra.mxu1 %v1428_v22  ;;  %7982 = vmatprep.subr.msk.bf16.mxu0 %vm13266_vm15, %v9634_v10  ;;  %v9658_v22 = vcombine.low %v13667_v39, %v13666_v36  ;;  %v9674_v36 = vcombine.low %v13673_v15, %v13672_v54  ;;  %v13676_v39 = vld [vmem:[#allocation144_spill] sm:$0xff] }
 0x117   : > { %7990 = vmatprep.subr.msk.bf16.mxu1 %vm13266_vm15, %v9640_v37  ;;  %v9680_v12 = vcombine.low %v13676_v39, %v13675_v43  ;;  %v9696_v43 = vcombine.low %v13682_v4, %v13681_v27  ;;  %v13684_v39 = vld [vmem:[#allocation111_spill] sm:$0xff]  ;;  %v13690_v27 = vld [vmem:[#allocation125_spill] sm:$0xff] }
 0x118   : > { %13668 = vst [vmem:[#allocation295_spill] sm:$0xff] %v9658_v22  ;;  %13674 = vst [vmem:[#allocation297_spill] sm:$0xff] %v9674_v36  ;;  %v9702_v63 = vcombine.low %v13685_v45, %v13684_v39  ;;  %v13694_v45 = vld [vmem:[#allocation156_spill] sm:$0xff] }
 0x119   : > { %13677 = vst [vmem:[#allocation298_spill] sm:$0xff] %v9680_v12  ;;  %v1542_v15 = vsel %vm13266_vm15, %v9680_v12, 0  ;;  %13683 = vst [vmem:[#allocation300_spill] sm:$0xff] %v9696_v43  ;;  %v9720_v39 = vcombine.low %v13694_v45, %v13693_v32  ;;  %v13702_v45 = vld [vmem:[#allocation123_spill] sm:$0xff] }
 0x11a   : > { %13686 = vst [vmem:[#allocation301_spill] sm:$0xff] %v9702_v63  ;;  %v1491_v4 = vsel %vm13266_vm15, %v9702_v63, 0 }
 0x11b   : > { %13695 = vst [vmem:[#allocation304_spill] sm:$0xff] %v9720_v39 }
 0x11c   : > { %6823 = vmatmul.mubr.msk.bf16.vlgmr.msra.gmra.mxu0 %vm13266_vm15, %v9444_v53 }
 0x11d   : > { %6841 = vmatmul.mubr.msk.bf16.vlgmr.msra.gmra.mxu1 %vm13266_vm15, %v9444_v53  ;;  %6843 = vmatpush3.bf16.xpose.msra.mxu0 %v1497_v8  ;;  %v13678_v8 = vld [vmem:[#allocation127_spill] sm:$0xff] }
 0x11e   : > { %6861 = vmatpush3.bf16.xpose.msra.mxu1 %v1545_v6  ;;  %7983 = vmatprep.subr.msk.bf16.mxu0 %vm13266_vm15, %v9658_v22  ;;  %v1494_v6 = vsel %vm13266_vm15, %v9674_v36, 0  ;;  %v9690_v54 = vcombine.low %v13679_v61, %v13678_v8  ;;  %v13687_v61 = vld [vmem:[#allocation143_spill] sm:$0xff]  ;;  %v13688_v8 = vld [vmem:[#allocation142_spill] sm:$0xff] }
 0x11f   : > { %7991 = vmatprep.subr.msk.bf16.mxu1 %vm13266_vm15, %v9664_v11  ;;  %6858 = vmatprep.mubr.msk.bf16.mxu0 %vm13266_vm15, %v9444_v53  ;;  %v9708_v29 = vcombine.low %v13688_v8, %v13687_v61  ;;  %v13696_v61 = vld [vmem:[#allocation109_spill] sm:$0xff]  ;;  %v13697_v8 = vld [vmem:[#allocation108_spill] sm:$0xff] }
 0x120   : > { %6876 = vmatprep.mubr.msk.bf16.mxu1 %vm13266_vm15, %v9444_v53  ;;  %13680 = vst [vmem:[#allocation299_spill] sm:$0xff] %v9690_v54  ;;  %v9726_v33 = vcombine.low %v13697_v8, %v13696_v61  ;;  %v13706_v61 = vld [vmem:[#allocation154_spill] sm:$0xff] }
 0x121   : > { %13689 = vst [vmem:[#allocation302_spill] sm:$0xff] %v9708_v29  ;;  %v1539_v30 = vsel %vm13266_vm15, %v9708_v29, 0 }
 0x122   : > { %13698 = vst [vmem:[#allocation305_spill] sm:$0xff] %v9726_v33  ;;  %v1488_v32 = vsel %vm13266_vm15, %v9726_v33, 0 }
 0x125   : > { %6845 = vmatpush3.bf16.xpose.msra.mxu0 %v1494_v6  ;;  %v13691_v6 = vld [vmem:[#allocation124_spill] sm:$0xff] }
 0x126   : > { %6863 = vmatpush3.bf16.xpose.msra.mxu1 %v1542_v15  ;;  %7984 = vmatprep.subr.msk.bf16.mxu0 %vm13266_vm15, %v9690_v54  ;;  %v9714_v15 = vcombine.low %v13691_v6, %v13690_v27  ;;  %v13699_v27 = vld [vmem:[#allocation141_spill] sm:$0xff]  ;;  %v13700_v6 = vld [vmem:[#allocation140_spill] sm:$0xff] }
 0x127   : > { %7992 = vmatprep.subr.msk.bf16.mxu1 %vm13266_vm15, %v9696_v43  ;;  %v9732_v1 = vcombine.low %v13700_v6, %v13699_v27  ;;  %v13708_v27 = vld [vmem:[#allocation107_spill] sm:$0xff]  ;;  %v13709_v6 = vld [vmem:[#allocation106_spill] sm:$0xff] }
 0x128   : > { %13692 = vst [vmem:[#allocation303_spill] sm:$0xff] %v9714_v15 }
 0x129   : > { %13701 = vst [vmem:[#allocation306_spill] sm:$0xff] %v9732_v1  ;;  %v1536_v49 = vsel %vm13266_vm15, %v9732_v1, 0  ;;  %v13717_v1 = vld [vmem:[#allocation153_spill] sm:$0xff] }
 0x12d   : > { %6847 = vmatpush3.bf16.xpose.msra.mxu0 %v1491_v4  ;;  %v13703_v4 = vld [vmem:[#allocation122_spill] sm:$0xff] }
 0x12e   : > { %6865 = vmatpush3.bf16.xpose.msra.mxu1 %v1539_v30  ;;  %7985 = vmatprep.subr.msk.bf16.mxu0 %vm13266_vm15, %v9714_v15  ;;  %v9738_v30 = vcombine.low %v13703_v4, %v13702_v45  ;;  %v13705_v15 = vld [vmem:[#allocation155_spill] sm:$0xff]  ;;  %v13712_v4 = vld [vmem:[#allocation138_spill] sm:$0xff] }
 0x12f   : > { %7993 = vmatprep.subr.msk.bf16.mxu1 %vm13266_vm15, %v9720_v39  ;;  %v9744_v8 = vcombine.low %v13706_v61, %v13705_v15  ;;  %v9750_v39 = vcombine.low %v13709_v6, %v13708_v27  ;;  %v13711_v45 = vld [vmem:[#allocation139_spill] sm:$0xff]  ;;  %v13714_v61 = vld [vmem:[#allocation121_spill] sm:$0xff]  ;;  %v13718_v27 = vld [vmem:[#allocation152_spill] sm:$0xff] }
 0x130   : > { %13704 = vst [vmem:[#allocation307_spill] sm:$0xff] %v9738_v30  ;;  %v9756_v33 = vcombine.low %v13712_v4, %v13711_v45  ;;  %v9768_v6 = vcombine.low %v13718_v27, %v13717_v1  ;;  %v13720_v45 = vld [vmem:[#allocation105_spill] sm:$0xff]  ;;  %v13721_v4 = vld [vmem:[#allocation104_spill] sm:$0xff]  ;;  %v13726_v27 = vld [vmem:[#allocation119_spill] sm:$0xff] }
 0x131   : > { %13707 = vst [vmem:[#allocation308_spill] sm:$0xff] %v9744_v8  ;;  %13710 = vst [vmem:[#allocation309_spill] sm:$0xff] %v9750_v39  ;;  %v1485_v15 = vsel %vm13266_vm15, %v9750_v39, 0 }
 0x132   : > { %13713 = vst [vmem:[#allocation310_spill] sm:$0xff] %v9756_v33  ;;  %13719 = vst [vmem:[#allocation312_spill] sm:$0xff] %v9768_v6 }
 0x135   : > { %6849 = vmatpush3.bf16.xpose.msra.mxu0 %v1488_v32  ;;  %v13715_v32 = vld [vmem:[#allocation120_spill] sm:$0xff] }
 0x136   : > { %6867 = vmatpush3.bf16.xpose.msra.mxu1 %v1536_v49  ;;  %7986 = vmatprep.subr.msk.bf16.mxu0 %vm13266_vm15, %v9738_v30  ;;  %v9762_v49 = vcombine.low %v13715_v32, %v13714_v61  ;;  %v1533_v30 = vsel %vm13266_vm15, %v9756_v33, 0  ;;  %v13723_v61 = vld [vmem:[#allocation137_spill] sm:$0xff]  ;;  %v13724_v32 = vld [vmem:[#allocation136_spill] sm:$0xff]  ;;  %v13729_v33 = vld [vmem:[#allocation151_spill] sm:$0xff] }
 0x137   : > { %7994 = vmatprep.subr.msk.bf16.mxu1 %vm13266_vm15, %v9744_v8  ;;  %v9774_v8 = vcombine.low %v13721_v4, %v13720_v45  ;;  %v9780_v39 = vcombine.low %v13724_v32, %v13723_v61  ;;  %v13730_v45 = vld [vmem:[#allocation150_spill] sm:$0xff]  ;;  %v13732_v61 = vld [vmem:[#allocation103_spill] sm:$0xff] }
 0x138   : > { %13716 = vst [vmem:[#allocation311_spill] sm:$0xff] %v9762_v49  ;;  %v9792_v4 = vcombine.low %v13730_v45, %v13729_v33  ;;  %v13733_v32 = vld [vmem:[#allocation102_spill] sm:$0xff]  ;;  %v13738_v45 = vld [vmem:[#allocation117_spill] sm:$0xff] }
 0x139   : > { %13722 = vst [vmem:[#allocation313_spill] sm:$0xff] %v9774_v8  ;;  %13725 = vst [vmem:[#allocation314_spill] sm:$0xff] %v9780_v39  ;;  %v1482_v1 = vsel %vm13266_vm15, %v9774_v8, 0 }
 0x13a   : > { %13731 = vst [vmem:[#allocation316_spill] sm:$0xff] %v9792_v4 }
 0x13d   : > { %6851 = vmatpush3.bf16.xpose.msra.mxu0 %v1485_v15  ;;  %v13727_v15 = vld [vmem:[#allocation118_spill] sm:$0xff] }
 0x13e   : > { %6869 = vmatpush3.bf16.xpose.msra.mxu1 %v1533_v30  ;;  %7987 = vmatprep.subr.msk.bf16.mxu0 %vm13266_vm15, %v9762_v49  ;;  %v9786_v30 = vcombine.low %v13727_v15, %v13726_v27  ;;  %v1530_v49 = vsel %vm13266_vm15, %v9780_v39, 0  ;;  %v13735_v27 = vld [vmem:[#allocation135_spill] sm:$0xff]  ;;  %v13736_v15 = vld [vmem:[#allocation134_spill] sm:$0xff]  ;;  %v13741_v39 = vld [vmem:[#allocation149_spill] sm:$0xff] }
 0x13f   : > { %7995 = vmatprep.subr.msk.bf16.mxu1 %vm13266_vm15, %v9768_v6  ;;  %v9798_v6 = vcombine.low %v13733_v32, %v13732_v61  ;;  %v9804_v8 = vcombine.low %v13736_v15, %v13735_v27  ;;  %v13742_v61 = vld [vmem:[#allocation148_spill] sm:$0xff]  ;;  %v13744_v27 = vld [vmem:[#allocation101_spill] sm:$0xff] }
 0x140   : > { %13728 = vst [vmem:[#allocation315_spill] sm:$0xff] %v9786_v30  ;;  %v9816_v32 = vcombine.low %v13742_v61, %v13741_v39  ;;  %v13745_v15 = vld [vmem:[#allocation100_spill] sm:$0xff]  ;;  %v13750_v61 = vld [vmem:[#allocation195_spill] sm:$0xff] }
 0x141   : > { %13734 = vst [vmem:[#allocation317_spill] sm:$0xff] %v9798_v6  ;;  %13737 = vst [vmem:[#allocation318_spill] sm:$0xff] %v9804_v8  ;;  %v1479_v33 = vsel %vm13266_vm15, %v9798_v6, 0 }
 0x142   : > { %13743 = vst [vmem:[#allocation320_spill] sm:$0xff] %v9816_v32 }
 0x145   : > { %6853 = vmatpush3.bf16.xpose.msra.mxu0 %v1482_v1  ;;  %v13739_v1 = vld [vmem:[#allocation116_spill] sm:$0xff] }
 0x146   : > { %6871 = vmatpush3.bf16.xpose.msra.mxu1 %v1530_v49  ;;  %7988 = vmatprep.subr.msk.bf16.mxu0 %vm13266_vm15, %v9786_v30  ;;  %v9810_v49 = vcombine.low %v13739_v1, %v13738_v45  ;;  %v1527_v30 = vsel %vm13266_vm15, %v9804_v8, 0  ;;  %v13747_v45 = vld [vmem:[#allocation133_spill] sm:$0xff]  ;;  %v13748_v1 = vld [vmem:[#allocation132_spill] sm:$0xff]  ;;  %v13753_v8 = vld [vmem:[#allocation227_spill] sm:$0xff] }
 0x147   : > { %7996 = vmatprep.subr.msk.bf16.mxu1 %vm13266_vm15, %v9792_v4  ;;  %v9822_v4 = vcombine.low %v13745_v15, %v13744_v27  ;;  %v9828_v6 = vcombine.low %v13748_v1, %v13747_v45  ;;  %v13754_v27 = vld [vmem:[#allocation226_spill] sm:$0xff]  ;;  %v13756_v45 = vld [vmem:[#allocation179_spill] sm:$0xff] }
 0x148   : > { %13740 = vst [vmem:[#allocation319_spill] sm:$0xff] %v9810_v49  ;;  %v9840_v15 = vcombine.low %v13754_v27, %v13753_v8  ;;  %v13757_v1 = vld [vmem:[#allocation178_spill] sm:$0xff]  ;;  %v13762_v27 = vld [vmem:[#allocation193_spill] sm:$0xff] }
 0x149   : > { %13746 = vst [vmem:[#allocation321_spill] sm:$0xff] %v9822_v4  ;;  %13749 = vst [vmem:[#allocation322_spill] sm:$0xff] %v9828_v6  ;;  %v1476_v39 = vsel %vm13266_vm15, %v9822_v4, 0 }
 0x14a   : > { %13755 = vst [vmem:[#allocation324_spill] sm:$0xff] %v9840_v15 }
 0x14d   : > { %6855 = vmatpush3.bf16.xpose.msra.mxu0 %v1479_v33  ;;  %v13751_v33 = vld [vmem:[#allocation194_spill] sm:$0xff] }
 0x14e   : > { %6873 = vmatpush3.bf16.xpose.msra.mxu1 %v1527_v30  ;;  %7989 = vmatprep.subr.msk.bf16.mxu0 %vm13266_vm15, %v9810_v49  ;;  %v9834_v30 = vcombine.low %v13751_v33, %v13750_v61  ;;  %v1524_v49 = vsel %vm13266_vm15, %v9828_v6, 0  ;;  %v13759_v61 = vld [vmem:[#allocation211_spill] sm:$0xff]  ;;  %v13760_v33 = vld [vmem:[#allocation210_spill] sm:$0xff]  ;;  %v13765_v6 = vld [vmem:[#allocation225_spill] sm:$0xff] }
 0x14f   : > { %7997 = vmatprep.subr.msk.bf16.mxu1 %vm13266_vm15, %v9816_v32  ;;  %v9846_v32 = vcombine.low %v13757_v1, %v13756_v45  ;;  %v9852_v4 = vcombine.low %v13760_v33, %v13759_v61  ;;  %v13766_v45 = vld [vmem:[#allocation224_spill] sm:$0xff]  ;;  %v13768_v61 = vld [vmem:[#allocation177_spill] sm:$0xff] }
 0x150   : > { %13752 = vst [vmem:[#allocation323_spill] sm:$0xff] %v9834_v30  ;;  %v9864_v1 = vcombine.low %v13766_v45, %v13765_v6  ;;  %v13769_v33 = vld [vmem:[#allocation176_spill] sm:$0xff]  ;;  %v13771_v6 = vld [vmem:[#allocation209_spill] sm:$0xff] }
 0x151   : > { %13758 = vst [vmem:[#allocation325_spill] sm:$0xff] %v9846_v32  ;;  %13761 = vst [vmem:[#allocation326_spill] sm:$0xff] %v9852_v4  ;;  %v1593_v8 = vsel %vm13266_vm15, %v9846_v32, 0  ;;  %v13781_v32 = vld [vmem:[#allocation174_spill] sm:$0xff] }
 0x152   : > { %13767 = vst [vmem:[#allocation328_spill] sm:$0xff] %v9864_v1 }
 0x155   : > { %6857 = vmatpush3.bf16.xpose.msra.mxu0 %v1476_v39  ;;  %v13763_v39 = vld [vmem:[#allocation192_spill] sm:$0xff] }
 0x156   : > { %6875 = vmatpush3.bf16.xpose.msra.mxu1 %v1524_v49  ;;  %7998 = vmatprep.subr.msk.bf16.mxu0 %vm13266_vm15, %v9834_v30  ;;  %v9858_v49 = vcombine.low %v13763_v39, %v13762_v27  ;;  %v1641_v30 = vsel %vm13266_vm15, %v9852_v4, 0  ;;  %v9874_v27 = vcombine.low %v13769_v33, %v13768_v61  ;;  %v13772_v39 = vld [vmem:[#allocation208_spill] sm:$0xff]  ;;  %v13778_v4 = vld [vmem:[#allocation222_spill] sm:$0xff] }
 0x157   : > { %8006 = vmatprep.subr.msk.bf16.mxu1 %vm13266_vm15, %v9840_v15  ;;  %v9880_v45 = vcombine.low %v13772_v39, %v13771_v6  ;;  %v13780_v39 = vld [vmem:[#allocation175_spill] sm:$0xff] }
 0x158   : > { %13764 = vst [vmem:[#allocation327_spill] sm:$0xff] %v9858_v49  ;;  %13770 = vst [vmem:[#allocation329_spill] sm:$0xff] %v9874_v27  ;;  %v9902_v15 = vcombine.low %v13781_v32, %v13780_v39  ;;  %v13790_v32 = vld [vmem:[#allocation220_spill] sm:$0xff] }
 0x159   : > { %13773 = vst [vmem:[#allocation330_spill] sm:$0xff] %v9880_v45  ;;  %v1638_v33 = vsel %vm13266_vm15, %v9880_v45, 0  ;;  %v13789_v45 = vld [vmem:[#allocation221_spill] sm:$0xff] }
 0x15a   : > { %13782 = vst [vmem:[#allocation333_spill] sm:$0xff] %v9902_v15  ;;  %v9920_v39 = vcombine.low %v13790_v32, %v13789_v45  ;;  %v13798_v32 = vld [vmem:[#allocation187_spill] sm:$0xff] }
 0x15c   : > { %6859 = vmatmul.mubr.msk.bf16.vlgmr.msra.gmra.mxu0 %vm13266_vm15, %v9444_v53  ;;  %13791 = vst [vmem:[#allocation336_spill] sm:$0xff] %v9920_v39 }
 0x15d   : > { %6877 = vmatmul.mubr.msk.bf16.vlgmr.msra.gmra.mxu1 %vm13266_vm15, %v9444_v53  ;;  %6879 = vmatpush3.bf16.xpose.msra.mxu0 %v1593_v8  ;;  %v13774_v8 = vld [vmem:[#allocation191_spill] sm:$0xff] }
 0x15e   : > { %6897 = vmatpush3.bf16.xpose.msra.mxu1 %v1641_v30  ;;  %7999 = vmatprep.subr.msk.bf16.mxu0 %vm13266_vm15, %v9858_v49  ;;  %v1590_v30 = vsel %vm13266_vm15, %v9874_v27, 0  ;;  %v13775_v49 = vld [vmem:[#allocation190_spill] sm:$0xff] }
 0x15f   : > { %8007 = vmatprep.subr.msk.bf16.mxu1 %vm13266_vm15, %v9864_v1  ;;  %6894 = vmatprep.mubr.msk.bf16.mxu0 %vm13266_vm15, %v9444_v53  ;;  %v9890_v61 = vcombine.low %v13775_v49, %v13774_v8  ;;  %v13777_v1 = vld [vmem:[#allocation223_spill] sm:$0xff]  ;;  %v13784_v8 = vld [vmem:[#allocation206_spill] sm:$0xff] }
 0x160   : > { %6912 = vmatprep.mubr.msk.bf16.mxu1 %vm13266_vm15, %v9444_v53  ;;  %v9896_v6 = vcombine.low %v13778_v4, %v13777_v1  ;;  %v13783_v49 = vld [vmem:[#allocation207_spill] sm:$0xff]  ;;  %v1587_v4 = vsel %vm13266_vm15, %v9902_v15, 0  ;;  %v13786_v1 = vld [vmem:[#allocation189_spill] sm:$0xff] }
 0x161   : > { %13776 = vst [vmem:[#allocation331_spill] sm:$0xff] %v9890_v61  ;;  %v9908_v27 = vcombine.low %v13784_v8, %v13783_v49  ;;  %v13792_v49 = vld [vmem:[#allocation173_spill] sm:$0xff]  ;;  %v13793_v8 = vld [vmem:[#allocation172_spill] sm:$0xff] }
 0x162   : > { %13779 = vst [vmem:[#allocation332_spill] sm:$0xff] %v9896_v6 }
 0x163   : > { %13785 = vst [vmem:[#allocation334_spill] sm:$0xff] %v9908_v27 }
 0x165   : > { %6881 = vmatpush3.bf16.xpose.msra.mxu0 %v1590_v30  ;;  %v13787_v30 = vld [vmem:[#allocation188_spill] sm:$0xff] }
 0x166   : > { %6899 = vmatpush3.bf16.xpose.msra.mxu1 %v1638_v33  ;;  %8000 = vmatprep.subr.msk.bf16.mxu0 %vm13266_vm15, %v9890_v61  ;;  %v9914_v33 = vcombine.low %v13787_v30, %v13786_v1  ;;  %v1635_v61 = vsel %vm13266_vm15, %v9908_v27, 0  ;;  %v13795_v1 = vld [vmem:[#allocation205_spill] sm:$0xff]  ;;  %v13796_v30 = vld [vmem:[#allocation204_spill] sm:$0xff]  ;;  %v13801_v27 = vld [vmem:[#allocation219_spill] sm:$0xff] }
 0x167   : > { %8008 = vmatprep.subr.msk.bf16.mxu1 %vm13266_vm15, %v9896_v6  ;;  %v9926_v6 = vcombine.low %v13793_v8, %v13792_v49  ;;  %v9932_v15 = vcombine.low %v13796_v30, %v13795_v1  ;;  %v13802_v49 = vld [vmem:[#allocation218_spill] sm:$0xff]  ;;  %v13804_v1 = vld [vmem:[#allocation171_spill] sm:$0xff] }
 0x168   : > { %13788 = vst [vmem:[#allocation335_spill] sm:$0xff] %v9914_v33  ;;  %v9944_v8 = vcombine.low %v13802_v49, %v13801_v27  ;;  %v13805_v30 = vld [vmem:[#allocation170_spill] sm:$0xff]  ;;  %v13810_v49 = vld [vmem:[#allocation185_spill] sm:$0xff] }
 0x169   : > { %13794 = vst [vmem:[#allocation337_spill] sm:$0xff] %v9926_v6  ;;  %13797 = vst [vmem:[#allocation338_spill] sm:$0xff] %v9932_v15  ;;  %v1584_v45 = vsel %vm13266_vm15, %v9926_v6, 0 }
 0x16a   : > { %13803 = vst [vmem:[#allocation340_spill] sm:$0xff] %v9944_v8 }
 0x16d   : > { %6883 = vmatpush3.bf16.xpose.msra.mxu0 %v1587_v4  ;;  %v13799_v4 = vld [vmem:[#allocation186_spill] sm:$0xff] }
 0x16e   : > { %6901 = vmatpush3.bf16.xpose.msra.mxu1 %v1635_v61  ;;  %8001 = vmatprep.subr.msk.bf16.mxu0 %vm13266_vm15, %v9914_v33  ;;  %v9938_v61 = vcombine.low %v13799_v4, %v13798_v32  ;;  %v1632_v33 = vsel %vm13266_vm15, %v9932_v15, 0  ;;  %v13807_v32 = vld [vmem:[#allocation203_spill] sm:$0xff]  ;;  %v13808_v4 = vld [vmem:[#allocation202_spill] sm:$0xff]  ;;  %v13813_v15 = vld [vmem:[#allocation217_spill] sm:$0xff] }
 0x16f   : > { %8009 = vmatprep.subr.msk.bf16.mxu1 %vm13266_vm15, %v9920_v39  ;;  %v9950_v39 = vcombine.low %v13805_v30, %v13804_v1  ;;  %v9956_v6 = vcombine.low %v13808_v4, %v13807_v32  ;;  %v13814_v1 = vld [vmem:[#allocation216_spill] sm:$0xff]  ;;  %v13816_v32 = vld [vmem:[#allocation169_spill] sm:$0xff] }
 0x170   : > { %13800 = vst [vmem:[#allocation339_spill] sm:$0xff] %v9938_v61  ;;  %v9968_v30 = vcombine.low %v13814_v1, %v13813_v15  ;;  %v13817_v4 = vld [vmem:[#allocation168_spill] sm:$0xff]  ;;  %v13822_v1 = vld [vmem:[#allocation183_spill] sm:$0xff] }
 0x171   : > { %13806 = vst [vmem:[#allocation341_spill] sm:$0xff] %v9950_v39  ;;  %13809 = vst [vmem:[#allocation342_spill] sm:$0xff] %v9956_v6  ;;  %v1581_v27 = vsel %vm13266_vm15, %v9950_v39, 0 }
 0x172   : > { %13815 = vst [vmem:[#allocation344_spill] sm:$0xff] %v9968_v30 }
 0x175   : > { %6885 = vmatpush3.bf16.xpose.msra.mxu0 %v1584_v45  ;;  %v13811_v45 = vld [vmem:[#allocation184_spill] sm:$0xff] }
 0x176   : > { %6903 = vmatpush3.bf16.xpose.msra.mxu1 %v1632_v33  ;;  %8002 = vmatprep.subr.msk.bf16.mxu0 %vm13266_vm15, %v9938_v61  ;;  %v9962_v33 = vcombine.low %v13811_v45, %v13810_v49  ;;  %v1629_v61 = vsel %vm13266_vm15, %v9956_v6, 0  ;;  %v13819_v49 = vld [vmem:[#allocation201_spill] sm:$0xff]  ;;  %v13820_v45 = vld [vmem:[#allocation200_spill] sm:$0xff]  ;;  %v13825_v6 = vld [vmem:[#allocation215_spill] sm:$0xff] }
 0x177   : > { %8010 = vmatprep.subr.msk.bf16.mxu1 %vm13266_vm15, %v9944_v8  ;;  %v9974_v8 = vcombine.low %v13817_v4, %v13816_v32  ;;  %v9980_v39 = vcombine.low %v13820_v45, %v13819_v49  ;;  %v13826_v32 = vld [vmem:[#allocation214_spill] sm:$0xff]  ;;  %v13828_v49 = vld [vmem:[#allocation167_spill] sm:$0xff] }
 0x178   : > { %13812 = vst [vmem:[#allocation343_spill] sm:$0xff] %v9962_v33  ;;  %v9992_v4 = vcombine.low %v13826_v32, %v13825_v6  ;;  %v13829_v45 = vld [vmem:[#allocation166_spill] sm:$0xff]  ;;  %v13834_v32 = vld [vmem:[#allocation181_spill] sm:$0xff] }
 0x179   : > { %13818 = vst [vmem:[#allocation345_spill] sm:$0xff] %v9974_v8  ;;  %13821 = vst [vmem:[#allocation346_spill] sm:$0xff] %v9980_v39  ;;  %v1578_v15 = vsel %vm13266_vm15, %v9974_v8, 0 }
 0x17a   : > { %13827 = vst [vmem:[#allocation348_spill] sm:$0xff] %v9992_v4 }
 0x17d   : > { %6887 = vmatpush3.bf16.xpose.msra.mxu0 %v1581_v27  ;;  %v13823_v27 = vld [vmem:[#allocation182_spill] sm:$0xff] }
 0x17e   : > { %6905 = vmatpush3.bf16.xpose.msra.mxu1 %v1629_v61  ;;  %8003 = vmatprep.subr.msk.bf16.mxu0 %vm13266_vm15, %v9962_v33  ;;  %v9986_v61 = vcombine.low %v13823_v27, %v13822_v1  ;;  %v1626_v33 = vsel %vm13266_vm15, %v9980_v39, 0  ;;  %v13831_v1 = vld [vmem:[#allocation199_spill] sm:$0xff]  ;;  %v13832_v27 = vld [vmem:[#allocation198_spill] sm:$0xff]  ;;  %v13837_v39 = vld [vmem:[#allocation213_spill] sm:$0xff] }
 0x17f   : > { %8011 = vmatprep.subr.msk.bf16.mxu1 %vm13266_vm15, %v9968_v30  ;;  %v9998_v30 = vcombine.low %v13829_v45, %v13828_v49  ;;  %v10004_v8 = vcombine.low %v13832_v27, %v13831_v1  ;;  %v13838_v49 = vld [vmem:[#allocation212_spill] sm:$0xff]  ;;  %v13840_v1 = vld [vmem:[#allocation165_spill] sm:$0xff] }
 0x180   : > { %13824 = vst [vmem:[#allocation347_spill] sm:$0xff] %v9986_v61  ;;  %v10016_v45 = vcombine.low %v13838_v49, %v13837_v39  ;;  %v13841_v27 = vld [vmem:[#allocation164_spill] sm:$0xff]  ;;  %v13846_v49 = vld [vmem:[#allocation259_spill] sm:$0xff] }
 0x181   : > { %13830 = vst [vmem:[#allocation349_spill] sm:$0xff] %v9998_v30  ;;  %13833 = vst [vmem:[#allocation350_spill] sm:$0xff] %v10004_v8  ;;  %v1575_v6 = vsel %vm13266_vm15, %v9998_v30, 0 }
 0x182   : > { %13839 = vst [vmem:[#allocation352_spill] sm:$0xff] %v10016_v45 }
 0x185   : > { %6889 = vmatpush3.bf16.xpose.msra.mxu0 %v1578_v15  ;;  %v13835_v15 = vld [vmem:[#allocation180_spill] sm:$0xff] }
 0x186   : > { %6907 = vmatpush3.bf16.xpose.msra.mxu1 %v1626_v33  ;;  %8004 = vmatprep.subr.msk.bf16.mxu0 %vm13266_vm15, %v9986_v61  ;;  %v10010_v33 = vcombine.low %v13835_v15, %v13834_v32  ;;  %v1623_v61 = vsel %vm13266_vm15, %v10004_v8, 0  ;;  %v13843_v32 = vld [vmem:[#allocation197_spill] sm:$0xff]  ;;  %v13844_v15 = vld [vmem:[#allocation196_spill] sm:$0xff] }
 0x187   : > { %8012 = vmatprep.subr.msk.bf16.mxu1 %vm13266_vm15, %v9992_v4  ;;  %v10022_v4 = vcombine.low %v13841_v27, %v13840_v1  ;;  %v10028_v30 = vcombine.low %v13844_v15, %v13843_v32  ;;  %v10040_v1 = vcombine.low %v9420_v14, %v9423_v24  ;;  %v13850_v27 = vld [vmem:[#allocation243_spill] sm:$0xff]  ;;  %v13851_v32 = vld [vmem:[#allocation242_spill] sm:$0xff]  ;;  %v13856_v24 = vld [vmem:[#allocation257_spill] sm:$0xff] }
 0x188   : > { %13836 = vst [vmem:[#allocation351_spill] sm:$0xff] %v10010_v33  ;;  %v10046_v15 = vcombine.low %v13851_v32, %v13850_v27  ;;  %v10064_v27 = vcombine.low %v9414_v13, %v9417_v35  ;;  %v13861_v32 = vld [vmem:[#allocation240_spill] sm:$0xff]  ;;  %v13867_v35 = vld [vmem:[#allocation254_spill] sm:$0xff] }
 0x189   : > { %13842 = vst [vmem:[#allocation353_spill] sm:$0xff] %v10022_v4  ;;  %13845 = vst [vmem:[#allocation354_spill] sm:$0xff] %v10028_v30  ;;  %v1572_v39 = vsel %vm13266_vm15, %v10022_v4, 0 }
 0x18a   : > { %13849 = vst [vmem:[#allocation356_spill] sm:$0xff] %v10040_v1  ;;  %13852 = vst [vmem:[#allocation357_spill] sm:$0xff] %v10046_v15  ;;  %v1689_v14 = vsel %vm13266_vm15, %v10046_v15, 0 }
 0x18b   : > { %13859 = vst [vmem:[#allocation360_spill] sm:$0xff] %v10064_v27 }
 0x18d   : > { %6891 = vmatpush3.bf16.xpose.msra.mxu0 %v1575_v6  ;;  %v13847_v6 = vld [vmem:[#allocation258_spill] sm:$0xff] }
 0x18e   : > { %6909 = vmatpush3.bf16.xpose.msra.mxu1 %v1623_v61  ;;  %8005 = vmatprep.subr.msk.bf16.mxu0 %vm13266_vm15, %v10010_v33  ;;  %v10034_v61 = vcombine.low %v13847_v6, %v13846_v49  ;;  %v1620_v33 = vsel %vm13266_vm15, %v10028_v30, 0  ;;  %v13853_v49 = vld [vmem:[#allocation275_spill] sm:$0xff]  ;;  %v13854_v6 = vld [vmem:[#allocation274_spill] sm:$0xff] }
 0x18f   : > { %8013 = vmatprep.subr.msk.bf16.mxu1 %vm13266_vm15, %v10016_v45  ;;  %v10052_v4 = vcombine.low %v13854_v6, %v13853_v49  ;;  %v13863_v6 = vld [vmem:[#allocation273_spill] sm:$0xff] }
 0x190   : > { %13848 = vst [vmem:[#allocation355_spill] sm:$0xff] %v10034_v61 }
 0x191   : > { %13855 = vst [vmem:[#allocation358_spill] sm:$0xff] %v10052_v4 }
 0x195   : > { %6893 = vmatpush3.bf16.xpose.msra.mxu0 %v1572_v39  ;;  %v13857_v39 = vld [vmem:[#allocation256_spill] sm:$0xff] }
 0x196   : > { %6911 = vmatpush3.bf16.xpose.msra.mxu1 %v1620_v33  ;;  %8014 = vmatprep.subr.msk.bf16.mxu0 %vm13266_vm15, %v10034_v61  ;;  %v10058_v33 = vcombine.low %v13857_v39, %v13856_v24  ;;  %v1737_v61 = vsel %vm13266_vm15, %v10052_v4, 0  ;;  %v13860_v24 = vld [vmem:[#allocation241_spill] sm:$0xff]  ;;  %v13864_v39 = vld [vmem:[#allocation272_spill] sm:$0xff] }
 0x197   : > { %8022 = vmatprep.subr.msk.bf16.mxu1 %vm13266_vm15, %v10040_v1  ;;  %v10074_v49 = vcombine.low %v13861_v32, %v13860_v24  ;;  %v10080_v13 = vcombine.low %v13864_v39, %v13863_v6  ;;  %v10096_v6 = vcombine.low %v9408_v51, %v9411_v16  ;;  %v13870_v39 = vld [vmem:[#allocation239_spill] sm:$0xff]  ;;  %v13876_v16 = vld [vmem:[#allocation253_spill] sm:$0xff] }
 0x198   : > { %13858 = vst [vmem:[#allocation359_spill] sm:$0xff] %v10058_v33 }
 0x199   : > { %13862 = vst [vmem:[#allocation361_spill] sm:$0xff] %v10074_v49  ;;  %13865 = vst [vmem:[#allocation362_spill] sm:$0xff] %v10080_v13  ;;  %v1734_v32 = vsel %vm13266_vm15, %v10080_v13, 0  ;;  %v13879_v13 = vld [vmem:[#allocation285_spill] sm:$0xff] }
 0x19a   : > { %13869 = vst [vmem:[#allocation364_spill] sm:$0xff] %v10096_v6 }
 0x19c   : > { %6895 = vmatmul.mubr.msk.bf16.vlgmr.msra.gmra.mxu0 %vm13266_vm15, %v9444_v53 }
 0x19d   : > { %6913 = vmatmul.mubr.msk.bf16.vlgmr.msra.gmra.mxu1 %vm13266_vm15, %v9444_v53  ;;  %6915 = vmatpush3.bf16.xpose.msra.mxu0 %v1689_v14  ;;  %v1686_v14 = vsel %vm13266_vm15, %v10074_v49, 0 }
 0x19e   : > { %6933 = vmatpush3.bf16.xpose.msra.mxu1 %v1737_v61  ;;  %8015 = vmatprep.subr.msk.bf16.mxu0 %vm13266_vm15, %v10058_v33  ;;  %v13866_v61 = vld [vmem:[#allocation255_spill] sm:$0xff] }
 0x19f   : > { %8023 = vmatprep.subr.msk.bf16.mxu1 %vm13266_vm15, %v10064_v27  ;;  %6930 = vmatprep.mubr.msk.bf16.mxu0 %vm13266_vm15, %v9444_v53  ;;  %v10090_v24 = vcombine.low %v13867_v35, %v13866_v61  ;;  %v13871_v27 = vld [vmem:[#allocation238_spill] sm:$0xff]  ;;  %v13873_v35 = vld [vmem:[#allocation271_spill] sm:$0xff] }
 0x1a0   : > { %6948 = vmatprep.mubr.msk.bf16.mxu1 %vm13266_vm15, %v9444_v53  ;;  %v10102_v33 = vcombine.low %v13871_v27, %v13870_v39  ;;  %v13874_v61 = vld [vmem:[#allocation270_spill] sm:$0xff]  ;;  %v13880_v27 = vld [vmem:[#allocation284_spill] sm:$0xff] }
 0x1a1   : > { %13868 = vst [vmem:[#allocation363_spill] sm:$0xff] %v10090_v24  ;;  %v10108_v49 = vcombine.low %v13874_v61, %v13873_v35  ;;  %v10120_v39 = vcombine.low %v13880_v27, %v13879_v13  ;;  %v13882_v35 = vld [vmem:[#allocation237_spill] sm:$0xff]  ;;  %v13883_v61 = vld [vmem:[#allocation236_spill] sm:$0xff]  ;;  %v13888_v27 = vld [vmem:[#allocation251_spill] sm:$0xff] }
 0x1a2   : > { %13872 = vst [vmem:[#allocation365_spill] sm:$0xff] %v10102_v33  ;;  %v1683_v51 = vsel %vm13266_vm15, %v10102_v33, 0 }
 0x1a3   : > { %13875 = vst [vmem:[#allocation366_spill] sm:$0xff] %v10108_v49  ;;  %13881 = vst [vmem:[#allocation368_spill] sm:$0xff] %v10120_v39 }
 0x1a5   : > { %6917 = vmatpush3.bf16.xpose.msra.mxu0 %v1686_v14  ;;  %v13877_v14 = vld [vmem:[#allocation252_spill] sm:$0xff] }
 0x1a6   : > { %6935 = vmatpush3.bf16.xpose.msra.mxu1 %v1734_v32  ;;  %8016 = vmatprep.subr.msk.bf16.mxu0 %vm13266_vm15, %v10090_v24  ;;  %v10114_v32 = vcombine.low %v13877_v14, %v13876_v16  ;;  %v1731_v24 = vsel %vm13266_vm15, %v10108_v49, 0  ;;  %v13885_v16 = vld [vmem:[#allocation269_spill] sm:$0xff]  ;;  %v13886_v14 = vld [vmem:[#allocation268_spill] sm:$0xff]  ;;  %v13891_v49 = vld [vmem:[#allocation283_spill] sm:$0xff] }
 0x1a7   : > { %8024 = vmatprep.subr.msk.bf16.mxu1 %vm13266_vm15, %v10096_v6  ;;  %v10126_v6 = vcombine.low %v13883_v61, %v13882_v35  ;;  %v10132_v33 = vcombine.low %v13886_v14, %v13885_v16  ;;  %v13892_v35 = vld [vmem:[#allocation282_spill] sm:$0xff]  ;;  %v13894_v16 = vld [vmem:[#allocation235_spill] sm:$0xff] }
 0x1a8   : > { %13878 = vst [vmem:[#allocation367_spill] sm:$0xff] %v10114_v32  ;;  %v10144_v61 = vcombine.low %v13892_v35, %v13891_v49  ;;  %v13895_v14 = vld [vmem:[#allocation234_spill] sm:$0xff]  ;;  %v13900_v35 = vld [vmem:[#allocation249_spill] sm:$0xff] }
 0x1a9   : > { %13884 = vst [vmem:[#allocation369_spill] sm:$0xff] %v10126_v6  ;;  %13887 = vst [vmem:[#allocation370_spill] sm:$0xff] %v10132_v33  ;;  %v1680_v13 = vsel %vm13266_vm15, %v10126_v6, 0 }
 0x1aa   : > { %13893 = vst [vmem:[#allocation372_spill] sm:$0xff] %v10144_v61 }
 0x1ad   : > { %6919 = vmatpush3.bf16.xpose.msra.mxu0 %v1683_v51  ;;  %v13889_v51 = vld [vmem:[#allocation250_spill] sm:$0xff] }
 0x1ae   : > { %6937 = vmatpush3.bf16.xpose.msra.mxu1 %v1731_v24  ;;  %8017 = vmatprep.subr.msk.bf16.mxu0 %vm13266_vm15, %v10114_v32  ;;  %v10138_v24 = vcombine.low %v13889_v51, %v13888_v27  ;;  %v1728_v32 = vsel %vm13266_vm15, %v10132_v33, 0  ;;  %v13897_v27 = vld [vmem:[#allocation267_spill] sm:$0xff]  ;;  %v13898_v51 = vld [vmem:[#allocation266_spill] sm:$0xff]  ;;  %v13903_v33 = vld [vmem:[#allocation281_spill] sm:$0xff] }
 0x1af   : > { %8025 = vmatprep.subr.msk.bf16.mxu1 %vm13266_vm15, %v10120_v39  ;;  %v10150_v39 = vcombine.low %v13895_v14, %v13894_v16  ;;  %v10156_v6 = vcombine.low %v13898_v51, %v13897_v27  ;;  %v13904_v16 = vld [vmem:[#allocation280_spill] sm:$0xff]  ;;  %v13906_v27 = vld [vmem:[#allocation233_spill] sm:$0xff] }
 0x1b0   : > { %13890 = vst [vmem:[#allocation371_spill] sm:$0xff] %v10138_v24  ;;  %v10168_v14 = vcombine.low %v13904_v16, %v13903_v33  ;;  %v13907_v51 = vld [vmem:[#allocation232_spill] sm:$0xff]  ;;  %v13912_v16 = vld [vmem:[#allocation247_spill] sm:$0xff] }
 0x1b1   : > { %13896 = vst [vmem:[#allocation373_spill] sm:$0xff] %v10150_v39  ;;  %13899 = vst [vmem:[#allocation374_spill] sm:$0xff] %v10156_v6  ;;  %v1677_v49 = vsel %vm13266_vm15, %v10150_v39, 0 }
 0x1b2   : > { %13905 = vst [vmem:[#allocation376_spill] sm:$0xff] %v10168_v14 }
 0x1b5   : > { %6921 = vmatpush3.bf16.xpose.msra.mxu0 %v1680_v13  ;;  %v13901_v13 = vld [vmem:[#allocation248_spill] sm:$0xff] }
 0x1b6   : > { %6939 = vmatpush3.bf16.xpose.msra.mxu1 %v1728_v32  ;;  %8018 = vmatprep.subr.msk.bf16.mxu0 %vm13266_vm15, %v10138_v24  ;;  %v10162_v32 = vcombine.low %v13901_v13, %v13900_v35  ;;  %v1725_v24 = vsel %vm13266_vm15, %v10156_v6, 0  ;;  %v13909_v35 = vld [vmem:[#allocation265_spill] sm:$0xff]  ;;  %v13910_v13 = vld [vmem:[#allocation264_spill] sm:$0xff]  ;;  %v13915_v6 = vld [vmem:[#allocation279_spill] sm:$0xff] }
 0x1b7   : > { %8026 = vmatprep.subr.msk.bf16.mxu1 %vm13266_vm15, %v10144_v61  ;;  %v10174_v61 = vcombine.low %v13907_v51, %v13906_v27  ;;  %v10180_v39 = vcombine.low %v13910_v13, %v13909_v35  ;;  %v13916_v27 = vld [vmem:[#allocation278_spill] sm:$0xff]  ;;  %v13918_v35 = vld [vmem:[#allocation231_spill] sm:$0xff] }
 0x1b8   : > { %13902 = vst [vmem:[#allocation375_spill] sm:$0xff] %v10162_v32  ;;  %v10192_v51 = vcombine.low %v13916_v27, %v13915_v6  ;;  %v13919_v13 = vld [vmem:[#allocation230_spill] sm:$0xff]  ;;  %v13924_v27 = vld [vmem:[#allocation245_spill] sm:$0xff] }
 0x1b9   : > { %13908 = vst [vmem:[#allocation377_spill] sm:$0xff] %v10174_v61  ;;  %13911 = vst [vmem:[#allocation378_spill] sm:$0xff] %v10180_v39  ;;  %v1674_v33 = vsel %vm13266_vm15, %v10174_v61, 0 }
 0x1ba   : > { %13917 = vst [vmem:[#allocation380_spill] sm:$0xff] %v10192_v51 }
 0x1bd   : > { %6923 = vmatpush3.bf16.xpose.msra.mxu0 %v1677_v49  ;;  %v13913_v49 = vld [vmem:[#allocation246_spill] sm:$0xff] }
 0x1be   : > { %6941 = vmatpush3.bf16.xpose.msra.mxu1 %v1725_v24  ;;  %8019 = vmatprep.subr.msk.bf16.mxu0 %vm13266_vm15, %v10162_v32  ;;  %v10186_v24 = vcombine.low %v13913_v49, %v13912_v16  ;;  %v1722_v32 = vsel %vm13266_vm15, %v10180_v39, 0  ;;  %v13921_v16 = vld [vmem:[#allocation263_spill] sm:$0xff]  ;;  %v13922_v49 = vld [vmem:[#allocation262_spill] sm:$0xff]  ;;  %v13927_v39 = vld [vmem:[#allocation277_spill] sm:$0xff] }
 0x1bf   : > { %8027 = vmatprep.subr.msk.bf16.mxu1 %vm13266_vm15, %v10168_v14  ;;  %v10198_v14 = vcombine.low %v13919_v13, %v13918_v35  ;;  %v10204_v61 = vcombine.low %v13922_v49, %v13921_v16  ;;  %v13928_v35 = vld [vmem:[#allocation276_spill] sm:$0xff]  ;;  %v13930_v16 = vld [vmem:[#allocation229_spill] sm:$0xff] }
 0x1c0   : > { %13914 = vst [vmem:[#allocation379_spill] sm:$0xff] %v10186_v24  ;;  %v10216_v13 = vcombine.low %v13928_v35, %v13927_v39  ;;  %v13931_v49 = vld [vmem:[#allocation228_spill] sm:$0xff] }
 0x1c1   : > { %13920 = vst [vmem:[#allocation381_spill] sm:$0xff] %v10198_v14  ;;  %13923 = vst [vmem:[#allocation382_spill] sm:$0xff] %v10204_v61  ;;  %v1671_v6 = vsel %vm13266_vm15, %v10198_v14, 0 }
 0x1c2   : > { %13929 = vst [vmem:[#allocation384_spill] sm:$0xff] %v10216_v13 }
 0x1c5   : > { %6925 = vmatpush3.bf16.xpose.msra.mxu0 %v1674_v33  ;;  %v13925_v33 = vld [vmem:[#allocation244_spill] sm:$0xff] }
 0x1c6   : > { %6943 = vmatpush3.bf16.xpose.msra.mxu1 %v1722_v32  ;;  %8020 = vmatprep.subr.msk.bf16.mxu0 %vm13266_vm15, %v10186_v24  ;;  %v10210_v32 = vcombine.low %v13925_v33, %v13924_v27  ;;  %v1719_v24 = vsel %vm13266_vm15, %v10204_v61, 0  ;;  %v13933_v27 = vld [vmem:[#allocation261_spill] sm:$0xff]  ;;  %v13934_v33 = vld [vmem:[#allocation260_spill] sm:$0xff] }
 0x1c7   : > { %8028 = vmatprep.subr.msk.bf16.mxu1 %vm13266_vm15, %v10192_v51  ;;  %v10222_v51 = vcombine.low %v13931_v49, %v13930_v16  ;;  %v10228_v14 = vcombine.low %v13934_v33, %v13933_v27  ;;  %v13936_v49 = vlaneseq }
 0x1c8   : > { %13926 = vst [vmem:[#allocation383_spill] sm:$0xff] %v10210_v32 }
 0x1c9   : > { %13932 = vst [vmem:[#allocation385_spill] sm:$0xff] %v10222_v51  ;;  %13935 = vst [vmem:[#allocation386_spill] sm:$0xff] %v10228_v14  ;;  %v1668_v39 = vsel %vm13266_vm15, %v10222_v51, 0  ;;  %v2113_v61 = vshrl.u32 %v13936_v49, 7 }
 0x1cd   : > { %6927 = vmatpush3.bf16.xpose.msra.mxu0 %v1671_v6  ;;  %v8376_v6 = vmov 1983009808  }
 0x1ce   : > { %6945 = vmatpush3.bf16.xpose.msra.mxu1 %v1719_v24  ;;  %8021 = vmatprep.subr.msk.bf16.mxu0 %vm13266_vm15, %v10210_v32  ;;  %v1716_v24 = vsel %vm13266_vm15, %v10228_v14, 0  ;;  %v2110_v35 = vunpack.c.l.s4 %v8376_v6  ;;  %v10234_v32 = vpop.permute.xlu0 %732 }
 0x1cf   : > { %8029 = vmatprep.subr.msk.bf16.mxu1 %vm13266_vm15, %v10216_v13 }
 0x1d0   : > { %v2111_v16 = vunpack.c.0.s8 %v2110_v35 }
 0x1d2   : > { %v10250_v35 = vsub.s32 %v2111_v16, %v2113_v61 }
 0x1d5   : > { %6929 = vmatpush3.bf16.xpose.msra.mxu0 %v1668_v39 }
 0x1d6   : > { %6947 = vmatpush3.bf16.xpose.msra.mxu1 %v1716_v24 }
 0x1dc   : > { %v1797_v13 = vpop.f32.mrf.mxu0  ;;  %6931 = vmatmul.mubr.msk.bf16.vlgmr.msra.gmra.mxu0 %vm13266_vm15, %v9444_v53 }
 0x1dd   : > { %v1838_v27 = vpop.f32.mrf.mxu1  ;;  %6949 = vmatmul.mubr.msk.bf16.vlgmr.msra.gmra.mxu1 %vm13266_vm15, %v9444_v53  ;;  %v10242_v33 = vadd.f32 %v1797_v13, %v10234_v32 }
 0x1de   : > { %v1799_v39 = vpop.f32.mrf.mxu0  ;;  %v10245_v24 = vadd.f32 %v1838_v27, %v10234_v32 }
 0x1df   : > { %v10248_v6 = vadd.f32 %v1799_v39, %v10234_v32  ;;  %v1840_v49 = vpop.f32.mrf.mxu1 }
 0x1e0   : > { %v10253_v14 = vadd.f32 %v1840_v49, %v10234_v32  ;;  %v1801_v51 = vpop.f32.mrf.mxu0 }
 0x1e1   : > { %v2107_v53 = vcombine.low %v10242_v33, %v10248_v6  ;;  %v1842_v13 = vpop.f32.mrf.mxu1 }
 0x1e2   : > { %v2108_v4 = vcombine.low %v10245_v24, %v10253_v14  ;;  %v1802_v15 = vpop.f32.mrf.mxu0 }
 0x1e3   : > { %v2115_v27 = vrot.slane %v2107_v53, %v10250_v35  ;;  %v1843_v1 = vpop.f32.mrf.mxu1 }
 0x1e4   : > { %v2122_v39 = vrot.slane %v2108_v4, %v10250_v35 }
 0x1e6   : > { %v2123_v61 = vcombine.low %v2115_v27, %v2122_v39 }
 0x1e8   : > { %2179 = vst [vmem:[%s9426_s28] sm:$0xff] %v2123_v61 }
 0x21c   : > { %v1879_v16 = vpop.f32.mrf.mxu0 }
 0x21d   : > { %v10263_v49 = vadd.f32 %v1879_v16, %v10234_v32  ;;  %v1920_v51 = vpop.f32.mrf.mxu1 }
 0x21e   : > { %v10266_v30 = vadd.f32 %v1920_v51, %v10234_v32  ;;  %v1881_v13 = vpop.f32.mrf.mxu0 }
 0x21f   : > { %v10269_v45 = vadd.f32 %v1881_v13, %v10234_v32  ;;  %v1922_v15 = vpop.f32.mrf.mxu1 }
 0x220   : > { %v10272_v1 = vadd.f32 %v1922_v15, %v10234_v32  ;;  %v1883_v4 = vpop.f32.mrf.mxu0 }
 0x221   : > { %v2124_v53 = vcombine.low %v10263_v49, %v10269_v45  ;;  %v1924_v27 = vpop.f32.mrf.mxu1 }
 0x222   : > { %v2125_v39 = vcombine.low %v10266_v30, %v10272_v1  ;;  %v1884_v61 = vpop.f32.mrf.mxu0 }
 0x223   : > { %v2132_v16 = vrot.slane %v2124_v53, %v10250_v35  ;;  %v1925_v51 = vpop.f32.mrf.mxu1 }
 0x224   : > { %v2139_v8 = vrot.slane %v2125_v39, %v10250_v35 }
 0x226   : > { %v2140_v13 = vcombine.low %v2132_v16, %v2139_v8 }
 0x228   : > { %2180 = vst [vmem:[%s9426_s28 + $0x8] sm:$0xff] %v2140_v13 }
 0x25c   : > { %v1961_v29 = vpop.f32.mrf.mxu0 }
 0x25d   : > { %v1962_v15 = vadd.f32 %v1961_v29, %v10234_v32  ;;  %v2002_v4 = vpop.f32.mrf.mxu1 }
 0x25e   : > { %v2003_v63 = vadd.f32 %v2002_v4, %v10234_v32  ;;  %v1963_v43 = vpop.f32.mrf.mxu0 }
 0x25f   : > { %v1964_v27 = vadd.f32 %v1963_v43, %v10234_v32  ;;  %v2004_v54 = vpop.f32.mrf.mxu1 }
 0x260   : > { %v2005_v61 = vadd.f32 %v2004_v54, %v10234_v32  ;;  %v1965_v12 = vpop.f32.mrf.mxu0 }
 0x261   : > { %v2141_v53 = vcombine.low %v1962_v15, %v1964_v27  ;;  %v2006_v51 = vpop.f32.mrf.mxu1 }
 0x262   : > { %v2142_v36 = vcombine.low %v2003_v63, %v2005_v61  ;;  %v1966_v39 = vpop.f32.mrf.mxu0 }
 0x263   : > { %v2149_v8 = vrot.slane %v2141_v53, %v10250_v35  ;;  %v2007_v16 = vpop.f32.mrf.mxu1 }
 0x264   : > { %v2156_v29 = vrot.slane %v2142_v36, %v10250_v35 }
 0x266   : > { %v2157_v13 = vcombine.low %v2149_v8, %v2156_v29 }
 0x268   : > { %2181 = vst [vmem:[%s9426_s28 + $0x10] sm:$0xff] %v2157_v13 }
 0x29c   : > { %v2043_v11 = vpop.f32.mrf.mxu0 }
 0x29d   : > { %v2084_v4 = vpop.f32.mrf.mxu1  ;;  %v2044_v43 = vadd.f32 %v2043_v11, %v10234_v32 }
 0x29e   : > { %v2045_v22 = vpop.f32.mrf.mxu0  ;;  %v2085_v51 = vadd.f32 %v2084_v4, %v10234_v32 }
 0x29f   : > { %v2046_v54 = vadd.f32 %v2045_v22, %v10234_v32  ;;  %v2086_v12 = vpop.f32.mrf.mxu1 }
 0x2a0   : > { %v2087_v39 = vadd.f32 %v2086_v12, %v10234_v32  ;;  %v2047_v59 = vpop.f32.mrf.mxu0 }
 0x2a1   : > { %v2158_v53 = vcombine.low %v2044_v43, %v2046_v54  ;;  %v2088_v16 = vpop.f32.mrf.mxu1 }
 0x2a2   : > { %v2159_v41 = vcombine.low %v2085_v51, %v2087_v39  ;;  %v2048_v36 = vpop.f32.mrf.mxu0 }
 0x2a3   : > { %v2166_v8 = vrot.slane %v2158_v53, %v10250_v35  ;;  %v2089_v29 = vpop.f32.mrf.mxu1 }
 0x2a4   : > { %v2173_v13 = vrot.slane %v2159_v41, %v10250_v35  ;;  %2185 = sbr.rel (%p6473_p10) target bundleno = 684 (0x2ac), region = 64 }
 0x2a6   : > { %v2174_v37 = vcombine.low %v2166_v8, %v2173_v13 }
 0x2a8   : > { %2182 = vst [vmem:[%s9426_s28 + $0x18] sm:$0xff] %v2174_v37 }
 0x2a9   : > { %vm2186_vm15 = vcmask 1024   ;;  %vm2188_vm14 = vcmask 254976   ;;  %v8377_v22 = vmov -1e+30   ;;  %v8378_v11 = vmov 0.0  }
 0x2aa   : > { %2187 = vst.msk [vmem:[#allocation2] sm:$0x3] %vm2186_vm15, %v8377_v22 }
 0x2ab   : > { %2189 = vst.msk [vmem:[#allocation3] sm:$0x3] %vm2188_vm14, %v8378_v11 }
 0x2ac PF: > { %v13937_v59 = vld [vmem:[#allocation19_spill] sm:$0xff]  ;;  %v13938_v32 = vld [vmem:[#allocation49_spill] sm:$0xff]  ;;  %v10300_v4 = vsel %vm13281_vm0, %v10242_v33, -1e+30  ;;  %v13939_v41 = vld [vmem:[#allocation20_spill] sm:$0xff]  ;;  %v13940_v35 = vmov 0   ;;  %6950 = vmatprep.subr.bf16.mxu0 %v9431_v52  ;;  %6972 = vmatprep.subr.bf16.mxu1 %v9435_v18 }
 0x2ad   : > { %v10306_v37 = vsel %vm13276_vm1, %v10248_v6, -1e+30  ;;  %8181 = vset.pattern.permute.xlu1 %v13940_v35  ;;  %v13941_v12 = vld [vmem:[#allocation21_spill] sm:$0xff]  ;;  %v10314_v53 = vsel %vm13278_vm2, %v10245_v24, -1e+30  ;;  %v13942_v16 = vld [vmem:[#allocation22_spill] sm:$0xff]  ;;  %6951 = vmatpush3.bf16.msra.mxu0 %v9439_v34 }
 0x2ae   : > { %v10320_v33 = vsel %vm13275_vm3, %v10253_v14, -1e+30  ;;  %v13943_v36 = vld [vmem:[#allocation23_spill] sm:$0xff]  ;;  %v10326_v6 = vsel %vm13280_vm4, %v10263_v49, -1e+30  ;;  %v13944_v52 = vld [vmem:[#allocation24_spill] sm:$0xff]  ;;  %6973 = vmatpush3.bf16.msra.mxu1 %v9448_v50  ;;  %6952 = vmatprep.subr.bf16.mxu0 %v9452_v48 }
 0x2af   : > { %v10334_v24 = vsel %vm13277_vm5, %v10269_v45, -1e+30  ;;  %v13945_v8 = vld [vmem:[#allocation25_spill] sm:$0xff]  ;;  %v10340_v14 = vsel %vm13279_vm6, %v10266_v30, -1e+30  ;;  %6974 = vmatprep.subr.bf16.mxu1 %v9456_v31  ;;  %8182 = vset.pattern.permute.xlu0 %v13940_v35  ;;  %v13955_v35 = vld [vmem:[#allocation48_spill] sm:$0xff] }
 0x2b0   : > { %v10346_v49 = vsel %vm13274_vm7, %v10272_v1, -1e+30  ;;  %v10353_v34 = vsel %vm13273_vm8, %v1962_v15, -1e+30  ;;  %v10358_v30 = vsel %vm13272_vm9, %v1964_v27, -1e+30  ;;  %vm13956_vm15 = vcmp.lt.s32.totalorder %v13955_v35, %v13938_v32 }
 0x2b1   : > { %v10363_v22 = vsel %vm13271_vm10, %v2003_v63, -1e+30  ;;  %v10370_v50 = vsel %vm13268_vm11, %v2005_v61, -1e+30  ;;  %v10375_v15 = vsel %vm13270_vm12, %v2044_v43, -1e+30  ;;  %6953 = vmatpush3.bf16.msra.mxu0 %v9474_v3 }
 0x2b2   : > { %v10380_v11 = vsel %vm13269_vm13, %v2046_v54, -1e+30  ;;  %v13953_v63 = vld [vmem:[#allocation42_spill] sm:$0xff]  ;;  %v10390_v61 = vsel %vm13956_vm15, %v2087_v39, -1e+30  ;;  %vm13282_vm11 = vcmask 1041408   ;;  %6975 = vmatpush3.bf16.msra.mxu1 %v9480_v0  ;;  %6954 = vmatprep.subr.bf16.mxu0 %v9486_v46 }
 0x2b3   : > { %vm13954_vm14 = vcmp.lt.s32.totalorder %v13953_v63, %v13938_v32  ;;  %v2207_v43 = vsel %vm13282_vm11, %v10300_v4, -inf  ;;  %v2208_v54 = vsel %vm13282_vm11, %v10306_v37, -inf  ;;  %v2209_v27 = vsel %vm13282_vm11, %v10314_v53, -inf  ;;  %6976 = vmatprep.subr.bf16.mxu1 %v9492_v28  ;;  %p6522_p11 = scmp.ne.s32.totalorder %s8611_s26, 1 }
 0x2b4   : > { %v10385_v31 = vsel %vm13954_vm14, %v2085_v51, -1e+30  ;;  %v2210_v51 = vsel %vm13282_vm11, %v10320_v33, -inf  ;;  %v2211_v39 = vsel %vm13282_vm11, %v10326_v6, -inf  ;;  %v2213_v3 = vsel %vm13282_vm11, %v10334_v24, -inf  ;;  %s14078_s7 = sld [smem:[#allocation491_spill]] (!%p6522_p11) }
 0x2b5   : > { %v2215_v32 = vsel %vm13282_vm11, %v10340_v14, -inf  ;;  %v2217_v35 = vsel %vm13282_vm11, %v10346_v49, -inf  ;;  %v2212_v63 = vmax.f32 %v2207_v43, %v2211_v39  ;;  %v2214_v1 = vmax.f32 %v2208_v54, %v2213_v3  ;;  %6955 = vmatpush3.bf16.msra.mxu0 %v9498_v62  ;;  %s6527_s22 = sshll.u32 (!%p6522_p11), %s8566_s27, 1 }
 0x2b6   : > { %v2216_v48 = vmax.f32 %v2209_v27, %v2215_v32  ;;  %v2218_v0 = vmax.f32 %v2210_v51, %v2217_v35  ;;  %v2219_v46 = vsel %vm13282_vm11, %v10353_v34, -inf  ;;  %v2221_v13 = vsel %vm13282_vm11, %v10358_v30, -inf  ;;  %6977 = vmatpush3.bf16.msra.mxu1 %v9504_v44  ;;  %6956 = vmatprep.subr.bf16.mxu0 %v9510_v2  ;;  %v13960_v2 = vld [vmem:[#allocation28_spill] sm:$0xff]  ;;  %s2979_s21 = scalar_lea.vmem (!%p6522_p11), [#allocation5], %s6527_s22  ;;  %s2977_s1 = scalar_lea.vmem (!%p6522_p11), [#allocation4], %s6527_s22 }
 0x2b7   : > { %v2223_v45 = vsel %vm13282_vm11, %v10363_v22, -inf  ;;  %v2225_v18 = vsel %vm13282_vm11, %v10370_v50, -inf  ;;  %v2220_v29 = vmax.f32 %v2212_v63, %v2219_v46  ;;  %v2222_v28 = vmax.f32 %v2214_v1, %v2221_v13  ;;  %6978 = vmatprep.subr.bf16.mxu1 %v9516_v26 }
 0x2b8   : > { %v2224_v43 = vmax.f32 %v2216_v48, %v2223_v45  ;;  %v2226_v54 = vmax.f32 %v2218_v0, %v2225_v18  ;;  %v2227_v35 = vsel %vm13282_vm11, %v10375_v15, -inf  ;;  %v2229_v27 = vsel %vm13282_vm11, %v10380_v11, -inf }
 0x2b9   : > { %v2231_v51 = vsel %vm13282_vm11, %v10385_v31, -inf  ;;  %v2233_v39 = vsel %vm13282_vm11, %v10390_v61, -inf  ;;  %v2228_v62 = vmax.f32 %v2220_v29, %v2227_v35  ;;  %v2230_v18 = vmax.f32 %v2222_v28, %v2229_v27  ;;  %6957 = vmatpush3.bf16.msra.mxu0 %v9522_v60 }
 0x2ba   : > { %v2232_v45 = vmax.f32 %v2224_v43, %v2231_v51  ;;  %v2234_v44 = vmax.f32 %v2226_v54, %v2233_v39  ;;  %6979 = vmatpush3.bf16.msra.mxu1 %v9528_v42  ;;  %6958 = vmatprep.subr.bf16.mxu0 %v9534_v5  ;;  %v13958_v42 = vld [vmem:[#allocation26_spill] sm:$0xff] }
 0x2bb   : > { %v2235_v13 = vmax.f32 %v2228_v62, %v2230_v18  ;;  %6980 = vmatprep.subr.bf16.mxu1 %v9543_v25 }
 0x2bc   : > { %v2236_v48 = vmax.f32 %v2232_v45, %v2234_v44 }
 0x2bd   : > { %6959 = vmatpush3.bf16.msra.mxu0 %v9550_v40 }
 0x2be   : > { %v2237_v1 = vmax.f32 %v2235_v13, %v2236_v48  ;;  %6981 = vmatpush3.bf16.msra.mxu1 %v9556_v9  ;;  %6960 = vmatprep.subr.bf16.mxu0 %v9562_v7  ;;  %v13957_v9 = vld [vmem:[#allocation292_spill] sm:$0xff]  ;;  %v13961_v7 = vld [vmem:[#allocation29_spill] sm:$0xff] }
 0x2bf   : > { %6982 = vmatprep.subr.bf16.mxu1 %v9568_v47 }
 0x2c0   : > { %2238 = vmax.xlane.f32.xlu0 %v2237_v1 }
 0x2c1   : > { %6961 = vmatpush3.bf16.msra.mxu0 %v9574_v56  ;;  %v10518_v56 = vld [vmem:[#allocation2] sm:$0x3] }
 0x2c2   : > { %6983 = vmatpush3.bf16.msra.mxu1 %v9580_v38  ;;  %6962 = vmatprep.subr.bf16.mxu0 %v9586_v58  ;;  %v13962_v58 = vld [vmem:[#allocation30_spill] sm:$0xff] }
 0x2c3   : > { %6984 = vmatprep.subr.bf16.mxu1 %v9592_v19 }
 0x2c5   : > { %6963 = vmatpush3.bf16.msra.mxu0 %v9598_v55 }
 0x2c6   : > { %6985 = vmatpush3.bf16.msra.mxu1 %v9604_v20  ;;  %6964 = vmatprep.subr.bf16.mxu0 %v9610_v23 }
 0x2c7   : > { %6986 = vmatprep.subr.bf16.mxu1 %v9616_v17 }
 0x2c9   : > { %6965 = vmatpush3.bf16.msra.mxu0 %v9622_v57  ;;  %v13959_v57 = vld [vmem:[#allocation27_spill] sm:$0xff] }
 0x2ca   : > { %6987 = vmatpush3.bf16.msra.mxu1 %v9628_v21  ;;  %6994 = vmatprep.subr.bf16.mxu0 %v9634_v10  ;;  %v13963_v10 = vld [vmem:[#allocation33_spill] sm:$0xff] }
 0x2cb   : > { %7016 = vmatprep.subr.bf16.mxu1 %v13957_v9 }
 0x349   : > { %v10452_v25 = vpop.xlane.xlu0 %2238 }
 0x34a   : > { %vm2240_vm15 = vcmp.eq.f32.partialorder %v10300_v4, %v10452_v25  ;;  %vm2241_vm13 = vcmp.eq.f32.partialorder %v10306_v37, %v10452_v25  ;;  %vm2242_vm12 = vcmp.eq.f32.partialorder %v10314_v53, %v10452_v25  ;;  %vm2243_vm10 = vcmp.eq.f32.partialorder %v10320_v33, %v10452_v25  ;;  %v13964_v37 = vld [vmem:[#allocation36_spill] sm:$0xff]  ;;  %v13965_v33 = vld [vmem:[#allocation42_spill] sm:$0xff] }
 0x34b   : > { %vm2244_vm9 = vcmp.eq.f32.partialorder %v10326_v6, %v10452_v25  ;;  %vm2245_vm8 = vcmp.eq.f32.partialorder %v10334_v24, %v10452_v25  ;;  %vm2246_vm7 = vcmp.eq.f32.partialorder %v10340_v14, %v10452_v25  ;;  %vm2247_vm3 = vcmp.eq.f32.partialorder %v10346_v49, %v10452_v25  ;;  %v13966_v24 = vld [vmem:[#allocation48_spill] sm:$0xff] }
 0x34c   : > { %vm2248_vm1 = vcmp.eq.f32.partialorder %v10353_v34, %v10452_v25  ;;  %vm2249_vm5 = vcmp.eq.f32.partialorder %v10358_v30, %v10452_v25  ;;  %vm2250_vm2 = vcmp.eq.f32.partialorder %v10363_v22, %v10452_v25  ;;  %vm2251_vm6 = vcmp.eq.f32.partialorder %v10370_v50, %v10452_v25 }
 0x34d   : > { %vm2252_vm4 = vcmp.eq.f32.partialorder %v10375_v15, %v10452_v25  ;;  %vm2253_vm0 = vcmp.eq.f32.partialorder %v10380_v11, %v10452_v25  ;;  %vm2254_vm14 = vcmp.eq.f32.partialorder %v10385_v31, %v10452_v25  ;;  %vm2255_vm11 = vcmp.eq.f32.partialorder %v10390_v61, %v10452_v25 }
 0x34e   : > { %v2256_v17 = vsel %vm2240_vm15, %v13937_v59, 2048  ;;  %v2257_v19 = vsel %vm2241_vm13, %v13939_v41, 2048  ;;  %v2258_v20 = vsel %vm2242_vm12, %v13941_v12, 2048  ;;  %v2259_v21 = vsel %vm2243_vm10, %v13942_v16, 2048 }
 0x34f   : > { %v2260_v26 = vsel %vm2244_vm9, %v13943_v36, 2048  ;;  %v2261_v38 = vsel %vm2245_vm8, %v13944_v52, 2048  ;;  %v2262_v40 = vsel %vm2246_vm7, %v13945_v8, 2048  ;;  %v2263_v55 = vsel %vm2247_vm3, %v13958_v42, 2048 }
 0x350   : > { %v2264_v60 = vsel %vm2248_vm1, %v13959_v57, 2048  ;;  %v2265_v5 = vsel %vm2249_vm5, %v13960_v2, 2048  ;;  %v2266_v47 = vsel %vm2250_vm2, %v13961_v7, 2048  ;;  %v2267_v23 = vsel %vm2251_vm6, %v13962_v58, 2048 }
 0x351   : > { %v2268_v4 = vsel %vm2252_vm4, %v13963_v10, 2048  ;;  %v2269_v53 = vsel %vm2253_vm0, %v13964_v37, 2048  ;;  %v2270_v6 = vsel %vm2254_vm14, %v13965_v33, 2048  ;;  %v2271_v14 = vsel %vm2255_vm11, %v13966_v24, 2048 }
 0x352   : > { %vm13967_vm1 = vcmask 1041408   ;;  %vm2845_vm4 = vcmp.gt.f32.partialorder %v10452_v25, %v10518_v56  ;;  %vm13975_vm11 = vcmask 1024  }
 0x353   : > { %v2272_v29 = vsel %vm13967_vm1, %v2256_v17, 2147483647  ;;  %vm13968_vm2 = vmmov %vm13967_vm1  ;;  %v2846_v15 = vsel %vm2845_vm4, %v10452_v25, %v10518_v56  ;;  %v8379_v25 = vmov 1.0|1.0   ;;  %v13990_v56 = vld [vmem:[#allocation299_spill] sm:$0xff] }
 0x354   : > { %v2273_v49 = vsel %vm13968_vm2, %v2257_v19, 2147483647  ;;  %vm13969_vm3 = vmmov %vm13967_vm1  ;;  %2848 = vst.msk [vmem:[#allocation2] sm:$0x3] %vm13975_vm11, %v2846_v15  ;;  %v13998_v15 = vld [vmem:[#allocation307_spill] sm:$0xff] }
 0x355   : > { %v2274_v34 = vsel %vm13969_vm3, %v2258_v20, 2147483647  ;;  %vm13970_vm0 = vmmov %vm13967_vm1 }
 0x356   : > { %v2275_v30 = vsel %vm13970_vm0, %v2259_v21, 2147483647  ;;  %vm13971_vm5 = vmmov %vm13970_vm0  ;;  %v2297_v43 = vsel %vm13970_vm0, %v2267_v23, 2147483647 }
 0x357   : > { %v2276_v22 = vsel %vm13971_vm5, %v2260_v26, 2147483647  ;;  %vm13972_vm6 = vmmov %vm13970_vm0 }
 0x358   : > { %v2279_v50 = vsel %vm13972_vm6, %v2261_v38, 2147483647  ;;  %vm2277_vm7 = vcmp.lt.s32.totalorder %v2272_v29, %v2276_v22  ;;  %vm13973_vm9 = vmmov %vm13970_vm0 }
 0x359   : > { %vm2280_vm8 = vcmp.lt.s32.totalorder %v2273_v49, %v2279_v50  ;;  %v2282_v11 = vsel %vm13973_vm9, %v2262_v40, 2147483647  ;;  %vm13974_vm10 = vmmov %vm13970_vm0  ;;  %v2278_v31 = vsel %vm2277_vm7, %v2272_v29, %v2276_v22  ;;  %v13992_v29 = vld [vmem:[#allocation301_spill] sm:$0xff] }
 0x35a   : > { %v2285_v63 = vsel %vm13974_vm10, %v2263_v55, 2147483647  ;;  %v2281_v61 = vsel %vm2280_vm8, %v2273_v49, %v2279_v50  ;;  %vm2283_vm12 = vcmp.lt.s32.totalorder %v2274_v34, %v2282_v11  ;;  %vm13976_vm14 = vmmov %vm13970_vm0  ;;  %v13993_v49 = vld [vmem:[#allocation302_spill] sm:$0xff]  ;;  %v13996_v22 = vld [vmem:[#allocation305_spill] sm:$0xff] }
 0x35b   : > { %vm2286_vm13 = vcmp.lt.s32.totalorder %v2275_v30, %v2285_v63  ;;  %v2284_v3 = vsel %vm2283_vm12, %v2274_v34, %v2282_v11  ;;  %v2288_v0 = vsel %vm13976_vm14, %v2264_v60, 2147483647  ;;  %vm13977_vm15 = vmmov %vm13970_vm0  ;;  %v13983_v60 = vmov 0   ;;  %v13994_v34 = vld [vmem:[#allocation303_spill] sm:$0xff]  ;;  %v13997_v50 = vld [vmem:[#allocation306_spill] sm:$0xff] }
 0x35c   : > { %v2287_v32 = vsel %vm2286_vm13, %v2275_v30, %v2285_v63  ;;  %v2291_v46 = vsel %vm13977_vm15, %v2265_v5, 2147483647  ;;  %vm2289_vm1 = vcmp.lt.s32.totalorder %v2278_v31, %v2288_v0  ;;  %vm13978_vm3 = vmmov %vm13970_vm0  ;;  %v2850_v5 = vsel %vm2845_vm4, 1, %v13983_v60  ;;  %v13995_v30 = vld [vmem:[#allocation304_spill] sm:$0xff]  ;;  %v14000_v63 = vld [vmem:[#allocation309_spill] sm:$0xff] }
 0x35d   : > { %vm2292_vm2 = vcmp.lt.s32.totalorder %v2281_v61, %v2291_v46  ;;  %v2294_v28 = vsel %vm13978_vm3, %v2266_v47, 2147483647  ;;  %v2290_v54 = vsel %vm2289_vm1, %v2278_v31, %v2288_v0  ;;  %vm2298_vm6 = vcmp.lt.s32.totalorder %v2287_v32, %v2297_v43  ;;  %vm13979_vm7 = vmmov %vm13970_vm0  ;;  %v13999_v11 = vld [vmem:[#allocation308_spill] sm:$0xff]  ;;  %v14001_v31 = vld [vmem:[#allocation310_spill] sm:$0xff] }
 0x35e   : > { %v2293_v35 = vsel %vm2292_vm2, %v2281_v61, %v2291_v46  ;;  %vm2295_vm5 = vcmp.lt.s32.totalorder %v2284_v3, %v2294_v28  ;;  %v2299_v51 = vsel %vm2298_vm6, %v2287_v32, %v2297_v43  ;;  %v2300_v39 = vsel %vm13979_vm7, %v2268_v4, 2147483647  ;;  %vm13980_vm8 = vmmov %vm13970_vm0  ;;  %v14002_v61 = vld [vmem:[#allocation311_spill] sm:$0xff]  ;;  %v14004_v32 = vld [vmem:[#allocation313_spill] sm:$0xff] }
 0x35f   : > { %v2296_v27 = vsel %vm2295_vm5, %v2284_v3, %v2294_v28  ;;  %v2303_v62 = vsel %vm13980_vm8, %v2269_v53, 2147483647  ;;  %vm2301_vm9 = vcmp.lt.s32.totalorder %v2290_v54, %v2300_v39  ;;  %vm13981_vm11 = vmmov %vm13970_vm0  ;;  %v14003_v3 = vld [vmem:[#allocation312_spill] sm:$0xff]  ;;  %v14005_v0 = vld [vmem:[#allocation314_spill] sm:$0xff] }
 0x360   : > { %vm2304_vm10 = vcmp.lt.s32.totalorder %v2293_v35, %v2303_v62  ;;  %v2306_v18 = vsel %vm13981_vm11, %v2270_v6, 2147483647  ;;  %vm13982_vm12 = vmmov %vm13970_vm0  ;;  %v2302_v44 = vsel %vm2301_vm9, %v2290_v54, %v2300_v39  ;;  %v14006_v46 = vld [vmem:[#allocation315_spill] sm:$0xff]  ;;  %v14007_v28 = vld [vmem:[#allocation316_spill] sm:$0xff] }
 0x361   : > { %v2309_v45 = vsel %vm13982_vm12, %v2271_v14, 2147483647  ;;  %v2305_v13 = vsel %vm2304_vm10, %v2293_v35, %v2303_v62  ;;  %vm2307_vm13 = vcmp.lt.s32.totalorder %v2296_v27, %v2306_v18  ;;  %v13991_v14 = vld [vmem:[#allocation300_spill] sm:$0xff]  ;;  %v14008_v43 = vld [vmem:[#allocation317_spill] sm:$0xff]  ;;  %v14009_v54 = vld [vmem:[#allocation318_spill] sm:$0xff] }
 0x362   : > { %vm2310_vm14 = vcmp.lt.s32.totalorder %v2299_v51, %v2309_v45  ;;  %v2308_v48 = vsel %vm2307_vm13, %v2296_v27, %v2306_v18  ;;  %vm2312_vm15 = vcmp.lt.s32.totalorder %v2302_v44, %v2305_v13  ;;  %v14010_v35 = vld [vmem:[#allocation319_spill] sm:$0xff]  ;;  %v14011_v27 = vld [vmem:[#allocation320_spill] sm:$0xff]  ;;  %v14013_v39 = vld [vmem:[#allocation322_spill] sm:$0xff] }
 0x363   : > { %v2311_v1 = vsel %vm2310_vm14, %v2299_v51, %v2309_v45  ;;  %v2313_v9 = vsel %vm2312_vm15, %v2302_v44, %v2305_v13  ;;  %v14012_v51 = vld [vmem:[#allocation321_spill] sm:$0xff]  ;;  %v14014_v62 = vld [vmem:[#allocation323_spill] sm:$0xff]  ;;  %v14015_v18 = vld [vmem:[#allocation324_spill] sm:$0xff] }
 0x364   : > { %vm2314_vm1 = vcmp.lt.s32.totalorder %v2308_v48, %v2311_v1  ;;  %v14019_v45 = vld [vmem:[#allocation328_spill] sm:$0xff]  ;;  %v14021_v44 = vld [vmem:[#allocation330_spill] sm:$0xff]  ;;  %v14022_v13 = vld [vmem:[#allocation331_spill] sm:$0xff] }
 0x365   : > { %v2315_v17 = vsel %vm2314_vm1, %v2308_v48, %v2311_v1  ;;  %v14023_v48 = vld [vmem:[#allocation332_spill] sm:$0xff]  ;;  %v14024_v1 = vld [vmem:[#allocation333_spill] sm:$0xff]  ;;  %v14034_v60 = vld [vmem:[#allocation343_spill] sm:$0xff] }
 0x366   : > { %vm2316_vm2 = vcmp.lt.s32.totalorder %v2313_v9, %v2315_v17 }
 0x367   : > { %v2317_v19 = vsel %vm2316_vm2, %v2313_v9, %v2315_v17  ;;  %v14025_v9 = vld [vmem:[#allocation334_spill] sm:$0xff]  ;;  %v14026_v17 = vld [vmem:[#allocation335_spill] sm:$0xff] }
 0x368   : > { %v2319_v20 = vshra.s32 %v2317_v19, 16  ;;  %v2318_v26 = vand.u32 65535, %v2317_v19  ;;  %v14027_v19 = vld [vmem:[#allocation336_spill] sm:$0xff] }
 0x36a   : > { %v2321_v21 = vcvt.s32.f32 %v2319_v20  ;;  %v2320_v40 = vcvt.s32.f32 %v2318_v26  ;;  %v14028_v20 = vld [vmem:[#allocation337_spill] sm:$0xff]  ;;  %v14030_v26 = vld [vmem:[#allocation339_spill] sm:$0xff] }
 0x36c   : > { %2322 = vmin.xlane.f32.xlu0 %v2321_v21 }
 0x3f5   : > { %v2323_v38 = vpop.xlane.xlu0 %2322 }
 0x3f6   : > { %vm2324_vm3 = vcmp.eq.f32.partialorder %v2321_v21, %v2323_v38  ;;  %v2329_v47 = vcvt.f32.s32 %v2323_v38  ;;  %v14029_v21 = vld [vmem:[#allocation338_spill] sm:$0xff]  ;;  %v14031_v38 = vld [vmem:[#allocation340_spill] sm:$0xff] }
 0x3f7   : > { %v2325_v55 = vsel %vm2324_vm3, %v2320_v40, inf  ;;  %v14032_v40 = vld [vmem:[#allocation341_spill] sm:$0xff] }
 0x3f8   : > { %2326 = vmin.xlane.f32.xlu1 %v2325_v55  ;;  %v2330_v4 = vshll.u32 %v2329_v47, 16  ;;  %v14033_v55 = vld [vmem:[#allocation342_spill] sm:$0xff]  ;;  %v14036_v47 = vld [vmem:[#allocation345_spill] sm:$0xff] }
 0x409   : > { %2852 = vperm.xlu1 %8181, %v2850_v5   ;;  %v14035_v5 = vld [vmem:[#allocation344_spill] sm:$0xff] }
 0x481   : > { %v2327_v23 = vpop.xlane.xlu1 %2326 }
 0x482   : > { %v2328_v53 = vcvt.f32.s32 %v2327_v23  ;;  %v14037_v23 = vld [vmem:[#allocation346_spill] sm:$0xff] }
 0x484   : > { %v10580_v6 = vadd.s32 %v2330_v4, %v2328_v53  ;;  %v14038_v4 = vld [vmem:[#allocation347_spill] sm:$0xff]  ;;  %v14039_v53 = vld [vmem:[#allocation348_spill] sm:$0xff] }
 0x486   : > { %vm2333_vm0 = vcmp.eq.s32.totalorder %v13939_v41, %v10580_v6  ;;  %vm2335_vm5 = vcmp.eq.s32.totalorder %v13942_v16, %v10580_v6  ;;  %vm2332_vm6 = vcmp.eq.s32.totalorder %v13937_v59, %v10580_v6  ;;  %vm2334_vm4 = vcmp.eq.s32.totalorder %v13941_v12, %v10580_v6  ;;  %v13984_v59 = vld [vmem:[#allocation293_spill] sm:$0xff]  ;;  %v13985_v41 = vld [vmem:[#allocation294_spill] sm:$0xff]  ;;  %v13986_v12 = vld [vmem:[#allocation295_spill] sm:$0xff] }
 0x487   : > { %vm6490_vm7 = vmpackc.low %vm2333_vm0, %vm2333_vm0  ;;  %vm2337_vm9 = vcmp.eq.s32.totalorder %v13944_v52, %v10580_v6  ;;  %vm2339_vm11 = vcmp.eq.s32.totalorder %v13958_v42, %v10580_v6  ;;  %v13987_v16 = vld [vmem:[#allocation296_spill] sm:$0xff]  ;;  %v13988_v52 = vld [vmem:[#allocation297_spill] sm:$0xff]  ;;  %vm2336_vm15 = vcmp.eq.s32.totalorder %v13943_v36, %v10580_v6  ;;  %vm2338_vm1 = vcmp.eq.s32.totalorder %v13945_v8, %v10580_v6 }
 0x488   : > { %6491 = vmatprep.mubr.msk.bf16.mxu0 %vm6490_vm7, %v8379_v25  ;;  %vm6494_vm8 = vmpackc.low %vm2335_vm5, %vm2335_vm5  ;;  %v13989_v42 = vld [vmem:[#allocation298_spill] sm:$0xff]  ;;  %vm2341_vm2 = vcmp.eq.s32.totalorder %v13960_v2, %v10580_v6  ;;  %vm2343_vm0 = vcmp.eq.s32.totalorder %v13962_v58, %v10580_v6  ;;  %v14016_v36 = vld [vmem:[#allocation325_spill] sm:$0xff] }
 0x489   : > { %6495 = vmatprep.mubr.msk.bf16.mxu1 %vm6494_vm8, %v8379_v25  ;;  %vm6492_vm10 = vmpackc.low %vm2332_vm6, %vm2332_vm6  ;;  %v14017_v8 = vld [vmem:[#allocation326_spill] sm:$0xff]  ;;  %v14018_v2 = vld [vmem:[#allocation327_spill] sm:$0xff]  ;;  %vm2342_vm8 = vcmp.eq.s32.totalorder %v13961_v7, %v10580_v6 }
 0x48a   : > { %6493 = vmatmul.mubr.msk.bf16.vlgmr.msra.gmra.mxu0 %vm6492_vm10, %v8379_v25  ;;  %vm6496_vm12 = vmpackc.low %vm2334_vm4, %vm2334_vm4  ;;  %v14020_v58 = vld [vmem:[#allocation329_spill] sm:$0xff]  ;;  %vm2340_vm4 = vcmp.eq.s32.totalorder %v13959_v57, %v10580_v6  ;;  %v14049_v7 = vld [vmem:[#allocation358_spill] sm:$0xff] }
 0x48b   : > { %6497 = vmatmul.mubr.msk.bf16.vlgmr.msra.gmra.mxu1 %vm6496_vm12, %v8379_v25  ;;  %6995 = vmatpush3.bf16.msra.mxu0 %v13984_v59  ;;  %vm6498_vm13 = vmpackc.low %vm2337_vm9, %vm2337_vm9  ;;  %v14040_v59 = vld [vmem:[#allocation349_spill] sm:$0xff]  ;;  %vm2345_vm9 = vcmp.eq.s32.totalorder %v13964_v37, %v10580_v6  ;;  %v14050_v37 = vld [vmem:[#allocation359_spill] sm:$0xff] }
 0x48c   : > { %7017 = vmatpush3.bf16.msra.mxu1 %v13985_v41  ;;  %6499 = vmatprep.mubr.msk.bf16.mxu0 %vm6498_vm13, %v8379_v25  ;;  %vm6502_vm14 = vmpackc.low %vm2339_vm11, %vm2339_vm11  ;;  %v14041_v41 = vld [vmem:[#allocation350_spill] sm:$0xff]  ;;  %vm2347_vm11 = vcmp.eq.s32.totalorder %v13966_v24, %v10580_v6  ;;  %v14048_v57 = vld [vmem:[#allocation357_spill] sm:$0xff] }
 0x48d   : > { %6503 = vmatprep.mubr.msk.bf16.mxu1 %vm6502_vm14, %v8379_v25  ;;  %6996 = vmatprep.subr.bf16.mxu0 %v13986_v12  ;;  %vm6500_vm3 = vmpackc.low %vm2336_vm15, %vm2336_vm15  ;;  %v14042_v12 = vld [vmem:[#allocation351_spill] sm:$0xff]  ;;  %v14052_v24 = vld [vmem:[#allocation361_spill] sm:$0xff]  ;;  %vm2344_vm15 = vcmp.eq.s32.totalorder %v13963_v10, %v10580_v6 }
 0x48e   : > { %7018 = vmatprep.subr.bf16.mxu1 %v13987_v16  ;;  %vm6504_vm5 = vmpackc.low %vm2338_vm1, %vm2338_vm1  ;;  %v14043_v16 = vld [vmem:[#allocation352_spill] sm:$0xff]  ;;  %vm2346_vm1 = vcmp.eq.s32.totalorder %v13965_v33, %v10580_v6 }
 0x48f   : > { %6997 = vmatpush3.bf16.msra.mxu0 %v13988_v52  ;;  %vm6506_vm6 = vmpackc.low %vm2341_vm2, %vm2341_vm2  ;;  %v14044_v52 = vld [vmem:[#allocation353_spill] sm:$0xff] }
 0x490   : > { %7019 = vmatpush3.bf16.msra.mxu1 %v13989_v42  ;;  %6998 = vmatprep.subr.bf16.mxu0 %v13990_v56  ;;  %vm6510_vm7 = vmpackc.low %vm2343_vm0, %vm2343_vm0  ;;  %v14045_v42 = vld [vmem:[#allocation354_spill] sm:$0xff]  ;;  %v14046_v56 = vld [vmem:[#allocation355_spill] sm:$0xff]  ;;  %vm2856_vm0 = vcmask 254976  }
 0x491   : > { %7020 = vmatprep.subr.bf16.mxu1 %v13991_v14  ;;  %vm6508_vm10 = vmpackc.low %vm2340_vm4, %vm2340_vm4  ;;  %v14047_v14 = vld [vmem:[#allocation356_spill] sm:$0xff] }
 0x492   : > { %vm6512_vm12 = vmpackc.low %vm2342_vm8, %vm2342_vm8 }
 0x493   : > { %6999 = vmatpush3.bf16.msra.mxu0 %v13992_v29  ;;  %vm6514_vm13 = vmpackc.low %vm2345_vm9, %vm2345_vm9  ;;  %v14051_v29 = vld [vmem:[#allocation360_spill] sm:$0xff] }
 0x494   : > { %7021 = vmatpush3.bf16.msra.mxu1 %v13993_v49  ;;  %7000 = vmatprep.subr.bf16.mxu0 %v13994_v34  ;;  %vm6518_vm14 = vmpackc.low %vm2347_vm11, %vm2347_vm11  ;;  %v14053_v49 = vld [vmem:[#allocation362_spill] sm:$0xff]  ;;  %v14054_v34 = vld [vmem:[#allocation363_spill] sm:$0xff] }
 0x495   : > { %7022 = vmatprep.subr.bf16.mxu1 %v13995_v30  ;;  %v14055_v30 = vld [vmem:[#allocation364_spill] sm:$0xff]  ;;  %vm6516_vm2 = vmpackc.low %vm2344_vm15, %vm2344_vm15 }
 0x497   : > { %7001 = vmatpush3.bf16.msra.mxu0 %v13996_v22  ;;  %v14056_v22 = vld [vmem:[#allocation365_spill] sm:$0xff] }
 0x498   : > { %7023 = vmatpush3.bf16.msra.mxu1 %v13997_v50  ;;  %7002 = vmatprep.subr.bf16.mxu0 %v13998_v15  ;;  %v14057_v50 = vld [vmem:[#allocation366_spill] sm:$0xff]  ;;  %v14058_v15 = vld [vmem:[#allocation367_spill] sm:$0xff] }
 0x499   : > { %7024 = vmatprep.subr.bf16.mxu1 %v13999_v11  ;;  %v14059_v11 = vld [vmem:[#allocation368_spill] sm:$0xff] }
 0x49b   : > { %7003 = vmatpush3.bf16.msra.mxu0 %v14000_v63  ;;  %v14060_v63 = vld [vmem:[#allocation369_spill] sm:$0xff] }
 0x49c   : > { %7025 = vmatpush3.bf16.msra.mxu1 %v14001_v31  ;;  %7004 = vmatprep.subr.bf16.mxu0 %v14002_v61  ;;  %v14061_v31 = vld [vmem:[#allocation370_spill] sm:$0xff]  ;;  %v14062_v61 = vld [vmem:[#allocation371_spill] sm:$0xff] }
 0x49d   : > { %7026 = vmatprep.subr.bf16.mxu1 %v14003_v3  ;;  %v14063_v3 = vld [vmem:[#allocation372_spill] sm:$0xff] }
 0x49f   : > { %7005 = vmatpush3.bf16.msra.mxu0 %v14004_v32  ;;  %v14064_v32 = vld [vmem:[#allocation373_spill] sm:$0xff] }
 0x4a0   : > { %7027 = vmatpush3.bf16.msra.mxu1 %v14005_v0  ;;  %7006 = vmatprep.subr.bf16.mxu0 %v14006_v46  ;;  %v14065_v0 = vld [vmem:[#allocation374_spill] sm:$0xff]  ;;  %v14066_v46 = vld [vmem:[#allocation375_spill] sm:$0xff] }
 0x4a1   : > { %7028 = vmatprep.subr.bf16.mxu1 %v14007_v28  ;;  %v14067_v28 = vld [vmem:[#allocation376_spill] sm:$0xff] }
 0x4a3   : > { %7007 = vmatpush3.bf16.msra.mxu0 %v14008_v43  ;;  %v14068_v43 = vld [vmem:[#allocation377_spill] sm:$0xff] }
 0x4a4   : > { %7029 = vmatpush3.bf16.msra.mxu1 %v14009_v54  ;;  %7008 = vmatprep.subr.bf16.mxu0 %v14010_v35  ;;  %v14069_v54 = vld [vmem:[#allocation378_spill] sm:$0xff]  ;;  %v14070_v35 = vld [vmem:[#allocation379_spill] sm:$0xff] }
 0x4a5   : > { %7030 = vmatprep.subr.bf16.mxu1 %v14011_v27  ;;  %v14071_v27 = vld [vmem:[#allocation380_spill] sm:$0xff] }
 0x4a7   : > { %7009 = vmatpush3.bf16.msra.mxu0 %v14012_v51  ;;  %v14072_v51 = vld [vmem:[#allocation381_spill] sm:$0xff] }
 0x4a8   : > { %7031 = vmatpush3.bf16.msra.mxu1 %v14013_v39  ;;  %7038 = vmatprep.subr.bf16.mxu0 %v14014_v62  ;;  %v14073_v39 = vld [vmem:[#allocation382_spill] sm:$0xff]  ;;  %v14074_v62 = vld [vmem:[#allocation383_spill] sm:$0xff] }
 0x4a9   : > { %7060 = vmatprep.subr.bf16.mxu1 %v14015_v18  ;;  %v14075_v18 = vld [vmem:[#allocation384_spill] sm:$0xff] }
 0x4aa   : > { %6501 = vmatmul.mubr.msk.bf16.vlgmr.msra.gmra.mxu0 %vm6500_vm3, %v8379_v25  ;;  %vm6520_vm3 = vmpackc.low %vm2346_vm1, %vm2346_vm1 }
 0x4ab   : > { %6505 = vmatmul.mubr.msk.bf16.vlgmr.msra.gmra.mxu1 %vm6504_vm5, %v8379_v25  ;;  %7039 = vmatpush3.bf16.msra.mxu0 %v14016_v36  ;;  %v14076_v36 = vld [vmem:[#allocation385_spill] sm:$0xff] }
 0x4ac   : > { %6507 = vmatprep.mubr.msk.bf16.mxu0 %vm6506_vm6, %v8379_v25  ;;  %7061 = vmatpush3.bf16.msra.mxu1 %v14017_v8  ;;  %v14077_v8 = vld [vmem:[#allocation386_spill] sm:$0xff] }
 0x4ad   : > { %6511 = vmatprep.mubr.msk.bf16.mxu1 %vm6510_vm7, %v8379_v25  ;;  %7040 = vmatprep.subr.bf16.mxu0 %v14018_v2 }
 0x4ae   : > { %7062 = vmatprep.subr.bf16.mxu1 %v14019_v45 }
 0x4af   : > { %7041 = vmatpush3.bf16.msra.mxu0 %v14020_v58 }
 0x4b0   : > { %7063 = vmatpush3.bf16.msra.mxu1 %v14021_v44  ;;  %7042 = vmatprep.subr.bf16.mxu0 %v14022_v13 }
 0x4b1   : > { %7064 = vmatprep.subr.bf16.mxu1 %v14023_v48 }
 0x4b3   : > { %7043 = vmatpush3.bf16.msra.mxu0 %v14024_v1 }
 0x4b4   : > { %7065 = vmatpush3.bf16.msra.mxu1 %v14025_v9  ;;  %7044 = vmatprep.subr.bf16.mxu0 %v14026_v17 }
 0x4b5   : > { %7066 = vmatprep.subr.bf16.mxu1 %v14027_v19 }
 0x4b7   : > { %7045 = vmatpush3.bf16.msra.mxu0 %v14028_v20 }
 0x4b8   : > { %7067 = vmatpush3.bf16.msra.mxu1 %v14029_v21  ;;  %7046 = vmatprep.subr.bf16.mxu0 %v14030_v26 }
 0x4b9   : > { %7068 = vmatprep.subr.bf16.mxu1 %v14031_v38 }
 0x4bb   : > { %7047 = vmatpush3.bf16.msra.mxu0 %v14032_v40 }
 0x4bc   : > { %7069 = vmatpush3.bf16.msra.mxu1 %v14033_v55  ;;  %7048 = vmatprep.subr.bf16.mxu0 %v14034_v60 }
 0x4bd   : > { %7070 = vmatprep.subr.bf16.mxu1 %v14035_v5 }
 0x4bf   : > { %7049 = vmatpush3.bf16.msra.mxu0 %v14036_v47 }
 0x4c0   : > { %7071 = vmatpush3.bf16.msra.mxu1 %v14037_v23  ;;  %7050 = vmatprep.subr.bf16.mxu0 %v14038_v4 }
 0x4c1   : > { %7072 = vmatprep.subr.bf16.mxu1 %v14039_v53 }
 0x4c3   : > { %7051 = vmatpush3.bf16.msra.mxu0 %v14040_v59 }
 0x4c4   : > { %7073 = vmatpush3.bf16.msra.mxu1 %v14041_v41  ;;  %7052 = vmatprep.subr.bf16.mxu0 %v14042_v12 }
 0x4c5   : > { %7074 = vmatprep.subr.bf16.mxu1 %v14043_v16 }
 0x4c7   : > { %7053 = vmatpush3.bf16.msra.mxu0 %v14044_v52 }
 0x4c8   : > { %7075 = vmatpush3.bf16.msra.mxu1 %v14045_v42  ;;  %7082 = vmatprep.subr.bf16.mxu0 %v14046_v56 }
 0x4c9   : > { %7104 = vmatprep.subr.bf16.mxu1 %v14047_v14 }
 0x4ca   : > { %6509 = vmatmul.mubr.msk.bf16.vlgmr.msra.gmra.mxu0 %vm6508_vm10, %v8379_v25 }
 0x4cb   : > { %6513 = vmatmul.mubr.msk.bf16.vlgmr.msra.gmra.mxu1 %vm6512_vm12, %v8379_v25  ;;  %7083 = vmatpush3.bf16.msra.mxu0 %v14048_v57 }
 0x4cc   : > { %6515 = vmatprep.mubr.msk.bf16.mxu0 %vm6514_vm13, %v8379_v25  ;;  %7105 = vmatpush3.bf16.msra.mxu1 %v14049_v7 }
 0x4cd   : > { %6519 = vmatprep.mubr.msk.bf16.mxu1 %vm6518_vm14, %v8379_v25  ;;  %7084 = vmatprep.subr.bf16.mxu0 %v14050_v37 }
 0x4ce   : > { %7106 = vmatprep.subr.bf16.mxu1 %v14051_v29 }
 0x4cf   : > { %7085 = vmatpush3.bf16.msra.mxu0 %v14052_v24 }
 0x4d0   : > { %7107 = vmatpush3.bf16.msra.mxu1 %v14053_v49  ;;  %7086 = vmatprep.subr.bf16.mxu0 %v14054_v34 }
 0x4d1   : > { %7108 = vmatprep.subr.bf16.mxu1 %v14055_v30  ;;  %v2853_v30 = vpop.permute.xlu1 %2852 }
 0x4d2   : > { %vm2854_vm5 = vcmp.eq.s32.totalorder %v2853_v30, 1 }
 0x4d3   : > { %7087 = vmatpush3.bf16.msra.mxu0 %v14056_v22 }
 0x4d4   : > { %7109 = vmatpush3.bf16.msra.mxu1 %v14057_v50  ;;  %7088 = vmatprep.subr.bf16.mxu0 %v14058_v15 }
 0x4d5   : > { %7110 = vmatprep.subr.bf16.mxu1 %v14059_v11  ;;  %v2849_v11 = vld [vmem:[#allocation3] sm:$0x3] }
 0x4d7   : > { %7089 = vmatpush3.bf16.msra.mxu0 %v14060_v63 }
 0x4d8   : > { %7111 = vmatpush3.bf16.msra.mxu1 %v14061_v31  ;;  %7090 = vmatprep.subr.bf16.mxu0 %v14062_v61 }
 0x4d9   : > { %7112 = vmatprep.subr.bf16.mxu1 %v14063_v3 }
 0x4db   : > { %7091 = vmatpush3.bf16.msra.mxu0 %v14064_v32 }
 0x4dc   : > { %7113 = vmatpush3.bf16.msra.mxu1 %v14065_v0  ;;  %7092 = vmatprep.subr.bf16.mxu0 %v14066_v46 }
 0x4dd   : > { %7114 = vmatprep.subr.bf16.mxu1 %v14067_v28 }
 0x4df   : > { %7093 = vmatpush3.bf16.msra.mxu0 %v14068_v43 }
 0x4e0   : > { %7115 = vmatpush3.bf16.msra.mxu1 %v14069_v54  ;;  %7094 = vmatprep.subr.bf16.mxu0 %v14070_v35 }
 0x4e1   : > { %7116 = vmatprep.subr.bf16.mxu1 %v14071_v27 }
 0x4e3   : > { %7095 = vmatpush3.bf16.msra.mxu0 %v14072_v51 }
 0x4e4   : > { %7117 = vmatpush3.bf16.msra.mxu1 %v14073_v39  ;;  %7096 = vmatprep.subr.bf16.mxu0 %v14074_v62 }
 0x4e5   : > { %7118 = vmatprep.subr.bf16.mxu1 %v14075_v18 }
 0x4e7   : > { %7097 = vmatpush3.bf16.msra.mxu0 %v14076_v36 }
 0x4e8   : > { %7119 = vmatpush3.bf16.msra.mxu1 %v14077_v8 }
 0x4ea   : > { %6517 = vmatmul.mubr.msk.bf16.vlgmr.msra.gmra.mxu0 %vm6516_vm2, %v8379_v25 }
 0x4eb   : > { %6521 = vmatmul.mubr.msk.bf16.vlgmr.msra.gmra.mxu1 %vm6520_vm3, %v8379_v25 }
 0x54a   : > { %v6966_v2 = vpop.f32.mrf.mxu0 }
 0x54b   : > { %v6988_v45 = vpop.f32.mrf.mxu1 }
 0x54c   : > { %v6967_v58 = vpop.f32.mrf.mxu0 }
 0x54d   : > { %v6968_v44 = vadd.f32 %v6967_v58, %v6966_v2  ;;  %v6989_v13 = vpop.f32.mrf.mxu1 }
 0x54e   : > { %v6990_v48 = vadd.f32 %v6989_v13, %v6988_v45  ;;  %v6969_v10 = vpop.f32.mrf.mxu0 }
 0x54f   : > { %v6991_v1 = vpop.f32.mrf.mxu1 }
 0x550   : > { %v2599_v9 = vadd.f32 %v6990_v48, %v6968_v44  ;;  %v6970_v17 = vpop.f32.mrf.mxu0 }
 0x551   : > { %v6992_v19 = vpop.f32.mrf.mxu1 }
 0x56a   : > { %v7010_v33 = vpop.f32.mrf.mxu0 }
 0x56b   : > { %v7032_v6 = vpop.f32.mrf.mxu1 }
 0x56c   : > { %v7011_v20 = vpop.f32.mrf.mxu0 }
 0x56d   : > { %v7033_v21 = vpop.f32.mrf.mxu1  ;;  %v7012_v41 = vadd.f32 %v7011_v20, %v7010_v33 }
 0x56e   : > { %v7013_v26 = vpop.f32.mrf.mxu0  ;;  %v7034_v16 = vadd.f32 %v7033_v21, %v7032_v6 }
 0x56f   : > { %v7035_v38 = vpop.f32.mrf.mxu1  ;;  %v2639_v12 = vadd.f32 %v7012_v41, %v2599_v9 }
 0x570   : > { %v7014_v40 = vpop.f32.mrf.mxu0 }
 0x571   : > { %v7036_v55 = vpop.f32.mrf.mxu1  ;;  %v2679_v42 = vadd.f32 %v7034_v16, %v2639_v12 }
 0x58a   : > { %v7054_v25 = vpop.f32.mrf.mxu0 }
 0x58b   : > { %v7076_v60 = vpop.f32.mrf.mxu1 }
 0x58c   : > { %v7055_v5 = vpop.f32.mrf.mxu0 }
 0x58d   : > { %v7077_v47 = vpop.f32.mrf.mxu1  ;;  %v7056_v52 = vadd.f32 %v7055_v5, %v7054_v25 }
 0x58e   : > { %v7057_v23 = vpop.f32.mrf.mxu0  ;;  %v7078_v57 = vadd.f32 %v7077_v47, %v7076_v60 }
 0x58f   : > { %v7079_v4 = vpop.f32.mrf.mxu1  ;;  %v2719_v56 = vadd.f32 %v7056_v52, %v2679_v42 }
 0x590   : > { %v7058_v53 = vpop.f32.mrf.mxu0 }
 0x591   : > { %v7080_v59 = vpop.f32.mrf.mxu1  ;;  %v2759_v29 = vadd.f32 %v7078_v57, %v2719_v56 }
 0x5aa   : > { %v7098_v14 = vpop.f32.mrf.mxu0 }
 0x5ab   : > { %v7120_v7 = vpop.f32.mrf.mxu1 }
 0x5ac   : > { %v7099_v37 = vpop.f32.mrf.mxu0 }
 0x5ad   : > { %v7100_v24 = vadd.f32 %v7099_v37, %v7098_v14  ;;  %v7121_v49 = vpop.f32.mrf.mxu1 }
 0x5ae   : > { %v7101_v34 = vpop.f32.mrf.mxu0  ;;  %v7122_v50 = vadd.f32 %v7121_v49, %v7120_v7 }
 0x5af   : > { %v2799_v22 = vadd.f32 %v7100_v24, %v2759_v29  ;;  %v7123_v15 = vpop.f32.mrf.mxu1 }
 0x5b0   : > { %v7102_v63 = vpop.f32.mrf.mxu0  ;;  %2860 = sbr.rel (%p6522_p11) target bundleno = 1866 (0x74a), region = 68 }
 0x5b1   : > { %v2839_v31 = vadd.f32 %v7122_v50, %v2799_v22  ;;  %v7124_v61 = vpop.f32.mrf.mxu1 }
 0x5b3   : > { %v2855_v3 = vsel %vm2854_vm5, %v2839_v31, %v2849_v11 }
 0x5b4   : > { %2857 = vst.msk [vmem:[#allocation3] sm:$0x3] %vm2856_vm0, %v2855_v3 }
 0x5b5   : > { %v8183_v32 = vld [vmem:[%s14078_s7 + $0x8] sm:$0xff]   ;;  %v8380_v0 = vmov 0.0   ;;  %v8184_v46 = vld [vmem:[%s14078_s7] sm:$0xff]   ;;  %vm8381_vm6 = vmmov 0   ;;  %vm14079_vm7 = vcmask 261120   ;;  %vm14080_vm4 = vcmask 1041408  }
 0x5b6   : > { %7686 = vmatprep.subr.bf16.mxu0 %v8380_v0  ;;  %7694 = vmatprep.subr.bf16.mxu1 %v8380_v0  ;;  %v6523_v54 = vld [vmem:[%s13062_s8] ss:$0 sm:$0xff]  ;;  %vm14081_vm8 = vcmask 1024  }
 0x5b7   : > { %7687 = vmatpush3.bf16.msra.mxu0 %v8183_v32  ;;  %7690 = vmatprep.mubr.msk.bf16.mxu0 %vm8381_vm6, %v8380_v0 }
 0x5b8   : > { %7688 = vmatprep.subr.bf16.mxu0 %v8380_v0  ;;  %7695 = vmatpush3.bf16.xpose.msra.mxu1 %v8183_v32 }
 0x5b9   : > { %7696 = vmatprep.subr.bf16.mxu1 %v8380_v0  ;;  %7698 = vmatprep.mubr.msk.bf16.mxu1 %vm8381_vm6, %v8380_v0 }
 0x5bb   : > { %v2861_v28 = vld [vmem:[#allocation3] sm:$0x3]  ;;  %7689 = vmatpush3.bf16.msra.mxu0 %v8184_v46 }
 0x5bc   : > { %v2862_v43 = vpack.c.bf16 %v2861_v28, %v2861_v28 }
 0x5be   : > { %7691 = vmatmul.mubr.msk.bf16.vlgmr.msra.gmra.mxu0 %vm14079_vm7, %v2862_v43 }
 0x5c0   : > { %7697 = vmatpush3.bf16.xpose.msra.mxu1 %v8184_v46 }
 0x67e   : > { %v2923_v35 = vpop.f32.mrf.mxu0 }
 0x67f   : > { %v2924_v27 = vadd.f32 %v6523_v54, %v2923_v35 }
 0x680   : > { %v7692_v51 = vpop.f32.mrf.mxu0 }
 0x681   : > { %v2929_v39 = vpack.c.bf16 %v2924_v27, %v2924_v27  ;;  %v2971_v62 = vmul.f32 %v6523_v54, %v2924_v27 }
 0x682   : > { %v2926_v18 = vpop.f32.mrf.mxu0 }
 0x683   : > { %7699 = vmatmul.mubr.bf16.vlgmr.msra.gmra.mxu1 %v2929_v39  ;;  %v2972_v36 = vsel %vm14080_vm4, %v2971_v62, 0.0 }
 0x684   : > { %v7693_v8 = vpop.f32.mrf.mxu0  ;;  %2973 = vadd.xlane.f32.xlu0 %v2972_v36 }
 0x70d   : > { %v2974_v2 = vpop.xlane.xlu0 %2973 }
 0x70e   : > { %v2975_v45 = vmul.f32 0.088388346, %v2974_v2 }
 0x710   : > { %2980 = vst.msk [vmem:[%s2979_s21] sm:$0x3] %vm14081_vm8, %v2975_v45 }
 0x743   : > { %v2964_v58 = vpop.f32.mrf.mxu1 }
 0x744   : > { %v2970_v44 = vmul.f32 0.088388346, %v2964_v58 }
 0x745   : > { %v7700_v13 = vpop.f32.mrf.mxu1 }
 0x746   : > { %2978 = vst.msk [vmem:[%s2977_s1] sm:$0x3] %vm2856_vm0, %v2970_v44 }
 0x747   : > { %v2967_v48 = vpop.f32.mrf.mxu1 }
 0x749   : > { %v7701_v10 = vpop.f32.mrf.mxu1 }
 0x74a PF: > { %p6528_p12 = scmp.ne.s32.totalorder %s8357_s17, 1 }
 0x74c   : > { %2984 = sbr.rel (%p6528_p12) target bundleno = 3350 (0xd16), region = 72 }
 0x751   : > { %p6529_p1 = scmp.ne.s32.totalorder %s8599_s2, 1 }
 0x753   : > { %2987 = sbr.rel (%p6529_p1) target bundleno = 1883 (0x75b), region = 76 }
 0x758   : > { %vm2988_vm9 = vcmask 1024   ;;  %vm2991_vm10 = vcmask 254976   ;;  %v8382_v1 = vmov -1e+30   ;;  %v8383_v9 = vmov 0.0  }
 0x759   : > { %2989 = vst.msk [vmem:[#allocation6] sm:$0x3] %vm2988_vm9, %v8382_v1  ;;  %2990 = vst.msk [vmem:[#allocation7] sm:$0x3] %vm2988_vm9, %v8383_v9 }
 0x75a   : > { %2992 = vst.msk [vmem:[#allocation8] sm:$0x3] %vm2991_vm10, %v8383_v9 }
 0x75b PF: > { %v14082_v17 = vld [vmem:[#allocation67_spill] sm:$0xff]  ;;  %v14083_v19 = vld [vmem:[#allocation66_spill] sm:$0xff]  ;;  %vm3644_vm11 = vcmask 261120   ;;  %v14091_v5 = vld [vmem:[#allocation65_spill] sm:$0xff]  ;;  %s6530_s2 = sshll.u32 %s8566_s27, 1  ;;  %vm5457_vm12 = vcmask 1041408  }
 0x75c   : > { %v10744_v33 = vcombine.low %v14083_v19, %v14082_v17  ;;  %v14084_v6 = vld [vmem:[#allocation99_spill] sm:$0xff]  ;;  %v14085_v20 = vld [vmem:[#allocation98_spill] sm:$0xff]  ;;  %v14092_v47 = vld [vmem:[#allocation64_spill] sm:$0xff]  ;;  %s2994_s23 = scalar_lea.vmem [#allocation4], %s6530_s2  ;;  %s2997_s22 = scalar_lea.vmem [#allocation5], %s6530_s2  ;;  %v8384_v19 = vmov 0  }
 0x75d   : > { %v10748_v21 = vcombine.low %v14085_v20, %v14084_v6  ;;  %v14087_v26 = vld [vmem:[#allocation51_spill] sm:$0xff]  ;;  %v14088_v38 = vld [vmem:[#allocation50_spill] sm:$0xff]  ;;  %v10760_v23 = vcombine.low %v14092_v47, %v14091_v5  ;;  %v14093_v4 = vld [vmem:[#allocation97_spill] sm:$0xff]  ;;  %8185 = vset.pattern.permute.xlu0 %v8384_v19  ;;  %8186 = vset.pattern.permute.xlu1 %v8384_v19  ;;  %p6798_p2 = scmp.ne.s32.totalorder %s8611_s26, 1 }
 0x75e   : > { %v10752_v40 = vcombine.low %v14088_v38, %v14087_v26  ;;  %v14089_v55 = vld [vmem:[#allocation83_spill] sm:$0xff]  ;;  %v14090_v25 = vld [vmem:[#allocation82_spill] sm:$0xff]  ;;  %v14094_v53 = vld [vmem:[#allocation96_spill] sm:$0xff]  ;;  %8030 = vmatprep.subr.msk.bf16.mxu0 %vm3644_vm11, %v10744_v33 }
 0x75f   : > { %14086 = vst [vmem:[#allocation387_spill] sm:$0xff] %v10748_v21  ;;  %v10756_v60 = vcombine.low %v14090_v25, %v14089_v55  ;;  %v10764_v59 = vcombine.low %v14094_v53, %v14093_v4  ;;  %8038 = vmatprep.subr.msk.bf16.mxu1 %vm3644_vm11, %v10748_v21  ;;  %v14096_v16 = vld [vmem:[#allocation47_spill] sm:$0xff]  ;;  %v14097_v52 = vld [vmem:[#allocation46_spill] sm:$0xff]  ;;  %v14098_v56 = vld [vmem:[#allocation81_spill] sm:$0xff] }
 0x760   : > { %v3670_v41 = vsel %vm3644_vm11, %v10752_v40, 0  ;;  %v10779_v42 = vcombine.low %v14097_v52, %v14096_v16  ;;  %v14099_v14 = vld [vmem:[#allocation80_spill] sm:$0xff]  ;;  %v14100_v37 = vld [vmem:[#allocation63_spill] sm:$0xff]  ;;  %v14101_v29 = vld [vmem:[#allocation62_spill] sm:$0xff] }
 0x761   : > { %14095 = vst [vmem:[#allocation388_spill] sm:$0xff] %v10764_v59  ;;  %7133 = vmatpush3.bf16.xpose.msra.mxu0 %v3670_v41  ;;  %v3718_v12 = vsel %vm3644_vm11, %v10756_v60, 0  ;;  %v10785_v57 = vcombine.low %v14099_v14, %v14098_v56  ;;  %v10791_v24 = vcombine.low %v14101_v29, %v14100_v37  ;;  %v2995_v49 = vld [vmem:[%s2994_s23] sm:$0x3]  ;;  %v14102_v30 = vld [vmem:[#allocation95_spill] sm:$0xff]  ;;  %v14103_v22 = vld [vmem:[#allocation94_spill] sm:$0xff] }
 0x762   : > { %7151 = vmatpush3.bf16.xpose.msra.mxu1 %v3718_v12  ;;  %8031 = vmatprep.subr.msk.bf16.mxu0 %vm3644_vm11, %v10760_v23  ;;  %v3667_v7 = vsel %vm3644_vm11, %v10779_v42, 0  ;;  %v10799_v50 = vcombine.low %v14103_v22, %v14102_v30  ;;  %v10801_v15 = vpack.c.bf16 %v2995_v49, %v2995_v49  ;;  %v14105_v11 = vld [vmem:[#allocation45_spill] sm:$0xff]  ;;  %v14106_v63 = vld [vmem:[#allocation44_spill] sm:$0xff]  ;;  %v14107_v61 = vld [vmem:[#allocation79_spill] sm:$0xff] }
 0x763   : > { %8039 = vmatprep.subr.msk.bf16.mxu1 %vm3644_vm11, %v10764_v59  ;;  %v3715_v34 = vsel %vm3644_vm11, %v10785_v57, 0  ;;  %v10807_v31 = vcombine.low %v14106_v63, %v14105_v11  ;;  %v14108_v3 = vld [vmem:[#allocation78_spill] sm:$0xff]  ;;  %v14109_v46 = vld [vmem:[#allocation61_spill] sm:$0xff]  ;;  %v14110_v28 = vld [vmem:[#allocation60_spill] sm:$0xff] }
 0x764   : > { %14104 = vst [vmem:[#allocation389_spill] sm:$0xff] %v10799_v50  ;;  %v10813_v32 = vcombine.low %v14108_v3, %v14107_v61  ;;  %7148 = vmatprep.mubr.msk.bf16.mxu0 %vm3644_vm11, %v10801_v15  ;;  %7166 = vmatprep.mubr.msk.bf16.mxu1 %vm3644_vm11, %v10801_v15  ;;  %v10823_v43 = vcombine.low %v14110_v28, %v14109_v46  ;;  %v14111_v35 = vld [vmem:[#allocation93_spill] sm:$0xff]  ;;  %v14112_v27 = vld [vmem:[#allocation92_spill] sm:$0xff]  ;;  %v14114_v39 = vld [vmem:[#allocation43_spill] sm:$0xff] }
 0x765   : > { %v3664_v0 = vsel %vm3644_vm11, %v10807_v31, 0  ;;  %v10829_v51 = vcombine.low %v14112_v27, %v14111_v35  ;;  %v14115_v62 = vld [vmem:[#allocation41_spill] sm:$0xff]  ;;  %v14117_v8 = vld [vmem:[#allocation76_spill] sm:$0xff]  ;;  %v14118_v58 = vld [vmem:[#allocation59_spill] sm:$0xff] }
 0x766   : > { %v3712_v54 = vsel %vm3644_vm11, %v10813_v32, 0  ;;  %v10835_v18 = vcombine.low %v14115_v62, %v14114_v39  ;;  %v14116_v36 = vld [vmem:[#allocation77_spill] sm:$0xff]  ;;  %v14119_v44 = vld [vmem:[#allocation58_spill] sm:$0xff]  ;;  %v2998_v48 = vld [vmem:[%s2997_s22] sm:$0x3] }
 0x767   : > { %14113 = vst [vmem:[#allocation390_spill] sm:$0xff] %v10829_v51  ;;  %v10841_v2 = vcombine.low %v14117_v8, %v14116_v36  ;;  %v10847_v13 = vcombine.low %v14119_v44, %v14118_v58  ;;  %v14120_v1 = vld [vmem:[#allocation91_spill] sm:$0xff]  ;;  %v14121_v9 = vld [vmem:[#allocation90_spill] sm:$0xff]  ;;  %3001 = vperm.xlu0 %8185, %v2998_v48   ;;  %v14123_v6 = vld [vmem:[#allocation40_spill] sm:$0xff] }
 0x768   : > { %v3661_v45 = vsel %vm3644_vm11, %v10835_v18, 0  ;;  %v10855_v17 = vcombine.low %v14121_v9, %v14120_v1  ;;  %v14124_v20 = vld [vmem:[#allocation39_spill] sm:$0xff]  ;;  %v14126_v55 = vld [vmem:[#allocation74_spill] sm:$0xff]  ;;  %v14127_v47 = vld [vmem:[#allocation57_spill] sm:$0xff] }
 0x769   : > { %7135 = vmatpush3.bf16.xpose.msra.mxu0 %v3667_v7  ;;  %v3709_v10 = vsel %vm3644_vm11, %v10841_v2, 0  ;;  %v10861_v26 = vcombine.low %v14124_v20, %v14123_v6  ;;  %v14125_v38 = vld [vmem:[#allocation75_spill] sm:$0xff]  ;;  %v14128_v4 = vld [vmem:[#allocation56_spill] sm:$0xff]  ;;  %v14129_v12 = vld [vmem:[#allocation89_spill] sm:$0xff] }
 0x76a   : > { %7153 = vmatpush3.bf16.xpose.msra.mxu1 %v3715_v34  ;;  %8032 = vmatprep.subr.msk.bf16.mxu0 %vm3644_vm11, %v10791_v24  ;;  %14122 = vst [vmem:[#allocation391_spill] sm:$0xff] %v10855_v17  ;;  %v10867_v25 = vcombine.low %v14126_v55, %v14125_v38  ;;  %v10873_v53 = vcombine.low %v14128_v4, %v14127_v47  ;;  %v14130_v16 = vld [vmem:[#allocation88_spill] sm:$0xff]  ;;  %v14131_v56 = vld [vmem:[#allocation38_spill] sm:$0xff]  ;;  %v14132_v14 = vld [vmem:[#allocation37_spill] sm:$0xff] }
 0x76b   : > { %8040 = vmatprep.subr.msk.bf16.mxu1 %vm3644_vm11, %v10799_v50  ;;  %v3658_v5 = vsel %vm3644_vm11, %v10861_v26, 0  ;;  %v10879_v52 = vcombine.low %v14130_v16, %v14129_v12  ;;  %v10885_v7 = vcombine.low %v14132_v14, %v14131_v56  ;;  %v14133_v37 = vld [vmem:[#allocation73_spill] sm:$0xff]  ;;  %v14134_v29 = vld [vmem:[#allocation72_spill] sm:$0xff]  ;;  %v14135_v30 = vld [vmem:[#allocation55_spill] sm:$0xff] }
 0x76c   : > { %v3706_v41 = vsel %vm3644_vm11, %v10867_v25, 0  ;;  %v10891_v49 = vcombine.low %v14134_v29, %v14133_v37  ;;  %v14136_v22 = vld [vmem:[#allocation54_spill] sm:$0xff]  ;;  %v14137_v61 = vld [vmem:[#allocation87_spill] sm:$0xff]  ;;  %v14143_v36 = vld [vmem:[#allocation53_spill] sm:$0xff] }
 0x76d   : > { %v3655_v34 = vsel %vm3644_vm11, %v10885_v7, 0  ;;  %v10897_v11 = vcombine.low %v14136_v22, %v14135_v30  ;;  %v14138_v3 = vld [vmem:[#allocation86_spill] sm:$0xff]  ;;  %v14139_v46 = vld [vmem:[#allocation35_spill] sm:$0xff]  ;;  %v14144_v8 = vld [vmem:[#allocation52_spill] sm:$0xff] }
 0x76e   : > { %v3703_v63 = vsel %vm3644_vm11, %v10891_v49, 0  ;;  %v14140_v28 = vld [vmem:[#allocation34_spill] sm:$0xff]  ;;  %v14141_v35 = vld [vmem:[#allocation71_spill] sm:$0xff]  ;;  %v14145_v44 = vld [vmem:[#allocation85_spill] sm:$0xff] }
 0x76f   : > { %v14142_v27 = vld [vmem:[#allocation70_spill] sm:$0xff]  ;;  %v14146_v48 = vld [vmem:[#allocation84_spill] sm:$0xff]  ;;  %v14148_v9 = vld [vmem:[#allocation31_spill] sm:$0xff] }
 0x770   : > { %v10915_v39 = vcombine.low %v14142_v27, %v14141_v35  ;;  %v14147_v1 = vld [vmem:[#allocation32_spill] sm:$0xff]  ;;  %v14149_v6 = vld [vmem:[#allocation69_spill] sm:$0xff]  ;;  %v14152_v47 = vld [vmem:[#allocation130_spill] sm:$0xff] }
 0x771   : > { %7137 = vmatpush3.bf16.xpose.msra.mxu0 %v3664_v0  ;;  %v10903_v0 = vcombine.low %v14138_v3, %v14137_v61  ;;  %v10933_v19 = vcombine.low %v14148_v9, %v14147_v1  ;;  %v14150_v20 = vld [vmem:[#allocation68_spill] sm:$0xff]  ;;  %v14154_v12 = vld [vmem:[#allocation163_spill] sm:$0xff]  ;;  %v14155_v16 = vld [vmem:[#allocation162_spill] sm:$0xff] }
 0x772   : > { %7155 = vmatpush3.bf16.xpose.msra.mxu1 %v3712_v54  ;;  %8033 = vmatprep.subr.msk.bf16.mxu0 %vm3644_vm11, %v10823_v43  ;;  %v10909_v54 = vcombine.low %v14140_v28, %v14139_v46  ;;  %v3700_v58 = vsel %vm3644_vm11, %v10915_v39, 0  ;;  %v10939_v38 = vcombine.low %v14150_v20, %v14149_v6  ;;  %v10951_v56 = vcombine.low %v14155_v16, %v14154_v12  ;;  %v14157_v14 = vld [vmem:[#allocation115_spill] sm:$0xff]  ;;  %v14158_v37 = vld [vmem:[#allocation114_spill] sm:$0xff]  ;;  %v14163_v61 = vld [vmem:[#allocation129_spill] sm:$0xff] }
 0x773   : > { %8041 = vmatprep.subr.msk.bf16.mxu1 %vm3644_vm11, %v10829_v51  ;;  %v3649_v55 = vsel %vm3644_vm11, %v10933_v19, 0  ;;  %v10957_v29 = vcombine.low %v14158_v37, %v14157_v14  ;;  %v14161_v30 = vld [vmem:[#allocation146_spill] sm:$0xff]  ;;  %v14164_v3 = vld [vmem:[#allocation128_spill] sm:$0xff]  ;;  %v14166_v35 = vld [vmem:[#allocation161_spill] sm:$0xff] }
 0x774   : > { %v3652_v62 = vsel %vm3644_vm11, %v10909_v54, 0  ;;  %14156 = vst [vmem:[#allocation393_spill] sm:$0xff] %v10951_v56  ;;  %v10969_v46 = vcombine.low %v14164_v3, %v14163_v61  ;;  %v14167_v27 = vld [vmem:[#allocation160_spill] sm:$0xff]  ;;  %v14175_v6 = vld [vmem:[#allocation127_spill] sm:$0xff]  ;;  %v14176_v20 = vld [vmem:[#allocation126_spill] sm:$0xff] }
 0x775   : > { %14159 = vst [vmem:[#allocation394_spill] sm:$0xff] %v10957_v29  ;;  %v14181_v16 = vld [vmem:[#allocation111_spill] sm:$0xff]  ;;  %v14182_v14 = vld [vmem:[#allocation110_spill] sm:$0xff]  ;;  %v14187_v3 = vld [vmem:[#allocation125_spill] sm:$0xff] }
 0x776   : > { %14165 = vst [vmem:[#allocation396_spill] sm:$0xff] %v10969_v46  ;;  %v11013_v37 = vcombine.low %v14182_v14, %v14181_v16  ;;  %v14199_v16 = vld [vmem:[#allocation123_spill] sm:$0xff]  ;;  %v14200_v14 = vld [vmem:[#allocation122_spill] sm:$0xff]  ;;  %v14407_v51 = vld [vmem:[#allocation276_spill] sm:$0xff] }
 0x778   : > { %14183 = vst [vmem:[#allocation402_spill] sm:$0xff] %v11013_v37  ;;  %v3760_v61 = vsel %vm3644_vm11, %v11013_v37, 0 }
 0x779   : > { %7139 = vmatpush3.bf16.xpose.msra.mxu0 %v3661_v45  ;;  %v10921_v45 = vcombine.low %v14144_v8, %v14143_v36  ;;  %v14169_v36 = vld [vmem:[#allocation113_spill] sm:$0xff]  ;;  %v14170_v8 = vld [vmem:[#allocation112_spill] sm:$0xff] }
 0x77a   : > { %7157 = vmatpush3.bf16.xpose.msra.mxu1 %v3709_v10  ;;  %8034 = vmatprep.subr.msk.bf16.mxu0 %vm3644_vm11, %v10847_v13  ;;  %v10927_v10 = vcombine.low %v14146_v48, %v14145_v44  ;;  %v14172_v44 = vld [vmem:[#allocation145_spill] sm:$0xff]  ;;  %v14173_v48 = vld [vmem:[#allocation144_spill] sm:$0xff] }
 0x77b   : > { %8042 = vmatprep.subr.msk.bf16.mxu1 %vm3644_vm11, %v10855_v17  ;;  %v10991_v1 = vcombine.low %v14173_v48, %v14172_v44  ;;  %v14193_v48 = vld [vmem:[#allocation109_spill] sm:$0xff] }
 0x77d   : > { %14174 = vst [vmem:[#allocation399_spill] sm:$0xff] %v10991_v1 }
 0x781   : > { %7141 = vmatpush3.bf16.xpose.msra.mxu0 %v3658_v5  ;;  %v14151_v5 = vld [vmem:[#allocation131_spill] sm:$0xff] }
 0x782   : > { %7159 = vmatpush3.bf16.xpose.msra.mxu1 %v3706_v41  ;;  %8035 = vmatprep.subr.msk.bf16.mxu0 %vm3644_vm11, %v10873_v53  ;;  %v10945_v4 = vcombine.low %v14152_v47, %v14151_v5  ;;  %v3697_v41 = vsel %vm3644_vm11, %v10939_v38, 0  ;;  %v3811_v5 = vsel %vm3644_vm11, %v10991_v1, 0  ;;  %v14178_v47 = vld [vmem:[#allocation159_spill] sm:$0xff] }
 0x783   : > { %8043 = vmatprep.subr.msk.bf16.mxu1 %vm3644_vm11, %v10879_v52 }
 0x784   : > { %14153 = vst [vmem:[#allocation392_spill] sm:$0xff] %v10945_v4 }
 0x789   : > { %7143 = vmatpush3.bf16.xpose.msra.mxu0 %v3655_v34  ;;  %v14160_v34 = vld [vmem:[#allocation147_spill] sm:$0xff] }
 0x78a   : > { %7161 = vmatpush3.bf16.xpose.msra.mxu1 %v3703_v63  ;;  %8036 = vmatprep.subr.msk.bf16.mxu0 %vm3644_vm11, %v10897_v11  ;;  %v10963_v22 = vcombine.low %v14161_v30, %v14160_v34  ;;  %v3766_v63 = vsel %vm3644_vm11, %v10957_v29, 0  ;;  %v14184_v34 = vld [vmem:[#allocation143_spill] sm:$0xff]  ;;  %v14185_v30 = vld [vmem:[#allocation142_spill] sm:$0xff]  ;;  %v14370_v29 = vld [vmem:[#allocation285_spill] sm:$0xff] }
 0x78b   : > { %8044 = vmatprep.subr.msk.bf16.mxu1 %vm3644_vm11, %v10903_v0 }
 0x78c   : > { %14162 = vst [vmem:[#allocation395_spill] sm:$0xff] %v10963_v22  ;;  %v3814_v28 = vsel %vm3644_vm11, %v10963_v22, 0  ;;  %v14238_v22 = vld [vmem:[#allocation149_spill] sm:$0xff] }
 0x791   : > { %7145 = vmatpush3.bf16.xpose.msra.mxu0 %v3652_v62  ;;  %v10975_v62 = vcombine.low %v14167_v27, %v14166_v35 }
 0x792   : > { %7163 = vmatpush3.bf16.xpose.msra.mxu1 %v3700_v58  ;;  %8037 = vmatprep.subr.msk.bf16.mxu0 %vm3644_vm11, %v10921_v45  ;;  %v10985_v58 = vcombine.low %v14170_v8, %v14169_v36  ;;  %v14190_v36 = vld [vmem:[#allocation157_spill] sm:$0xff]  ;;  %v14191_v8 = vld [vmem:[#allocation156_spill] sm:$0xff] }
 0x793   : > { %8045 = vmatprep.subr.msk.bf16.mxu1 %vm3644_vm11, %v10927_v10  ;;  %14168 = vst [vmem:[#allocation397_spill] sm:$0xff] %v10975_v62  ;;  %v11031_v44 = vcombine.low %v14191_v8, %v14190_v36  ;;  %v14206_v36 = vld [vmem:[#allocation106_spill] sm:$0xff] }
 0x794   : > { %14171 = vst [vmem:[#allocation398_spill] sm:$0xff] %v10985_v58  ;;  %v3763_v9 = vsel %vm3644_vm11, %v10985_v58, 0 }
 0x795   : > { %14192 = vst [vmem:[#allocation405_spill] sm:$0xff] %v11031_v44 }
 0x799   : > { %7147 = vmatpush3.bf16.xpose.msra.mxu0 %v3649_v55  ;;  %v11001_v55 = vcombine.low %v14176_v20, %v14175_v6  ;;  %v14196_v20 = vld [vmem:[#allocation141_spill] sm:$0xff] }
 0x79a   : > { %7165 = vmatpush3.bf16.xpose.msra.mxu1 %v3697_v41  ;;  %8046 = vmatprep.subr.msk.bf16.mxu0 %vm3644_vm11, %v10945_v4  ;;  %v14179_v41 = vld [vmem:[#allocation158_spill] sm:$0xff]  ;;  %v14352_v4 = vld [vmem:[#allocation289_spill] sm:$0xff] }
 0x79b   : > { %8054 = vmatprep.subr.msk.bf16.mxu1 %vm3644_vm11, %v10951_v56  ;;  %14177 = vst [vmem:[#allocation400_spill] sm:$0xff] %v11001_v55  ;;  %v11007_v12 = vcombine.low %v14179_v41, %v14178_v47 }
 0x79d   : > { %14180 = vst [vmem:[#allocation401_spill] sm:$0xff] %v11007_v12 }
 0x7a0   : > { %7149 = vmatmul.mubr.msk.bf16.vlgmr.msra.gmra.mxu0 %vm3644_vm11, %v10801_v15 }
 0x7a1   : > { %7167 = vmatmul.mubr.msk.bf16.vlgmr.msra.gmra.mxu1 %vm3644_vm11, %v10801_v15  ;;  %7169 = vmatpush3.bf16.xpose.msra.mxu0 %v3766_v63  ;;  %v11019_v63 = vcombine.low %v14185_v30, %v14184_v34  ;;  %v11049_v34 = vcombine.low %v14200_v14, %v14199_v16  ;;  %v14211_v16 = vld [vmem:[#allocation121_spill] sm:$0xff] }
 0x7a2   : > { %7187 = vmatpush3.bf16.xpose.msra.mxu1 %v3814_v28  ;;  %8047 = vmatprep.subr.msk.bf16.mxu0 %vm3644_vm11, %v10969_v46  ;;  %v14188_v28 = vld [vmem:[#allocation124_spill] sm:$0xff]  ;;  %v14360_v46 = vld [vmem:[#allocation254_spill] sm:$0xff] }
 0x7a3   : > { %8055 = vmatprep.subr.msk.bf16.mxu1 %vm3644_vm11, %v10975_v62  ;;  %7184 = vmatprep.mubr.msk.bf16.mxu0 %vm3644_vm11, %v10801_v15  ;;  %14186 = vst [vmem:[#allocation403_spill] sm:$0xff] %v11019_v63  ;;  %v11025_v35 = vcombine.low %v14188_v28, %v14187_v3  ;;  %v3808_v27 = vsel %vm3644_vm11, %v11019_v63, 0  ;;  %14201 = vst [vmem:[#allocation408_spill] sm:$0xff] %v11049_v34  ;;  %v14203_v3 = vld [vmem:[#allocation154_spill] sm:$0xff] }
 0x7a4   : > { %7202 = vmatprep.mubr.msk.bf16.mxu1 %vm3644_vm11, %v10801_v15 }
 0x7a5   : > { %14189 = vst [vmem:[#allocation404_spill] sm:$0xff] %v11025_v35 }
 0x7a9   : > { %7171 = vmatpush3.bf16.xpose.msra.mxu0 %v3763_v9  ;;  %v14194_v9 = vld [vmem:[#allocation108_spill] sm:$0xff] }
 0x7aa   : > { %7189 = vmatpush3.bf16.xpose.msra.mxu1 %v3811_v5  ;;  %8048 = vmatprep.subr.msk.bf16.mxu0 %vm3644_vm11, %v11001_v55  ;;  %v11037_v6 = vcombine.low %v14194_v9, %v14193_v48  ;;  %v14197_v5 = vld [vmem:[#allocation140_spill] sm:$0xff]  ;;  %v14208_v48 = vld [vmem:[#allocation139_spill] sm:$0xff]  ;;  %v14209_v9 = vld [vmem:[#allocation138_spill] sm:$0xff] }
 0x7ab   : > { %8056 = vmatprep.subr.msk.bf16.mxu1 %vm3644_vm11, %v11007_v12  ;;  %v11043_v47 = vcombine.low %v14197_v5, %v14196_v20  ;;  %v11067_v20 = vcombine.low %v14209_v9, %v14208_v48  ;;  %v14218_v48 = vld [vmem:[#allocation104_spill] sm:$0xff]  ;;  %v14226_v12 = vld [vmem:[#allocation151_spill] sm:$0xff] }
 0x7ac   : > { %14195 = vst [vmem:[#allocation406_spill] sm:$0xff] %v11037_v6  ;;  %v3757_v41 = vsel %vm3644_vm11, %v11037_v6, 0  ;;  %v14361_v55 = vld [vmem:[#allocation287_spill] sm:$0xff] }
 0x7ad   : > { %14198 = vst [vmem:[#allocation407_spill] sm:$0xff] %v11043_v47  ;;  %v3805_v30 = vsel %vm3644_vm11, %v11043_v47, 0  ;;  %14210 = vst [vmem:[#allocation411_spill] sm:$0xff] %v11067_v20  ;;  %v14250_v47 = vld [vmem:[#allocation227_spill] sm:$0xff] }
 0x7b1   : > { %7173 = vmatpush3.bf16.xpose.msra.mxu0 %v3760_v61  ;;  %v14202_v61 = vld [vmem:[#allocation155_spill] sm:$0xff] }
 0x7b2   : > { %7191 = vmatpush3.bf16.xpose.msra.mxu1 %v3808_v27  ;;  %8049 = vmatprep.subr.msk.bf16.mxu0 %vm3644_vm11, %v11025_v35  ;;  %v11055_v28 = vcombine.low %v14203_v3, %v14202_v61  ;;  %v14205_v27 = vld [vmem:[#allocation107_spill] sm:$0xff]  ;;  %v14214_v61 = vld [vmem:[#allocation153_spill] sm:$0xff]  ;;  %v14215_v3 = vld [vmem:[#allocation152_spill] sm:$0xff] }
 0x7b3   : > { %8057 = vmatprep.subr.msk.bf16.mxu1 %vm3644_vm11, %v11031_v44  ;;  %v11061_v8 = vcombine.low %v14206_v36, %v14205_v27  ;;  %v11079_v27 = vcombine.low %v14215_v3, %v14214_v61  ;;  %v14217_v36 = vld [vmem:[#allocation105_spill] sm:$0xff]  ;;  %v14223_v3 = vld [vmem:[#allocation119_spill] sm:$0xff]  ;;  %v14362_v35 = vld [vmem:[#allocation286_spill] sm:$0xff] }
 0x7b4   : > { %14204 = vst [vmem:[#allocation409_spill] sm:$0xff] %v11055_v28  ;;  %v11085_v9 = vcombine.low %v14218_v48, %v14217_v36  ;;  %v14227_v36 = vld [vmem:[#allocation150_spill] sm:$0xff] }
 0x7b5   : > { %14207 = vst [vmem:[#allocation410_spill] sm:$0xff] %v11061_v8  ;;  %v3754_v5 = vsel %vm3644_vm11, %v11061_v8, 0  ;;  %14216 = vst [vmem:[#allocation413_spill] sm:$0xff] %v11079_v27  ;;  %v11103_v48 = vcombine.low %v14227_v36, %v14226_v12  ;;  %v14235_v36 = vld [vmem:[#allocation117_spill] sm:$0xff]  ;;  %v14379_v8 = vld [vmem:[#allocation283_spill] sm:$0xff] }
 0x7b6   : > { %14219 = vst [vmem:[#allocation414_spill] sm:$0xff] %v11085_v9  ;;  %v3751_v61 = vsel %vm3644_vm11, %v11085_v9, 0 }
 0x7b7   : > { %14228 = vst [vmem:[#allocation417_spill] sm:$0xff] %v11103_v48 }
 0x7b9   : > { %7175 = vmatpush3.bf16.xpose.msra.mxu0 %v3757_v41  ;;  %v14212_v41 = vld [vmem:[#allocation120_spill] sm:$0xff] }
 0x7ba   : > { %7193 = vmatpush3.bf16.xpose.msra.mxu1 %v3805_v30  ;;  %8050 = vmatprep.subr.msk.bf16.mxu0 %vm3644_vm11, %v11049_v34  ;;  %v11073_v14 = vcombine.low %v14212_v41, %v14211_v16  ;;  %v3802_v30 = vsel %vm3644_vm11, %v11067_v20, 0  ;;  %v14220_v16 = vld [vmem:[#allocation137_spill] sm:$0xff]  ;;  %v14221_v41 = vld [vmem:[#allocation136_spill] sm:$0xff]  ;;  %v14365_v34 = vld [vmem:[#allocation238_spill] sm:$0xff] }
 0x7bb   : > { %8058 = vmatprep.subr.msk.bf16.mxu1 %vm3644_vm11, %v11055_v28  ;;  %v11091_v56 = vcombine.low %v14221_v41, %v14220_v16  ;;  %v14229_v16 = vld [vmem:[#allocation103_spill] sm:$0xff]  ;;  %v14230_v41 = vld [vmem:[#allocation102_spill] sm:$0xff] }
 0x7bc   : > { %14213 = vst [vmem:[#allocation412_spill] sm:$0xff] %v11073_v14  ;;  %v11109_v44 = vcombine.low %v14230_v41, %v14229_v16  ;;  %v14239_v16 = vld [vmem:[#allocation148_spill] sm:$0xff] }
 0x7bd   : > { %14222 = vst [vmem:[#allocation415_spill] sm:$0xff] %v11091_v56  ;;  %v3799_v62 = vsel %vm3644_vm11, %v11091_v56, 0  ;;  %v11127_v41 = vcombine.low %v14239_v16, %v14238_v22  ;;  %v14247_v16 = vld [vmem:[#allocation195_spill] sm:$0xff]  ;;  %v14261_v56 = vld [vmem:[#allocation225_spill] sm:$0xff] }
 0x7be   : > { %14231 = vst [vmem:[#allocation418_spill] sm:$0xff] %v11109_v44  ;;  %v3748_v12 = vsel %vm3644_vm11, %v11109_v44, 0 }
 0x7bf   : > { %14240 = vst [vmem:[#allocation421_spill] sm:$0xff] %v11127_v41 }
 0x7c1   : > { %7177 = vmatpush3.bf16.xpose.msra.mxu0 %v3754_v5  ;;  %v14224_v5 = vld [vmem:[#allocation118_spill] sm:$0xff] }
 0x7c2   : > { %7195 = vmatpush3.bf16.xpose.msra.mxu1 %v3802_v30  ;;  %8051 = vmatprep.subr.msk.bf16.mxu0 %vm3644_vm11, %v11073_v14  ;;  %v11097_v30 = vcombine.low %v14224_v5, %v14223_v3  ;;  %v14232_v3 = vld [vmem:[#allocation135_spill] sm:$0xff]  ;;  %v14233_v5 = vld [vmem:[#allocation134_spill] sm:$0xff] }
 0x7c3   : > { %8059 = vmatprep.subr.msk.bf16.mxu1 %vm3644_vm11, %v11079_v27  ;;  %v11115_v28 = vcombine.low %v14233_v5, %v14232_v3  ;;  %v14241_v3 = vld [vmem:[#allocation101_spill] sm:$0xff]  ;;  %v14242_v5 = vld [vmem:[#allocation100_spill] sm:$0xff] }
 0x7c4   : > { %14225 = vst [vmem:[#allocation416_spill] sm:$0xff] %v11097_v30 }
 0x7c5   : > { %14234 = vst [vmem:[#allocation419_spill] sm:$0xff] %v11115_v28  ;;  %v3796_v27 = vsel %vm3644_vm11, %v11115_v28, 0  ;;  %v14276_v28 = vld [vmem:[#allocation174_spill] sm:$0xff] }
 0x7c9   : > { %7179 = vmatpush3.bf16.xpose.msra.mxu0 %v3751_v61  ;;  %v14236_v61 = vld [vmem:[#allocation116_spill] sm:$0xff] }
 0x7ca   : > { %7197 = vmatpush3.bf16.xpose.msra.mxu1 %v3799_v62  ;;  %8052 = vmatprep.subr.msk.bf16.mxu0 %vm3644_vm11, %v11097_v30  ;;  %v11121_v62 = vcombine.low %v14236_v61, %v14235_v36  ;;  %v14244_v36 = vld [vmem:[#allocation133_spill] sm:$0xff]  ;;  %v14245_v61 = vld [vmem:[#allocation132_spill] sm:$0xff] }
 0x7cb   : > { %8060 = vmatprep.subr.msk.bf16.mxu1 %vm3644_vm11, %v11103_v48  ;;  %v11133_v48 = vcombine.low %v14242_v5, %v14241_v3  ;;  %v11139_v1 = vcombine.low %v14245_v61, %v14244_v36  ;;  %v14251_v3 = vld [vmem:[#allocation226_spill] sm:$0xff]  ;;  %v14252_v36 = vld [vmem:[#allocation179_spill] sm:$0xff] }
 0x7cc   : > { %14237 = vst [vmem:[#allocation420_spill] sm:$0xff] %v11121_v62  ;;  %v11151_v5 = vcombine.low %v14251_v3, %v14250_v47  ;;  %v14253_v61 = vld [vmem:[#allocation178_spill] sm:$0xff]  ;;  %v14258_v3 = vld [vmem:[#allocation193_spill] sm:$0xff] }
 0x7cd   : > { %14243 = vst [vmem:[#allocation422_spill] sm:$0xff] %v11133_v48  ;;  %14246 = vst [vmem:[#allocation423_spill] sm:$0xff] %v11139_v1  ;;  %v3745_v22 = vsel %vm3644_vm11, %v11133_v48, 0  ;;  %v3793_v63 = vsel %vm3644_vm11, %v11139_v1, 0 }
 0x7d1   : > { %7181 = vmatpush3.bf16.xpose.msra.mxu0 %v3748_v12  ;;  %v14248_v12 = vld [vmem:[#allocation194_spill] sm:$0xff] }
 0x7d2   : > { %7199 = vmatpush3.bf16.xpose.msra.mxu1 %v3796_v27  ;;  %8053 = vmatprep.subr.msk.bf16.mxu0 %vm3644_vm11, %v11121_v62  ;;  %v11145_v27 = vcombine.low %v14248_v12, %v14247_v16  ;;  %v14255_v16 = vld [vmem:[#allocation211_spill] sm:$0xff]  ;;  %v14256_v12 = vld [vmem:[#allocation210_spill] sm:$0xff] }
 0x7d3   : > { %8061 = vmatprep.subr.msk.bf16.mxu1 %vm3644_vm11, %v11127_v41  ;;  %v11157_v41 = vcombine.low %v14253_v61, %v14252_v36  ;;  %v11163_v20 = vcombine.low %v14256_v12, %v14255_v16  ;;  %v14262_v36 = vld [vmem:[#allocation224_spill] sm:$0xff]  ;;  %v14263_v16 = vld [vmem:[#allocation177_spill] sm:$0xff] }
 0x7d4   : > { %14249 = vst [vmem:[#allocation424_spill] sm:$0xff] %v11145_v27  ;;  %v11175_v61 = vcombine.low %v14262_v36, %v14261_v56  ;;  %v14264_v12 = vld [vmem:[#allocation176_spill] sm:$0xff]  ;;  %v14266_v56 = vld [vmem:[#allocation209_spill] sm:$0xff] }
 0x7d5   : > { %14254 = vst [vmem:[#allocation425_spill] sm:$0xff] %v11157_v41  ;;  %14257 = vst [vmem:[#allocation426_spill] sm:$0xff] %v11163_v20  ;;  %v3862_v47 = vsel %vm3644_vm11, %v11157_v41, 0  ;;  %v14273_v41 = vld [vmem:[#allocation222_spill] sm:$0xff] }
 0x7d9   : > { %7183 = vmatpush3.bf16.xpose.msra.mxu0 %v3745_v22  ;;  %v14259_v22 = vld [vmem:[#allocation192_spill] sm:$0xff] }
 0x7da   : > { %7201 = vmatpush3.bf16.xpose.msra.mxu1 %v3793_v63  ;;  %8062 = vmatprep.subr.msk.bf16.mxu0 %vm3644_vm11, %v11145_v27  ;;  %v11169_v63 = vcombine.low %v14259_v22, %v14258_v3  ;;  %v3910_v27 = vsel %vm3644_vm11, %v11163_v20, 0  ;;  %v11185_v3 = vcombine.low %v14264_v12, %v14263_v16  ;;  %v14267_v22 = vld [vmem:[#allocation208_spill] sm:$0xff]  ;;  %v14270_v20 = vld [vmem:[#allocation190_spill] sm:$0xff] }
 0x7db   : > { %8070 = vmatprep.subr.msk.bf16.mxu1 %vm3644_vm11, %v11151_v5  ;;  %v11191_v36 = vcombine.low %v14267_v22, %v14266_v56  ;;  %v14275_v22 = vld [vmem:[#allocation175_spill] sm:$0xff] }
 0x7dc   : > { %14260 = vst [vmem:[#allocation427_spill] sm:$0xff] %v11169_v63  ;;  %14265 = vst [vmem:[#allocation428_spill] sm:$0xff] %v11185_v3  ;;  %v11213_v1 = vcombine.low %v14276_v28, %v14275_v22  ;;  %v14285_v28 = vld [vmem:[#allocation220_spill] sm:$0xff] }
 0x7dd   : > { %14268 = vst [vmem:[#allocation429_spill] sm:$0xff] %v11191_v36  ;;  %v3907_v12 = vsel %vm3644_vm11, %v11191_v36, 0 }
 0x7de   : > { %14277 = vst [vmem:[#allocation432_spill] sm:$0xff] %v11213_v1 }
 0x7e0   : > { %7185 = vmatmul.mubr.msk.bf16.vlgmr.msra.gmra.mxu0 %vm3644_vm11, %v10801_v15 }
 0x7e1   : > { %7203 = vmatmul.mubr.msk.bf16.vlgmr.msra.gmra.mxu1 %vm3644_vm11, %v10801_v15  ;;  %7205 = vmatpush3.bf16.xpose.msra.mxu0 %v3862_v47  ;;  %v14269_v47 = vld [vmem:[#allocation191_spill] sm:$0xff] }
 0x7e2   : > { %7223 = vmatpush3.bf16.xpose.msra.mxu1 %v3910_v27  ;;  %8063 = vmatprep.subr.msk.bf16.mxu0 %vm3644_vm11, %v11169_v63  ;;  %v3859_v27 = vsel %vm3644_vm11, %v11185_v3, 0  ;;  %v11201_v16 = vcombine.low %v14270_v20, %v14269_v47  ;;  %v14272_v63 = vld [vmem:[#allocation223_spill] sm:$0xff]  ;;  %v14279_v47 = vld [vmem:[#allocation206_spill] sm:$0xff] }
 0x7e3   : > { %8071 = vmatprep.subr.msk.bf16.mxu1 %vm3644_vm11, %v11175_v61  ;;  %7220 = vmatprep.mubr.msk.bf16.mxu0 %vm3644_vm11, %v10801_v15  ;;  %v11207_v56 = vcombine.low %v14273_v41, %v14272_v63  ;;  %v14278_v20 = vld [vmem:[#allocation207_spill] sm:$0xff]  ;;  %v3856_v41 = vsel %vm3644_vm11, %v11213_v1, 0  ;;  %v14281_v63 = vld [vmem:[#allocation189_spill] sm:$0xff] }
 0x7e4   : > { %7238 = vmatprep.mubr.msk.bf16.mxu1 %vm3644_vm11, %v10801_v15  ;;  %14271 = vst [vmem:[#allocation430_spill] sm:$0xff] %v11201_v16  ;;  %v11219_v3 = vcombine.low %v14279_v47, %v14278_v20  ;;  %v14287_v20 = vld [vmem:[#allocation173_spill] sm:$0xff]  ;;  %v14288_v47 = vld [vmem:[#allocation172_spill] sm:$0xff] }
 0x7e5   : > { %14274 = vst [vmem:[#allocation431_spill] sm:$0xff] %v11207_v56 }
 0x7e6   : > { %14280 = vst [vmem:[#allocation433_spill] sm:$0xff] %v11219_v3  ;;  %v3904_v36 = vsel %vm3644_vm11, %v11219_v3, 0 }
 0x7e9   : > { %7207 = vmatpush3.bf16.xpose.msra.mxu0 %v3859_v27  ;;  %v14282_v27 = vld [vmem:[#allocation188_spill] sm:$0xff] }
 0x7ea   : > { %7225 = vmatpush3.bf16.xpose.msra.mxu1 %v3907_v12  ;;  %8064 = vmatprep.subr.msk.bf16.mxu0 %vm3644_vm11, %v11201_v16  ;;  %v11225_v12 = vcombine.low %v14282_v27, %v14281_v63  ;;  %v14284_v16 = vld [vmem:[#allocation221_spill] sm:$0xff]  ;;  %v14291_v27 = vld [vmem:[#allocation204_spill] sm:$0xff] }
 0x7eb   : > { %8072 = vmatprep.subr.msk.bf16.mxu1 %vm3644_vm11, %v11207_v56  ;;  %v11231_v22 = vcombine.low %v14285_v28, %v14284_v16  ;;  %v11237_v56 = vcombine.low %v14288_v47, %v14287_v20  ;;  %v14290_v63 = vld [vmem:[#allocation205_spill] sm:$0xff]  ;;  %v14293_v28 = vld [vmem:[#allocation187_spill] sm:$0xff]  ;;  %v14297_v20 = vld [vmem:[#allocation218_spill] sm:$0xff] }
 0x7ec   : > { %14283 = vst [vmem:[#allocation434_spill] sm:$0xff] %v11225_v12  ;;  %v11243_v1 = vcombine.low %v14291_v27, %v14290_v63  ;;  %v14299_v63 = vld [vmem:[#allocation171_spill] sm:$0xff]  ;;  %v14300_v27 = vld [vmem:[#allocation170_spill] sm:$0xff] }
 0x7ed   : > { %14286 = vst [vmem:[#allocation435_spill] sm:$0xff] %v11231_v22  ;;  %14289 = vst [vmem:[#allocation436_spill] sm:$0xff] %v11237_v56  ;;  %v3853_v16 = vsel %vm3644_vm11, %v11237_v56, 0 }
 0x7ee   : > { %14292 = vst [vmem:[#allocation437_spill] sm:$0xff] %v11243_v1  ;;  %v3901_v3 = vsel %vm3644_vm11, %v11243_v1, 0 }
 0x7f1   : > { %7209 = vmatpush3.bf16.xpose.msra.mxu0 %v3856_v41  ;;  %v14294_v41 = vld [vmem:[#allocation186_spill] sm:$0xff] }
 0x7f2   : > { %7227 = vmatpush3.bf16.xpose.msra.mxu1 %v3904_v36  ;;  %8065 = vmatprep.subr.msk.bf16.mxu0 %vm3644_vm11, %v11225_v12  ;;  %v11249_v36 = vcombine.low %v14294_v41, %v14293_v28  ;;  %v14296_v12 = vld [vmem:[#allocation219_spill] sm:$0xff]  ;;  %v14303_v41 = vld [vmem:[#allocation202_spill] sm:$0xff] }
 0x7f3   : > { %8073 = vmatprep.subr.msk.bf16.mxu1 %vm3644_vm11, %v11231_v22  ;;  %v11255_v47 = vcombine.low %v14297_v20, %v14296_v12  ;;  %v11261_v22 = vcombine.low %v14300_v27, %v14299_v63  ;;  %v14302_v28 = vld [vmem:[#allocation203_spill] sm:$0xff]  ;;  %v14305_v20 = vld [vmem:[#allocation185_spill] sm:$0xff]  ;;  %v14309_v63 = vld [vmem:[#allocation216_spill] sm:$0xff] }
 0x7f4   : > { %14295 = vst [vmem:[#allocation438_spill] sm:$0xff] %v11249_v36  ;;  %v11267_v56 = vcombine.low %v14303_v41, %v14302_v28  ;;  %v14311_v28 = vld [vmem:[#allocation169_spill] sm:$0xff]  ;;  %v14312_v41 = vld [vmem:[#allocation168_spill] sm:$0xff] }
 0x7f5   : > { %14298 = vst [vmem:[#allocation439_spill] sm:$0xff] %v11255_v47  ;;  %14301 = vst [vmem:[#allocation440_spill] sm:$0xff] %v11261_v22  ;;  %v3850_v12 = vsel %vm3644_vm11, %v11261_v22, 0 }
 0x7f6   : > { %14304 = vst [vmem:[#allocation441_spill] sm:$0xff] %v11267_v56  ;;  %v3898_v1 = vsel %vm3644_vm11, %v11267_v56, 0 }
 0x7f9   : > { %7211 = vmatpush3.bf16.xpose.msra.mxu0 %v3853_v16  ;;  %v14306_v16 = vld [vmem:[#allocation184_spill] sm:$0xff] }
 0x7fa   : > { %7229 = vmatpush3.bf16.xpose.msra.mxu1 %v3901_v3  ;;  %8066 = vmatprep.subr.msk.bf16.mxu0 %vm3644_vm11, %v11249_v36  ;;  %v11273_v3 = vcombine.low %v14306_v16, %v14305_v20  ;;  %v14308_v36 = vld [vmem:[#allocation217_spill] sm:$0xff]  ;;  %v14315_v16 = vld [vmem:[#allocation200_spill] sm:$0xff] }
 0x7fb   : > { %8074 = vmatprep.subr.msk.bf16.mxu1 %vm3644_vm11, %v11255_v47  ;;  %v11279_v27 = vcombine.low %v14309_v63, %v14308_v36  ;;  %v11285_v47 = vcombine.low %v14312_v41, %v14311_v28  ;;  %v14314_v20 = vld [vmem:[#allocation201_spill] sm:$0xff]  ;;  %v14317_v63 = vld [vmem:[#allocation183_spill] sm:$0xff]  ;;  %v14321_v28 = vld [vmem:[#allocation214_spill] sm:$0xff] }
 0x7fc   : > { %14307 = vst [vmem:[#allocation442_spill] sm:$0xff] %v11273_v3  ;;  %v11291_v22 = vcombine.low %v14315_v16, %v14314_v20  ;;  %v14323_v20 = vld [vmem:[#allocation167_spill] sm:$0xff]  ;;  %v14324_v16 = vld [vmem:[#allocation166_spill] sm:$0xff] }
 0x7fd   : > { %14310 = vst [vmem:[#allocation443_spill] sm:$0xff] %v11279_v27  ;;  %14313 = vst [vmem:[#allocation444_spill] sm:$0xff] %v11285_v47  ;;  %v3847_v36 = vsel %vm3644_vm11, %v11285_v47, 0 }
 0x7fe   : > { %14316 = vst [vmem:[#allocation445_spill] sm:$0xff] %v11291_v22  ;;  %v3895_v56 = vsel %vm3644_vm11, %v11291_v22, 0 }
 0x801   : > { %7213 = vmatpush3.bf16.xpose.msra.mxu0 %v3850_v12  ;;  %v14318_v12 = vld [vmem:[#allocation182_spill] sm:$0xff] }
 0x802   : > { %7231 = vmatpush3.bf16.xpose.msra.mxu1 %v3898_v1  ;;  %8067 = vmatprep.subr.msk.bf16.mxu0 %vm3644_vm11, %v11273_v3  ;;  %v11297_v1 = vcombine.low %v14318_v12, %v14317_v63  ;;  %v14320_v3 = vld [vmem:[#allocation215_spill] sm:$0xff]  ;;  %v14327_v12 = vld [vmem:[#allocation198_spill] sm:$0xff] }
 0x803   : > { %8075 = vmatprep.subr.msk.bf16.mxu1 %vm3644_vm11, %v11279_v27  ;;  %v11303_v41 = vcombine.low %v14321_v28, %v14320_v3  ;;  %v11309_v27 = vcombine.low %v14324_v16, %v14323_v20  ;;  %v14326_v63 = vld [vmem:[#allocation199_spill] sm:$0xff]  ;;  %v14329_v28 = vld [vmem:[#allocation181_spill] sm:$0xff]  ;;  %v14333_v20 = vld [vmem:[#allocation212_spill] sm:$0xff] }
 0x804   : > { %14319 = vst [vmem:[#allocation446_spill] sm:$0xff] %v11297_v1  ;;  %v11315_v47 = vcombine.low %v14327_v12, %v14326_v63  ;;  %v14335_v63 = vld [vmem:[#allocation165_spill] sm:$0xff]  ;;  %v14336_v12 = vld [vmem:[#allocation164_spill] sm:$0xff] }
 0x805   : > { %14322 = vst [vmem:[#allocation447_spill] sm:$0xff] %v11303_v41  ;;  %14325 = vst [vmem:[#allocation448_spill] sm:$0xff] %v11309_v27  ;;  %v3844_v3 = vsel %vm3644_vm11, %v11309_v27, 0 }
 0x806   : > { %14328 = vst [vmem:[#allocation449_spill] sm:$0xff] %v11315_v47  ;;  %v3892_v22 = vsel %vm3644_vm11, %v11315_v47, 0 }
 0x809   : > { %7215 = vmatpush3.bf16.xpose.msra.mxu0 %v3847_v36  ;;  %v14330_v36 = vld [vmem:[#allocation180_spill] sm:$0xff] }
 0x80a   : > { %7233 = vmatpush3.bf16.xpose.msra.mxu1 %v3895_v56  ;;  %8068 = vmatprep.subr.msk.bf16.mxu0 %vm3644_vm11, %v11297_v1  ;;  %v11321_v56 = vcombine.low %v14330_v36, %v14329_v28  ;;  %v14332_v1 = vld [vmem:[#allocation213_spill] sm:$0xff]  ;;  %v14339_v36 = vld [vmem:[#allocation196_spill] sm:$0xff] }
 0x80b   : > { %8076 = vmatprep.subr.msk.bf16.mxu1 %vm3644_vm11, %v11303_v41  ;;  %v11327_v16 = vcombine.low %v14333_v20, %v14332_v1  ;;  %v11333_v41 = vcombine.low %v14336_v12, %v14335_v63  ;;  %v14338_v28 = vld [vmem:[#allocation197_spill] sm:$0xff]  ;;  %v14341_v20 = vld [vmem:[#allocation259_spill] sm:$0xff]  ;;  %v14344_v63 = vld [vmem:[#allocation290_spill] sm:$0xff] }
 0x80c   : > { %14331 = vst [vmem:[#allocation450_spill] sm:$0xff] %v11321_v56  ;;  %v11339_v27 = vcombine.low %v14339_v36, %v14338_v28  ;;  %v14346_v28 = vld [vmem:[#allocation243_spill] sm:$0xff]  ;;  %v14347_v36 = vld [vmem:[#allocation242_spill] sm:$0xff] }
 0x80d   : > { %14334 = vst [vmem:[#allocation451_spill] sm:$0xff] %v11327_v16  ;;  %14337 = vst [vmem:[#allocation452_spill] sm:$0xff] %v11333_v41  ;;  %v3841_v1 = vsel %vm3644_vm11, %v11333_v41, 0 }
 0x80e   : > { %14340 = vst [vmem:[#allocation453_spill] sm:$0xff] %v11339_v27  ;;  %v3889_v47 = vsel %vm3644_vm11, %v11339_v27, 0 }
 0x811   : > { %7217 = vmatpush3.bf16.xpose.msra.mxu0 %v3844_v3  ;;  %v14342_v3 = vld [vmem:[#allocation258_spill] sm:$0xff] }
 0x812   : > { %7235 = vmatpush3.bf16.xpose.msra.mxu1 %v3892_v22  ;;  %8069 = vmatprep.subr.msk.bf16.mxu0 %vm3644_vm11, %v11321_v56  ;;  %v11345_v22 = vcombine.low %v14342_v3, %v14341_v20  ;;  %v14343_v56 = vld [vmem:[#allocation291_spill] sm:$0xff]  ;;  %v14349_v3 = vld [vmem:[#allocation274_spill] sm:$0xff] }
 0x813   : > { %8077 = vmatprep.subr.msk.bf16.mxu1 %vm3644_vm11, %v11327_v16  ;;  %v11351_v12 = vcombine.low %v14344_v63, %v14343_v56  ;;  %v11357_v16 = vcombine.low %v14347_v36, %v14346_v28  ;;  %v14348_v20 = vld [vmem:[#allocation275_spill] sm:$0xff]  ;;  %v14350_v63 = vld [vmem:[#allocation257_spill] sm:$0xff]  ;;  %v14353_v28 = vld [vmem:[#allocation288_spill] sm:$0xff] }
 0x814   : > { %v11363_v41 = vcombine.low %v14349_v3, %v14348_v20  ;;  %v11375_v36 = vcombine.low %v14353_v28, %v14352_v4  ;;  %v14355_v20 = vld [vmem:[#allocation241_spill] sm:$0xff]  ;;  %v14356_v3 = vld [vmem:[#allocation240_spill] sm:$0xff] }
 0x815   : > { %14345 = vst [vmem:[#allocation454_spill] sm:$0xff] %v11351_v12  ;;  %v3958_v56 = vsel %vm3644_vm11, %v11357_v16, 0  ;;  %v14357_v4 = vld [vmem:[#allocation273_spill] sm:$0xff] }
 0x816   : > { %v4006_v27 = vsel %vm3644_vm11, %v11363_v41, 0  ;;  %14354 = vst [vmem:[#allocation455_spill] sm:$0xff] %v11375_v36 }
 0x819   : > { %7219 = vmatpush3.bf16.xpose.msra.mxu0 %v3841_v1  ;;  %v14351_v1 = vld [vmem:[#allocation256_spill] sm:$0xff] }
 0x81a   : > { %7237 = vmatpush3.bf16.xpose.msra.mxu1 %v3889_v47  ;;  %8078 = vmatprep.subr.msk.bf16.mxu0 %vm3644_vm11, %v11345_v22  ;;  %v11369_v47 = vcombine.low %v14351_v1, %v14350_v63  ;;  %v11385_v63 = vcombine.low %v14356_v3, %v14355_v20  ;;  %v14358_v1 = vld [vmem:[#allocation272_spill] sm:$0xff] }
 0x81b   : > { %8086 = vmatprep.subr.msk.bf16.mxu1 %vm3644_vm11, %v11351_v12  ;;  %v11391_v28 = vcombine.low %v14358_v1, %v14357_v4  ;;  %v11407_v4 = vcombine.low %v14362_v35, %v14361_v55  ;;  %v14364_v1 = vld [vmem:[#allocation239_spill] sm:$0xff]  ;;  %v14368_v35 = vld [vmem:[#allocation253_spill] sm:$0xff] }
 0x81c   : > { %v11413_v14 = vcombine.low %v14365_v34, %v14364_v1  ;;  %v14371_v34 = vld [vmem:[#allocation284_spill] sm:$0xff] }
 0x81d   : > { %v4003_v3 = vsel %vm3644_vm11, %v11391_v28, 0  ;;  %14363 = vst [vmem:[#allocation456_spill] sm:$0xff] %v11407_v4  ;;  %v11431_v1 = vcombine.low %v14371_v34, %v14370_v29  ;;  %v14377_v34 = vld [vmem:[#allocation251_spill] sm:$0xff] }
 0x81e   : > { %v3952_v55 = vsel %vm3644_vm11, %v11413_v14, 0 }
 0x81f   : > { %14372 = vst [vmem:[#allocation457_spill] sm:$0xff] %v11431_v1 }
 0x820   : > { %7221 = vmatmul.mubr.msk.bf16.vlgmr.msra.gmra.mxu0 %vm3644_vm11, %v10801_v15 }
 0x821   : > { %7239 = vmatmul.mubr.msk.bf16.vlgmr.msra.gmra.mxu1 %vm3644_vm11, %v10801_v15  ;;  %7241 = vmatpush3.bf16.xpose.msra.mxu0 %v3958_v56  ;;  %v14359_v56 = vld [vmem:[#allocation255_spill] sm:$0xff] }
 0x822   : > { %7259 = vmatpush3.bf16.xpose.msra.mxu1 %v4006_v27  ;;  %8079 = vmatprep.subr.msk.bf16.mxu0 %vm3644_vm11, %v11369_v47  ;;  %v3955_v27 = vsel %vm3644_vm11, %v11385_v63, 0  ;;  %v11401_v20 = vcombine.low %v14360_v46, %v14359_v56  ;;  %v14366_v46 = vld [vmem:[#allocation271_spill] sm:$0xff]  ;;  %v14367_v56 = vld [vmem:[#allocation270_spill] sm:$0xff] }
 0x823   : > { %8087 = vmatprep.subr.msk.bf16.mxu1 %vm3644_vm11, %v11375_v36  ;;  %7256 = vmatprep.mubr.msk.bf16.mxu0 %vm3644_vm11, %v10801_v15  ;;  %v11419_v30 = vcombine.low %v14367_v56, %v14366_v46  ;;  %v14373_v46 = vld [vmem:[#allocation237_spill] sm:$0xff]  ;;  %v14374_v56 = vld [vmem:[#allocation236_spill] sm:$0xff] }
 0x824   : > { %7274 = vmatprep.mubr.msk.bf16.mxu1 %vm3644_vm11, %v10801_v15  ;;  %v11437_v58 = vcombine.low %v14374_v56, %v14373_v46  ;;  %v14380_v46 = vld [vmem:[#allocation282_spill] sm:$0xff]  ;;  %v14388_v36 = vld [vmem:[#allocation281_spill] sm:$0xff] }
 0x825   : > { %v4000_v62 = vsel %vm3644_vm11, %v11419_v30, 0  ;;  %v11455_v56 = vcombine.low %v14380_v46, %v14379_v8  ;;  %v14386_v46 = vld [vmem:[#allocation249_spill] sm:$0xff] }
 0x826   : > { %v3949_v29 = vsel %vm3644_vm11, %v11437_v58, 0 }
 0x827   : > { %14381 = vst [vmem:[#allocation458_spill] sm:$0xff] %v11455_v56 }
 0x829   : > { %7243 = vmatpush3.bf16.xpose.msra.mxu0 %v3955_v27  ;;  %v14369_v27 = vld [vmem:[#allocation252_spill] sm:$0xff] }
 0x82a   : > { %7261 = vmatpush3.bf16.xpose.msra.mxu1 %v4003_v3  ;;  %8080 = vmatprep.subr.msk.bf16.mxu0 %vm3644_vm11, %v11401_v20  ;;  %v11425_v3 = vcombine.low %v14369_v27, %v14368_v35  ;;  %v14375_v35 = vld [vmem:[#allocation269_spill] sm:$0xff]  ;;  %v14376_v27 = vld [vmem:[#allocation268_spill] sm:$0xff] }
 0x82b   : > { %8088 = vmatprep.subr.msk.bf16.mxu1 %vm3644_vm11, %v11407_v4  ;;  %v11443_v37 = vcombine.low %v14376_v27, %v14375_v35  ;;  %v14382_v35 = vld [vmem:[#allocation235_spill] sm:$0xff]  ;;  %v14383_v27 = vld [vmem:[#allocation234_spill] sm:$0xff] }
 0x82c   : > { %v11461_v12 = vcombine.low %v14383_v27, %v14382_v35  ;;  %v14389_v35 = vld [vmem:[#allocation280_spill] sm:$0xff] }
 0x82d   : > { %v3997_v6 = vsel %vm3644_vm11, %v11443_v37, 0  ;;  %v11479_v27 = vcombine.low %v14389_v35, %v14388_v36  ;;  %v14396_v36 = vld [vmem:[#allocation246_spill] sm:$0xff] }
 0x82e   : > { %v3946_v8 = vsel %vm3644_vm11, %v11461_v12, 0 }
 0x82f   : > { %14390 = vst [vmem:[#allocation459_spill] sm:$0xff] %v11479_v27 }
 0x831   : > { %7245 = vmatpush3.bf16.xpose.msra.mxu0 %v3952_v55  ;;  %v14378_v55 = vld [vmem:[#allocation250_spill] sm:$0xff] }
 0x832   : > { %7263 = vmatpush3.bf16.xpose.msra.mxu1 %v4000_v62  ;;  %8081 = vmatprep.subr.msk.bf16.mxu0 %vm3644_vm11, %v11425_v3  ;;  %v11449_v62 = vcombine.low %v14378_v55, %v14377_v34  ;;  %v14384_v34 = vld [vmem:[#allocation267_spill] sm:$0xff]  ;;  %v14385_v55 = vld [vmem:[#allocation266_spill] sm:$0xff] }
 0x833   : > { %8089 = vmatprep.subr.msk.bf16.mxu1 %vm3644_vm11, %v11431_v1  ;;  %v11467_v9 = vcombine.low %v14385_v55, %v14384_v34  ;;  %v14391_v34 = vld [vmem:[#allocation233_spill] sm:$0xff]  ;;  %v14392_v55 = vld [vmem:[#allocation232_spill] sm:$0xff]  ;;  %v14395_v1 = vld [vmem:[#allocation247_spill] sm:$0xff] }
 0x834   : > { %v6629_v4 = vcombine.low %v14392_v55, %v14391_v34  ;;  %v11494_v35 = vcombine.low %v14396_v36, %v14395_v1  ;;  %v14400_v34 = vld [vmem:[#allocation231_spill] sm:$0xff]  ;;  %v14401_v55 = vld [vmem:[#allocation230_spill] sm:$0xff] }
 0x835   : > { %v3994_v44 = vsel %vm3644_vm11, %v11467_v9, 0  ;;  %v14402_v1 = vld [vmem:[#allocation263_spill] sm:$0xff] }
 0x836   : > { %v3943_v21 = vsel %vm3644_vm11, %v6629_v4, 0 }
 0x839   : > { %7247 = vmatpush3.bf16.xpose.msra.mxu0 %v3949_v29  ;;  %v14387_v29 = vld [vmem:[#allocation248_spill] sm:$0xff] }
 0x83a   : > { %7265 = vmatpush3.bf16.xpose.msra.mxu1 %v3997_v6  ;;  %8082 = vmatprep.subr.msk.bf16.mxu0 %vm3644_vm11, %v11449_v62  ;;  %v11473_v6 = vcombine.low %v14387_v29, %v14386_v46  ;;  %v14393_v46 = vld [vmem:[#allocation265_spill] sm:$0xff]  ;;  %v14394_v29 = vld [vmem:[#allocation264_spill] sm:$0xff] }
 0x83b   : > { %8090 = vmatprep.subr.msk.bf16.mxu1 %vm3644_vm11, %v11455_v56  ;;  %v11489_v48 = vcombine.low %v14394_v29, %v14393_v46  ;;  %v14398_v56 = vld [vmem:[#allocation278_spill] sm:$0xff]  ;;  %v6628_v46 = vcombine.low %v14401_v55, %v14400_v34  ;;  %v14408_v34 = vld [vmem:[#allocation229_spill] sm:$0xff]  ;;  %v14409_v55 = vld [vmem:[#allocation228_spill] sm:$0xff] }
 0x83c   : > { %v14403_v29 = vld [vmem:[#allocation262_spill] sm:$0xff] }
 0x83d   : > { %v11510_v36 = vcombine.low %v14403_v29, %v14402_v1  ;;  %v3940_v50 = vsel %vm3644_vm11, %v6628_v46, 0  ;;  %v6627_v1 = vcombine.low %v14409_v55, %v14408_v34  ;;  %v14410_v29 = vld [vmem:[#allocation261_spill] sm:$0xff] }
 0x841   : > { %7249 = vmatpush3.bf16.xpose.msra.mxu0 %v3946_v8  ;;  %v14397_v8 = vld [vmem:[#allocation279_spill] sm:$0xff] }
 0x842   : > { %7267 = vmatpush3.bf16.xpose.msra.mxu1 %v3994_v44  ;;  %8083 = vmatprep.subr.msk.bf16.mxu0 %vm3644_vm11, %v11473_v6  ;;  %v3991_v44 = vsel %vm3644_vm11, %v11489_v48, 0  ;;  %v11500_v59 = vcombine.low %v14398_v56, %v14397_v8  ;;  %v14405_v56 = vld [vmem:[#allocation244_spill] sm:$0xff] }
 0x843   : > { %8091 = vmatprep.subr.msk.bf16.mxu1 %vm3644_vm11, %v11479_v27  ;;  %v14404_v27 = vld [vmem:[#allocation245_spill] sm:$0xff] }
 0x844   : > { %14399 = vst [vmem:[#allocation460_spill] sm:$0xff] %v11500_v59  ;;  %v6635_v8 = vcombine.low %v14405_v56, %v14404_v27  ;;  %v3937_v56 = vsel %vm3644_vm11, %v6627_v1, 0 }
 0x849   : > { %7251 = vmatpush3.bf16.xpose.msra.mxu0 %v3943_v21  ;;  %v3988_v21 = vsel %vm3644_vm11, %v11510_v36, 0 }
 0x84a   : > { %7269 = vmatpush3.bf16.xpose.msra.mxu1 %v3991_v44  ;;  %8084 = vmatprep.subr.msk.bf16.mxu0 %vm3644_vm11, %v11494_v35  ;;  %v14406_v44 = vld [vmem:[#allocation277_spill] sm:$0xff] }
 0x84b   : > { %8092 = vmatprep.subr.msk.bf16.mxu1 %vm3644_vm11, %v11500_v59  ;;  %v11519_v17 = vcombine.low %v14407_v51, %v14406_v44  ;;  %v14411_v59 = vld [vmem:[#allocation260_spill] sm:$0xff]  ;;  %v8187_v51 = vld [vmem:[%s13063_s9 + $0x8] sm:$0xff]  }
 0x84c   : > { %v11528_v27 = vcombine.low %v14411_v59, %v14410_v29 }
 0x851   : > { %7253 = vmatpush3.bf16.xpose.msra.mxu0 %v3940_v50  ;;  %v3985_v50 = vsel %vm3644_vm11, %v11528_v27, 0 }
 0x852   : > { %7271 = vmatpush3.bf16.xpose.msra.mxu1 %v3988_v21  ;;  %8085 = vmatprep.subr.msk.bf16.mxu0 %vm3644_vm11, %v6635_v8  ;;  %v8188_v21 = vld [vmem:[%s13063_s9] sm:$0xff]  }
 0x853   : > { %8093 = vmatprep.subr.msk.bf16.mxu1 %vm3644_vm11, %v11519_v17 }
 0x859   : > { %7255 = vmatpush3.bf16.xpose.msra.mxu0 %v3937_v56 }
 0x85a   : > { %7273 = vmatpush3.bf16.xpose.msra.mxu1 %v3985_v50  ;;  %7702 = vmatprep.subr.bf16.mxu0 %v8187_v51 }
 0x85b   : > { %7962 = vmatprep.subr.bf16.mxu1 %v8187_v51 }
 0x860   : > { %v11539_v44 = vpop.f32.mrf.mxu0  ;;  %7257 = vmatmul.mubr.msk.bf16.vlgmr.msra.gmra.mxu0 %vm3644_vm11, %v10801_v15 }
 0x861   : > { %v11543_v59 = vpop.f32.mrf.mxu1  ;;  %7275 = vmatmul.mubr.msk.bf16.vlgmr.msra.gmra.mxu1 %vm3644_vm11, %v10801_v15  ;;  %7703 = vmatpush3.bf16.msra.mxu0 %v8187_v51 }
 0x862   : > { %14412 = vst [vmem:[#allocation461_spill] sm:$0xff] %v11543_v59  ;;  %v11547_v34 = vpop.f32.mrf.mxu0  ;;  %7704 = vmatprep.subr.bf16.mxu0 %v8188_v21  ;;  %7706 = vmatprep.mubr.msk.bf16.mxu0 %vm3644_vm11, %v10933_v19 }
 0x863   : > { %v11551_v55 = vpop.f32.mrf.mxu1  ;;  %7964 = vmatpush3.bf16.msra.mxu1 %v8187_v51  ;;  %7894 = vmatprep.mubr.msk.bf16.mxu1 %vm3644_vm11, %v11175_v61  ;;  %v14433_v61 = vld [vmem:[#allocation420_spill] sm:$0xff] }
 0x864   : > { %v4070_v29 = vpop.f32.mrf.mxu0  ;;  %7963 = vmatprep.subr.bf16.mxu1 %v8188_v21 }
 0x865   : > { %v4111_v56 = vpop.f32.mrf.mxu1  ;;  %7705 = vmatpush3.bf16.msra.mxu0 %v8188_v21 }
 0x866   : > { %v4071_v50 = vpop.f32.mrf.mxu0  ;;  %v14448_v56 = vld [vmem:[#allocation21_spill] sm:$0xff] }
 0x867   : > { %v4112_v59 = vpop.f32.mrf.mxu1  ;;  %7965 = vmatpush3.bf16.msra.mxu1 %v8188_v21  ;;  %v14444_v21 = vld [vmem:[#allocation23_spill] sm:$0xff] }
 0x868   : > { %7707 = vmatmul.mubr.msk.bf16.vlgmr.msra.gmra.mxu0 %vm3644_vm11, %v10909_v54  ;;  %v14424_v54 = vld [vmem:[#allocation455_spill] sm:$0xff]  ;;  %v14446_v59 = vld [vmem:[#allocation25_spill] sm:$0xff] }
 0x869   : > { %7710 = vmatprep.mubr.msk.bf16.mxu0 %vm3644_vm11, %v10885_v7  ;;  %v14422_v7 = vld [vmem:[#allocation422_spill] sm:$0xff] }
 0x86a   : > { %7895 = vmatmul.mubr.msk.bf16.vlgmr.msra.gmra.mxu1 %vm3644_vm11, %v11151_v5  ;;  %v14432_v5 = vld [vmem:[#allocation394_spill] sm:$0xff] }
 0x86b   : > { %7898 = vmatprep.mubr.msk.bf16.mxu1 %vm3644_vm11, %v6627_v1  ;;  %v14442_v1 = vld [vmem:[#allocation49_spill] sm:$0xff] }
 0x86c   : > { %vm14445_vm14 = vcmp.lt.s32.totalorder %v14444_v21, %v14442_v1  ;;  %vm14447_vm15 = vcmp.lt.s32.totalorder %v14446_v59, %v14442_v1  ;;  %vm14449_vm1 = vcmp.lt.s32.totalorder %v14448_v56, %v14442_v1  ;;  %v14472_v21 = vld [vmem:[#allocation36_spill] sm:$0xff] }
 0x870   : > { %7711 = vmatmul.mubr.msk.bf16.gmra.mxu0 %vm3644_vm11, %v10861_v26  ;;  %v14419_v26 = vld [vmem:[#allocation458_spill] sm:$0xff] }
 0x871   : > { %7714 = vmatprep.mubr.msk.bf16.mxu0 %vm3644_vm11, %v10835_v18 }
 0x872   : > { %7899 = vmatmul.mubr.msk.bf16.gmra.mxu1 %vm3644_vm11, %v6628_v46 }
 0x873   : > { %7902 = vmatprep.mubr.msk.bf16.mxu1 %vm3644_vm11, %v6629_v4  ;;  %v14438_v4 = vld [vmem:[#allocation461_spill] sm:$0xff] }
 0x878   : > { %7715 = vmatmul.mubr.msk.bf16.gmra.mxu0 %vm3644_vm11, %v10807_v31 }
 0x879   : > { %7718 = vmatprep.mubr.msk.bf16.mxu0 %vm3644_vm11, %v10779_v42 }
 0x87a   : > { %7903 = vmatmul.mubr.msk.bf16.gmra.mxu1 %vm3644_vm11, %v11461_v12  ;;  %v14437_v12 = vld [vmem:[#allocation404_spill] sm:$0xff] }
 0x87b   : > { %7906 = vmatprep.mubr.msk.bf16.mxu1 %vm3644_vm11, %v11437_v58  ;;  %v14426_v58 = vld [vmem:[#allocation414_spill] sm:$0xff] }
 0x880   : > { %7719 = vmatmul.mubr.msk.bf16.gmra.mxu0 %vm3644_vm11, %v10752_v40 }
 0x881   : > { %7722 = vmatprep.mubr.msk.bf16.mxu0 %vm3644_vm11, %v10921_v45 }
 0x882   : > { %7907 = vmatmul.mubr.msk.bf16.gmra.mxu1 %vm3644_vm11, %v11413_v14  ;;  %v14428_v14 = vld [vmem:[#allocation410_spill] sm:$0xff] }
 0x883   : > { %7910 = vmatprep.mubr.msk.bf16.mxu1 %vm3644_vm11, %v11385_v63 }
 0x888   : > { %7723 = vmatmul.mubr.msk.bf16.gmra.mxu0 %vm3644_vm11, %v10897_v11  ;;  %v14423_v11 = vld [vmem:[#allocation456_spill] sm:$0xff] }
 0x889   : > { %7726 = vmatprep.mubr.msk.bf16.mxu0 %vm3644_vm11, %v10873_v53  ;;  %v14421_v53 = vld [vmem:[#allocation387_spill] sm:$0xff] }
 0x88a   : > { %7911 = vmatmul.mubr.msk.bf16.gmra.mxu1 %vm3644_vm11, %v11357_v16  ;;  %v14435_v16 = vld [vmem:[#allocation412_spill] sm:$0xff] }
 0x88b   : > { %7914 = vmatprep.mubr.msk.bf16.mxu1 %vm3644_vm11, %v6635_v8  ;;  %v14441_v8 = vld [vmem:[#allocation19_spill] sm:$0xff] }
 0x88c   : > { %vm14443_vm13 = vcmp.lt.s32.totalorder %v14441_v8, %v14442_v1 }
 0x890   : > { %7727 = vmatmul.mubr.msk.bf16.gmra.mxu0 %vm3644_vm11, %v10847_v13  ;;  %v14418_v13 = vld [vmem:[#allocation388_spill] sm:$0xff] }
 0x891   : > { %7730 = vmatprep.mubr.msk.bf16.mxu0 %vm3644_vm11, %v10823_v43 }
 0x892   : > { %7915 = vmatmul.mubr.msk.bf16.gmra.mxu1 %vm3644_vm11, %v11494_v35 }
 0x893   : > { %7918 = vmatprep.mubr.msk.bf16.mxu1 %vm3644_vm11, %v11473_v6  ;;  %v14439_v6 = vld [vmem:[#allocation400_spill] sm:$0xff] }
 0x898   : > { %7731 = vmatmul.mubr.msk.bf16.gmra.mxu0 %vm3644_vm11, %v10791_v24 }
 0x899   : > { %7734 = vmatprep.mubr.msk.bf16.mxu0 %vm3644_vm11, %v10760_v23 }
 0x89a   : > { %7919 = vmatmul.mubr.msk.bf16.gmra.mxu1 %vm3644_vm11, %v11449_v62 }
 0x89b   : > { %7922 = vmatprep.mubr.msk.bf16.mxu1 %vm3644_vm11, %v11425_v3 }
 0x8a0   : > { %v11607_v40 = vpop.f32.mrf.mxu0  ;;  %7735 = vmatmul.mubr.msk.bf16.gmra.mxu0 %vm3644_vm11, %v10744_v33  ;;  %v14413_v33 = vld [vmem:[#allocation391_spill] sm:$0xff] }
 0x8a1   : > { %v11611_v42 = vpop.f32.mrf.mxu1  ;;  %7738 = vmatprep.mubr.msk.bf16.mxu0 %vm3644_vm11, %v10939_v38  ;;  %v14425_v38 = vld [vmem:[#allocation418_spill] sm:$0xff] }
 0x8a2   : > { %v11615_v24 = vpop.f32.mrf.mxu0  ;;  %7923 = vmatmul.mubr.msk.bf16.gmra.mxu1 %vm3644_vm11, %v11401_v20 }
 0x8a3   : > { %v11619_v23 = vpop.f32.mrf.mxu1  ;;  %7926 = vmatprep.mubr.msk.bf16.mxu1 %vm3644_vm11, %v11369_v47  ;;  %v3002_v47 = vpop.permute.xlu0 %3001 }
 0x8a4   : > { %v4152_v15 = vpop.f32.mrf.mxu0  ;;  %v4067_v63 = vadd.f32 %v11539_v44, %v3002_v47  ;;  %v4190_v20 = vadd.f32 %v11611_v42, %v3002_v47  ;;  %v4108_v3 = vadd.f32 %v14438_v4, %v3002_v47  ;;  %v4151_v62 = vadd.f32 %v11615_v24, %v3002_v47 }
 0x8a5   : > { %v4193_v31 = vpop.f32.mrf.mxu1  ;;  %v4069_v35 = vadd.f32 %v11547_v34, %v3002_v47  ;;  %v4110_v46 = vadd.f32 %v11551_v55, %v3002_v47  ;;  %v4192_v51 = vadd.f32 %v11619_v23, %v3002_v47  ;;  %v14452_v15 = vld [vmem:[#allocation20_spill] sm:$0xff] }
 0x8a6   : > { %v4153_v43 = vpop.f32.mrf.mxu0  ;;  %v11738_v34 = vsel %vm14447_vm15, %v4190_v20, -1e+30  ;;  %v11743_v50 = vsel %vm14449_vm1, %v4108_v3, -1e+30  ;;  %vm14453_vm3 = vcmp.lt.s32.totalorder %v14452_v15, %v14442_v1  ;;  %vm5584_vm15 = vcmask 1024  }
 0x8a7   : > { %v4194_v18 = vpop.f32.mrf.mxu1  ;;  %v11753_v31 = vsel %vm14453_vm3, %v4069_v35, -1e+30  ;;  %v14454_v43 = vld [vmem:[#allocation22_spill] sm:$0xff] }
 0x8a8   : > { %7739 = vmatmul.mubr.msk.bf16.gmra.mxu0 %vm3644_vm11, %v10915_v39  ;;  %vm14455_vm0 = vcmp.lt.s32.totalorder %v14454_v43, %v14442_v1 }
 0x8a9   : > { %7742 = vmatprep.mubr.msk.bf16.mxu0 %vm3644_vm11, %v10891_v49  ;;  %v11758_v18 = vsel %vm14455_vm0, %v4110_v46, -1e+30 }
 0x8aa   : > { %7927 = vmatmul.mubr.msk.bf16.gmra.mxu1 %vm3644_vm11, %v11345_v22  ;;  %v14436_v22 = vld [vmem:[#allocation408_spill] sm:$0xff] }
 0x8ab   : > { %7930 = vmatprep.mubr.msk.bf16.mxu1 %vm3644_vm11, %v11528_v27  ;;  %v11727_v27 = vsel %vm14443_vm13, %v4067_v63, -1e+30  ;;  %vm14473_vm13 = vcmp.lt.s32.totalorder %v14472_v21, %v14442_v1  ;;  %v14487_v21 = vld [vmem:[#allocation405_spill] sm:$0xff] }
 0x8b0   : > { %7743 = vmatmul.mubr.msk.bf16.gmra.mxu0 %vm3644_vm11, %v10867_v25 }
 0x8b1   : > { %7746 = vmatprep.mubr.msk.bf16.mxu0 %vm3644_vm11, %v10841_v2  ;;  %v14417_v2 = vld [vmem:[#allocation389_spill] sm:$0xff] }
 0x8b2   : > { %7931 = vmatmul.mubr.msk.bf16.gmra.mxu1 %vm3644_vm11, %v11510_v36  ;;  %v14440_v36 = vld [vmem:[#allocation396_spill] sm:$0xff] }
 0x8b3   : > { %7934 = vmatprep.mubr.msk.bf16.mxu1 %vm3644_vm11, %v11489_v48  ;;  %v14431_v48 = vld [vmem:[#allocation398_spill] sm:$0xff] }
 0x8b8   : > { %7747 = vmatmul.mubr.msk.bf16.gmra.mxu0 %vm3644_vm11, %v10813_v32  ;;  %v14416_v32 = vld [vmem:[#allocation459_spill] sm:$0xff] }
 0x8b9   : > { %7750 = vmatprep.mubr.msk.bf16.mxu0 %vm3644_vm11, %v10785_v57  ;;  %v14415_v57 = vld [vmem:[#allocation460_spill] sm:$0xff] }
 0x8ba   : > { %7935 = vmatmul.mubr.msk.bf16.gmra.mxu1 %vm3644_vm11, %v11467_v9  ;;  %v14429_v9 = vld [vmem:[#allocation406_spill] sm:$0xff] }
 0x8bb   : > { %7938 = vmatprep.mubr.msk.bf16.mxu1 %vm3644_vm11, %v11443_v37  ;;  %v14427_v37 = vld [vmem:[#allocation454_spill] sm:$0xff] }
 0x8c0   : > { %7751 = vmatmul.mubr.msk.bf16.gmra.mxu0 %vm3644_vm11, %v10756_v60  ;;  %v14414_v60 = vld [vmem:[#allocation390_spill] sm:$0xff] }
 0x8c1   : > { %7754 = vmatprep.mubr.msk.bf16.mxu0 %vm3644_vm11, %v10927_v10 }
 0x8c2   : > { %7939 = vmatmul.mubr.msk.bf16.gmra.mxu1 %vm3644_vm11, %v11419_v30  ;;  %v14430_v30 = vld [vmem:[#allocation402_spill] sm:$0xff] }
 0x8c3   : > { %7942 = vmatprep.mubr.msk.bf16.mxu1 %vm3644_vm11, %v11391_v28  ;;  %v4149_v28 = vadd.f32 %v11607_v40, %v3002_v47  ;;  %v14450_v40 = vld [vmem:[#allocation24_spill] sm:$0xff] }
 0x8c4   : > { %vm14451_vm2 = vcmp.lt.s32.totalorder %v14450_v40, %v14442_v1 }
 0x8c5   : > { %v11733_v44 = vsel %vm14445_vm14, %v4149_v28, -1e+30  ;;  %v11748_v42 = vsel %vm14451_vm2, %v4151_v62, -1e+30  ;;  %v14470_v62 = vld [vmem:[#allocation42_spill] sm:$0xff] }
 0x8c6   : > { %vm14471_vm10 = vcmp.lt.s32.totalorder %v14470_v62, %v14442_v1  ;;  %v14485_v62 = vld [vmem:[#allocation413_spill] sm:$0xff] }
 0x8c8   : > { %7755 = vmatmul.mubr.msk.bf16.gmra.mxu0 %vm3644_vm11, %v10903_v0 }
 0x8c9   : > { %7758 = vmatprep.mubr.msk.bf16.mxu0 %vm3644_vm11, %v10879_v52 }
 0x8ca   : > { %7943 = vmatmul.mubr.msk.bf16.gmra.mxu1 %vm3644_vm11, %v11363_v41  ;;  %v14434_v41 = vld [vmem:[#allocation416_spill] sm:$0xff] }
 0x8cb   : > { %7946 = vmatprep.mubr.msk.bf16.mxu1 %vm3644_vm11, %v11519_v17  ;;  %v14420_v17 = vld [vmem:[#allocation457_spill] sm:$0xff] }
 0x8d0   : > { %7759 = vmatmul.mubr.msk.bf16.gmra.mxu0 %vm3644_vm11, %v14413_v33  ;;  %v5458_v33 = vsel %vm5457_vm12, %v11727_v27, -inf }
 0x8d1   : > { %7762 = vmatprep.mubr.msk.bf16.mxu0 %vm3644_vm11, %v14414_v60  ;;  %v5462_v60 = vsel %vm5457_vm12, %v11733_v44, -inf }
 0x8d2   : > { %7947 = vmatmul.mubr.msk.bf16.gmra.mxu1 %vm3644_vm11, %v14415_v57  ;;  %v5466_v57 = vsel %vm5457_vm12, %v11738_v34, -inf }
 0x8d3   : > { %7950 = vmatprep.mubr.msk.bf16.mxu1 %vm3644_vm11, %v14416_v32  ;;  %v14456_v32 = vld [vmem:[#allocation26_spill] sm:$0xff] }
 0x8d4   : > { %vm14457_vm5 = vcmp.lt.s32.totalorder %v14456_v32, %v14442_v1 }
 0x8d8   : > { %7763 = vmatmul.mubr.msk.bf16.gmra.mxu0 %vm3644_vm11, %v14417_v2  ;;  %v11769_v2 = vsel %vm14457_vm5, %v4192_v51, -1e+30 }
 0x8d9   : > { %7766 = vmatprep.mubr.msk.bf16.mxu0 %vm3644_vm11, %v14418_v13  ;;  %v5460_v13 = vsel %vm5457_vm12, %v11743_v50, -inf }
 0x8da   : > { %7951 = vmatmul.mubr.msk.bf16.gmra.mxu1 %vm3644_vm11, %v14419_v26  ;;  %v5464_v26 = vsel %vm5457_vm12, %v11748_v42, -inf }
 0x8db   : > { %7954 = vmatprep.mubr.msk.bf16.mxu1 %vm3644_vm11, %v14420_v17  ;;  %v14458_v17 = vld [vmem:[#allocation27_spill] sm:$0xff] }
 0x8dc   : > { %vm14459_vm6 = vcmp.lt.s32.totalorder %v14458_v17, %v14442_v1 }
 0x8e0   : > { %v4230_v25 = vpop.f32.mrf.mxu0  ;;  %7767 = vmatmul.mubr.msk.bf16.gmra.mxu0 %vm3644_vm11, %v14421_v53  ;;  %v14460_v53 = vld [vmem:[#allocation28_spill] sm:$0xff] }
 0x8e1   : > { %v4271_v52 = vpop.f32.mrf.mxu1  ;;  %7770 = vmatprep.mubr.msk.bf16.mxu0 %vm3644_vm11, %v14422_v7  ;;  %v4231_v55 = vadd.f32 %v4230_v25, %v3002_v47  ;;  %vm14461_vm7 = vcmp.lt.s32.totalorder %v14460_v53, %v14442_v1  ;;  %v5459_v7 = vsel %vm5457_vm12, %v11753_v31, -inf  ;;  %v14477_v53 = vld [vmem:[#allocation415_spill] sm:$0xff] }
 0x8e2   : > { %v4232_v49 = vpop.f32.mrf.mxu0  ;;  %7955 = vmatmul.mubr.msk.bf16.gmra.mxu1 %vm3644_vm11, %v14423_v11  ;;  %v4272_v24 = vadd.f32 %v4271_v52, %v3002_v47  ;;  %v14462_v11 = vld [vmem:[#allocation29_spill] sm:$0xff] }
 0x8e3   : > { %v4273_v0 = vpop.f32.mrf.mxu1  ;;  %7958 = vmatprep.mubr.msk.bf16.mxu1 %vm3644_vm11, %v14424_v54  ;;  %v4233_v29 = vadd.f32 %v4232_v49, %v3002_v47  ;;  %v11778_v25 = vsel %vm14459_vm6, %v4231_v55, -1e+30  ;;  %v5461_v49 = vsel %vm5457_vm12, %v11758_v18, -inf  ;;  %vm14463_vm4 = vcmp.lt.s32.totalorder %v14462_v11, %v14442_v1  ;;  %v14464_v54 = vld [vmem:[#allocation30_spill] sm:$0xff] }
 0x8e4   : > { %v4234_v39 = vpop.f32.mrf.mxu0  ;;  %v4274_v23 = vadd.f32 %v4273_v0, %v3002_v47  ;;  %v11792_v0 = vsel %vm14463_vm4, %v4272_v24, -1e+30  ;;  %vm14465_vm8 = vcmp.lt.s32.totalorder %v14464_v54, %v14442_v1  ;;  %v14474_v24 = vld [vmem:[#allocation48_spill] sm:$0xff] }
 0x8e5   : > { %v4275_v45 = vpop.f32.mrf.mxu1  ;;  %v11783_v52 = vsel %vm14461_vm7, %v4233_v29, -1e+30  ;;  %vm14475_vm14 = vcmp.lt.s32.totalorder %v14474_v24, %v14442_v1  ;;  %v14488_v24 = vld [vmem:[#allocation401_spill] sm:$0xff] }
 0x8e6   : > { %v4235_v10 = vpop.f32.mrf.mxu0  ;;  %v11797_v39 = vsel %vm14465_vm8, %v4274_v23, -1e+30 }
 0x8e7   : > { %v4276_v19 = vpop.f32.mrf.mxu1  ;;  %v14466_v10 = vld [vmem:[#allocation392_spill] sm:$0xff] }
 0x8e8   : > { %7771 = vmatmul.mubr.msk.bf16.gmra.mxu0 %vm3644_vm11, %v14425_v38  ;;  %v5463_v19 = vmax.f32 %v5458_v33, %v5462_v60  ;;  %v5467_v38 = vmax.f32 %v5460_v13, %v5466_v57 }
 0x8e9   : > { %7774 = vmatprep.mubr.msk.bf16.mxu0 %vm3644_vm11, %v14426_v58  ;;  %v5468_v58 = vsel %vm5457_vm12, %v11769_v2, -inf }
 0x8ea   : > { %7959 = vmatmul.mubr.msk.bf16.gmra.mxu1 %vm3644_vm11, %v14427_v37  ;;  %v5469_v4 = vmax.f32 %v5461_v49, %v5468_v58 }
 0x8f0   : > { %7775 = vmatmul.mubr.msk.bf16.gmra.mxu0 %vm3644_vm11, %v14428_v14 }
 0x8f1   : > { %7778 = vmatprep.mubr.msk.bf16.mxu0 %vm3644_vm11, %v14429_v9  ;;  %v14467_v9 = vld [vmem:[#allocation423_spill] sm:$0xff] }
 0x8f8   : > { %7779 = vmatmul.mubr.msk.bf16.gmra.mxu0 %vm3644_vm11, %v14430_v30  ;;  %v5465_v30 = vmax.f32 %v5459_v7, %v5464_v26  ;;  %v14476_v26 = vld [vmem:[#allocation419_spill] sm:$0xff] }
 0x8f9   : > { %7782 = vmatprep.mubr.msk.bf16.mxu0 %vm3644_vm11, %v14431_v48  ;;  %v5470_v48 = vsel %vm5457_vm12, %v11778_v25, -inf }
 0x900   : > { %7783 = vmatmul.mubr.msk.bf16.gmra.mxu0 %vm3644_vm11, %v14432_v5  ;;  %v5472_v5 = vsel %vm5457_vm12, %v11783_v52, -inf }
 0x901   : > { %7786 = vmatprep.mubr.msk.bf16.mxu0 %vm3644_vm11, %v14433_v61  ;;  %v5473_v8 = vmax.f32 %v5465_v30, %v5472_v5  ;;  %v14481_v30 = vld [vmem:[#allocation399_spill] sm:$0xff] }
 0x908   : > { %7787 = vmatmul.mubr.msk.bf16.gmra.mxu0 %vm3644_vm11, %v14434_v41 }
 0x909   : > { %7790 = vmatprep.mubr.msk.bf16.mxu0 %vm3644_vm11, %v14435_v16  ;;  %v5474_v16 = vsel %vm5457_vm12, %v11792_v0, -inf }
 0x90a   : > { %v5475_v29 = vmax.f32 %v5467_v38, %v5474_v16  ;;  %v14482_v16 = vld [vmem:[#allocation395_spill] sm:$0xff] }
 0x910   : > { %7791 = vmatmul.mubr.msk.bf16.gmra.mxu0 %vm3644_vm11, %v14436_v22  ;;  %v5476_v22 = vsel %vm5457_vm12, %v11797_v39, -inf }
 0x911   : > { %7794 = vmatprep.mubr.msk.bf16.mxu0 %vm3644_vm11, %v14437_v12  ;;  %v14468_v12 = vld [vmem:[#allocation33_spill] sm:$0xff]  ;;  %v5477_v56 = vmax.f32 %v5469_v4, %v5476_v22  ;;  %v14483_v22 = vld [vmem:[#allocation421_spill] sm:$0xff] }
 0x912   : > { %vm14469_vm9 = vcmp.lt.s32.totalorder %v14468_v12, %v14442_v1 }
 0x918   : > { %7795 = vmatmul.mubr.msk.bf16.gmra.mxu0 %vm3644_vm11, %v14439_v6 }
 0x919   : > { %7798 = vmatprep.mubr.msk.bf16.mxu0 %vm3644_vm11, %v14440_v36  ;;  %v5471_v36 = vmax.f32 %v5463_v19, %v5470_v48  ;;  %v14479_v19 = vld [vmem:[#allocation407_spill] sm:$0xff] }
 0x920   : > { %v4312_v45 = vpop.f32.mrf.mxu0  ;;  %7799 = vmatmul.mubr.msk.bf16.gmra.mxu0 %vm3644_vm11, %v14466_v10  ;;  %v14478_v10 = vld [vmem:[#allocation411_spill] sm:$0xff] }
 0x921   : > { %v4313_v37 = vadd.f32 %v4312_v45, %v3002_v47  ;;  %v4353_v14 = vpop.f32.mrf.mxu1  ;;  %7802 = vmatprep.mubr.msk.bf16.mxu0 %vm3644_vm11, %v14467_v9  ;;  %v14480_v9 = vld [vmem:[#allocation403_spill] sm:$0xff] }
 0x922   : > { %v4354_v61 = vadd.f32 %v4353_v14, %v3002_v47  ;;  %v4314_v41 = vpop.f32.mrf.mxu0 }
 0x923   : > { %v11816_v63 = vsel %vm14469_vm9, %v4313_v37, -1e+30  ;;  %v4315_v28 = vadd.f32 %v4314_v41, %v3002_v47  ;;  %v4355_v20 = vpop.f32.mrf.mxu1 }
 0x924   : > { %v5478_v3 = vsel %vm5457_vm12, %v11816_v63, -inf  ;;  %v11823_v6 = vsel %vm14471_vm10, %v4354_v61, -1e+30  ;;  %v4356_v35 = vadd.f32 %v4355_v20, %v3002_v47  ;;  %v4316_v46 = vpop.f32.mrf.mxu0 }
 0x925   : > { %v5482_v51 = vsel %vm5457_vm12, %v11823_v6, -inf  ;;  %v11830_v59 = vsel %vm14473_vm13, %v4315_v28, -1e+30  ;;  %v4357_v55 = vpop.f32.mrf.mxu1  ;;  %v5479_v15 = vmax.f32 %v5471_v36, %v5478_v3  ;;  %v14484_v3 = vld [vmem:[#allocation417_spill] sm:$0xff] }
 0x926   : > { %v5480_v40 = vsel %vm5457_vm12, %v11830_v59, -inf  ;;  %v11837_v47 = vsel %vm14475_vm14, %v4356_v35, -1e+30  ;;  %v4317_v23 = vpop.f32.mrf.mxu0  ;;  %v5483_v57 = vmax.f32 %v5475_v29, %v5482_v51  ;;  %v14486_v51 = vld [vmem:[#allocation409_spill] sm:$0xff] }
 0x927   : > { %v5481_v43 = vmax.f32 %v5473_v8, %v5480_v40  ;;  %v5484_v33 = vsel %vm5457_vm12, %v11837_v47, -inf  ;;  %v4358_v60 = vpop.f32.mrf.mxu1  ;;  %v14489_v23 = vld [vmem:[#allocation397_spill] sm:$0xff] }
 0x928   : > { %v5485_v32 = vmax.f32 %v5477_v56, %v5484_v33  ;;  %v11841_v13 = vpop.f32.mrf.mxu0  ;;  %7803 = vmatmul.mubr.msk.bf16.gmra.mxu0 %vm3644_vm11, %v14476_v26 }
 0x929   : > { %v5486_v17 = vmax.f32 %v5479_v15, %v5481_v43  ;;  %7806 = vmatprep.mubr.msk.bf16.mxu0 %vm3644_vm11, %v14477_v53 }
 0x92a   : > { %v11847_v1 = vpop.f32.mrf.mxu0  ;;  %v5487_v7 = vmax.f32 %v5483_v57, %v5485_v32  ;;  %v14490_v57 = vld [vmem:[#allocation393_spill] sm:$0xff]  ;;  %v14491_v32 = vld [vmem:[#allocation452_spill] sm:$0xff] }
 0x92c   : > { %v11849_v49 = vpop.f32.mrf.mxu0  ;;  %v5488_v11 = vmax.f32 %v5486_v17, %v5487_v7  ;;  %v11908_v17 = vld [vmem:[%s13064_s10] ss:$0 sm:$0xff] }
 0x92e   : > { %5489 = vmax.xlane.f32.xlu0 %v5488_v11  ;;  %v11851_v54 = vpop.f32.mrf.mxu0 }
 0x930   : > { %v11853_v45 = vpop.f32.mrf.mxu0  ;;  %7807 = vmatmul.mubr.msk.bf16.gmra.mxu0 %vm3644_vm11, %v14478_v10 }
 0x931   : > { %7810 = vmatprep.mubr.msk.bf16.mxu0 %vm3644_vm11, %v14479_v19 }
 0x932   : > { %v11859_v38 = vpop.f32.mrf.mxu0 }
 0x934   : > { %v11861_v58 = vpop.f32.mrf.mxu0 }
 0x936   : > { %v11863_v37 = vpop.f32.mrf.mxu0 }
 0x938   : > { %v11865_v14 = vpop.f32.mrf.mxu0  ;;  %7811 = vmatmul.mubr.msk.bf16.gmra.mxu0 %vm3644_vm11, %v14480_v9 }
 0x939   : > { %7814 = vmatprep.mubr.msk.bf16.mxu0 %vm3644_vm11, %v14481_v30 }
 0x93a   : > { %v11871_v48 = vpop.f32.mrf.mxu0 }
 0x93c   : > { %v7717_v5 = vpop.f32.mrf.mxu0 }
 0x93e   : > { %v11873_v61 = vpop.f32.mrf.mxu0 }
 0x940   : > { %v7720_v41 = vpop.f32.mrf.mxu0  ;;  %7815 = vmatmul.mubr.msk.bf16.gmra.mxu0 %vm3644_vm11, %v14482_v16 }
 0x941   : > { %7818 = vmatprep.mubr.msk.bf16.mxu0 %vm3644_vm11, %v14483_v22  ;;  %v4490_v19 = vadd.f32 %v7720_v41, %v11908_v17 }
 0x942   : > { %v4481_v12 = vpop.f32.mrf.mxu0 }
 0x943   : > { %v4482_v41 = vadd.f32 %v11908_v17, %v4481_v12  ;;  %v4474_v12 = vadd.f32 %v11865_v14, %v11908_v17 }
 0x944   : > { %v7721_v28 = vpop.f32.mrf.mxu0 }
 0x945   : > { %v4493_v53 = vadd.f32 %v7721_v28, %v11908_v17 }
 0x946   : > { %v4484_v20 = vpop.f32.mrf.mxu0 }
 0x947   : > { %v4485_v16 = vadd.f32 %v11908_v17, %v4484_v20 }
 0x948   : > { %v11879_v4 = vpop.f32.mrf.mxu0  ;;  %7819 = vmatmul.mubr.msk.bf16.gmra.mxu0 %vm3644_vm11, %v14484_v3  ;;  %v14492_v3 = vld [vmem:[#allocation448_spill] sm:$0xff] }
 0x949   : > { %7822 = vmatprep.mubr.msk.bf16.mxu0 %vm3644_vm11, %v14485_v62  ;;  %v14493_v62 = vld [vmem:[#allocation444_spill] sm:$0xff] }
 0x94a   : > { %v11885_v35 = vpop.f32.mrf.mxu0 }
 0x94c   : > { %v11887_v46 = vpop.f32.mrf.mxu0 }
 0x94e   : > { %v11889_v36 = vpop.f32.mrf.mxu0 }
 0x950   : > { %v7728_v8 = vpop.f32.mrf.mxu0  ;;  %7823 = vmatmul.mubr.msk.bf16.gmra.mxu0 %vm3644_vm11, %v14486_v51 }
 0x951   : > { %7826 = vmatprep.mubr.msk.bf16.mxu0 %vm3644_vm11, %v14487_v21 }
 0x952   : > { %v11895_v55 = vpop.f32.mrf.mxu0 }
 0x954   : > { %v7729_v29 = vpop.f32.mrf.mxu0 }
 0x955   : > { %v4525_v14 = vadd.f32 %v7729_v29, %v11908_v17  ;;  %v4458_v29 = vadd.f32 %v11853_v45, %v11908_v17  ;;  %v4450_v45 = vadd.f32 %v11908_v17, %v11859_v38  ;;  %v4442_v38 = vadd.f32 %v11841_v13, %v11908_v17 }
 0x956   : > { %v4516_v56 = vpop.f32.mrf.mxu0  ;;  %v4498_v13 = vadd.f32 %v11908_v17, %v11885_v35 }
 0x958   : > { %v7732_v40 = vpop.f32.mrf.mxu0  ;;  %7827 = vmatmul.mubr.msk.bf16.gmra.mxu0 %vm3644_vm11, %v14488_v24 }
 0x959   : > { %7830 = vmatprep.mubr.msk.bf16.mxu0 %vm3644_vm11, %v14489_v23  ;;  %v4538_v24 = vadd.f32 %v7732_v40, %v11908_v17  ;;  %v4477_v23 = vadd.f32 %v7717_v5, %v11908_v17  ;;  %v4469_v5 = vadd.f32 %v11908_v17, %v11873_v61 }
 0x95a   : > { %v4529_v15 = vpop.f32.mrf.mxu0 }
 0x95b   : > { %v4530_v40 = vadd.f32 %v11908_v17, %v4529_v15  ;;  %v4522_v15 = vadd.f32 %v7728_v8, %v11908_v17  ;;  %v4514_v8 = vadd.f32 %v11908_v17, %v11895_v55  ;;  %v4509_v55 = vadd.f32 %v11887_v46, %v11908_v17 }
 0x95c   : > { %v7733_v43 = vpop.f32.mrf.mxu0  ;;  %v4501_v46 = vadd.f32 %v11908_v17, %v11889_v36 }
 0x95d   : > { %v4541_v21 = vadd.f32 %v7733_v43, %v11908_v17 }
 0x95e   : > { %v4532_v33 = vpop.f32.mrf.mxu0 }
 0x960   : > { %v7736_v60 = vpop.f32.mrf.mxu0  ;;  %7831 = vmatmul.mubr.msk.bf16.gmra.mxu0 %vm3644_vm11, %v14490_v57  ;;  %v4533_v57 = vadd.f32 %v11908_v17, %v4532_v33 }
 0x961   : > { %7834 = vmatprep.mubr.msk.bf16.mxu0 %vm3644_vm11, %v14491_v32  ;;  %v4554_v11 = vadd.f32 %v7736_v60, %v11908_v17  ;;  %v14494_v32 = vld [vmem:[#allocation440_spill] sm:$0xff] }
 0x962   : > { %v4545_v26 = vpop.f32.mrf.mxu0 }
 0x963   : > { %v4546_v28 = vadd.f32 %v11908_v17, %v4545_v26  ;;  %v14495_v26 = vld [vmem:[#allocation436_spill] sm:$0xff] }
 0x964   : > { %v7737_v7 = vpop.f32.mrf.mxu0 }
 0x965   : > { %v4557_v10 = vadd.f32 %v7737_v7, %v11908_v17 }
 0x966   : > { %v4548_v9 = vpop.f32.mrf.mxu0 }
 0x967   : > { %7406 = vmatprep.subr.mxu1 %v4557_v10  ;;  %v4549_v30 = vadd.f32 %v11908_v17, %v4548_v9  ;;  %v4517_v10 = vadd.f32 %v11908_v17, %v4516_v56  ;;  %v4453_v56 = vadd.f32 %v11908_v17, %v11863_v37  ;;  %v4506_v37 = vadd.f32 %v11879_v4, %v11908_v17 }
 0x968   : > { %7407 = vmatpush3.msra.mxu1 %v4493_v53  ;;  %v11916_v22 = vpop.f32.mrf.mxu0  ;;  %7835 = vmatmul.mubr.msk.bf16.gmra.mxu0 %vm3644_vm11, %v14492_v3  ;;  %v4466_v53 = vadd.f32 %v11908_v17, %v11871_v48  ;;  %v4437_v4 = vadd.f32 %v11908_v17, %v11851_v54  ;;  %v14500_v54 = vld [vmem:[#allocation446_spill] sm:$0xff] }
 0x969   : > { %7408 = vmatprep.subr.mxu1 %v4554_v11  ;;  %7838 = vmatprep.mubr.msk.bf16.mxu0 %vm3644_vm11, %v14493_v62  ;;  %v4461_v11 = vadd.f32 %v11861_v58, %v11908_v17  ;;  %v14497_v58 = vld [vmem:[#allocation428_spill] sm:$0xff]  ;;  %v14498_v62 = vld [vmem:[#allocation425_spill] sm:$0xff] }
 0x96a   : > { %7409 = vmatpush3.msra.mxu1 %v4490_v19  ;;  %v11924_v51 = vpop.f32.mrf.mxu0  ;;  %v14496_v19 = vld [vmem:[#allocation432_spill] sm:$0xff] }
 0x96b   : > { %7410 = vmatprep.subr.mxu1 %v4549_v30 }
 0x96c   : > { %7411 = vmatpush3.msra.mxu1 %v4485_v16  ;;  %v11927_v20 = vpop.f32.mrf.mxu0  ;;  %v4445_v16 = vadd.f32 %v11849_v49, %v11908_v17  ;;  %v14499_v49 = vld [vmem:[#allocation450_spill] sm:$0xff] }
 0x96d   : > { %7412 = vmatprep.subr.mxu1 %v4546_v28 }
 0x96e   : > { %7413 = vmatpush3.msra.mxu1 %v4482_v41  ;;  %v11931_v60 = vpop.f32.mrf.mxu0 }
 0x96f   : > { %7414 = vmatprep.subr.mxu1 %v4541_v21  ;;  %v4434_v21 = vadd.f32 %v11908_v17, %v11847_v1 }
 0x970   : > { %7415 = vmatpush3.msra.mxu1 %v4477_v23  ;;  %v11936_v43 = vpop.f32.mrf.mxu0  ;;  %7839 = vmatmul.mubr.msk.bf16.gmra.mxu0 %vm3644_vm11, %v14494_v32 }
 0x971   : > { %7416 = vmatprep.subr.mxu1 %v4538_v24  ;;  %7842 = vmatprep.mubr.msk.bf16.mxu0 %vm3644_vm11, %v14495_v26  ;;  %v14503_v26 = vld [vmem:[#allocation434_spill] sm:$0xff] }
 0x972   : > { %7417 = vmatpush3.msra.mxu1 %v4474_v12  ;;  %v11945_v33 = vpop.f32.mrf.mxu0 }
 0x973   : > { %7418 = vmatprep.subr.mxu1 %v4533_v57  ;;  %v14501_v57 = vld [vmem:[#allocation442_spill] sm:$0xff] }
 0x974   : > { %7419 = vmatpush3.msra.mxu1 %v4469_v5  ;;  %v11950_v7 = vpop.f32.mrf.mxu0 }
 0x975   : > { %7420 = vmatprep.subr.mxu1 %v4530_v40  ;;  %v14502_v40 = vld [vmem:[#allocation438_spill] sm:$0xff] }
 0x976   : > { %7421 = vmatpush3.msra.mxu1 %v4466_v53  ;;  %v11955_v61 = vpop.f32.mrf.mxu0 }
 0x977   : > { %7422 = vmatprep.subr.mxu1 %v4525_v14 }
 0x978   : > { %7423 = vmatpush3.msra.mxu1 %v4461_v11  ;;  %v11960_v48 = vpop.f32.mrf.mxu0  ;;  %7843 = vmatmul.mubr.msk.bf16.gmra.mxu0 %vm3644_vm11, %v14496_v19  ;;  %v14504_v11 = vld [vmem:[#allocation430_spill] sm:$0xff] }
 0x979   : > { %7424 = vmatprep.subr.mxu1 %v4522_v15  ;;  %7846 = vmatprep.mubr.msk.bf16.mxu0 %vm3644_vm11, %v14497_v58 }
 0x97a   : > { %7425 = vmatpush3.msra.mxu1 %v4458_v29  ;;  %v11970_v9 = vpop.f32.mrf.mxu0 }
 0x97b   : > { %7426 = vmatprep.subr.mxu1 %v4517_v10  ;;  %v14505_v10 = vld [vmem:[#allocation427_spill] sm:$0xff] }
 0x97c   : > { %7427 = vmatpush3.msra.mxu1 %v4453_v56  ;;  %v11974_v30 = vpop.f32.mrf.mxu0  ;;  %v14506_v56 = vld [vmem:[#allocation424_spill] sm:$0xff] }
 0x97d   : > { %7428 = vmatprep.subr.mxu1 %v4514_v8 }
 0x97e   : > { %7429 = vmatpush3.msra.mxu1 %v4450_v45  ;;  %v11980_v3 = vpop.f32.mrf.mxu0  ;;  %v14507_v45 = vld [vmem:[#allocation453_spill] sm:$0xff] }
 0x97f   : > { %7430 = vmatprep.subr.mxu1 %v4509_v55 }
 0x980   : > { %7431 = vmatpush3.msra.mxu1 %v4445_v16  ;;  %v11986_v28 = vpop.f32.mrf.mxu0  ;;  %7847 = vmatmul.mubr.msk.bf16.gmra.mxu0 %vm3644_vm11, %v14498_v62 }
 0x981   : > { %7432 = vmatprep.subr.mxu1 %v4506_v37  ;;  %7850 = vmatprep.mubr.msk.bf16.mxu0 %vm3644_vm11, %v14499_v49  ;;  %v14510_v49 = vld [vmem:[#allocation445_spill] sm:$0xff] }
 0x982   : > { %7433 = vmatpush3.msra.mxu1 %v4442_v38  ;;  %v11996_v41 = vpop.f32.mrf.mxu0 }
 0x983   : > { %7434 = vmatprep.subr.mxu1 %v4501_v46  ;;  %v14509_v46 = vld [vmem:[#allocation449_spill] sm:$0xff] }
 0x984   : > { %7435 = vmatpush3.msra.mxu1 %v4437_v4  ;;  %v12002_v24 = vpop.f32.mrf.mxu0 }
 0x985   : > { %7436 = vmatprep.subr.mxu1 %v4498_v13 }
 0x986   : > { %7437 = vmatpush3.msra.mxu1 %v4434_v21  ;;  %v12004_v36 = vpop.f32.mrf.mxu0 }
 0x988   : > { %v12006_v23 = vpop.f32.mrf.mxu0  ;;  %7851 = vmatmul.mubr.msk.bf16.gmra.mxu0 %vm3644_vm11, %v14500_v54 }
 0x989   : > { %7854 = vmatprep.mubr.msk.bf16.mxu0 %vm3644_vm11, %v14501_v57  ;;  %v14515_v57 = vld [vmem:[#allocation441_spill] sm:$0xff] }
 0x98a   : > { %v12012_v35 = vpop.f32.mrf.mxu0 }
 0x98c   : > { %v12014_v12 = vpop.f32.mrf.mxu0 }
 0x98e   : > { %v12016_v1 = vpop.f32.mrf.mxu0 }
 0x990   : > { %v12018_v32 = vpop.f32.mrf.mxu0  ;;  %7855 = vmatmul.mubr.msk.bf16.gmra.mxu0 %vm3644_vm11, %v14502_v40  ;;  %v14516_v40 = vld [vmem:[#allocation437_spill] sm:$0xff] }
 0x991   : > { %7858 = vmatprep.mubr.msk.bf16.mxu0 %vm3644_vm11, %v14503_v26 }
 0x992   : > { %v12024_v5 = vpop.f32.mrf.mxu0 }
 0x994   : > { %v12026_v14 = vpop.f32.mrf.mxu0 }
 0x996   : > { %v12028_v53 = vpop.f32.mrf.mxu0 }
 0x998   : > { %v12030_v15 = vpop.f32.mrf.mxu0  ;;  %7859 = vmatmul.mubr.msk.bf16.gmra.mxu0 %vm3644_vm11, %v14504_v11 }
 0x999   : > { %7862 = vmatprep.mubr.msk.bf16.mxu0 %vm3644_vm11, %v14505_v10  ;;  %v5456_v10 = vld [vmem:[#allocation6] sm:$0x3] }
 0x99a   : > { %v12036_v29 = vpop.f32.mrf.mxu0 }
 0x99c   : > { %v12038_v19 = vpop.f32.mrf.mxu0 }
 0x99e   : > { %v12040_v8 = vpop.f32.mrf.mxu0 }
 0x9a0   : > { %v12042_v58 = vpop.f32.mrf.mxu0  ;;  %7863 = vmatmul.mubr.msk.bf16.gmra.mxu0 %vm3644_vm11, %v14506_v56 }
 0x9a1   : > { %7866 = vmatprep.mubr.msk.bf16.mxu0 %vm3644_vm11, %v14507_v45 }
 0x9a2   : > { %v12048_v55 = vpop.f32.mrf.mxu0 }
 0x9a4   : > { %v7769_v16 = vpop.f32.mrf.mxu0 }
 0x9a5   : > { %v4685_v37 = vadd.f32 %v7769_v16, %v11908_v17 }
 0x9a6   : > { %v12051_v38 = vpop.f32.mrf.mxu0 }
 0x9a7   : > { %7441 = vmatprep.subr.mxu1 %v4685_v37 }
 0x9a8   : > { %v12053_v62 = vpop.f32.mrf.mxu0  ;;  %7867 = vmatmul.mubr.msk.bf16.gmra.mxu0 %vm3644_vm11, %v14509_v46  ;;  %v14521_v46 = vld [vmem:[#allocation433_spill] sm:$0xff] }
 0x9a9   : > { %14508 = vst [vmem:[#allocation391_spill] sm:$0xff] %v12053_v62  ;;  %7870 = vmatprep.mubr.msk.bf16.mxu0 %vm3644_vm11, %v14510_v49  ;;  %v14522_v49 = vld [vmem:[#allocation429_spill] sm:$0xff] }
 0x9aa   : > { %v12059_v4 = vpop.f32.mrf.mxu0 }
 0x9ab   : > { %14511 = vst [vmem:[#allocation390_spill] sm:$0xff] %v12059_v4 }
 0x9ac   : > { %v12061_v13 = vpop.f32.mrf.mxu0 }
 0x9ad   : > { %14512 = vst [vmem:[#allocation460_spill] sm:$0xff] %v12061_v13  ;;  %v14526_v13 = vld [vmem:[#allocation426_spill] sm:$0xff] }
 0x9ae   : > { %v12063_v21 = vpop.f32.mrf.mxu0 }
 0x9af   : > { %14513 = vst [vmem:[#allocation459_spill] sm:$0xff] %v12063_v21 }
 0x9b0   : > { %v12065_v54 = vpop.f32.mrf.mxu0  ;;  %7871 = vmatmul.mubr.msk.bf16.gmra.mxu0 %vm3644_vm11, %v14515_v57 }
 0x9b1   : > { %14514 = vst [vmem:[#allocation389_spill] sm:$0xff] %v12065_v54  ;;  %7874 = vmatprep.mubr.msk.bf16.mxu0 %vm3644_vm11, %v14516_v40 }
 0x9b2   : > { %v12071_v26 = vpop.f32.mrf.mxu0 }
 0x9b3   : > { %14517 = vst [vmem:[#allocation388_spill] sm:$0xff] %v12071_v26  ;;  %v14531_v26 = vld [vmem:[#allocation447_spill] sm:$0xff] }
 0x9b4   : > { %v12073_v11 = vpop.f32.mrf.mxu0 }
 0x9b5   : > { %14518 = vst [vmem:[#allocation458_spill] sm:$0xff] %v12073_v11 }
 0x9b6   : > { %v12075_v56 = vpop.f32.mrf.mxu0 }
 0x9b7   : > { %14519 = vst [vmem:[#allocation457_spill] sm:$0xff] %v12075_v56  ;;  %v5490_v45 = vpop.xlane.xlu0 %5489 }
 0x9b8   : > { %v5491_v16 = vmax.f32 %v5456_v10, %v5490_v45  ;;  %v12077_v37 = vpop.f32.mrf.mxu0  ;;  %7875 = vmatmul.mubr.msk.bf16.gmra.mxu0 %vm3644_vm11, %v14521_v46  ;;  %v14527_v46 = vld [vmem:[#allocation451_spill] sm:$0xff] }
 0x9b9   : > { %14520 = vst [vmem:[#allocation387_spill] sm:$0xff] %v12077_v37  ;;  %7878 = vmatprep.mubr.msk.bf16.mxu0 %vm3644_vm11, %v14522_v49 }
 0x9ba   : > { %v5492_v57 = vsub.f32 %v5456_v10, %v5491_v16  ;;  %6156 = vst.msk [vmem:[#allocation6] sm:$0x3] %vm5584_vm15, %v5491_v16  ;;  %5497 = vperm.xlu1 %8186, %v5491_v16   ;;  %v12084_v40 = vpop.f32.mrf.mxu0 }
 0x9bb   : > { %14523 = vst [vmem:[#allocation422_spill] sm:$0xff] %v12084_v40  ;;  %v14538_v40 = vld [vmem:[#allocation439_spill] sm:$0xff] }
 0x9bc   : > { %v5493_v4 = vmul.f32 1.442695, %v5492_v57  ;;  %v12086_v21 = vpop.f32.mrf.mxu0 }
 0x9bd   : > { %14524 = vst [vmem:[#allocation456_spill] sm:$0xff] %v12086_v21 }
 0x9be   : > { %8189 = vpow2.f32 %v5493_v4  ;;  %v12088_v62 = vpop.f32.mrf.mxu0  ;;  %v14532_v4 = vld [vmem:[#allocation443_spill] sm:$0xff] }
 0x9bf   : > { %14525 = vst [vmem:[#allocation455_spill] sm:$0xff] %v12088_v62 }
 0x9c0   : > { %v12090_v45 = vpop.f32.mrf.mxu0  ;;  %7879 = vmatmul.mubr.msk.bf16.gmra.mxu0 %vm3644_vm11, %v14526_v13 }
 0x9c1   : > { %7882 = vmatprep.mubr.msk.bf16.mxu0 %vm3644_vm11, %v14527_v46 }
 0x9c2   : > { %v12096_v10 = vpop.f32.mrf.mxu0 }
 0x9c3   : > { %14528 = vst [vmem:[#allocation418_spill] sm:$0xff] %v12096_v10 }
 0x9c4   : > { %v12098_v49 = vpop.f32.mrf.mxu0 }
 0x9c6   : > { %v12100_v16 = vpop.f32.mrf.mxu0 }
 0x9c7   : > { %14529 = vst [vmem:[#allocation414_spill] sm:$0xff] %v12100_v16 }
 0x9c8   : > { %v12102_v57 = vpop.f32.mrf.mxu0  ;;  %7883 = vmatmul.mubr.msk.bf16.gmra.mxu0 %vm3644_vm11, %v14531_v26 }
 0x9c9   : > { %14530 = vst [vmem:[#allocation454_spill] sm:$0xff] %v12102_v57  ;;  %7886 = vmatprep.mubr.msk.bf16.mxu0 %vm3644_vm11, %v14532_v4  ;;  %v14539_v57 = vld [vmem:[#allocation435_spill] sm:$0xff] }
 0x9ca   : > { %v12108_v56 = vpop.f32.mrf.mxu0 }
 0x9cb   : > { %14533 = vst [vmem:[#allocation410_spill] sm:$0xff] %v12108_v56  ;;  %v12110_v13 = vpop.eup %8189 }
 0x9cc   : > { %14534 = vst [vmem:[#allocation406_spill] sm:$0xff] %v12110_v13  ;;  %5589 = vperm.xlu0 %8185, %v12110_v13   ;;  %v12113_v46 = vpop.f32.mrf.mxu0  ;;  %v14544_v13 = vld [vmem:[#allocation431_spill] sm:$0xff] }
 0x9cd   : > { %14535 = vst [vmem:[#allocation402_spill] sm:$0xff] %v12113_v46 }
 0x9ce   : > { %v12115_v54 = vpop.f32.mrf.mxu0 }
 0x9cf   : > { %14536 = vst [vmem:[#allocation398_spill] sm:$0xff] %v12115_v54 }
 0x9d0   : > { %v12117_v11 = vpop.f32.mrf.mxu0  ;;  %7887 = vmatmul.mubr.msk.bf16.gmra.mxu0 %vm3644_vm11, %v14538_v40 }
 0x9d1   : > { %14537 = vst [vmem:[#allocation394_spill] sm:$0xff] %v12117_v11  ;;  %7890 = vmatprep.mubr.msk.bf16.mxu0 %vm3644_vm11, %v14539_v57 }
 0x9d2   : > { %v12123_v26 = vpop.f32.mrf.mxu0 }
 0x9d3   : > { %14540 = vst [vmem:[#allocation420_spill] sm:$0xff] %v12123_v26 }
 0x9d4   : > { %v12125_v4 = vpop.f32.mrf.mxu0 }
 0x9d5   : > { %14541 = vst [vmem:[#allocation416_spill] sm:$0xff] %v12125_v4 }
 0x9d6   : > { %v12127_v56 = vpop.f32.mrf.mxu0 }
 0x9d7   : > { %14542 = vst [vmem:[#allocation412_spill] sm:$0xff] %v12127_v56 }
 0x9d8   : > { %v12129_v62 = vpop.f32.mrf.mxu0  ;;  %7891 = vmatmul.mubr.msk.bf16.gmra.mxu0 %vm3644_vm11, %v14544_v13  ;;  %vm6154_vm11 = vcmask 254976  }
 0x9d9   : > { %14543 = vst [vmem:[#allocation408_spill] sm:$0xff] %v12129_v62 }
 0x9da   : > { %v12133_v54 = vpop.f32.mrf.mxu0 }
 0x9db   : > { %14545 = vst [vmem:[#allocation404_spill] sm:$0xff] %v12133_v54 }
 0x9dc   : > { %v12135_v46 = vpop.f32.mrf.mxu0 }
 0x9dd   : > { %14546 = vst [vmem:[#allocation461_spill] sm:$0xff] %v12135_v46 }
 0x9de   : > { %v12137_v11 = vpop.f32.mrf.mxu0 }
 0x9df   : > { %14547 = vst [vmem:[#allocation400_spill] sm:$0xff] %v12137_v11 }
 0x9e0   : > { %v12139_v40 = vpop.f32.mrf.mxu0 }
 0x9e2   : > { %v12141_v57 = vpop.f32.mrf.mxu0 }
 0x9e3   : > { %14548 = vst [vmem:[#allocation396_spill] sm:$0xff] %v12141_v57 }
 0x9e4   : > { %v12143_v26 = vpop.f32.mrf.mxu0 }
 0x9e6   : > { %v12145_v4 = vpop.f32.mrf.mxu0 }
 0x9e8   : > { %v12147_v56 = vpop.f32.mrf.mxu0 }
 0x9e9   : > { %14549 = vst [vmem:[#allocation392_spill] sm:$0xff] %v12147_v56  ;;  %v12169_v56 = vpop.f32.mrf.mxu1 }
 0x9ea   : > { %v12149_v37 = vpop.f32.mrf.mxu0  ;;  %14560 = vst [vmem:[#allocation413_spill] sm:$0xff] %v12169_v56 }
 0x9eb   : > { %14550 = vst [vmem:[#allocation423_spill] sm:$0xff] %v12149_v37 }
 0x9ec   : > { %v12151_v62 = vpop.f32.mrf.mxu0 }
 0x9ed   : > { %14551 = vst [vmem:[#allocation419_spill] sm:$0xff] %v12151_v62 }
 0x9ee   : > { %v12153_v13 = vpop.f32.mrf.mxu0 }
 0x9ef   : > { %14552 = vst [vmem:[#allocation415_spill] sm:$0xff] %v12153_v13  ;;  %v12175_v13 = vpop.f32.mrf.mxu1 }
 0x9f0   : > { %v12155_v54 = vpop.f32.mrf.mxu0  ;;  %14563 = vst [vmem:[#allocation401_spill] sm:$0xff] %v12175_v13 }
 0x9f1   : > { %14553 = vst [vmem:[#allocation411_spill] sm:$0xff] %v12155_v54 }
 0x9f2   : > { %v12157_v21 = vpop.f32.mrf.mxu0 }
 0x9f3   : > { %14554 = vst [vmem:[#allocation407_spill] sm:$0xff] %v12157_v21 }
 0x9f4   : > { %v12159_v11 = vpop.f32.mrf.mxu0 }
 0x9f5   : > { %14555 = vst [vmem:[#allocation403_spill] sm:$0xff] %v12159_v11  ;;  %v12181_v11 = vpop.f32.mrf.mxu1 }
 0x9f6   : > { %v12161_v46 = vpop.f32.mrf.mxu0  ;;  %14566 = vst [vmem:[#allocation452_spill] sm:$0xff] %v12181_v11 }
 0x9f7   : > { %14556 = vst [vmem:[#allocation399_spill] sm:$0xff] %v12161_v46 }
 0x9f8   : > { %v12163_v10 = vpop.f32.mrf.mxu0 }
 0x9f9   : > { %14557 = vst [vmem:[#allocation395_spill] sm:$0xff] %v12163_v10 }
 0x9fa   : > { %v12165_v57 = vpop.f32.mrf.mxu0 }
 0x9fb   : > { %14558 = vst [vmem:[#allocation421_spill] sm:$0xff] %v12165_v57  ;;  %v12187_v57 = vpop.f32.mrf.mxu1 }
 0x9fc   : > { %v12167_v16 = vpop.f32.mrf.mxu0  ;;  %14569 = vst [vmem:[#allocation440_spill] sm:$0xff] %v12187_v57 }
 0x9fd   : > { %14559 = vst [vmem:[#allocation417_spill] sm:$0xff] %v12167_v16 }
 0x9fe   : > { %v12171_v37 = vpop.f32.mrf.mxu0 }
 0x9ff   : > { %14561 = vst [vmem:[#allocation409_spill] sm:$0xff] %v12171_v37  ;;  %v12193_v37 = vpop.f32.mrf.mxu1 }
 0xa00   : > { %v12173_v62 = vpop.f32.mrf.mxu0  ;;  %14572 = vst [vmem:[#allocation428_spill] sm:$0xff] %v12193_v37 }
 0xa01   : > { %14562 = vst [vmem:[#allocation405_spill] sm:$0xff] %v12173_v62 }
 0xa02   : > { %v12177_v54 = vpop.f32.mrf.mxu0 }
 0xa03   : > { %14564 = vst [vmem:[#allocation397_spill] sm:$0xff] %v12177_v54  ;;  %v12199_v54 = vpop.f32.mrf.mxu1 }
 0xa04   : > { %v12179_v21 = vpop.f32.mrf.mxu0  ;;  %14575 = vst [vmem:[#allocation446_spill] sm:$0xff] %v12199_v54 }
 0xa05   : > { %14565 = vst [vmem:[#allocation393_spill] sm:$0xff] %v12179_v21 }
 0xa06   : > { %v12183_v46 = vpop.f32.mrf.mxu0 }
 0xa07   : > { %14567 = vst [vmem:[#allocation448_spill] sm:$0xff] %v12183_v46  ;;  %v12205_v46 = vpop.f32.mrf.mxu1 }
 0xa08   : > { %v12185_v10 = vpop.f32.mrf.mxu0  ;;  %14578 = vst [vmem:[#allocation434_spill] sm:$0xff] %v12205_v46 }
 0xa09   : > { %14568 = vst [vmem:[#allocation444_spill] sm:$0xff] %v12185_v10 }
 0xa0a   : > { %v12189_v16 = vpop.f32.mrf.mxu0 }
 0xa0b   : > { %14570 = vst [vmem:[#allocation436_spill] sm:$0xff] %v12189_v16  ;;  %v12211_v16 = vpop.f32.mrf.mxu1 }
 0xa0c   : > { %v12191_v56 = vpop.f32.mrf.mxu0  ;;  %14581 = vst [vmem:[#allocation424_spill] sm:$0xff] %v12211_v16 }
 0xa0d   : > { %14571 = vst [vmem:[#allocation432_spill] sm:$0xff] %v12191_v56 }
 0xa0e   : > { %v12195_v62 = vpop.f32.mrf.mxu0 }
 0xa0f   : > { %14573 = vst [vmem:[#allocation425_spill] sm:$0xff] %v12195_v62  ;;  %v12217_v62 = vpop.f32.mrf.mxu1 }
 0xa10   : > { %v12197_v13 = vpop.f32.mrf.mxu0  ;;  %14584 = vst [vmem:[#allocation445_spill] sm:$0xff] %v12217_v62 }
 0xa11   : > { %14574 = vst [vmem:[#allocation450_spill] sm:$0xff] %v12197_v13 }
 0xa12   : > { %v12201_v21 = vpop.f32.mrf.mxu0 }
 0xa13   : > { %14576 = vst [vmem:[#allocation442_spill] sm:$0xff] %v12201_v21  ;;  %v12223_v21 = vpop.f32.mrf.mxu1 }
 0xa14   : > { %v12203_v11 = vpop.f32.mrf.mxu0  ;;  %14587 = vst [vmem:[#allocation433_spill] sm:$0xff] %v12223_v21 }
 0xa15   : > { %14577 = vst [vmem:[#allocation438_spill] sm:$0xff] %v12203_v11 }
 0xa16   : > { %v12207_v10 = vpop.f32.mrf.mxu0 }
 0xa17   : > { %14579 = vst [vmem:[#allocation430_spill] sm:$0xff] %v12207_v10  ;;  %v12229_v10 = vpop.f32.mrf.mxu1 }
 0xa18   : > { %v12209_v57 = vpop.f32.mrf.mxu0  ;;  %14590 = vst [vmem:[#allocation451_spill] sm:$0xff] %v12229_v10 }
 0xa19   : > { %14580 = vst [vmem:[#allocation427_spill] sm:$0xff] %v12209_v57 }
 0xa1a   : > { %v12213_v56 = vpop.f32.mrf.mxu0 }
 0xa1b   : > { %14582 = vst [vmem:[#allocation453_spill] sm:$0xff] %v12213_v56  ;;  %v12235_v56 = vpop.f32.mrf.mxu1 }
 0xa1c   : > { %v12215_v37 = vpop.f32.mrf.mxu0  ;;  %14593 = vst [vmem:[#allocation439_spill] sm:$0xff] %v12235_v56 }
 0xa1d   : > { %14583 = vst [vmem:[#allocation449_spill] sm:$0xff] %v12215_v37 }
 0xa1e   : > { %v12219_v13 = vpop.f32.mrf.mxu0 }
 0xa1f   : > { %14585 = vst [vmem:[#allocation441_spill] sm:$0xff] %v12219_v13  ;;  %v12241_v13 = vpop.f32.mrf.mxu1 }
 0xa20   : > { %v12221_v54 = vpop.f32.mrf.mxu0  ;;  %14596 = vst [vmem:[#allocation462_spill] sm:$0xff] %v12241_v13 }
 0xa21   : > { %14586 = vst [vmem:[#allocation437_spill] sm:$0xff] %v12221_v54 }
 0xa22   : > { %v12225_v11 = vpop.f32.mrf.mxu0 }
 0xa23   : > { %14588 = vst [vmem:[#allocation429_spill] sm:$0xff] %v12225_v11  ;;  %v12247_v11 = vpop.f32.mrf.mxu1 }
 0xa24   : > { %v12227_v46 = vpop.f32.mrf.mxu0  ;;  %14599 = vst [vmem:[#allocation465_spill] sm:$0xff] %v12247_v11 }
 0xa25   : > { %14589 = vst [vmem:[#allocation426_spill] sm:$0xff] %v12227_v46 }
 0xa26   : > { %v12231_v57 = vpop.f32.mrf.mxu0 }
 0xa27   : > { %14591 = vst [vmem:[#allocation447_spill] sm:$0xff] %v12231_v57 }
 0xa28   : > { %v12233_v16 = vpop.f32.mrf.mxu0 }
 0xa29   : > { %14592 = vst [vmem:[#allocation443_spill] sm:$0xff] %v12233_v16  ;;  %v12255_v16 = vpop.f32.mrf.mxu1 }
 0xa2a   : > { %v12237_v37 = vpop.f32.mrf.mxu0  ;;  %14602 = vst [vmem:[#allocation468_spill] sm:$0xff] %v12255_v16 }
 0xa2b   : > { %14594 = vst [vmem:[#allocation435_spill] sm:$0xff] %v12237_v37 }
 0xa2c   : > { %v12239_v62 = vpop.f32.mrf.mxu0 }
 0xa2d   : > { %14595 = vst [vmem:[#allocation431_spill] sm:$0xff] %v12239_v62 }
 0xa2e   : > { %v12243_v54 = vpop.f32.mrf.mxu0 }
 0xa2f   : > { %14597 = vst [vmem:[#allocation463_spill] sm:$0xff] %v12243_v54 }
 0xa30   : > { %v12245_v21 = vpop.f32.mrf.mxu0 }
 0xa31   : > { %14598 = vst [vmem:[#allocation464_spill] sm:$0xff] %v12245_v21 }
 0xa32   : > { %v12249_v46 = vpop.f32.mrf.mxu0 }
 0xa33   : > { %14600 = vst [vmem:[#allocation466_spill] sm:$0xff] %v12249_v46 }
 0xa34   : > { %v12251_v10 = vpop.f32.mrf.mxu0 }
 0xa35   : > { %14601 = vst [vmem:[#allocation467_spill] sm:$0xff] %v12251_v10  ;;  %v12253_v57 = vpop.permute.xlu1 %5497 }
 0xa36   : > { %v5500_v56 = vsub.f32 %v11727_v27, %v12253_v57  ;;  %v5501_v13 = vsub.f32 %v11753_v31, %v12253_v57  ;;  %v5503_v37 = vsub.f32 %v11758_v18, %v12253_v57  ;;  %v12263_v54 = vpop.f32.mrf.mxu0  ;;  %v5502_v21 = vsub.f32 %v11743_v50, %v12253_v57  ;;  %v12271_v27 = vpop.f32.mrf.mxu1 }
 0xa37   : > { %14603 = vst [vmem:[#allocation469_spill] sm:$0xff] %v12263_v54  ;;  %v5504_v16 = vsub.f32 %v11733_v44, %v12253_v57  ;;  %14605 = vst [vmem:[#allocation471_spill] sm:$0xff] %v12271_v27  ;;  %v5505_v18 = vsub.f32 %v11748_v42, %v12253_v57  ;;  %v5507_v44 = vsub.f32 %v11769_v2, %v12253_v57 }
 0xa38   : > { %v5516_v11 = vmul.f32 1.442695, %v5500_v56  ;;  %v5518_v62 = vmul.f32 1.442695, %v5501_v13  ;;  %v12265_v46 = vpop.f32.mrf.mxu0  ;;  %v5522_v10 = vmul.f32 1.442695, %v5503_v37  ;;  %v5506_v13 = vsub.f32 %v11738_v34, %v12253_v57 }
 0xa39   : > { %14604 = vst [vmem:[#allocation470_spill] sm:$0xff] %v12265_v46  ;;  %v5520_v54 = vmul.f32 1.442695, %v5502_v21  ;;  %v5524_v50 = vmul.f32 1.442695, %v5504_v16  ;;  %v12281_v46 = vpop.f32.mrf.mxu1  ;;  %v5508_v42 = vsub.f32 %v11778_v25, %v12253_v57  ;;  %v5509_v21 = vsub.f32 %v11783_v52, %v12253_v57 }
 0xa3a   : > { %8191 = vpow2.f32 %v5516_v11  ;;  %v12273_v31 = vpop.f32.mrf.mxu0  ;;  %14607 = vst [vmem:[#allocation473_spill] sm:$0xff] %v12281_v46  ;;  %v5526_v11 = vmul.f32 1.442695, %v5505_v18  ;;  %v5510_v2 = vsub.f32 %v11792_v0, %v12253_v57  ;;  %v4621_v46 = vadd.f32 %v12002_v24, %v11908_v17 }
 0xa3b   : > { %14606 = vst [vmem:[#allocation472_spill] sm:$0xff] %v12273_v31  ;;  %8193 = vpow2.f32 %v5518_v62  ;;  %v5528_v62 = vmul.f32 1.442695, %v5506_v13  ;;  %v12291_v34 = vpop.f32.mrf.mxu1  ;;  %v5511_v13 = vsub.f32 %v11797_v39, %v12253_v57  ;;  %v4682_v39 = vadd.f32 %v12042_v58, %v11908_v17 }
 0xa3c   : > { %v12277_v56 = vpop.f32.mrf.mxu0  ;;  %8195 = vpow2.f32 %v5522_v10  ;;  %14608 = vst [vmem:[#allocation474_spill] sm:$0xff] %v12291_v34  ;;  %v5530_v10 = vmul.f32 1.442695, %v5507_v44  ;;  %v5536_v0 = vmul.f32 1.442695, %v5510_v2  ;;  %v4618_v24 = vadd.f32 %v11986_v28, %v11908_v17 }
 0xa3d   : > { %8197 = vpow2.f32 %v5520_v54  ;;  %v5532_v54 = vmul.f32 1.442695, %v5508_v42  ;;  %v12301_v25 = vpop.f32.mrf.mxu1  ;;  %v5538_v2 = vmul.f32 1.442695, %v5511_v13  ;;  %v4677_v58 = vadd.f32 %v11908_v17, %v12051_v38 }
 0xa3e   : > { %v12285_v37 = vpop.f32.mrf.mxu0  ;;  %8199 = vpow2.f32 %v5524_v50  ;;  %14609 = vst [vmem:[#allocation475_spill] sm:$0xff] %v12301_v25  ;;  %v5534_v50 = vmul.f32 1.442695, %v5509_v21  ;;  %v4613_v28 = vadd.f32 %v11908_v17, %v12004_v36  ;;  %v4674_v38 = vadd.f32 %v11908_v17, %v12048_v55 }
 0xa3f   : > { %8201 = vpow2.f32 %v5526_v11  ;;  %v5512_v11 = vsub.f32 %v11816_v63, %v12253_v57  ;;  %v5513_v63 = vsub.f32 %v11830_v59, %v12253_v57  ;;  %v4610_v36 = vadd.f32 %v11908_v17, %v11996_v41 }
 0xa40   : > { %v12289_v27 = vpop.f32.mrf.mxu0  ;;  %8203 = vpow2.f32 %v5528_v62 }
 0xa41   : > { %8205 = vpow2.f32 %v5530_v10  ;;  %v12317_v10 = vpop.f32.mrf.mxu1  ;;  %v5540_v59 = vmul.f32 1.442695, %v5512_v11  ;;  %v5542_v11 = vmul.f32 1.442695, %v5513_v63  ;;  %v4605_v63 = vadd.f32 %v11974_v30, %v11908_v17 }
 0xa42   : > { %v12295_v16 = vpop.f32.mrf.mxu0  ;;  %8207 = vpow2.f32 %v5532_v54  ;;  %v4602_v30 = vadd.f32 %v11960_v48, %v11908_v17 }
 0xa43   : > { %8209 = vpow2.f32 %v5534_v50 }
 0xa44   : > { %v12299_v18 = vpop.f32.mrf.mxu0  ;;  %8211 = vpow2.f32 %v5536_v0 }
 0xa45   : > { %8213 = vpow2.f32 %v5538_v2 }
 0xa46   : > { %v12305_v34 = vpop.f32.mrf.mxu0  ;;  %8215 = vpow2.f32 %v5540_v59 }
 0xa47   : > { %v8192_v52 = vpop.eup %8191  ;;  %8217 = vpow2.f32 %v5542_v11  ;;  %v4597_v11 = vadd.f32 %v11908_v17, %v11980_v3 }
 0xa48   : > { %v8194_v44 = vpop.eup %8193  ;;  %v5550_v42 = vsel %vm5457_vm12, %v8192_v52, 0.0  ;;  %v12310_v62 = vpop.f32.mrf.mxu0 }
 0xa49   : > { %14610 = vst [vmem:[#allocation476_spill] sm:$0xff] %v12310_v62  ;;  %5657 = vmatprep.mubr.f32.mxu1 %v8194_v44  ;;  %v5551_v21 = vsel %vm5457_vm12, %v8194_v44, 0.0  ;;  %v8196_v25 = vpop.eup %8195 }
 0xa4a   : > { %5658 = vmatmul.mubr.f32.vlgmr.msra.gmra.mxu1 %v8192_v52  ;;  %v5552_v54 = vadd.f32 %v5551_v21, %v5550_v42  ;;  %v12321_v62 = vpop.f32.mrf.mxu0  ;;  %v12323_v31 = vpop.eup %8197  ;;  %v5514_v52 = vsub.f32 %v11823_v6, %v12253_v57  ;;  %v5515_v6 = vsub.f32 %v11837_v47, %v12253_v57  ;;  %v5555_v0 = vsel %vm5457_vm12, %v8196_v25, 0.0 }
 0xa4b   : > { %7442 = vmatpush3.msra.mxu1 %v4621_v46  ;;  %5727 = vmatprep.mubr.f32.mxu1 %v8196_v25  ;;  %v5553_v13 = vsel %vm5457_vm12, %v12323_v31, 0.0  ;;  %v12335_v44 = vpop.eup %8199  ;;  %v12341_v42 = vpop.f32.mrf.mxu1 }
 0xa4c   : > { %7443 = vmatprep.subr.mxu1 %v4682_v39  ;;  %v12333_v50 = vpop.f32.mrf.mxu0  ;;  %v5554_v46 = vadd.f32 %v5553_v13, %v5552_v54  ;;  %14611 = vst [vmem:[#allocation477_spill] sm:$0xff] %v12341_v42  ;;  %v12348_v21 = vpop.eup %8201  ;;  %v4669_v54 = vadd.f32 %v12038_v19, %v11908_v17  ;;  %v5557_v47 = vsel %vm5457_vm12, %v12335_v44, 0.0  ;;  %v4666_v19 = vadd.f32 %v12030_v15, %v11908_v17 }
 0xa4d   : > { %7444 = vmatpush3.msra.mxu1 %v4618_v24  ;;  %v5544_v24 = vmul.f32 1.442695, %v5514_v52  ;;  %v12358_v25 = vpop.eup %8203  ;;  %v12362_v2 = vpop.f32.mrf.mxu1  ;;  %v5559_v52 = vsel %vm5457_vm12, %v12348_v21, 0.0 }
 0xa4e   : > { %7445 = vmatprep.subr.mxu1 %v4677_v58  ;;  %v12346_v39 = vpop.f32.mrf.mxu0  ;;  %v5556_v55 = vadd.f32 %v5555_v0, %v5554_v46  ;;  %14612 = vst [vmem:[#allocation478_spill] sm:$0xff] %v12362_v2  ;;  %v5546_v58 = vmul.f32 1.442695, %v5515_v6  ;;  %v12370_v13 = vpop.eup %8205  ;;  %v5561_v15 = vsel %vm5457_vm12, %v12358_v25, 0.0 }
 0xa4f   : > { %7446 = vmatpush3.msra.mxu1 %v4613_v28  ;;  %8219 = vpow2.f32 %v5544_v24  ;;  %v12380_v6 = vpop.eup %8207  ;;  %v12384_v48 = vpop.f32.mrf.mxu1  ;;  %v4594_v24 = vadd.f32 %v11908_v17, %v11970_v9  ;;  %v4650_v9 = vadd.f32 %v12018_v32, %v11908_v17 }
 0xa50   : > { %7447 = vmatprep.subr.mxu1 %v4674_v38  ;;  %v12356_v57 = vpop.f32.mrf.mxu0  ;;  %v5558_v41 = vadd.f32 %v5557_v47, %v5556_v55  ;;  %v4661_v38 = vadd.f32 %v11908_v17, %v12040_v8  ;;  %14613 = vst [vmem:[#allocation479_spill] sm:$0xff] %v12384_v48  ;;  %8221 = vpow2.f32 %v5546_v58  ;;  %v5563_v8 = vsel %vm5457_vm12, %v12370_v13, 0.0 }
 0xa51   : > { %7448 = vmatpush3.msra.mxu1 %v4610_v36  ;;  %v4658_v36 = vadd.f32 %v11908_v17, %v12036_v29  ;;  %v4653_v47 = vadd.f32 %v12026_v14, %v11908_v17  ;;  %v5565_v29 = vsel %vm5457_vm12, %v12380_v6, 0.0 }
 0xa52   : > { %7449 = vmatprep.subr.mxu1 %v4669_v54  ;;  %v12368_v59 = vpop.f32.mrf.mxu0  ;;  %v5560_v28 = vadd.f32 %v5559_v52, %v5558_v41  ;;  %v12392_v54 = vpop.eup %8209 }
 0xa53   : > { %7450 = vmatpush3.msra.mxu1 %v4605_v63  ;;  %v12402_v41 = vpop.eup %8211  ;;  %v12406_v52 = vpop.f32.mrf.mxu1  ;;  %v5567_v14 = vsel %vm5457_vm12, %v12392_v54, 0.0 }
 0xa54   : > { %7451 = vmatprep.subr.mxu1 %v4666_v19  ;;  %v12378_v46 = vpop.f32.mrf.mxu0  ;;  %v5562_v0 = vadd.f32 %v5561_v15, %v5560_v28  ;;  %v4589_v19 = vadd.f32 %v11950_v7, %v11908_v17  ;;  %14614 = vst [vmem:[#allocation480_spill] sm:$0xff] %v12406_v52  ;;  %v12414_v28 = vpop.eup %8213  ;;  %v4645_v15 = vadd.f32 %v11908_v17, %v12028_v53  ;;  %v5569_v32 = vsel %vm5457_vm12, %v12402_v41, 0.0  ;;  %v14649_v52 = vld [vmem:[#allocation410_spill] sm:$0xff] }
 0xa55   : > { %7452 = vmatpush3.msra.mxu1 %v4602_v30  ;;  %v5571_v53 = vsel %vm5457_vm12, %v12414_v28, 0.0 }
 0xa56   : > { %7453 = vmatprep.subr.mxu1 %v4661_v38  ;;  %v12390_v55 = vpop.f32.mrf.mxu0  ;;  %v5564_v3 = vadd.f32 %v5563_v8, %v5562_v0  ;;  %v4586_v38 = vadd.f32 %v11936_v43, %v11908_v17  ;;  %v12424_v0 = vpop.eup %8215  ;;  %v4642_v43 = vadd.f32 %v11908_v17, %v12024_v5 }
 0xa57   : > { %7454 = vmatpush3.msra.mxu1 %v4597_v11  ;;  %14615 = vst [vmem:[#allocation481_spill] sm:$0xff] %v12424_v0  ;;  %v5573_v5 = vsel %vm5457_vm12, %v12424_v0, 0.0  ;;  %v14645_v0 = vld [vmem:[#allocation454_spill] sm:$0xff] }
 0xa58   : > { %7455 = vmatprep.subr.mxu1 %v4658_v36  ;;  %v12400_v63 = vpop.f32.mrf.mxu0  ;;  %v5566_v58 = vadd.f32 %v5565_v29, %v5564_v3  ;;  %v4581_v36 = vadd.f32 %v11908_v17, %v11955_v61  ;;  %v4578_v29 = vadd.f32 %v11908_v17, %v11945_v33  ;;  %v4634_v33 = vadd.f32 %v12006_v23, %v11908_v17 }
 0xa59   : > { %7456 = vmatpush3.msra.mxu1 %v4594_v24  ;;  %v12428_v24 = vpop.f32.mrf.mxu1 }
 0xa5a   : > { %7457 = vmatprep.subr.mxu1 %v4653_v47  ;;  %v12412_v30 = vpop.f32.mrf.mxu0  ;;  %v5568_v7 = vadd.f32 %v5567_v14, %v5566_v58  ;;  %14616 = vst [vmem:[#allocation482_spill] sm:$0xff] %v12428_v24  ;;  %v12436_v47 = vpop.eup %8217  ;;  %v4573_v14 = vadd.f32 %v11927_v20, %v11908_v17 }
 0xa5b   : > { %7458 = vmatpush3.msra.mxu1 %v4589_v19  ;;  %v4637_v19 = vadd.f32 %v12014_v12, %v11908_v17  ;;  %v5575_v12 = vsel %vm5457_vm12, %v12436_v47, 0.0 }
 0xa5c   : > { %7459 = vmatprep.subr.mxu1 %v4650_v9  ;;  %v12422_v11 = vpop.f32.mrf.mxu0  ;;  %v5570_v8 = vadd.f32 %v5569_v32, %v5568_v7  ;;  %v12446_v9 = vpop.eup %8219 }
 0xa5d   : > { %7460 = vmatpush3.msra.mxu1 %v4586_v38  ;;  %14617 = vst [vmem:[#allocation483_spill] sm:$0xff] %v12446_v9  ;;  %v12450_v7 = vpop.f32.mrf.mxu1  ;;  %v12458_v32 = vpop.eup %8221  ;;  %v5577_v23 = vsel %vm5457_vm12, %v12446_v9, 0.0  ;;  %v14641_v9 = vld [vmem:[#allocation420_spill] sm:$0xff] }
 0xa5e   : > { %7461 = vmatprep.subr.mxu1 %v4645_v15  ;;  %v12434_v3 = vpop.f32.mrf.mxu0  ;;  %v5572_v61 = vadd.f32 %v5571_v53, %v5570_v8  ;;  %14618 = vst [vmem:[#allocation484_spill] sm:$0xff] %v12450_v7  ;;  %14619 = vst [vmem:[#allocation485_spill] sm:$0xff] %v12458_v32  ;;  %v4629_v8 = vadd.f32 %v11908_v17, %v12016_v1  ;;  %v4565_v53 = vadd.f32 %v11908_v17, %v11931_v60 }
 0xa5f   : > { %7462 = vmatpush3.msra.mxu1 %v4581_v36  ;;  %v4570_v36 = vadd.f32 %v11916_v22, %v11908_v17  ;;  %v4626_v22 = vadd.f32 %v11908_v17, %v12012_v35  ;;  %v5579_v1 = vsel %vm5457_vm12, %v12458_v32, 0.0  ;;  %v4813_v60 = vadd.f32 %v12143_v26, %v11908_v17 }
 0xa60   : > { %7463 = vmatprep.subr.mxu1 %v4642_v43  ;;  %v12444_v58 = vpop.f32.mrf.mxu0  ;;  %v5574_v38 = vadd.f32 %v5573_v5, %v5572_v61  ;;  %v12470_v61 = vpop.f32.mrf.mxu1  ;;  %v4562_v5 = vadd.f32 %v11908_v17, %v11924_v51  ;;  %v4749_v35 = vadd.f32 %v12098_v49, %v11908_v17  ;;  %v4746_v26 = vadd.f32 %v12090_v45, %v11908_v17  ;;  %v14624_v45 = vld [vmem:[#allocation418_spill] sm:$0xff] }
 0xa61   : > { %7464 = vmatpush3.msra.mxu1 %v4578_v29  ;;  %14620 = vst [vmem:[#allocation486_spill] sm:$0xff] %v12470_v61  ;;  %v4805_v49 = vadd.f32 %v11908_v17, %v12145_v4 }
 0xa62   : > { %7465 = vmatprep.subr.mxu1 %v4637_v19  ;;  %v12456_v15 = vpop.f32.mrf.mxu0  ;;  %v5576_v20 = vadd.f32 %v5575_v12, %v5574_v38  ;;  %v4810_v12 = vadd.f32 %v12139_v40, %v11908_v17 }
 0xa63   : > { %7466 = vmatpush3.msra.mxu1 %v4573_v14 }
 0xa64   : > { %7467 = vmatprep.subr.mxu1 %v4634_v33  ;;  %v12466_v43 = vpop.f32.mrf.mxu0  ;;  %v5578_v29 = vadd.f32 %v5577_v23, %v5576_v20  ;;  %v12486_v33 = vpop.f32.mrf.mxu1 }
 0xa65   : > { %7468 = vmatpush3.msra.mxu1 %v4570_v36  ;;  %14621 = vst [vmem:[#allocation487_spill] sm:$0xff] %v12486_v33  ;;  %v14622_v36 = vld [vmem:[#allocation414_spill] sm:$0xff] }
 0xa66   : > { %7469 = vmatprep.subr.mxu1 %v4629_v8  ;;  %v12476_v19 = vpop.f32.mrf.mxu0  ;;  %v5580_v14 = vadd.f32 %v5579_v1, %v5578_v29  ;;  %v4741_v20 = vadd.f32 %v11908_v17, %v14622_v36  ;;  %v14623_v8 = vld [vmem:[#allocation396_spill] sm:$0xff]  ;;  %v14631_v36 = vld [vmem:[#allocation455_spill] sm:$0xff] }
 0xa67   : > { %7470 = vmatpush3.msra.mxu1 %v4565_v53  ;;  %v4802_v23 = vadd.f32 %v11908_v17, %v14623_v8  ;;  %v4738_v53 = vadd.f32 %v11908_v17, %v14624_v45  ;;  %v14626_v29 = vld [vmem:[#allocation456_spill] sm:$0xff] }
 0xa68   : > { %7471 = vmatprep.subr.mxu1 %v4626_v22  ;;  %v12482_v38 = vpop.f32.mrf.mxu0  ;;  %5581 = vadd.xlane.f32.xlu1 %v5580_v14  ;;  %v4733_v22 = vadd.f32 %v14626_v29, %v11908_v17  ;;  %v14628_v14 = vld [vmem:[#allocation408_spill] sm:$0xff] }
 0xa69   : > { %7472 = vmatpush3.msra.mxu1 %v4562_v5  ;;  %v14632_v45 = vld [vmem:[#allocation404_spill] sm:$0xff] }
 0xa6a   : > { %5728 = vmatmul.mubr.f32.vlgmr.msra.gmra.mxu1 %v12323_v31  ;;  %7476 = vmatprep.subr.mxu1 %v4813_v60  ;;  %v12491_v51 = vpop.f32.mrf.mxu0  ;;  %v12502_v31 = vpop.f32.mrf.mxu1  ;;  %v4794_v60 = vadd.f32 %v14628_v14, %v11908_v17  ;;  %v14634_v29 = vld [vmem:[#allocation416_spill] sm:$0xff]  ;;  %v14635_v14 = vld [vmem:[#allocation458_spill] sm:$0xff] }
 0xa6b   : > { %7477 = vmatpush3.msra.mxu1 %v4749_v35  ;;  %5797 = vmatprep.mubr.f32.mxu1 %v12348_v21  ;;  %v14625_v21 = vld [vmem:[#allocation461_spill] sm:$0xff]  ;;  %v14629_v35 = vld [vmem:[#allocation387_spill] sm:$0xff] }
 0xa6c   : > { %7478 = vmatprep.subr.mxu1 %v4810_v12  ;;  %v12500_v40 = vpop.f32.mrf.mxu0  ;;  %v4797_v4 = vadd.f32 %v14625_v21, %v11908_v17  ;;  %v12514_v5 = vpop.f32.mrf.mxu1  ;;  %v4730_v12 = vadd.f32 %v14629_v35, %v11908_v17  ;;  %v14633_v21 = vld [vmem:[#allocation422_spill] sm:$0xff] }
 0xa6d   : > { %7479 = vmatpush3.msra.mxu1 %v4746_v26  ;;  %14627 = vst [vmem:[#allocation414_spill] sm:$0xff] %v12514_v5  ;;  %v14630_v26 = vld [vmem:[#allocation400_spill] sm:$0xff] }
 0xa6e   : > { %7480 = vmatprep.subr.mxu1 %v4805_v49  ;;  %v12512_v1 = vpop.f32.mrf.mxu0  ;;  %v4789_v49 = vadd.f32 %v11908_v17, %v14630_v26  ;;  %v14637_v26 = vld [vmem:[#allocation394_spill] sm:$0xff] }
 0xa6f   : > { %7481 = vmatpush3.msra.mxu1 %v4741_v20  ;;  %v4725_v20 = vadd.f32 %v11908_v17, %v14631_v36  ;;  %v4778_v36 = vadd.f32 %v14637_v26, %v11908_v17  ;;  %v4770_v26 = vadd.f32 %v11908_v17, %v14641_v9  ;;  %v4762_v9 = vadd.f32 %v14645_v0, %v11908_v17 }
 0xa70   : > { %7482 = vmatprep.subr.mxu1 %v4802_v23  ;;  %v12524_v8 = vpop.f32.mrf.mxu0  ;;  %v12526_v23 = vpop.f32.mrf.mxu1  ;;  %v4754_v0 = vadd.f32 %v11908_v17, %v14649_v52  ;;  %v12591_v52 = vld [vmem:[%s13064_s10] ss:$0 sm:$0xff] }
 0xa71   : > { %7483 = vmatpush3.msra.mxu1 %v4738_v53  ;;  %v4786_v53 = vadd.f32 %v11908_v17, %v14632_v45 }
 0xa72   : > { %7484 = vmatprep.subr.mxu1 %v4797_v4  ;;  %v4722_v4 = vadd.f32 %v11908_v17, %v14633_v21  ;;  %v12536_v35 = vpop.f32.mrf.mxu0 }
 0xa73   : > { %7485 = vmatpush3.msra.mxu1 %v4733_v22  ;;  %v4781_v22 = vadd.f32 %v14634_v29, %v11908_v17 }
 0xa74   : > { %7486 = vmatprep.subr.mxu1 %v4794_v60  ;;  %v4717_v60 = vadd.f32 %v14635_v14, %v11908_v17 }
 0xa75   : > { %7487 = vmatpush3.msra.mxu1 %v4730_v12  ;;  %v12538_v12 = vpop.f32.mrf.mxu1 }
 0xa76   : > { %7488 = vmatprep.subr.mxu1 %v4789_v49  ;;  %14636 = vst [vmem:[#allocation396_spill] sm:$0xff] %v12538_v12  ;;  %v14638_v49 = vld [vmem:[#allocation389_spill] sm:$0xff] }
 0xa77   : > { %7489 = vmatpush3.msra.mxu1 %v4725_v20  ;;  %v4714_v45 = vadd.f32 %v14638_v49, %v11908_v17  ;;  %v14639_v20 = vld [vmem:[#allocation412_spill] sm:$0xff]  ;;  %v12550_v14 = vpop.f32.mrf.mxu1 }
 0xa78   : > { %7490 = vmatprep.subr.mxu1 %v4786_v53  ;;  %v4773_v21 = vadd.f32 %v11908_v17, %v14639_v20  ;;  %v14640_v53 = vld [vmem:[#allocation457_spill] sm:$0xff] }
 0xa79   : > { %7491 = vmatpush3.msra.mxu1 %v4722_v4  ;;  %v4709_v29 = vadd.f32 %v11908_v17, %v14640_v53  ;;  %v12548_v4 = vpop.f32.mrf.mxu0  ;;  %v12562_v32 = vpop.f32.mrf.mxu1 }
 0xa7a   : > { %7492 = vmatprep.subr.mxu1 %v4781_v22  ;;  %v14642_v22 = vld [vmem:[#allocation388_spill] sm:$0xff] }
 0xa7b   : > { %7493 = vmatpush3.msra.mxu1 %v4717_v60  ;;  %v4706_v49 = vadd.f32 %v11908_v17, %v14642_v22  ;;  %v14643_v60 = vld [vmem:[#allocation402_spill] sm:$0xff]  ;;  %v12574_v2 = vpop.f32.mrf.mxu1 }
 0xa7c   : > { %7494 = vmatprep.subr.mxu1 %v4778_v36  ;;  %v4765_v20 = vadd.f32 %v14643_v60, %v11908_v17  ;;  %v14644_v36 = vld [vmem:[#allocation460_spill] sm:$0xff] }
 0xa7d   : > { %7495 = vmatpush3.msra.mxu1 %v4714_v45  ;;  %v4701_v53 = vadd.f32 %v14644_v36, %v11908_v17  ;;  %v12560_v45 = vpop.f32.mrf.mxu0  ;;  %v12586_v42 = vpop.f32.mrf.mxu1 }
 0xa7e   : > { %7496 = vmatprep.subr.mxu1 %v4773_v21  ;;  %v14646_v21 = vld [vmem:[#allocation391_spill] sm:$0xff] }
 0xa7f   : > { %7497 = vmatpush3.msra.mxu1 %v4709_v29  ;;  %v4698_v22 = vadd.f32 %v14646_v21, %v11908_v17  ;;  %v14647_v29 = vld [vmem:[#allocation398_spill] sm:$0xff] }
 0xa80   : > { %7498 = vmatprep.subr.mxu1 %v4770_v26  ;;  %v4757_v60 = vadd.f32 %v11908_v17, %v14647_v29  ;;  %v14648_v26 = vld [vmem:[#allocation459_spill] sm:$0xff] }
 0xa81   : > { %7499 = vmatpush3.msra.mxu1 %v4706_v49  ;;  %v4693_v36 = vadd.f32 %v11908_v17, %v14648_v26  ;;  %v12572_v49 = vpop.f32.mrf.mxu0 }
 0xa82   : > { %7500 = vmatprep.subr.mxu1 %v4765_v20  ;;  %v14650_v20 = vld [vmem:[#allocation390_spill] sm:$0xff] }
 0xa83   : > { %7501 = vmatpush3.msra.mxu1 %v4701_v53  ;;  %v4690_v21 = vadd.f32 %v11908_v17, %v14650_v20  ;;  %v14651_v53 = vld [vmem:[#allocation426_spill] sm:$0xff] }
 0xa84   : > { %7502 = vmatprep.subr.mxu1 %v4762_v9  ;;  %v4941_v29 = vadd.f32 %v14651_v53, %v11908_v17  ;;  %v14652_v9 = vld [vmem:[#allocation393_spill] sm:$0xff]  ;;  %v14656_v53 = vld [vmem:[#allocation448_spill] sm:$0xff] }
 0xa85   : > { %7503 = vmatpush3.msra.mxu1 %v4698_v22  ;;  %v4877_v26 = vadd.f32 %v14652_v9, %v11908_v17  ;;  %v12584_v22 = vpop.f32.mrf.mxu0  ;;  %v14655_v17 = vld [vmem:[#allocation447_spill] sm:$0xff]  ;;  %v4869_v9 = vadd.f32 %v12591_v52, %v14656_v53 }
 0xa86   : > { %7504 = vmatprep.subr.mxu1 %v4757_v60  ;;  %v14653_v60 = vld [vmem:[#allocation437_spill] sm:$0xff] }
 0xa87   : > { %7505 = vmatpush3.msra.mxu1 %v4693_v36  ;;  %v4938_v36 = vadd.f32 %v12591_v52, %v14653_v60  ;;  %v12603_v48 = vpop.f32.mrf.mxu0  ;;  %v12605_v60 = vpop.f32.mrf.mxu1 }
 0xa88   : > { %7506 = vmatprep.subr.mxu1 %v4754_v0  ;;  %v14654_v0 = vld [vmem:[#allocation405_spill] sm:$0xff]  ;;  %14657 = vst [vmem:[#allocation418_spill] sm:$0xff] %v12605_v60  ;;  %v14663_v60 = vld [vmem:[#allocation427_spill] sm:$0xff] }
 0xa89   : > { %7507 = vmatpush3.msra.mxu1 %v4690_v21  ;;  %v4874_v20 = vadd.f32 %v12591_v52, %v14654_v0  ;;  %v4933_v21 = vadd.f32 %v12591_v52, %v14655_v17  ;;  %v14659_v0 = vld [vmem:[#allocation397_spill] sm:$0xff]  ;;  %v12617_v7 = vpop.f32.mrf.mxu1 }
 0xa8a   : > { %5798 = vmatmul.mubr.f32.vlgmr.msra.gmra.mxu1 %v12335_v44  ;;  %7511 = vmatprep.subr.mxu1 %v4941_v29  ;;  %v14658_v44 = vld [vmem:[#allocation429_spill] sm:$0xff]  ;;  %14662 = vst [vmem:[#allocation461_spill] sm:$0xff] %v12617_v7 }
 0xa8b   : > { %7512 = vmatpush3.msra.mxu1 %v4877_v26  ;;  %5867 = vmatprep.mubr.f32.mxu1 %v12370_v13  ;;  %v4930_v29 = vadd.f32 %v12591_v52, %v14658_v44  ;;  %v4866_v26 = vadd.f32 %v12591_v52, %v14659_v0  ;;  %v14660_v13 = vld [vmem:[#allocation449_spill] sm:$0xff]  ;;  %v4922_v44 = vadd.f32 %v12591_v52, %v14663_v60  ;;  %v12629_v33 = vpop.f32.mrf.mxu1 }
 0xa8c   : > { %7513 = vmatprep.subr.mxu1 %v4938_v36  ;;  %v4925_v17 = vadd.f32 %v12591_v52, %v14660_v13  ;;  %v14661_v36 = vld [vmem:[#allocation417_spill] sm:$0xff]  ;;  %14667 = vst [vmem:[#allocation456_spill] sm:$0xff] %v12629_v33  ;;  %v14673_v33 = vld [vmem:[#allocation450_spill] sm:$0xff] }
 0xa8d   : > { %7514 = vmatpush3.msra.mxu1 %v4874_v20  ;;  %v4861_v53 = vadd.f32 %v12591_v52, %v14661_v36  ;;  %v12615_v20 = vpop.f32.mrf.mxu0  ;;  %v14668_v7 = vld [vmem:[#allocation453_spill] sm:$0xff]  ;;  %v12641_v24 = vpop.f32.mrf.mxu1 }
 0xa8e   : > { %7515 = vmatprep.subr.mxu1 %v4933_v21  ;;  %v14664_v21 = vld [vmem:[#allocation395_spill] sm:$0xff]  ;;  %v4914_v60 = vadd.f32 %v12591_v52, %v14668_v7  ;;  %14672 = vst [vmem:[#allocation408_spill] sm:$0xff] %v12641_v24  ;;  %v4906_v7 = vadd.f32 %v12591_v52, %v14673_v33  ;;  %v14678_v24 = vld [vmem:[#allocation442_spill] sm:$0xff] }
 0xa8f   : > { %7516 = vmatpush3.msra.mxu1 %v4869_v9  ;;  %v4858_v0 = vadd.f32 %v12591_v52, %v14664_v21  ;;  %v14665_v9 = vld [vmem:[#allocation441_spill] sm:$0xff]  ;;  %v12653_v61 = vpop.f32.mrf.mxu1  ;;  %v4898_v33 = vadd.f32 %v12591_v52, %v14678_v24 }
 0xa90   : > { %7517 = vmatprep.subr.mxu1 %v4930_v29  ;;  %v4917_v13 = vadd.f32 %v12591_v52, %v14665_v9  ;;  %v14666_v29 = vld [vmem:[#allocation409_spill] sm:$0xff]  ;;  %14677 = vst [vmem:[#allocation387_spill] sm:$0xff] %v12653_v61  ;;  %v14683_v61 = vld [vmem:[#allocation444_spill] sm:$0xff] }
 0xa91   : > { %7518 = vmatpush3.msra.mxu1 %v4866_v26  ;;  %v4853_v36 = vadd.f32 %v12591_v52, %v14666_v29  ;;  %v12627_v26 = vpop.f32.mrf.mxu0  ;;  %v12665_v5 = vpop.f32.mrf.mxu1  ;;  %v4890_v24 = vadd.f32 %v12591_v52, %v14683_v61 }
 0xa92   : > { %7519 = vmatprep.subr.mxu1 %v4925_v17  ;;  %v14669_v17 = vld [vmem:[#allocation421_spill] sm:$0xff]  ;;  %14682 = vst [vmem:[#allocation400_spill] sm:$0xff] %v12665_v5  ;;  %v14687_v5 = vld [vmem:[#allocation436_spill] sm:$0xff] }
 0xa93   : > { %7520 = vmatpush3.msra.mxu1 %v4861_v53  ;;  %v4850_v21 = vadd.f32 %v12591_v52, %v14669_v17  ;;  %v14670_v53 = vld [vmem:[#allocation438_spill] sm:$0xff]  ;;  %v12677_v12 = vpop.f32.mrf.mxu1  ;;  %v4882_v61 = vadd.f32 %v12591_v52, %v14687_v5  ;;  %v5066_v5 = vadd.f32 %v12591_v52, %v12444_v58 }
 0xa94   : > { %7521 = vmatprep.subr.mxu1 %v4922_v44  ;;  %v4909_v9 = vadd.f32 %v12591_v52, %v14670_v53  ;;  %v14671_v44 = vld [vmem:[#allocation403_spill] sm:$0xff] }
 0xa95   : > { %7522 = vmatpush3.msra.mxu1 %v4858_v0  ;;  %v4845_v29 = vadd.f32 %v12591_v52, %v14671_v44  ;;  %v12639_v0 = vpop.f32.mrf.mxu0 }
 0xa96   : > { %7523 = vmatprep.subr.mxu1 %v4917_v13  ;;  %v14674_v13 = vld [vmem:[#allocation411_spill] sm:$0xff] }
 0xa97   : > { %7524 = vmatpush3.msra.mxu1 %v4853_v36  ;;  %v4842_v17 = vadd.f32 %v12591_v52, %v14674_v13  ;;  %v14675_v36 = vld [vmem:[#allocation430_spill] sm:$0xff] }
 0xa98   : > { %7525 = vmatprep.subr.mxu1 %v4914_v60  ;;  %v4901_v53 = vadd.f32 %v12591_v52, %v14675_v36  ;;  %v14676_v60 = vld [vmem:[#allocation399_spill] sm:$0xff] }
 0xa99   : > { %7526 = vmatpush3.msra.mxu1 %v4850_v21  ;;  %v4837_v44 = vadd.f32 %v12591_v52, %v14676_v60  ;;  %v12651_v21 = vpop.f32.mrf.mxu0 }
 0xa9a   : > { %7527 = vmatprep.subr.mxu1 %v4909_v9  ;;  %v14679_v9 = vld [vmem:[#allocation407_spill] sm:$0xff] }
 0xa9b   : > { %7528 = vmatpush3.msra.mxu1 %v4845_v29  ;;  %v4834_v13 = vadd.f32 %v12591_v52, %v14679_v9  ;;  %v14680_v29 = vld [vmem:[#allocation432_spill] sm:$0xff] }
 0xa9c   : > { %7529 = vmatprep.subr.mxu1 %v4906_v7  ;;  %v4893_v36 = vadd.f32 %v12591_v52, %v14680_v29  ;;  %v14681_v7 = vld [vmem:[#allocation419_spill] sm:$0xff] }
 0xa9d   : > { %7530 = vmatpush3.msra.mxu1 %v4842_v17  ;;  %v4829_v60 = vadd.f32 %v12591_v52, %v14681_v7  ;;  %v12663_v17 = vpop.f32.mrf.mxu0 }
 0xa9e   : > { %7531 = vmatprep.subr.mxu1 %v4901_v53  ;;  %v14684_v53 = vld [vmem:[#allocation392_spill] sm:$0xff] }
 0xa9f   : > { %7532 = vmatpush3.msra.mxu1 %v4837_v44  ;;  %v4826_v9 = vadd.f32 %v12591_v52, %v14684_v53  ;;  %v14685_v44 = vld [vmem:[#allocation425_spill] sm:$0xff] }
 0xaa0   : > { %7533 = vmatprep.subr.mxu1 %v4898_v33  ;;  %v4885_v29 = vadd.f32 %v12591_v52, %v14685_v44  ;;  %v14686_v33 = vld [vmem:[#allocation415_spill] sm:$0xff]  ;;  %v12689_v44 = vpop.f32.mrf.mxu1 }
 0xaa1   : > { %7534 = vmatpush3.msra.mxu1 %v4834_v13  ;;  %v4821_v7 = vadd.f32 %v12591_v52, %v14686_v33  ;;  %v12675_v13 = vpop.f32.mrf.mxu0 }
 0xaa2   : > { %7535 = vmatprep.subr.mxu1 %v4893_v36  ;;  %v14688_v36 = vld [vmem:[#allocation423_spill] sm:$0xff]  ;;  %v12703_v58 = vpop.f32.mrf.mxu1 }
 0xaa3   : > { %7536 = vmatpush3.msra.mxu1 %v4829_v60  ;;  %v4818_v53 = vadd.f32 %v12591_v52, %v14688_v36  ;;  %v5069_v60 = vadd.f32 %v12591_v52, %v12466_v43  ;;  %v4997_v43 = vadd.f32 %v12591_v52, %v12305_v34  ;;  %v4989_v34 = vadd.f32 %v12591_v52, %v12277_v56 }
 0xaa4   : > { %7537 = vmatprep.subr.mxu1 %v4890_v24  ;;  %v5005_v24 = vadd.f32 %v12591_v52, %v12299_v18  ;;  %v5061_v18 = vadd.f32 %v12591_v52, %v12476_v19  ;;  %v4981_v56 = vadd.f32 %v12591_v52, %v12285_v37 }
 0xaa5   : > { %7538 = vmatpush3.msra.mxu1 %v4826_v9  ;;  %v12687_v9 = vpop.f32.mrf.mxu0 }
 0xaa6   : > { %7539 = vmatprep.subr.mxu1 %v4885_v29  ;;  %v5002_v29 = vadd.f32 %v12591_v52, %v12289_v27  ;;  %v4994_v27 = vadd.f32 %v12591_v52, %v12295_v16 }
 0xaa7   : > { %7540 = vmatpush3.msra.mxu1 %v4821_v7  ;;  %v12701_v33 = vpop.f32.mrf.mxu0  ;;  %v12715_v7 = vpop.f32.mrf.mxu1 }
 0xaa8   : > { %7541 = vmatprep.subr.mxu1 %v4882_v61  ;;  %v14689_v61 = vld [vmem:[#allocation470_spill] sm:$0xff] }
 0xaa9   : > { %7542 = vmatpush3.msra.mxu1 %v4818_v53  ;;  %v12713_v19 = vpop.f32.mrf.mxu0  ;;  %v4986_v16 = vadd.f32 %v12591_v52, %v14689_v61  ;;  %v12727_v53 = vpop.f32.mrf.mxu1  ;;  %v14694_v61 = vld [vmem:[#allocation466_spill] sm:$0xff] }
 0xaaa   : > { %5868 = vmatmul.mubr.f32.vlgmr.msra.gmra.mxu1 %v12358_v25  ;;  %7546 = vmatprep.subr.mxu1 %v5069_v60  ;;  %v5058_v25 = vadd.f32 %v12591_v52, %v12456_v15  ;;  %v5050_v15 = vadd.f32 %v12591_v52, %v12400_v63  ;;  %v5042_v63 = vadd.f32 %v12591_v52, %v12412_v30  ;;  %v14690_v60 = vld [vmem:[#allocation472_spill] sm:$0xff] }
 0xaab   : > { %7547 = vmatpush3.msra.mxu1 %v5005_v24  ;;  %5937 = vmatprep.mubr.f32.mxu1 %v12392_v54  ;;  %v5053_v54 = vadd.f32 %v12591_v52, %v12422_v11  ;;  %v5045_v11 = vadd.f32 %v12591_v52, %v12434_v3  ;;  %v12725_v36 = vpop.f32.mrf.mxu0  ;;  %v4978_v24 = vadd.f32 %v12591_v52, %v14690_v60 }
 0xaac   : > { %7548 = vmatprep.subr.mxu1 %v5066_v5  ;;  %v5037_v3 = vadd.f32 %v12591_v52, %v12378_v46  ;;  %v14691_v5 = vld [vmem:[#allocation467_spill] sm:$0xff]  ;;  %v5034_v30 = vadd.f32 %v12591_v52, %v12356_v57  ;;  %v5029_v46 = vadd.f32 %v12591_v52, %v12390_v55  ;;  %v5026_v57 = vadd.f32 %v12591_v52, %v12368_v59 }
 0xaad   : > { %7549 = vmatpush3.msra.mxu1 %v5002_v29  ;;  %v4973_v37 = vadd.f32 %v12591_v52, %v14691_v5  ;;  %v12737_v29 = vpop.f32.mrf.mxu0  ;;  %v5021_v55 = vadd.f32 %v12591_v52, %v12333_v50  ;;  %v5013_v50 = vadd.f32 %v12591_v52, %v12346_v39  ;;  %v5133_v39 = vadd.f32 %v12591_v52, %v12651_v21 }
 0xaae   : > { %7550 = vmatprep.subr.mxu1 %v5061_v18  ;;  %v12739_v18 = vpop.f32.mrf.mxu1  ;;  %v5125_v21 = vadd.f32 %v12591_v52, %v12663_v17 }
 0xaaf   : > { %7551 = vmatpush3.msra.mxu1 %v4997_v43  ;;  %v14692_v43 = vld [vmem:[#allocation464_spill] sm:$0xff] }
 0xab0   : > { %7552 = vmatprep.subr.mxu1 %v5058_v25  ;;  %v4970_v25 = vadd.f32 %v12591_v52, %v14692_v43 }
 0xab1   : > { %7553 = vmatpush3.msra.mxu1 %v4994_v27  ;;  %v14693_v27 = vld [vmem:[#allocation469_spill] sm:$0xff] }
 0xab2   : > { %7554 = vmatprep.subr.mxu1 %v5053_v54  ;;  %v4965_v54 = vadd.f32 %v12591_v52, %v14693_v27  ;;  %v14699_v27 = vld [vmem:[#allocation435_spill] sm:$0xff] }
 0xab3   : > { %7555 = vmatpush3.msra.mxu1 %v4989_v34  ;;  %v12749_v34 = vpop.f32.mrf.mxu0 }
 0xab4   : > { %7556 = vmatprep.subr.mxu1 %v5050_v15  ;;  %v12751_v15 = vpop.f32.mrf.mxu1 }
 0xab5   : > { %7557 = vmatpush3.msra.mxu1 %v4986_v16  ;;  %v4962_v16 = vadd.f32 %v12591_v52, %v14694_v61 }
 0xab6   : > { %7558 = vmatprep.subr.mxu1 %v5045_v11  ;;  %v14695_v11 = vld [vmem:[#allocation431_spill] sm:$0xff]  ;;  %v12763_v60 = vpop.f32.mrf.mxu1 }
 0xab7   : > { %7559 = vmatpush3.msra.mxu1 %v4981_v56  ;;  %v4957_v56 = vadd.f32 %v12591_v52, %v14695_v11  ;;  %v14701_v11 = vld [vmem:[#allocation413_spill] sm:$0xff] }
 0xab8   : > { %7560 = vmatprep.subr.mxu1 %v5042_v63  ;;  %v12761_v63 = vpop.f32.mrf.mxu0 }
 0xab9   : > { %7561 = vmatpush3.msra.mxu1 %v4978_v24  ;;  %v14696_v24 = vld [vmem:[#allocation476_spill] sm:$0xff] }
 0xaba   : > { %7562 = vmatprep.subr.mxu1 %v5037_v3  ;;  %v5018_v59 = vadd.f32 %v12591_v52, %v14696_v24  ;;  %v14697_v3 = vld [vmem:[#allocation443_spill] sm:$0xff]  ;;  %v7892_v43 = vpop.f32.mrf.mxu0  ;;  %v14702_v24 = vld [vmem:[#allocation440_spill] sm:$0xff] }
 0xabb   : > { %7563 = vmatpush3.msra.mxu1 %v4973_v37  ;;  %v4954_v5 = vadd.f32 %v12591_v52, %v14697_v3  ;;  %v14698_v37 = vld [vmem:[#allocation463_spill] sm:$0xff] }
 0xabc   : > { %7564 = vmatprep.subr.mxu1 %v5034_v30  ;;  %v4949_v30 = vadd.f32 %v12591_v52, %v14698_v37  ;;  %v5117_v37 = vadd.f32 %v12591_v52, %v12603_v48 }
 0xabd   : > { %7565 = vmatpush3.msra.mxu1 %v4970_v25  ;;  %v12773_v25 = vpop.f32.mrf.mxu1 }
 0xabe   : > { %7566 = vmatprep.subr.mxu1 %v5029_v46  ;;  %v5010_v46 = vadd.f32 %v12591_v52, %v12321_v62  ;;  %v5130_v62 = vadd.f32 %v12591_v52, %v12627_v26  ;;  %v5122_v26 = vadd.f32 %v12591_v52, %v12639_v0 }
 0xabf   : > { %7567 = vmatpush3.msra.mxu1 %v4965_v54  ;;  %v4946_v54 = vadd.f32 %v12591_v52, %v14699_v27  ;;  %v5114_v27 = vadd.f32 %v12591_v52, %v12572_v49  ;;  %v5165_v49 = vadd.f32 %v12591_v52, %v12749_v34  ;;  %v5093_v34 = vadd.f32 %v12591_v52, %v12560_v45 }
 0xac0   : > { %7568 = vmatprep.subr.mxu1 %v5026_v57  ;;  %v14700_v57 = vld [vmem:[#allocation452_spill] sm:$0xff] }
 0xac1   : > { %7569 = vmatpush3.msra.mxu1 %v4962_v16  ;;  %v5197_v61 = vadd.f32 %v12591_v52, %v14700_v57  ;;  %v5169_v16 = vpop.f32.mrf.mxu0 }
 0xac2   : > { %7570 = vmatprep.subr.mxu1 %v5021_v55  ;;  %v12783_v55 = vpop.f32.mrf.mxu1  ;;  %v5170_v48 = vadd.f32 %v12591_v52, %v5169_v16  ;;  %v5098_v16 = vadd.f32 %v12591_v52, %v12524_v8  ;;  %v5149_v8 = vadd.f32 %v12591_v52, %v12701_v33  ;;  %v5077_v33 = vadd.f32 %v12591_v52, %v12512_v1 }
 0xac3   : > { %7571 = vmatpush3.msra.mxu1 %v4957_v56  ;;  %v5194_v56 = vadd.f32 %v12591_v52, %v14701_v11  ;;  %v7893_v3 = vpop.f32.mrf.mxu0  ;;  %v5154_v11 = vadd.f32 %v12591_v52, %v12737_v29  ;;  %v5082_v29 = vadd.f32 %v12591_v52, %v12482_v38  ;;  %v5325_v38 = vadd.f32 %v12591_v52, %v12574_v2 }
 0xac4   : > { %7572 = vmatprep.subr.mxu1 %v5018_v59  ;;  %v5189_v59 = vadd.f32 %v12591_v52, %v14702_v24  ;;  %v5317_v2 = vadd.f32 %v12591_v52, %v12586_v42  ;;  %v14707_v42 = vld [vmem:[#allocation468_spill] sm:$0xff] }
 0xac5   : > { %7573 = vmatpush3.msra.mxu1 %v4954_v5  ;;  %v12795_v5 = vpop.f32.mrf.mxu1 }
 0xac6   : > { %7574 = vmatprep.subr.mxu1 %v5013_v50  ;;  %v14703_v50 = vld [vmem:[#allocation401_spill] sm:$0xff] }
 0xac7   : > { %7575 = vmatpush3.msra.mxu1 %v4949_v30  ;;  %v5172_v30 = vpop.f32.mrf.mxu0  ;;  %v12804_v17 = vpop.f32.mrf.mxu1 }
 0xac8   : > { %7576 = vmatprep.subr.mxu1 %v5010_v46  ;;  %v5178_v46 = vadd.f32 %v12591_v52, %v7892_v43  ;;  %v5173_v0 = vadd.f32 %v12591_v52, %v5172_v30  ;;  %v5106_v43 = vadd.f32 %v12591_v52, %v12584_v22  ;;  %v5157_v22 = vadd.f32 %v12591_v52, %v12761_v63 }
 0xac9   : > { %7577 = vmatpush3.msra.mxu1 %v4946_v54  ;;  %v5109_v54 = vadd.f32 %v12591_v52, %v12615_v20  ;;  %v12812_v57 = vpop.f32.mrf.mxu1  ;;  %v5162_v20 = vadd.f32 %v12591_v52, %v12725_v36  ;;  %v5090_v36 = vadd.f32 %v12591_v52, %v12536_v35  ;;  %v5085_v63 = vadd.f32 %v12591_v52, %v12500_v40 }
 0xaca   : > { %5938 = vmatmul.mubr.f32.vlgmr.msra.gmra.mxu1 %v12380_v6  ;;  %7581 = vmatprep.subr.mxu1 %v5197_v61  ;;  %v5186_v6 = vadd.f32 %v12591_v52, %v14703_v50  ;;  %v5101_v61 = vadd.f32 %v12591_v52, %v12548_v4  ;;  %v5141_v35 = vadd.f32 %v12591_v52, %v12713_v19  ;;  %v14704_v19 = vld [vmem:[#allocation475_spill] sm:$0xff]  ;;  %v14706_v50 = vld [vmem:[#allocation474_spill] sm:$0xff] }
 0xacb   : > { %7582 = vmatpush3.msra.mxu1 %v5133_v39  ;;  %6007 = vmatprep.mubr.f32.mxu1 %v12414_v28  ;;  %v5181_v28 = vadd.f32 %v12591_v52, %v7893_v3  ;;  %v12821_v39 = vpop.f32.mrf.mxu1  ;;  %v5261_v24 = vadd.f32 %v12591_v52, %v14704_v19 }
 0xacc   : > { %7583 = vmatprep.subr.mxu1 %v5194_v56  ;;  %v5146_v56 = vadd.f32 %v12591_v52, %v12675_v13  ;;  %v5074_v13 = vadd.f32 %v12591_v52, %v12491_v51 }
 0xacd   : > { %7584 = vmatpush3.msra.mxu1 %v5130_v62  ;;  %v12831_v4 = vpop.f32.mrf.mxu1  ;;  %v5138_v62 = vadd.f32 %v12591_v52, %v12687_v9  ;;  %v14705_v9 = vld [vmem:[#allocation473_spill] sm:$0xff] }
 0xace   : > { %7585 = vmatprep.subr.mxu1 %v5189_v59  ;;  %v5322_v59 = vadd.f32 %v12591_v52, %v12550_v14  ;;  %v5258_v51 = vadd.f32 %v12591_v52, %v14705_v9  ;;  %v5548_v14 = vld [vmem:[#allocation7] sm:$0x3] }
 0xacf   : > { %7586 = vmatpush3.msra.mxu1 %v5125_v21  ;;  %v12841_v45 = vpop.f32.mrf.mxu1  ;;  %v5253_v21 = vadd.f32 %v12591_v52, %v12317_v10  ;;  %v14708_v10 = vld [vmem:[#allocation406_spill] sm:$0xff]  ;;  %v14721_v9 = vld [vmem:[#allocation433_spill] sm:$0xff] }
 0xad0   : > { %7587 = vmatprep.subr.mxu1 %v5186_v6  ;;  %v5250_v6 = vadd.f32 %v12591_v52, %v14706_v50 }
 0xad1   : > { %7588 = vmatpush3.msra.mxu1 %v5122_v26  ;;  %v12851_v40 = vpop.f32.mrf.mxu1  ;;  %v5245_v26 = vadd.f32 %v12591_v52, %v14707_v42  ;;  %v14725_v42 = vld [vmem:[#allocation428_spill] sm:$0xff] }
 0xad2   : > { %7589 = vmatprep.subr.mxu1 %v5181_v28  ;;  %v5549_v28 = vmul.f32 %v14708_v10, %v5548_v14  ;;  %v14726_v10 = vld [vmem:[#allocation480_spill] sm:$0xff] }
 0xad3   : > { %7590 = vmatpush3.msra.mxu1 %v5117_v37  ;;  %v12861_v1 = vpop.f32.mrf.mxu1 }
 0xad4   : > { %7591 = vmatprep.subr.mxu1 %v5178_v46  ;;  %v14709_v46 = vld [vmem:[#allocation462_spill] sm:$0xff] }
 0xad5   : > { %7592 = vmatpush3.msra.mxu1 %v5114_v27  ;;  %v12873_v3 = vpop.f32.mrf.mxu1  ;;  %v5242_v27 = vadd.f32 %v12591_v52, %v14709_v46 }
 0xad6   : > { %7593 = vmatprep.subr.mxu1 %v5173_v0 }
 0xad7   : > { %7594 = vmatpush3.msra.mxu1 %v5109_v54  ;;  %v12884_v37 = vpop.f32.mrf.mxu1 }
 0xad8   : > { %7595 = vmatprep.subr.mxu1 %v5170_v48  ;;  %v14711_v48 = vld [vmem:[#allocation471_spill] sm:$0xff] }
 0xad9   : > { %7596 = vmatpush3.msra.mxu1 %v5106_v43  ;;  %v5237_v43 = vadd.f32 %v12591_v52, %v14711_v48 }
 0xada   : > { %7597 = vmatprep.subr.mxu1 %v5165_v49  ;;  %v7957_v49 = vpop.f32.mrf.mxu1 }
 0xadb   : > { %7598 = vmatpush3.msra.mxu1 %v5101_v61  ;;  %v14712_v61 = vld [vmem:[#allocation414_spill] sm:$0xff] }
 0xadc   : > { %7599 = vmatprep.subr.mxu1 %v5162_v20  ;;  %v14713_v20 = vld [vmem:[#allocation465_spill] sm:$0xff] }
 0xadd   : > { %7600 = vmatpush3.msra.mxu1 %v5098_v16  ;;  %v5234_v16 = vadd.f32 %v12591_v52, %v14713_v20  ;;  %v14730_v20 = vld [vmem:[#allocation481_spill] sm:$0xff] }
 0xade   : > { %7601 = vmatprep.subr.mxu1 %v5157_v22  ;;  %v14714_v22 = vld [vmem:[#allocation486_spill] sm:$0xff] }
 0xadf   : > { %7602 = vmatpush3.msra.mxu1 %v5093_v34  ;;  %v5293_v34 = vadd.f32 %v12591_v52, %v14714_v22  ;;  %v14731_v22 = vld [vmem:[#allocation485_spill] sm:$0xff] }
 0xae0   : > { %7603 = vmatprep.subr.mxu1 %v5154_v11  ;;  %v14715_v11 = vld [vmem:[#allocation451_spill] sm:$0xff] }
 0xae1   : > { %7604 = vmatpush3.msra.mxu1 %v5090_v36  ;;  %v5229_v36 = vadd.f32 %v12591_v52, %v14715_v11  ;;  %v5381_v11 = vadd.f32 %v12591_v52, %v12783_v55  ;;  %v5370_v55 = vadd.f32 %v12591_v52, %v12703_v58  ;;  %v5357_v58 = vadd.f32 %v12591_v52, %v12677_v12 }
 0xae2   : > { %7605 = vmatprep.subr.mxu1 %v5149_v8  ;;  %v5428_v8 = vpop.f32.mrf.mxu1  ;;  %v5410_v12 = vadd.f32 %v12591_v52, %v12841_v45 }
 0xae3   : > { %7606 = vmatpush3.msra.mxu1 %v5085_v63  ;;  %v14716_v63 = vld [vmem:[#allocation482_spill] sm:$0xff] }
 0xae4   : > { %7607 = vmatprep.subr.mxu1 %v5146_v56  ;;  %v5290_v56 = vadd.f32 %v12591_v52, %v14716_v63  ;;  %v7960_v19 = vpop.f32.mrf.mxu1  ;;  %v5437_v63 = vadd.f32 %v12591_v52, %v7957_v49  ;;  %v5426_v49 = vadd.f32 %v12591_v52, %v12884_v37 }
 0xae5   : > { %7608 = vmatpush3.msra.mxu1 %v5082_v29  ;;  %v14717_v29 = vld [vmem:[#allocation445_spill] sm:$0xff] }
 0xae6   : > { %7609 = vmatprep.subr.mxu1 %v5141_v35  ;;  %v5226_v35 = vadd.f32 %v12591_v52, %v14717_v29  ;;  %v5441_v50 = vpop.f32.mrf.mxu1  ;;  %v5429_v29 = vadd.f32 %v12591_v52, %v5428_v8  ;;  %v14732_v8 = vld [vmem:[#allocation387_spill] sm:$0xff] }
 0xae7   : > { %7610 = vmatpush3.msra.mxu1 %v5077_v33  ;;  %v14718_v33 = vld [vmem:[#allocation487_spill] sm:$0xff]  ;;  %v5354_v37 = vadd.f32 %v12591_v52, %v14732_v8 }
 0xae8   : > { %7611 = vmatprep.subr.mxu1 %v5138_v62  ;;  %v5285_v62 = vadd.f32 %v12591_v52, %v14718_v33  ;;  %v7961_v46 = vpop.f32.mrf.mxu1  ;;  %v5405_v33 = vadd.f32 %v12591_v52, %v12812_v57 }
 0xae9   : > { %7612 = vmatpush3.msra.mxu1 %v5074_v13  ;;  %v14719_v13 = vld [vmem:[#allocation439_spill] sm:$0xff]  ;;  %v5453_v48 = vadd.f32 %v12591_v52, %v7961_v46 }
 0xaea   : > { %6008 = vmatmul.mubr.f32.vlgmr.msra.gmra.mxu1 %v12402_v41  ;;  %7616 = vmatprep.subr.mxu1 %v5325_v38  ;;  %v5314_v41 = vadd.f32 %v12591_v52, %v12562_v32  ;;  %v5306_v32 = vadd.f32 %v12591_v52, %v12502_v31  ;;  %v5298_v31 = vadd.f32 %v12591_v52, %v14712_v61  ;;  %v5444_v61 = vpop.f32.mrf.mxu1 }
 0xaeb   : > { %7617 = vmatpush3.msra.mxu1 %v5261_v24  ;;  %6077 = vmatprep.mubr.f32.mxu1 %v12436_v47  ;;  %v5309_v47 = vadd.f32 %v12591_v52, %v12526_v23  ;;  %v14710_v23 = vld [vmem:[#allocation396_spill] sm:$0xff]  ;;  %v5221_v38 = vadd.f32 %v12591_v52, %v14719_v13  ;;  %v14735_v13 = vld [vmem:[#allocation418_spill] sm:$0xff] }
 0xaec   : > { %7618 = vmatprep.subr.mxu1 %v5322_v59  ;;  %v5301_v54 = vadd.f32 %v12591_v52, %v14710_v23  ;;  %v14720_v24 = vld [vmem:[#allocation484_spill] sm:$0xff]  ;;  %v14729_v23 = vld [vmem:[#allocation446_spill] sm:$0xff]  ;;  %v5338_v45 = vadd.f32 %v12591_v52, %v14735_v13 }
 0xaed   : > { %7619 = vmatpush3.msra.mxu1 %v5258_v51  ;;  %v5282_v59 = vadd.f32 %v12591_v52, %v14720_v24  ;;  %v5218_v51 = vadd.f32 %v12591_v52, %v14721_v9  ;;  %v5394_v24 = vadd.f32 %v12591_v52, %v12804_v17  ;;  %v14738_v9 = vld [vmem:[#allocation483_spill] sm:$0xff] }
 0xaee   : > { %7620 = vmatprep.subr.mxu1 %v5317_v2  ;;  %v14722_v2 = vld [vmem:[#allocation479_spill] sm:$0xff] }
 0xaef   : > { %7621 = vmatpush3.msra.mxu1 %v5253_v21  ;;  %v5277_v21 = vadd.f32 %v12591_v52, %v14722_v2 }
 0xaf0   : > { %7622 = vmatprep.subr.mxu1 %v5314_v41  ;;  %v14723_v41 = vld [vmem:[#allocation434_spill] sm:$0xff] }
 0xaf1   : > { %7623 = vmatpush3.msra.mxu1 %v5250_v6  ;;  %v5582_v30 = vpop.xlane.xlu1 %5581  ;;  %v5213_v14 = vadd.f32 %v12591_v52, %v14723_v41  ;;  %v14724_v6 = vld [vmem:[#allocation477_spill] sm:$0xff] }
 0xaf2   : > { %7624 = vmatprep.subr.mxu1 %v5309_v47  ;;  %v5583_v0 = vadd.f32 %v5582_v30, %v5549_v28  ;;  %v5274_v47 = vadd.f32 %v12591_v52, %v14724_v6  ;;  %v5269_v28 = vadd.f32 %v12591_v52, %v14726_v10 }
 0xaf3   : > { %7625 = vmatpush3.msra.mxu1 %v5245_v26  ;;  %v5210_v26 = vadd.f32 %v12591_v52, %v14725_v42 }
 0xaf4   : > { %7626 = vmatprep.subr.mxu1 %v5306_v32  ;;  %5585 = vst.msk [vmem:[#allocation7] sm:$0x3] %vm5584_vm15, %v5583_v0  ;;  %v14727_v32 = vld [vmem:[#allocation424_spill] sm:$0xff] }
 0xaf5   : > { %7627 = vmatpush3.msra.mxu1 %v5242_v27  ;;  %v5205_v30 = vadd.f32 %v12591_v52, %v14727_v32  ;;  %v14728_v27 = vld [vmem:[#allocation478_spill] sm:$0xff] }
 0xaf6   : > { %7628 = vmatprep.subr.mxu1 %v5301_v54  ;;  %v5266_v0 = vadd.f32 %v12591_v52, %v14728_v27  ;;  %v5202_v54 = vadd.f32 %v12591_v52, %v14729_v23 }
 0xaf7   : > { %7629 = vmatpush3.msra.mxu1 %v5237_v43  ;;  %v5389_v43 = vadd.f32 %v12591_v52, %v12773_v25  ;;  %v5442_v25 = vadd.f32 %v12591_v52, %v5441_v50 }
 0xaf8   : > { %7630 = vmatprep.subr.mxu1 %v5298_v31  ;;  %v5450_v31 = vadd.f32 %v12591_v52, %v7960_v19  ;;  %v14736_v19 = vld [vmem:[#allocation408_spill] sm:$0xff] }
 0xaf9   : > { %7631 = vmatpush3.msra.mxu1 %v5234_v16  ;;  %v5386_v16 = vadd.f32 %v12591_v52, %v12751_v15  ;;  %v5373_v15 = vadd.f32 %v12591_v52, %v12727_v53  ;;  %v5362_v53 = vadd.f32 %v12591_v52, %v12715_v7  ;;  %v5413_v7 = vadd.f32 %v12591_v52, %v12861_v1 }
 0xafa   : > { %7632 = vmatprep.subr.mxu1 %v5293_v34  ;;  %v5445_v34 = vadd.f32 %v12591_v52, %v5444_v61  ;;  %v5333_v57 = vadd.f32 %v12591_v52, %v14736_v19 }
 0xafb   : > { %7633 = vmatpush3.msra.mxu1 %v5229_v36  ;;  %v5378_v36 = vadd.f32 %v12591_v52, %v12763_v60  ;;  %v5365_v60 = vadd.f32 %v12591_v52, %v12739_v18  ;;  %v5418_v18 = vadd.f32 %v12591_v52, %v12831_v4 }
 0xafc   : > { %7634 = vmatprep.subr.mxu1 %v5290_v56  ;;  %v5434_v56 = vadd.f32 %v12591_v52, %v12873_v3  ;;  %v5421_v3 = vadd.f32 %v12591_v52, %v12851_v40  ;;  %v5349_v40 = vadd.f32 %v12591_v52, %v12689_v44  ;;  %v5402_v44 = vadd.f32 %v12591_v52, %v12795_v5 }
 0xafd   : > { %7635 = vmatpush3.msra.mxu1 %v5226_v35  ;;  %v14733_v35 = vld [vmem:[#allocation400_spill] sm:$0xff] }
 0xafe   : > { %7636 = vmatprep.subr.mxu1 %v5285_v62  ;;  %v5346_v4 = vadd.f32 %v12591_v52, %v14733_v35  ;;  %v14734_v62 = vld [vmem:[#allocation456_spill] sm:$0xff] }
 0xaff   : > { %7637 = vmatpush3.msra.mxu1 %v5221_v38  ;;  %v5341_v1 = vadd.f32 %v12591_v52, %v14734_v62  ;;  %v5397_v38 = vadd.f32 %v12591_v52, %v12821_v39 }
 0xb00   : > { %7638 = vmatprep.subr.mxu1 %v5282_v59  ;;  %v14737_v59 = vld [vmem:[#allocation461_spill] sm:$0xff] }
 0xb01   : > { %7639 = vmatpush3.msra.mxu1 %v5218_v51  ;;  %v5330_v5 = vadd.f32 %v12591_v52, %v14737_v59 }
 0xb02   : > { %7640 = vmatprep.subr.mxu1 %v5277_v21 }
 0xb03   : > { %7641 = vmatpush3.msra.mxu1 %v5213_v14 }
 0xb04   : > { %7642 = vmatprep.subr.mxu1 %v5274_v47 }
 0xb05   : > { %7643 = vmatpush3.msra.mxu1 %v5210_v26 }
 0xb06   : > { %7644 = vmatprep.subr.mxu1 %v5269_v28 }
 0xb07   : > { %7645 = vmatpush3.msra.mxu1 %v5205_v30 }
 0xb08   : > { %7646 = vmatprep.subr.mxu1 %v5266_v0 }
 0xb09   : > { %7647 = vmatpush3.msra.mxu1 %v5202_v54 }
 0xb0a   : > { %6078 = vmatmul.mubr.f32.vlgmr.msra.gmra.mxu1 %v14730_v20  ;;  %7651 = vmatprep.subr.mxu1 %v5453_v48  ;;  %v7438_v51 = vpop.f32.mrf.mxu1 }
 0xb0b   : > { %7652 = vmatpush3.msra.mxu1 %v5389_v43  ;;  %6147 = vmatprep.mubr.f32.mxu1 %v14731_v22  ;;  %v5590_v22 = vpop.permute.xlu0 %5589 }
 0xb0c   : > { %7653 = vmatprep.subr.mxu1 %v5450_v31  ;;  %v7439_v2 = vpop.f32.mrf.mxu1 }
 0xb0d   : > { %7654 = vmatpush3.msra.mxu1 %v5386_v16  ;;  %v7440_v28 = vadd.f32 %v7439_v2, %v7438_v51  ;;  %v5586_v16 = vld [vmem:[#allocation8] sm:$0x3] }
 0xb0e   : > { %7655 = vmatprep.subr.mxu1 %v5445_v34 }
 0xb0f   : > { %7656 = vmatpush3.msra.mxu1 %v5381_v11 }
 0xb10   : > { %7657 = vmatprep.subr.mxu1 %v5442_v25 }
 0xb11   : > { %7658 = vmatpush3.msra.mxu1 %v5378_v36  ;;  %v5592_v36 = vmul.f32 %v5590_v22, %v5586_v16 }
 0xb12   : > { %7659 = vmatprep.subr.mxu1 %v5437_v63 }
 0xb13   : > { %7660 = vmatpush3.msra.mxu1 %v5373_v15 }
 0xb14   : > { %7661 = vmatprep.subr.mxu1 %v5434_v56 }
 0xb15   : > { %7662 = vmatpush3.msra.mxu1 %v5370_v55 }
 0xb16   : > { %7663 = vmatprep.subr.mxu1 %v5429_v29 }
 0xb17   : > { %7664 = vmatpush3.msra.mxu1 %v5365_v60 }
 0xb18   : > { %7665 = vmatprep.subr.mxu1 %v5426_v49 }
 0xb19   : > { %7666 = vmatpush3.msra.mxu1 %v5362_v53 }
 0xb1a   : > { %7667 = vmatprep.subr.mxu1 %v5421_v3 }
 0xb1b   : > { %7668 = vmatpush3.msra.mxu1 %v5357_v58 }
 0xb1c   : > { %7669 = vmatprep.subr.mxu1 %v5418_v18 }
 0xb1d   : > { %7670 = vmatpush3.msra.mxu1 %v5354_v37 }
 0xb1e   : > { %7671 = vmatprep.subr.mxu1 %v5413_v7 }
 0xb1f   : > { %7672 = vmatpush3.msra.mxu1 %v5349_v40 }
 0xb20   : > { %7673 = vmatprep.subr.mxu1 %v5410_v12 }
 0xb21   : > { %7674 = vmatpush3.msra.mxu1 %v5346_v4 }
 0xb22   : > { %7675 = vmatprep.subr.mxu1 %v5405_v33 }
 0xb23   : > { %7676 = vmatpush3.msra.mxu1 %v5341_v1 }
 0xb24   : > { %7677 = vmatprep.subr.mxu1 %v5402_v44 }
 0xb25   : > { %7678 = vmatpush3.msra.mxu1 %v5338_v45 }
 0xb26   : > { %7679 = vmatprep.subr.mxu1 %v5397_v38 }
 0xb27   : > { %7680 = vmatpush3.msra.mxu1 %v5333_v57 }
 0xb28   : > { %7681 = vmatprep.subr.mxu1 %v5394_v24 }
 0xb29   : > { %7682 = vmatpush3.msra.mxu1 %v5330_v5 }
 0xb2a   : > { %6148 = vmatmul.mubr.f32.vlgmr.msra.gmra.mxu1 %v14738_v9  ;;  %v7473_v39 = vpop.f32.mrf.mxu1 }
 0xb2c   : > { %v7474_v21 = vpop.f32.mrf.mxu1 }
 0xb2d   : > { %v7475_v26 = vadd.f32 %v7474_v21, %v7473_v39 }
 0xb2f   : > { %v5730_v30 = vadd.f32 %v7475_v26, %v7440_v28 }
 0xb4a   : > { %v7508_v41 = vpop.f32.mrf.mxu1 }
 0xb4c   : > { %v7509_v14 = vpop.f32.mrf.mxu1 }
 0xb4d   : > { %v7510_v52 = vadd.f32 %v7509_v14, %v7508_v41 }
 0xb4f   : > { %v5800_v27 = vadd.f32 %v7510_v52, %v5730_v30 }
 0xb6a   : > { %v7543_v50 = vpop.f32.mrf.mxu1 }
 0xb6c   : > { %v7544_v6 = vpop.f32.mrf.mxu1 }
 0xb6d   : > { %v7545_v46 = vadd.f32 %v7544_v6, %v7543_v50 }
 0xb6f   : > { %v5870_v54 = vadd.f32 %v7545_v46, %v5800_v27 }
 0xb8a   : > { %v7578_v47 = vpop.f32.mrf.mxu1 }
 0xb8c   : > { %v7579_v42 = vpop.f32.mrf.mxu1 }
 0xb8d   : > { %v7580_v0 = vadd.f32 %v7579_v42, %v7578_v47 }
 0xb8f   : > { %v5940_v43 = vadd.f32 %v7580_v0, %v5870_v54 }
 0xbaa   : > { %v7613_v17 = vpop.f32.mrf.mxu1 }
 0xbac   : > { %v7614_v10 = vpop.f32.mrf.mxu1 }
 0xbad   : > { %v7615_v48 = vadd.f32 %v7614_v10, %v7613_v17 }
 0xbaf   : > { %v6010_v20 = vadd.f32 %v7615_v48, %v5940_v43 }
 0xbca   : > { %v7648_v32 = vpop.f32.mrf.mxu1 }
 0xbcc   : > { %v7649_v23 = vpop.f32.mrf.mxu1 }
 0xbcd   : > { %v7650_v61 = vadd.f32 %v7649_v23, %v7648_v32 }
 0xbcf   : > { %v6080_v11 = vadd.f32 %v7650_v61, %v6010_v20 }
 0xbea   : > { %v7683_v31 = vpop.f32.mrf.mxu1 }
 0xbec   : > { %v7684_v34 = vpop.f32.mrf.mxu1 }
 0xbed   : > { %v7685_v25 = vadd.f32 %v7684_v34, %v7683_v31 }
 0xbef   : > { %v6150_v63 = vadd.f32 %v7685_v25, %v6080_v11  ;;  %6159 = sbr.rel (%p6798_p2) target bundleno = 3350 (0xd16), region = 80 }
 0xbf1   : > { %v6153_v15 = vadd.f32 %v6150_v63, %v5592_v36 }
 0xbf3   : > { %6155 = vst.msk [vmem:[#allocation8] sm:$0x3] %vm6154_vm11, %v6153_v15 }
 0xbf4   : > { %v6161_v56 = vld [vmem:[#allocation7] sm:$0x3]  ;;  %v8385_v55 = vmov 0   ;;  %v14739_v60 = vlaneseq  ;;  %v6799_v37 = vld [vmem:[%s13065_s11 + $0x2] sm:$0x3] }
 0xbf5   : > { %8224 = vset.pattern.permute.xlu0 %v8385_v55  ;;  %v6170_v7 = vld [vmem:[%s13065_s11] sm:$0x3] }
 0xbf6   : > { %6164 = vperm.xlu0 %8224, %v6161_v56   ;;  %v6172_v49 = vshrl.u32 %v14739_v60, 7  ;;  %v6169_v1 = vld [vmem:[%s13066_s12] sm:$0x3] }
 0xbf8   : > { %v6184_v3 = vsub.s32 1, %v6172_v49  ;;  %v6173_v58 = vsub.s32 0, %v6172_v49 }
 0xbfa   : > { %v6160_v53 = vld [vmem:[#allocation8] sm:$0x3] }
 0xc71   : > { %v6165_v29 = vpop.permute.xlu0 %6164 }
 0xc72   : > { %8225 = vrcp.f32 %v6165_v29 }
 0xc7f   : > { %v8226_v18 = vpop.eup %8225 }
 0xc80   : > { %v6168_v8 = vmul.f32 %v8226_v18, %v6160_v53 }
 0xc82   : > { %v6185_v40 = vrot.slane %v6168_v8, %v6184_v3  ;;  %v6174_v12 = vrot.slane %v6168_v8, %v6173_v58 }
 0xc84   : > { %v6186_v35 = vmul.f32 %v6799_v37, %v6185_v40  ;;  %v6175_v4 = vmul.f32 %v6174_v12, %v6170_v7 }
 0xc86   : > { %v6187_v33 = vsel %vm6154_vm11, %v6186_v35, 0.0  ;;  %v6176_v62 = vsel %vm6154_vm11, %v6175_v4, 0.0 }
 0xc87   : > { %6188 = vadd.xlane.f32.xlu1 %v6187_v33  ;;  %6177 = vadd.xlane.f32.xlu0 %v6176_v62 }
 0xd10   : > { %v6178_v44 = vpop.xlane.xlu0 %6177  ;;  %v6189_v45 = vpop.xlane.xlu1 %6188 }
 0xd11   : > { %v6179_v13 = vadd.f32 %v6178_v44, %v6169_v1 }
 0xd13   : > { %v6190_v38 = vadd.f32 %v6189_v45, %v6179_v13 }
 0xd15   : > { %6191 = vst.msk [vmem:[%s8727_s4] sm:$0x3] %vm5584_vm15, %v6190_v38 }
 0xd16 PF: > { %s6216_s21 = sshll.u32 %s9426_s28, 4  ;;  %s14762_s16 = smov (!%p417_p7, %s8353_s16), 2  ;;  %s6217_s21 = int_to_ptr.vmem [resolvable:$true] %s6216_s21 }
 0xd17   : > { %s6805_s1 = sshll.u32 %s14762_s16, 9  ;;  %s14740_s22 = sand.u32 1, %s8345_s30  }
 0xd18   : > { %s6214_s23 = scalar_lea.hbm %s13067_s13, %s6805_s1  ;;  %s6193_s27 = scalar_lea.sflag [#allocation15], %s14740_s22 }
 0xd19   : > { %s8275_s5 = scalar_lea.vmem %s6217_s21, 512  ;;  %s8386_s4 = smov [#allocation14]  }
 0xd1a   : > { %p8276_p3 = scmp.ne.s32.totalorder %s6217_s21, %s8275_s5  ;;  %s8279_s6 = sshll.u32 %s8386_s4, 4  ;;  %s8280_s6 = int_to_ptr.vmem [resolvable:$false] %s8279_s6 }
 0xd1b   : > { %s8281_s7 = scalar_lea.vmem %s8280_s6, 1024  ;;  %p8282_p6 = scmp.lt.s32.totalorder %s6217_s21, %s8280_s6 }
 0xd1c   : > { %p8277_p4 = pnand %p8276_p3, %p8529_p13  ;;  %p8283_p8 = scmp.lt.s32.totalorder %s8281_s7, %s8275_s5 }
 0xd1e   : > { %p8278_p5 = pneg %p8277_p4  ;;  %p8284_p7 = por %p8283_p8, %p8282_p6 }
 0xd20   : > { %p8285_p9 = pnand %p8284_p7, %p8278_p5 }
 0xd22   : > { %8288 = shalt.err (!%p8285_p9)
}
 0xd23   : > { %s8289_s16 = scalar_lea.hbm %s6214_s23, 512  ;;  %s8293_s1 = scalar_lea.hbm %s13067_s13, 1536 }
 0xd24   : > { %p8290_p10 = scmp.ne.s32.totalorder %s6214_s23, %s8289_s16  ;;  %p8294_p1 = scmp.lt.s32.totalorder %s6214_s23, %s13067_s13 }
 0xd25   : > { %p8295_p2 = scmp.lt.s32.totalorder %s8293_s1, %s8289_s16 }
 0xd26   : > { %p8291_p11 = pnand %p8290_p10, %p8529_p13 }
 0xd27   : > { %p8296_p3 = por %p8295_p2, %p8294_p1 }
 0xd28   : > { %p8292_p12 = pneg %p8291_p11 }
 0xd2a   : > { %p8297_p4 = pnand %p8296_p3, %p8292_p12 }
 0xd2c   : > { %8300 = shalt.err (!%p8297_p4)
}
 0xd2d   : > { %8094 = dma.vmem_to_hbm [thread:$0]  (%p8529_p13), %s6217_s21, 512, %s6214_s23, %s6193_s27  }
 0xd2e PF: > { %p8100_p5 = scmp.ge.s32.totalorder %s8369_s20, 2  ;;  %s6234_s5 = sand.u32 1, %s8341_s3  }
 0xd2f   : > { %s6235_s6 = scalar_lea.sflag [#allocation15], %s6234_s5 }
 0xd30   : > { %p8097_p6 = pnand %p8100_p5, %p8533_p0 }
 0xd32   : > { %p8098_p8 = pneg %p8097_p6 }
 0xd34   : > { %8336 = dma.done.wait (%p8098_p8), %s6235_s6, 512  }
 0xd35   : > { %8338 = vsyncadd (%p8098_p8), %s6235_s6, 4294966784  ;;  %s46_s20 = sadd.s32 1, %s8369_s20   ;;  %s14741_s7 = sld [smem:[#allocation18_spill]] }
 0xd36   : > { %p43_p7 = scmp.ge.s32.totalorder %s46_s20, 6   ;;  %s14742_s3 = smov %s8345_s30 }
 0xd37   : > { %s14743_s30 = smov %s8349_s15  ;;  %s14744_s15 = smov %s8543_s29 }
 0xd38   : > { %s14745_s16 = smov %s8361_s18  ;;  %s14746_s17 = smov %s8365_s19 }
 0xd39   : > { %s14747_s18 = smov %s14750_s0  ;;  %45 = sbr.rel (!%p43_p7) target bundleno = 53 (0x35), region = 132 }
 0xd3b   : > { %s14748_s19 = smov %s14741_s7 }
 0xd3e   :  { %6250 = vsyncpa [#allocation15], 1 }
 0xd3f   :  { %6252 = vsyncpa [#allocation15 + $0x1], 1 }

</bundles_post_ra>
